<compile_context>
chip_gen: v5e
topology: v5e:2x2
jax: 0.10.0
libtpu: 0.0.40
codegen_flags: <defaults>
</compile_context>

<pallas_src>
import jax
import jax.numpy as jnp
from jax.experimental import pallas as pl
from jax.experimental.pallas import tpu as pltpu


# ----------------------------------------------------------------------------
# Kernel: processes TG groups (M = TG*N points) per grid step.
# ----------------------------------------------------------------------------
def encoder_kernel(x_ref,                 # (M, CinP)  f32   (CinP = 8, zero padded)
                   w1_ref, t1_ref,        # (CinP,128) f32 (BN1-folded), (1,128) f32
                   w2_ref,                # (128,256)  bf16 (b2 folded into t2)
                   w3g_ref, w3f_ref,      # (256,512)  bf16 each (BN2-folded, K-split)
                   t2_ref,                # (1,512)    f32  (b3*s2 + BN2 shift + b2-fold)
                   w4_ref, b4_ref,        # (512,Ep)   bf16, (1,Ep) f32
                   out_ref):              # (TG, Ep)   f32
    m = x_ref.shape[0]
    tg, ep = out_ref.shape
    n = m // tg

    # ---- first_conv layer 1: small-K matmul on the MXU, exact f32 -----------
    h = jnp.maximum(
        jnp.dot(x_ref[...], w1_ref[...], preferred_element_type=jnp.float32)
        + t1_ref[...], 0.0)                                            # (M,128) f32

    # ---- first_conv layer 2 (bias folded away): bf16 in, f32 accumulate -----
    f = jnp.dot(h.astype(jnp.bfloat16), w2_ref[...],
                preferred_element_type=jnp.float32)                    # (M,256) f32
    f_bf = f.astype(jnp.bfloat16)                                      # single bf16 copy

    # ---- per-group global max; the "global" half of the 512x512 conv becomes
    #      a per-group bias (replaces concat + broadcast) ---------------------
    g = jnp.max(f.reshape(tg, n, 256), axis=1)                         # (TG,256) f32
    gb = jnp.dot(g.astype(jnp.bfloat16), w3g_ref[...],
                 preferred_element_type=jnp.float32) + t2_ref[...]     # (TG,512) f32
    fm = jnp.dot(f_bf, w3f_ref[...],
                 preferred_element_type=jnp.float32)                   # (M,512)  f32

    # relu(fm + gb) materialized directly in bf16 (largest intermediate)
    h2 = jnp.maximum(fm.reshape(tg, n, 512) + gb[:, None, :],
                     0.0).astype(jnp.bfloat16)                         # (TG,N,512) bf16

    # ---- second_conv layer 2; bias add moved to after the final max ---------
    o = jnp.dot(h2.reshape(m, 512), w4_ref[...],
                preferred_element_type=jnp.float32)                    # (M,Ep) f32
    out_ref[...] = jnp.max(o.reshape(tg, n, ep), axis=1) + b4_ref[...]  # (TG,Ep)


# ----------------------------------------------------------------------------
# Tiling heuristic
# ----------------------------------------------------------------------------
def _choose_tg(bg, requested=64):
    """Groups per grid step: big M for MXU occupancy, sublane-aligned output
    blocks, and grid >= 2 steps (v7x megacore) whenever BG allows."""
    tg = min(requested, bg)
    if bg >= 16:
        tg = min(tg, -(-bg // 2))          # keep at least 2 grid steps
    if bg >= 8:
        tg = max(8, (tg // 8) * 8)         # multiple of 8 (sublane alignment)
    return max(1, tg)


# ----------------------------------------------------------------------------
# Wrapper
# ----------------------------------------------------------------------------
def encoder_forward(point_groups, kparams, e_out, e_pad, tg=64):
    """point_groups: (B, G, N, Cin) f32 -> (B, G, e_out) f32."""
    B, G, N, Cin = point_groups.shape
    BG = B * G
    cin_pad = kparams["w1"].shape[0]

    tg = _choose_tg(BG, tg)
    bg_pad = ((BG + tg - 1) // tg) * tg
    grid = bg_pad // tg
    m_blk = tg * N

    # Pad groups (independent per-group compute -> padded groups sliced off)
    # and zero-pad the channel dim to cin_pad for the small-K MXU matmul.
    x = point_groups.reshape(BG, N, Cin)
    if bg_pad != BG:
        x = jnp.concatenate(
            [x, jnp.zeros((bg_pad - BG, N, Cin), x.dtype)], axis=0)
    if cin_pad != Cin:
        x = jnp.concatenate(
            [x, jnp.zeros((bg_pad, N, cin_pad - Cin), x.dtype)], axis=-1)
    x2d = x.reshape(bg_pad * N, cin_pad)

    def full(a):
        nd = a.ndim
        return pl.BlockSpec(a.shape, lambda i, _nd=nd: (0,) * _nd)

    weight_bytes = sum(int(v.size) * v.dtype.itemsize for v in kparams.values())
    flops = 2 * bg_pad * (
        N * (cin_pad * 128 + 128 * 256 + 256 * 512 + 512 * e_pad) + 256 * 512)
    cost = pl.CostEstimate(
        flops=int(flops),
        transcendentals=0,
        bytes_accessed=int(x2d.size) * 4 + int(bg_pad * e_pad) * 4 + weight_bytes)

    out = pl.pallas_call(
        encoder_kernel,
        out_shape=jax.ShapeDtypeStruct((bg_pad, e_pad), jnp.float32),
        grid_spec=pltpu.PrefetchScalarGridSpec(
            num_scalar_prefetch=0,
            grid=(grid,),
            in_specs=[
                pl.BlockSpec((m_blk, cin_pad), lambda i: (i, 0)),
                full(kparams["w1"]), full(kparams["t1"]),
                full(kparams["w2"]),
                full(kparams["w3g"]), full(kparams["w3f"]), full(kparams["t2"]),
                full(kparams["w4"]), full(kparams["b4"]),
            ],
            out_specs=pl.BlockSpec((tg, e_pad), lambda i: (i, 0)),
        ),
        compiler_params=pltpu.CompilerParams(
            dimension_semantics=("parallel",),
            vmem_limit_bytes=48 * 1024 * 1024),
        cost_estimate=cost,
    )(x2d,
      kparams["w1"], kparams["t1"],
      kparams["w2"],
      kparams["w3g"], kparams["w3f"], kparams["t2"],
      kparams["w4"], kparams["b4"])

    return out[:BG, :e_out].reshape(B, G, e_out)


# ----------------------------------------------------------------------------
# Parameters (PyTorch-module layout) + host-side folding for the kernel
# ----------------------------------------------------------------------------
def make_params(key, in_channel, encoder_channel):
    """Synthetic parameters matching the PyTorch module. Conv1d(k=1) weights of
    shape (Cout, Cin, 1) are stored pre-transposed as (Cin, Cout)."""
    ks = jax.random.split(key, 12)

    def conv(k, cin, cout, scale=0.1):
        return scale * jax.random.normal(k, (cin, cout), jnp.float32)

    def bias(k, cout, scale=0.05):
        return scale * jax.random.normal(k, (cout,), jnp.float32)

    def bn(kg, kb, c):
        gamma = 1.0 + 0.1 * jax.random.normal(kg, (c,), jnp.float32)
        beta = 0.05 * jax.random.normal(kb, (c,), jnp.float32)
        mean = 0.01 * jnp.arange(c, dtype=jnp.float32)
        var = 1.0 + 0.02 * jnp.arange(c, dtype=jnp.float32)
        return gamma, beta, mean, var

    return dict(
        w1=conv(ks[0], in_channel, 128), b1=bias(ks[1], 128),
        bn1=bn(ks[8], ks[9], 128),
        w2=conv(ks[2], 128, 256), b2=bias(ks[3], 256),
        w3=conv(ks[4], 512, 512), b3=bias(ks[5], 512),
        bn2=bn(ks[10], ks[11], 512),
        w4=conv(ks[6], 512, encoder_channel), b4=bias(ks[7], encoder_channel),
    )


def fold_params(p, eps=1e-5):
    """Fold inference-mode BN + conv biases into weights; split the 512x512
    conv into global/local K-halves; pad Cin to 8 and the output channel dim to
    a multiple of 128 (lane-dense stores); cast matmul weights to bf16."""
    cin = p["w1"].shape[0]
    cin_pad = 8

    g1, be1, m1, v1 = p["bn1"]
    s1 = g1 / jnp.sqrt(v1 + eps)
    t1 = be1 - m1 * s1
    w1p = jnp.zeros((cin_pad, 128), jnp.float32).at[:cin, :].set(p["w1"] * s1[None, :])
    t1f = (p["b1"] * s1 + t1)[None, :]                    # (1, 128) f32

    g2, be2, m2, v2 = p["bn2"]
    s2 = g2 / jnp.sqrt(v2 + eps)
    t2 = be2 - m2 * s2
    w3_all = p["w3"] * s2[None, :]                        # (512, 512) f32, BN2-folded
    w3g_f32 = w3_all[:256, :]                             # applies to the global feature
    w3f_f32 = w3_all[256:, :]                             # applies to the local feature
    # Fold b2 through the 512x512 conv:  t2 += b2 @ (w3g + w3f)   (exact, f32)
    t2f = (p["b3"] * s2 + t2 + p["b2"] @ (w3g_f32 + w3f_f32))[None, :]   # (1, 512)

    e = p["w4"].shape[1]
    e_pad = max(128, ((e + 127) // 128) * 128)
    w4p = jnp.zeros((512, e_pad), jnp.float32).at[:, :e].set(p["w4"])
    b4p = jnp.zeros((1, e_pad), jnp.float32).at[0, :e].set(p["b4"])

    kparams = dict(
        w1=w1p, t1=t1f,
        w2=p["w2"].astype(jnp.bfloat16),
        w3g=w3g_f32.astype(jnp.bfloat16),
        w3f=w3f_f32.astype(jnp.bfloat16),
        t2=t2f,
        w4=w4p.astype(jnp.bfloat16), b4=b4p,
    )
    return kparams, e, e_pad


# ----------------------------------------------------------------------------
# Pure-JAX f32 reference, faithful to the PyTorch forward (inference-mode BN)
# ----------------------------------------------------------------------------
def ref_forward(point_groups, p, eps=1e-5):
    B, G, N, Cin = point_groups.shape
    x = point_groups.reshape(B * G, N, Cin)

    def bn(h, stats):
        gamma, beta, mean, var = stats
        return (h - mean) / jnp.sqrt(var + eps) * gamma + beta

    h = jnp.maximum(bn(x @ p["w1"] + p["b1"], p["bn1"]), 0.0)
    f = h @ p["w2"] + p["b2"]
    g = jnp.max(f, axis=1, keepdims=True)
    feat = jnp.concatenate([jnp.broadcast_to(g, f.shape), f], axis=-1)
    h2 = jnp.maximum(bn(feat @ p["w3"] + p["b3"], p["bn2"]), 0.0)
    o = h2 @ p["w4"] + p["b4"]
    return jnp.max(o, axis=1).reshape(B, G, -1)


if __name__ == "__main__":
    B, G, N = 2, 16, 32          # BG = 32 -> TG = 16, grid = 2 (feeds both v7x TCs)
    IN_CHANNEL = 3
    ENCODER_CHANNEL = 64         # padded to 128 inside the kernel path

    key = jax.random.PRNGKey(0)
    k_x, k_p = jax.random.split(key)
    point_groups = jax.random.normal(k_x, (B, G, N, IN_CHANNEL), jnp.float32)
    params = make_params(k_p, IN_CHANNEL, ENCODER_CHANNEL)
    kparams, e_out, e_pad = fold_params(params)

    out = jax.block_until_ready(
        encoder_forward(point_groups, kparams, e_out, e_pad, tg=64))
    ref = jax.block_until_ready(ref_forward(point_groups, params))

    assert out.shape == (B, G, ENCODER_CHANNEL), out.shape
    # Kernel uses bf16 matmul inputs (f32 accumulation); compare against the
    # full-f32 reference with a tolerance sized for bf16 rounding.
    rel_err = jnp.max(jnp.abs(out - ref)) / (jnp.max(jnp.abs(ref)) + 1e-6)
    assert rel_err < 5e-2, f"mismatch vs reference: rel_err={rel_err}"
    print("KERNEL_OK")
</pallas_src>

<mosaic_0001>
module attributes {stable_mosaic.version = 11 : i64} {
  func.func @encoder_kernel(%arg0: i32, %arg1: memref<512x8xf32, #tpu.memory_space<vmem>>, %arg2: memref<8x128xf32, #tpu.memory_space<vmem>>, %arg3: memref<1x128xf32, #tpu.memory_space<vmem>>, %arg4: memref<128x256xbf16, #tpu.memory_space<vmem>>, %arg5: memref<256x512xbf16, #tpu.memory_space<vmem>>, %arg6: memref<256x512xbf16, #tpu.memory_space<vmem>>, %arg7: memref<1x512xf32, #tpu.memory_space<vmem>>, %arg8: memref<512x128xbf16, #tpu.memory_space<vmem>>, %arg9: memref<1x128xf32, #tpu.memory_space<vmem>>, %arg10: memref<16x128xf32, #tpu.memory_space<vmem>>) attributes {dimension_semantics = [#tpu.dimension_semantics<parallel>], iteration_bounds = array<i64: 2>, scalar_prefetch = 0 : i64, scratch_operands = 0 : i64, tpu.core_type = #tpu.core_type<tc>, window_params = [{transform_indices = @transform_0, window_bounds = array<i64: 512, 8>}, {pipeline_mode = #tpu.pipeline_mode<synchronous>, transform_indices = @transform_1, window_bounds = array<i64: 8, 128>}, {pipeline_mode = #tpu.pipeline_mode<synchronous>, transform_indices = @transform_2, window_bounds = array<i64: 1, 128>}, {pipeline_mode = #tpu.pipeline_mode<synchronous>, transform_indices = @transform_3, window_bounds = array<i64: 128, 256>}, {pipeline_mode = #tpu.pipeline_mode<synchronous>, transform_indices = @transform_4, window_bounds = array<i64: 256, 512>}, {pipeline_mode = #tpu.pipeline_mode<synchronous>, transform_indices = @transform_5, window_bounds = array<i64: 256, 512>}, {pipeline_mode = #tpu.pipeline_mode<synchronous>, transform_indices = @transform_6, window_bounds = array<i64: 1, 512>}, {pipeline_mode = #tpu.pipeline_mode<synchronous>, transform_indices = @transform_7, window_bounds = array<i64: 512, 128>}, {pipeline_mode = #tpu.pipeline_mode<synchronous>, transform_indices = @transform_8, window_bounds = array<i64: 1, 128>}, {transform_indices = @transform_9, window_bounds = array<i64: 16, 128>}]} {
    %c0 = arith.constant 0 : index
    %c0_0 = arith.constant 0 : index
    %0 = vector.load %arg1[%c0, %c0_0] : memref<512x8xf32, #tpu.memory_space<vmem>>, vector<512x8xf32>
    %c0_1 = arith.constant 0 : index
    %c0_2 = arith.constant 0 : index
    %1 = vector.load %arg2[%c0_1, %c0_2] : memref<8x128xf32, #tpu.memory_space<vmem>>, vector<8x128xf32>
    %cst = arith.constant dense<0.000000e+00> : vector<512x128xf32>
    %2 = tpu.matmul %0, %1, %cst {dimension_numbers = #tpu.dot_dimension_numbers<[1], [0], [0], [1], [0, 0, 1, 1], [], []>} : vector<512x8xf32>, vector<8x128xf32>, vector<512x128xf32> -> vector<512x128xf32>
    %c0_3 = arith.constant 0 : index
    %c0_4 = arith.constant 0 : index
    %3 = vector.load %arg3[%c0_3, %c0_4] : memref<1x128xf32, #tpu.memory_space<vmem>>, vector<1x128xf32>
    %4 = vector.broadcast %3 : vector<1x128xf32> to vector<512x128xf32>
    %5 = arith.addf %2, %4 : vector<512x128xf32>
    %cst_5 = arith.constant 0.000000e+00 : f32
    %6 = vector.broadcast %cst_5 : f32 to vector<512x128xf32>
    %7 = arith.maximumf %5, %6 : vector<512x128xf32>
    %8 = arith.truncf %7 : vector<512x128xf32> to vector<512x128xbf16>
    %c0_6 = arith.constant 0 : index
    %c0_7 = arith.constant 0 : index
    %9 = vector.load %arg4[%c0_6, %c0_7] : memref<128x256xbf16, #tpu.memory_space<vmem>>, vector<128x256xbf16>
    %cst_8 = arith.constant dense<0.000000e+00> : vector<512x256xf32>
    %10 = tpu.matmul %8, %9, %cst_8 {dimension_numbers = #tpu.dot_dimension_numbers<[1], [0], [0], [1], [0, 0, 1, 1], [], []>} : vector<512x128xbf16>, vector<128x256xbf16>, vector<512x256xf32> -> vector<512x256xf32>
    %11 = arith.truncf %10 : vector<512x256xf32> to vector<512x256xbf16>
    %12 = vector.shape_cast %10 : vector<512x256xf32> to vector<16x32x256xf32>
    %cst_9 = arith.constant dense<0xFF800000> : vector<16x256xf32>
    %13 = vector.multi_reduction <maximumf>, %12, %cst_9 [1] : vector<16x32x256xf32> to vector<16x256xf32>
    %14 = arith.truncf %13 : vector<16x256xf32> to vector<16x256xbf16>
    %c0_10 = arith.constant 0 : index
    %c0_11 = arith.constant 0 : index
    %15 = vector.load %arg5[%c0_10, %c0_11] : memref<256x512xbf16, #tpu.memory_space<vmem>>, vector<256x512xbf16>
    %cst_12 = arith.constant dense<0.000000e+00> : vector<16x512xf32>
    %16 = tpu.matmul %14, %15, %cst_12 {dimension_numbers = #tpu.dot_dimension_numbers<[1], [0], [0], [1], [0, 0, 1, 1], [], []>} : vector<16x256xbf16>, vector<256x512xbf16>, vector<16x512xf32> -> vector<16x512xf32>
    %c0_13 = arith.constant 0 : index
    %c0_14 = arith.constant 0 : index
    %17 = vector.load %arg7[%c0_13, %c0_14] : memref<1x512xf32, #tpu.memory_space<vmem>>, vector<1x512xf32>
    %18 = vector.broadcast %17 : vector<1x512xf32> to vector<16x512xf32>
    %19 = arith.addf %16, %18 : vector<16x512xf32>
    %c0_15 = arith.constant 0 : index
    %c0_16 = arith.constant 0 : index
    %20 = vector.load %arg6[%c0_15, %c0_16] : memref<256x512xbf16, #tpu.memory_space<vmem>>, vector<256x512xbf16>
    %cst_17 = arith.constant dense<0.000000e+00> : vector<512x512xf32>
    %21 = tpu.matmul %11, %20, %cst_17 {dimension_numbers = #tpu.dot_dimension_numbers<[1], [0], [0], [1], [0, 0, 1, 1], [], []>} : vector<512x256xbf16>, vector<256x512xbf16>, vector<512x512xf32> -> vector<512x512xf32>
    %22 = vector.shape_cast %21 : vector<512x512xf32> to vector<16x32x512xf32>
    %23 = vector.shape_cast %19 : vector<16x512xf32> to vector<16x1x512xf32>
    %24 = vector.broadcast %23 : vector<16x1x512xf32> to vector<16x32x512xf32>
    %25 = arith.addf %22, %24 : vector<16x32x512xf32>
    %cst_18 = arith.constant 0.000000e+00 : f32
    %26 = vector.broadcast %cst_18 : f32 to vector<16x32x512xf32>
    %27 = arith.maximumf %25, %26 : vector<16x32x512xf32>
    %28 = arith.truncf %27 : vector<16x32x512xf32> to vector<16x32x512xbf16>
    %29 = vector.shape_cast %28 : vector<16x32x512xbf16> to vector<512x512xbf16>
    %c0_19 = arith.constant 0 : index
    %c0_20 = arith.constant 0 : index
    %30 = vector.load %arg8[%c0_19, %c0_20] : memref<512x128xbf16, #tpu.memory_space<vmem>>, vector<512x128xbf16>
    %cst_21 = arith.constant dense<0.000000e+00> : vector<512x128xf32>
    %31 = tpu.matmul %29, %30, %cst_21 {dimension_numbers = #tpu.dot_dimension_numbers<[1], [0], [0], [1], [0, 0, 1, 1], [], []>} : vector<512x512xbf16>, vector<512x128xbf16>, vector<512x128xf32> -> vector<512x128xf32>
    %32 = vector.shape_cast %31 : vector<512x128xf32> to vector<16x32x128xf32>
    %cst_22 = arith.constant dense<0xFF800000> : vector<16x128xf32>
    %33 = vector.multi_reduction <maximumf>, %32, %cst_22 [1] : vector<16x32x128xf32> to vector<16x128xf32>
    %c0_23 = arith.constant 0 : index
    %c0_24 = arith.constant 0 : index
    %34 = vector.load %arg9[%c0_23, %c0_24] : memref<1x128xf32, #tpu.memory_space<vmem>>, vector<1x128xf32>
    %35 = vector.broadcast %34 : vector<1x128xf32> to vector<16x128xf32>
    %36 = arith.addf %33, %35 : vector<16x128xf32>
    %c0_25 = arith.constant 0 : index
    %c0_26 = arith.constant 0 : index
    %37 = vector.load %arg10[%c0_25, %c0_26] : memref<16x128xf32, #tpu.memory_space<vmem>>, vector<16x128xf32>
    tpu.vector_store %arg10[%c0_25, %c0_26], %36 {strides = array<i32>} : memref<16x128xf32, #tpu.memory_space<vmem>>, vector<16x128xf32>,
    return
  }
  func.func @transform_0(%arg0: i32) -> (i32, i32) {
    %c0_i32 = arith.constant 0 : i32
    %c0_i32_0 = arith.constant 0 : i32
    return %arg0, %c0_i32 : i32, i32
  }
  func.func @transform_1(%arg0: i32) -> (i32, i32) {
    %c0_i32 = arith.constant 0 : i32
    %c0_i32_0 = arith.constant 0 : i32
    %c0_i32_1 = arith.constant 0 : i32
    return %c0_i32, %c0_i32_0 : i32, i32
  }
  func.func @transform_2(%arg0: i32) -> (i32, i32) {
    %c0_i32 = arith.constant 0 : i32
    %c0_i32_0 = arith.constant 0 : i32
    %c0_i32_1 = arith.constant 0 : i32
    return %c0_i32, %c0_i32_0 : i32, i32
  }
  func.func @transform_3(%arg0: i32) -> (i32, i32) {
    %c0_i32 = arith.constant 0 : i32
    %c0_i32_0 = arith.constant 0 : i32
    %c0_i32_1 = arith.constant 0 : i32
    return %c0_i32, %c0_i32_0 : i32, i32
  }
  func.func @transform_4(%arg0: i32) -> (i32, i32) {
    %c0_i32 = arith.constant 0 : i32
    %c0_i32_0 = arith.constant 0 : i32
    %c0_i32_1 = arith.constant 0 : i32
    return %c0_i32, %c0_i32_0 : i32, i32
  }
  func.func @transform_5(%arg0: i32) -> (i32, i32) {
    %c0_i32 = arith.constant 0 : i32
    %c0_i32_0 = arith.constant 0 : i32
    %c0_i32_1 = arith.constant 0 : i32
    return %c0_i32, %c0_i32_0 : i32, i32
  }
  func.func @transform_6(%arg0: i32) -> (i32, i32) {
    %c0_i32 = arith.constant 0 : i32
    %c0_i32_0 = arith.constant 0 : i32
    %c0_i32_1 = arith.constant 0 : i32
    return %c0_i32, %c0_i32_0 : i32, i32
  }
  func.func @transform_7(%arg0: i32) -> (i32, i32) {
    %c0_i32 = arith.constant 0 : i32
    %c0_i32_0 = arith.constant 0 : i32
    %c0_i32_1 = arith.constant 0 : i32
    return %c0_i32, %c0_i32_0 : i32, i32
  }
  func.func @transform_8(%arg0: i32) -> (i32, i32) {
    %c0_i32 = arith.constant 0 : i32
    %c0_i32_0 = arith.constant 0 : i32
    %c0_i32_1 = arith.constant 0 : i32
    return %c0_i32, %c0_i32_0 : i32, i32
  }
  func.func @transform_9(%arg0: i32) -> (i32, i32) {
    %c0_i32 = arith.constant 0 : i32
    %c0_i32_0 = arith.constant 0 : i32
    return %arg0, %c0_i32 : i32, i32
  }
}

</mosaic_0001>

<bundles_post_ra>
// kernel: tpu_custom_call.1
= control target key start
LH: loop header
LB: loop body
LE: loop exit
PB: predicated region body
PF: predicated region fallthrough
CT: control target
= control target key end

     0   :  { %s11937_s0 = inlined_call_operand.vmem [shape: f32[1024,8], index: 0, kind: input, shape index: {}]   ;;  %s11938_s1 = inlined_call_operand.vmem [shape: f32[8,128], index: 1, kind: input, shape index: {}]   ;;  %s11939_s2 = inlined_call_operand.vmem [shape: f32[1,128], index: 2, kind: input, shape index: {}]   ;;  %s11940_s3 = inlined_call_operand.hbm [shape: bf16[128,256], index: 3, kind: input, shape index: {}]   ;;  %s11941_s4 = inlined_call_operand.vmem [shape: bf16[256,512], index: 4, kind: input, shape index: {}]   ;;  %s11942_s5 = inlined_call_operand.vmem [shape: bf16[256,512], index: 5, kind: input, shape index: {}]   ;;  %s11943_s6 = inlined_call_operand.vmem [shape: f32[1,512], index: 6, kind: input, shape index: {}]   ;;  %s11944_s7 = inlined_call_operand.hbm [shape: bf16[512,128], index: 7, kind: input, shape index: {}]   ;;  %s11945_s8 = inlined_call_operand.vmem [shape: f32[1,128], index: 8, kind: input, shape index: {}]   ;;  %s11946_s9 = inlined_call_operand.hbm [shape: f32[32,128], index: 9, kind: output, shape index: {}]  }
   0x1   :  { %12131 = sst [smem:[#allocation203_spill]] %s11940_s3 }
   0x2   :  { %14 = vsyncpa [#allocation3], 0 }
   0x3   :  { %15 = vsyncpa [#allocation6], 0 }
   0x4   :  { %16 = vsyncpa [#allocation4], 0 }
   0x5   :  { %18 = vsyncpa [#allocation4 + $0x1], 0  ;;  %s8073_s30 = smov 0   ;;  %s8075_s10 = smov 0  }
   0x6   :  { %s8077_s11 = smov 0   ;;  %s8079_s12 = smov 0  }
   0x7 LB: > { %s8094_s13 = sadd.s32 4294967295, %s8013_s12   ;;  %s6836_s14 = sadd.s32 4294967294, %s8013_s12   ;;  %s8013_s12 = sphi %s8079_s12, %s13089_s12   ;;  %s8009_s11 = sphi %s8077_s11, %s13088_s11   ;;  %s8005_s10 = sphi %s8075_s10, %s13087_s10   ;;  %s8001_s30 = sphi %s8073_s30, %s13086_s30  }
   0x8   : > { %s8098_s15 = sadd.s32 1, %s8013_s12   ;;  %s225_s16 = sadd.s32 1, %s8009_s11 }
   0x9   : > { %s222_s17 = ssub.s32 %s8013_s12, %s8098_s15  ;;  %p235_p0 = scmp.ne.s32.totalorder %s8009_s11, %s8005_s10 }
   0xa   : > { %p223_p1 = scmp.eq.s32.totalorder %s222_s17, 0  ;;  %p236_p2 = scmp.eq.s32.totalorder %s8094_s13, 1 }
   0xb   : > { %p241_p3 = scmp.ne.s32.totalorder %s8005_s10, %s8001_s30  ;;  %p242_p4 = scmp.eq.s32.totalorder %s6836_s14, 1 }
   0xc   : > { %s8109_s18 = scalar_select %p223_p1, %s8009_s11, %s225_s16  }
   0xd   : > { %p8111_p5 = por %p236_p2, %p235_p0  ;;  %p8115_p6 = por %p242_p4, %p241_p3 }
   0xe   : > { %p6837_p7 = scmp.ge.s32.totalorder %s8013_s12, 1  ;;  %p249_p8 = scmp.lt.s32.totalorder %s8013_s12, 3 }
   0xf   : > { %p7835_p9 = scmp.eq.s32.totalorder %s8094_s13, 0  ;;  %s12135_s3 = sld [smem:[#allocation203_spill]] }
  0x10   : > { %p8122_p10 = pnand %p6837_p7, %p249_p8  ;;  %s8015_s25 = smov [#allocation2]  }
  0x11   : > { %s268_s26 = sshll.u32 %s8015_s25, 4  ;;  %s289_s29 = sshll.u32 %s11944_s7, 4  ;;  %s269_s26 = int_to_ptr.vmem [resolvable:$true] %s268_s26  ;;  %s290_s29 = int_to_ptr.hbm [resolvable:$true] %s289_s29 }
  0x12   : > { %p7824_p11 = pneg %p8122_p10  ;;  %s8016_s14 = smov 128  }
  0x13   : > { %s8017_s16 = smov 8   ;;  %s8018_s17 = smov [#allocation5]  }
  0x14   : > { %p7825_p12 = pnand %p7835_p9, %p7824_p11  ;;  %s291_s22 = sshll.u32 %s8018_s17, 4  ;;  %s292_s22 = int_to_ptr.vmem [resolvable:$true] %s291_s22 }
  0x15   : > { %s266_s24 = sshll.u32 %s12135_s3, 4  ;;  %s8019_s23 = smov 64   ;;  %s267_s24 = int_to_ptr.hbm [resolvable:$true] %s266_s24 }
  0x16   : > { %7827 = dma.hbm_to_vmem [thread:$0]  (!%p7825_p12), %s267_s24, 2048, %s269_s26, [#allocation3], %s8016_s14, %s8016_s14, %s8017_s16  }
  0x17   : > { %s8020_s3 = smov 4   ;;  %319 = sbr.rel (%p8122_p10) target bundleno = 2780 (0xadc), region = 56 }
  0x18   : > { %7830 = dma.hbm_to_vmem [thread:$0]  (!%p7825_p12), %s290_s29, 4096, %s292_s22, [#allocation6], %s8019_s23, %s8019_s23, %s8020_s3  }
  0x1c   : > { %7988 = dma.done.wait (%p7835_p9), [#allocation3], 2048  }
  0x1d   : > { %7990 = vsyncadd (%p7835_p9), [#allocation3], 4294965248 }
  0x1e   : > { %7992 = dma.done.wait (%p7835_p9), [#allocation6], 4096  }
  0x1f   : > { %7994 = vsyncadd (%p7835_p9), [#allocation6], 4294963200  ;;  %s6845_s24 = sshll.u32 %s8094_s13, 6  ;;  %vm437_vm0 = vcmask 64512   ;;  %v432_v0 = vld [vmem:[%s11938_s1] sm:$0xff]  ;;  %vm1891_vm1 = vcmask 1041409  }
  0x20   : > { %p362_p13 = scmp.lt.s32.totalorder %s6845_s24, 127  ;;  %645 = vmatpush.msra.mxu0 %v432_v0  ;;  %7797 = vmatpush.msra.mxu3 %v432_v0  ;;  %v6969_v11 = vld [vmem:[#allocation2 + $0x70] sm:$0xf]  ;;  %v7635_v12 = vld [vmem:[#allocation2 + $0x74] sm:$0xf0]  ;;  %vm1893_vm2 = vcmask 1042434  }
  0x21   : > { %v7634_v13 = vld [vmem:[#allocation2 + $0x74] sm:$0xf]  ;;  %v6970_v14 = vor.u32 %v7635_v12, %v6969_v11  ;;  %v6971_v15 = vld [vmem:[#allocation2 + $0x78] sm:$0xf0]  ;;  %v6961_v18 = vld [vmem:[#allocation2 + $0x60] sm:$0xf] }
  0x22   : > { %s13091_s24 = smov (!%p362_p13, %s6845_s24), 127  ;;  %v8175_v16 = vor.u32 %v7634_v13, %v6971_v15  ;;  %v7633_v19 = vld [vmem:[#allocation2 + $0x64] sm:$0xf0]  ;;  %v7632_v20 = vld [vmem:[#allocation2 + $0x64] sm:$0xf]  ;;  %vm1895_vm3 = vcmask 1043459  }
  0x23   : > { %s6846_s3 = sshll.u32 %s13091_s24, 3  ;;  %1031 = vmatpush.bf16.msra.mxu1 %v6970_v14  ;;  %7798 = vmatpush.bf16.msrb.mxu3 %v6970_v14  ;;  %v6962_v21 = vor.u32 %v7633_v19, %v6961_v18  ;;  %v6963_v22 = vld [vmem:[#allocation2 + $0x68] sm:$0xf0]  ;;  %v6953_v24 = vld [vmem:[#allocation2 + $0x50] sm:$0xf]  ;;  %vm1897_vm4 = vcmask 1044484  }
  0x24   : > { %s8150_s26 = scalar_lea.vmem %s11937_s0, %s6846_s3  ;;  %1200 = vmatpush.bf16.msra.mxu2 %v8175_v16  ;;  %v8180_v23 = vor.u32 %v7632_v20, %v6963_v22  ;;  %v7631_v25 = vld [vmem:[#allocation2 + $0x54] sm:$0xf0]  ;;  %v7630_v26 = vld [vmem:[#allocation2 + $0x54] sm:$0xf]  ;;  %v6955_v28 = vld [vmem:[#allocation2 + $0x58] sm:$0xf0] }
  0x25   : > { %v368_v1 = vld [vmem:[%s8150_s26] sm:$0xff]  ;;  %v369_v2 = vld [vmem:[%s8150_s26 + $0x8] sm:$0xff]  ;;  %v370_v3 = vld [vmem:[%s8150_s26 + $0x10] sm:$0xff]  ;;  %v6954_v27 = vor.u32 %v7631_v25, %v6953_v24  ;;  %v8183_v29 = vor.u32 %v7630_v26, %v6955_v28  ;;  %vm1899_vm5 = vcmask 1045509   ;;  %vm1901_vm6 = vcmask 1046534   ;;  %s358_s16 = sand.u32 1, %s8005_s10  }
  0x26   : > { %6847 = vmatmul.msk.f32.vlgmr.msra.gmra.mxu0 %vm437_vm0, %v368_v1  ;;  %v371_v4 = vld [vmem:[%s8150_s26 + $0x18] sm:$0xff]  ;;  %v372_v5 = vld [vmem:[%s8150_s26 + $0x20] sm:$0xff]  ;;  %v373_v6 = vld [vmem:[%s8150_s26 + $0x28] sm:$0xff]  ;;  %vm1903_vm7 = vcmask 1047559   ;;  %vm4112_vm8 = vcmask 1040384   ;;  %vm4138_vm9 = vcmask 1046528  }
  0x27   : > { %v374_v7 = vld [vmem:[%s8150_s26 + $0x30] sm:$0xff]  ;;  %v375_v8 = vld [vmem:[%s8150_s26 + $0x38] sm:$0xff]  ;;  %v376_v9 = vld [vmem:[%s8150_s26 + $0x40] sm:$0xff]  ;;  %1032 = vmatpush.bf16.msra.mxu1 %v6962_v21  ;;  %7799 = vmatpush.bf16.msrb.mxu3 %v6962_v21  ;;  %vm4115_vm10 = vcmask 1041408   ;;  %vm4119_vm11 = vcmask 1042433   ;;  %vm4124_vm12 = vcmask 1043458  }
  0x28   : > { %v377_v10 = vld [vmem:[%s8150_s26 + $0x48] sm:$0xff]  ;;  %v378_v17 = vld [vmem:[%s8150_s26 + $0x50] sm:$0xff]  ;;  %1201 = vmatpush.bf16.msra.mxu2 %v8180_v23  ;;  %v379_v30 = vld [vmem:[%s8150_s26 + $0x58] sm:$0xff]  ;;  %vm4129_vm13 = vcmask 1044483   ;;  %vm4140_vm14 = vcmask 1046533   ;;  %vm4145_vm15 = vcmask 1045504  }
  0x29   : > { %v6945_v31 = vld [vmem:[#allocation2 + $0x40] sm:$0xf]  ;;  %v7629_v32 = vld [vmem:[#allocation2 + $0x44] sm:$0xf0]  ;;  %v7628_v33 = vld [vmem:[#allocation2 + $0x44] sm:$0xf] }
  0x2a   : > { %v6946_v34 = vor.u32 %v7629_v32, %v6945_v31  ;;  %v6947_v35 = vld [vmem:[#allocation2 + $0x48] sm:$0xf0]  ;;  %v6937_v37 = vld [vmem:[#allocation2 + $0x30] sm:$0xf]  ;;  %v7627_v38 = vld [vmem:[#allocation2 + $0x34] sm:$0xf0] }
  0x2b   : > { %1033 = vmatpush.bf16.msra.mxu1 %v6954_v27  ;;  %7800 = vmatpush.bf16.msrb.mxu3 %v6954_v27  ;;  %v8188_v36 = vor.u32 %v7628_v33, %v6947_v35  ;;  %v7626_v39 = vld [vmem:[#allocation2 + $0x34] sm:$0xf]  ;;  %v6938_v40 = vor.u32 %v7627_v38, %v6937_v37  ;;  %v6939_v41 = vld [vmem:[#allocation2 + $0x38] sm:$0xf0]  ;;  %v380_v43 = vld [vmem:[%s8150_s26 + $0x60] sm:$0xff]  ;;  %s6844_s17 = sshll.u32 %s358_s16, 4 }
  0x2c   : > { %1202 = vmatpush.bf16.msra.mxu2 %v8183_v29  ;;  %v8191_v42 = vor.u32 %v7626_v39, %v6939_v41  ;;  %v6929_v44 = vld [vmem:[#allocation2 + $0x20] sm:$0xf]  ;;  %v7625_v45 = vld [vmem:[#allocation2 + $0x24] sm:$0xf0]  ;;  %v7624_v46 = vld [vmem:[#allocation2 + $0x24] sm:$0xf] }
  0x2d   : > { %v6930_v47 = vor.u32 %v7625_v45, %v6929_v44  ;;  %v6931_v48 = vld [vmem:[#allocation2 + $0x28] sm:$0xf0]  ;;  %v6921_v50 = vld [vmem:[#allocation2 + $0x10] sm:$0xf]  ;;  %v7623_v51 = vld [vmem:[#allocation2 + $0x14] sm:$0xf0] }
  0x2e   : > { %6848 = vmatmul.msk.f32.gmra.mxu0 %vm437_vm0, %v369_v2  ;;  %v8196_v49 = vor.u32 %v7624_v46, %v6931_v48  ;;  %v7622_v52 = vld [vmem:[#allocation2 + $0x14] sm:$0xf]  ;;  %v6922_v53 = vor.u32 %v7623_v51, %v6921_v50  ;;  %v6923_v54 = vld [vmem:[#allocation2 + $0x18] sm:$0xf0]  ;;  %v381_v56 = vld [vmem:[%s8150_s26 + $0x68] sm:$0xff]  ;;  %s11862_s22 = scalar_lea.vmem [#allocation7], %s6844_s17 }
  0x2f   : > { %1034 = vmatpush.bf16.msra.mxu1 %v6946_v34  ;;  %7801 = vmatpush.bf16.msrb.mxu3 %v6946_v34  ;;  %v8199_v55 = vor.u32 %v7622_v52, %v6923_v54  ;;  %v6913_v57 = vld [vmem:[#allocation2] sm:$0xf]  ;;  %v7621_v58 = vld [vmem:[#allocation2 + $0x4] sm:$0xf0]  ;;  %v7620_v59 = vld [vmem:[#allocation2 + $0x4] sm:$0xf] }
  0x30   : > { %1203 = vmatpush.bf16.msra.mxu2 %v8188_v36  ;;  %v6914_v60 = vor.u32 %v7621_v58, %v6913_v57  ;;  %v6915_v61 = vld [vmem:[#allocation2 + $0x8] sm:$0xf0]  ;;  %v382_v63 = vld [vmem:[%s8150_s26 + $0x70] sm:$0xff]  ;;  %v383_v0 = vld [vmem:[%s8150_s26 + $0x78] sm:$0xff]  ;;  %s7796_s23 = sshll.u32 %s8094_s13, 4  ;;  %s6749_s21 = sshll.u32 %s11862_s22, 4  ;;  %s6750_s21 = int_to_ptr.vmem [resolvable:$true] %s6749_s21 }
  0x31   : > { %v8204_v62 = vor.u32 %v7620_v59, %v6915_v61  ;;  %v384_v2 = vld [vmem:[%s8150_s26 + $0x80] sm:$0xff]  ;;  %v386_v12 = vld [vmem:[%s8150_s26 + $0x90] sm:$0xff]  ;;  %v387_v15 = vld [vmem:[%s8150_s26 + $0x98] sm:$0xff]  ;;  %s6748_s25 = scalar_lea.hbm %s11946_s9, %s7796_s23  ;;  %s6737_s13 = scalar_lea.sflag [#allocation4], %s358_s16 }
  0x32   : > { %v388_v22 = vld [vmem:[%s8150_s26 + $0xa0] sm:$0xff]  ;;  %v389_v26 = vld [vmem:[%s8150_s26 + $0xa8] sm:$0xff]  ;;  %v390_v33 = vld [vmem:[%s8150_s26 + $0xb0] sm:$0xff]  ;;  %s6751_s27 = sshll.u32 %s6748_s25, 4  ;;  %s7963_s17 = scalar_lea.hbm %s11946_s9, 32  ;;  %s6752_s27 = int_to_ptr.hbm [resolvable:$true] %s6751_s27 }
  0x33   : > { %1035 = vmatpush.bf16.msra.mxu1 %v6938_v40  ;;  %7802 = vmatpush.bf16.msrb.mxu3 %v6938_v40  ;;  %v391_v37 = vld [vmem:[%s8150_s26 + $0xb8] sm:$0xff]  ;;  %v392_v44 = vld [vmem:[%s8150_s26 + $0xc0] sm:$0xff]  ;;  %v394_v54 = vld [vmem:[%s8150_s26 + $0xd0] sm:$0xff]  ;;  %s7957_s28 = sshra.s32 %s6752_s27, 4  ;;  %s7958_s28 = int_to_ptr.hbm [resolvable:$true] %s7957_s28 }
  0x34   : > { %1204 = vmatpush.bf16.msra.mxu2 %v8191_v42  ;;  %v395_v58 = vld [vmem:[%s8150_s26 + $0xd8] sm:$0xff]  ;;  %p7964_p3 = scmp.lt.s32.totalorder %s7958_s28, %s11946_s9 }
  0x36   : > { %6849 = vmatmul.msk.f32.gmra.mxu0 %vm437_vm0, %v370_v3  ;;  %v8215_v3 = vld [vmem:[%s11939_s2] ss:$0 sm:$0xff] }
  0x37   : > { %1036 = vmatpush.bf16.msra.mxu1 %v6930_v47  ;;  %7803 = vmatpush.bf16.msrb.mxu3 %v6930_v47  ;;  %v393_v47 = vld [vmem:[%s8150_s26 + $0xc8] sm:$0xff] }
  0x38   : > { %1205 = vmatpush.bf16.msra.mxu2 %v8196_v49 }
  0x3b   : > { %1037 = vmatpush.bf16.msra.mxu1 %v6922_v53  ;;  %7804 = vmatpush.bf16.msrb.mxu3 %v6922_v53 }
  0x3c   : > { %1206 = vmatpush.bf16.msra.mxu2 %v8199_v55 }
  0x3e   : > { %6850 = vmatmul.msk.f32.gmra.mxu0 %vm437_vm0, %v371_v4 }
  0x3f   : > { %1038 = vmatpush.bf16.msra.mxu1 %v6914_v60  ;;  %7805 = vmatpush.bf16.msrb.mxu3 %v6914_v60 }
  0x40   : > { %1207 = vmatpush.bf16.msra.mxu2 %v8204_v62 }
  0x46   : > { %6851 = vmatmul.msk.f32.gmra.mxu0 %vm437_vm0, %v372_v5 }
  0x4e   : > { %6852 = vmatmul.msk.f32.gmra.mxu0 %vm437_vm0, %v373_v6  ;;  %v385_v6 = vld [vmem:[%s8150_s26 + $0x88] sm:$0xff] }
  0x56   : > { %6853 = vmatmul.msk.f32.gmra.mxu0 %vm437_vm0, %v374_v7 }
  0x5e   : > { %6854 = vmatmul.msk.f32.gmra.mxu0 %vm437_vm0, %v375_v8 }
  0x66   : > { %6855 = vmatmul.msk.f32.gmra.mxu0 %vm437_vm0, %v376_v9 }
  0x6e   : > { %6856 = vmatmul.msk.f32.gmra.mxu0 %vm437_vm0, %v377_v10 }
  0x76   : > { %6857 = vmatmul.msk.f32.gmra.mxu0 %vm437_vm0, %v378_v17 }
  0x7e   : > { %6858 = vmatmul.msk.f32.gmra.mxu0 %vm437_vm0, %v379_v30 }
  0x86   : > { %6859 = vmatmul.msk.f32.gmra.mxu0 %vm437_vm0, %v380_v43 }
  0x8e   : > { %6860 = vmatmul.msk.f32.gmra.mxu0 %vm437_vm0, %v381_v56 }
  0x96   : > { %6861 = vmatmul.msk.f32.gmra.mxu0 %vm437_vm0, %v382_v63 }
  0x9e   : > { %6862 = vmatmul.msk.f32.gmra.mxu0 %vm437_vm0, %v383_v0 }
  0xa3   : > { %v647_v1 = vpop.f32.mrf.mxu0 }
  0xa4   : > { %v648_v4 = vadd.f32 %v8215_v3, %v647_v1  ;;  %v396_v1 = vld [vmem:[%s8150_s26 + $0xe0] sm:$0xff] }
  0xa6   : > { %6863 = vmatmul.msk.f32.gmra.mxu0 %vm437_vm0, %v384_v2  ;;  %v839_v8 = vmax.f32 %v648_v4, 0.0 }
  0xab   : > { %v650_v5 = vpop.f32.mrf.mxu0 }
  0xac   : > { %v651_v7 = vadd.f32 %v8215_v3, %v650_v5  ;;  %v397_v5 = vld [vmem:[%s8150_s26 + $0xe8] sm:$0xff] }
  0xae   : > { %v840_v9 = vmax.f32 %v651_v7, 0.0  ;;  %6864 = vmatmul.msk.f32.gmra.mxu0 %vm437_vm0, %v385_v6 }
  0xb0   : > { %v903_v10 = vpack.c.bf16 %v840_v9, %v839_v8 }
  0xb2   : > { %1039 = vmatmul.bf16.vlgmr.msra.gmra.mxu1 %v903_v10  ;;  %1208 = vmatmul.bf16.vlgmr.msra.gmra.mxu2 %v903_v10 }
  0xb3   : > { %v653_v11 = vpop.f32.mrf.mxu0 }
  0xb4   : > { %v654_v13 = vadd.f32 %v8215_v3, %v653_v11  ;;  %v398_v11 = vld [vmem:[%s8150_s26 + $0xf0] sm:$0xff] }
  0xb6   : > { %6865 = vmatmul.msk.f32.gmra.mxu0 %vm437_vm0, %v386_v12  ;;  %v841_v18 = vmax.f32 %v654_v13, 0.0 }
  0xbb   : > { %v656_v14 = vpop.f32.mrf.mxu0 }
  0xbc   : > { %v657_v17 = vadd.f32 %v8215_v3, %v656_v14  ;;  %v399_v14 = vld [vmem:[%s8150_s26 + $0xf8] sm:$0xff] }
  0xbe   : > { %v842_v19 = vmax.f32 %v657_v17, 0.0  ;;  %6866 = vmatmul.msk.f32.gmra.mxu0 %vm437_vm0, %v387_v15 }
  0xc0   : > { %v904_v20 = vpack.c.bf16 %v842_v19, %v841_v18 }
  0xc2   : > { %1044 = vmatmul.bf16.gmra.mxu1 %v904_v20  ;;  %1213 = vmatmul.bf16.gmra.mxu2 %v904_v20 }
  0xc3   : > { %v659_v21 = vpop.f32.mrf.mxu0 }
  0xc4   : > { %v660_v24 = vadd.f32 %v8215_v3, %v659_v21  ;;  %v400_v21 = vld [vmem:[%s8150_s26 + $0x100] sm:$0xff] }
  0xc6   : > { %6867 = vmatmul.msk.f32.gmra.mxu0 %vm437_vm0, %v388_v22  ;;  %v843_v28 = vmax.f32 %v660_v24, 0.0 }
  0xcb   : > { %v662_v25 = vpop.f32.mrf.mxu0 }
  0xcc   : > { %v663_v27 = vadd.f32 %v8215_v3, %v662_v25  ;;  %v401_v25 = vld [vmem:[%s8150_s26 + $0x108] sm:$0xff] }
  0xce   : > { %v844_v30 = vmax.f32 %v663_v27, 0.0  ;;  %6868 = vmatmul.msk.f32.gmra.mxu0 %vm437_vm0, %v389_v26 }
  0xd0   : > { %v905_v31 = vpack.c.bf16 %v844_v30, %v843_v28 }
  0xd2   : > { %1049 = vmatmul.bf16.gmra.mxu1 %v905_v31  ;;  %1218 = vmatmul.bf16.gmra.mxu2 %v905_v31 }
  0xd3   : > { %v665_v32 = vpop.f32.mrf.mxu0 }
  0xd4   : > { %v666_v34 = vadd.f32 %v8215_v3, %v665_v32 }
  0xd6   : > { %6869 = vmatmul.msk.f32.gmra.mxu0 %vm437_vm0, %v390_v33  ;;  %v845_v39 = vmax.f32 %v666_v34, 0.0  ;;  %v402_v33 = vld [vmem:[%s8150_s26 + $0x110] sm:$0xff] }
  0xdb   : > { %v668_v35 = vpop.f32.mrf.mxu0 }
  0xdc   : > { %v669_v38 = vadd.f32 %v8215_v3, %v668_v35 }
  0xde   : > { %v846_v40 = vmax.f32 %v669_v38, 0.0  ;;  %6870 = vmatmul.msk.f32.gmra.mxu0 %vm437_vm0, %v391_v37 }
  0xe0   : > { %v906_v41 = vpack.c.bf16 %v846_v40, %v845_v39 }
  0xe2   : > { %1054 = vmatmul.bf16.gmra.mxu1 %v906_v41  ;;  %1223 = vmatmul.bf16.gmra.mxu2 %v906_v41  ;;  %v403_v41 = vld [vmem:[%s8150_s26 + $0x118] sm:$0xff] }
  0xe3   : > { %v671_v43 = vpop.f32.mrf.mxu0 }
  0xe4   : > { %v672_v45 = vadd.f32 %v8215_v3, %v671_v43 }
  0xe6   : > { %6871 = vmatmul.msk.f32.gmra.mxu0 %vm437_vm0, %v392_v44  ;;  %v847_v50 = vmax.f32 %v672_v45, 0.0 }
  0xeb   : > { %v674_v46 = vpop.f32.mrf.mxu0 }
  0xec   : > { %v675_v48 = vadd.f32 %v8215_v3, %v674_v46 }
  0xee   : > { %v848_v51 = vmax.f32 %v675_v48, 0.0  ;;  %6872 = vmatmul.msk.f32.gmra.mxu0 %vm437_vm0, %v393_v47 }
  0xf0   : > { %v907_v52 = vpack.c.bf16 %v848_v51, %v847_v50 }
  0xf2   : > { %1059 = vmatmul.bf16.gmra.mxu1 %v907_v52  ;;  %1228 = vmatmul.bf16.gmra.mxu2 %v907_v52 }
  0xf3   : > { %v677_v53 = vpop.f32.mrf.mxu0 }
  0xf4   : > { %v678_v56 = vadd.f32 %v8215_v3, %v677_v53 }
  0xf6   : > { %6873 = vmatmul.msk.f32.gmra.mxu0 %vm437_vm0, %v394_v54  ;;  %v849_v60 = vmax.f32 %v678_v56, 0.0  ;;  %v404_v54 = vld [vmem:[%s8150_s26 + $0x120] sm:$0xff] }
  0xfb   : > { %v680_v57 = vpop.f32.mrf.mxu0 }
  0xfc   : > { %v681_v59 = vadd.f32 %v8215_v3, %v680_v57 }
  0xfe   : > { %v850_v61 = vmax.f32 %v681_v59, 0.0  ;;  %6874 = vmatmul.msk.f32.gmra.mxu0 %vm437_vm0, %v395_v58 }
 0x100   : > { %v908_v63 = vpack.c.bf16 %v850_v61, %v849_v60 }
 0x102   : > { %1064 = vmatmul.bf16.gmra.mxu1 %v908_v63  ;;  %1233 = vmatmul.bf16.gmra.mxu2 %v908_v63 }
 0x103   : > { %v683_v0 = vpop.f32.mrf.mxu0 }
 0x104   : > { %v684_v2 = vadd.f32 %v8215_v3, %v683_v0  ;;  %v405_v0 = vld [vmem:[%s8150_s26 + $0x128] sm:$0xff] }
 0x106   : > { %6875 = vmatmul.msk.f32.gmra.mxu0 %vm437_vm0, %v396_v1  ;;  %v851_v7 = vmax.f32 %v684_v2, 0.0 }
 0x10b   : > { %v686_v4 = vpop.f32.mrf.mxu0 }
 0x10c   : > { %v687_v6 = vadd.f32 %v8215_v3, %v686_v4 }
 0x10e   : > { %v852_v8 = vmax.f32 %v687_v6, 0.0  ;;  %6876 = vmatmul.msk.f32.gmra.mxu0 %vm437_vm0, %v397_v5 }
 0x110   : > { %v909_v9 = vpack.c.bf16 %v852_v8, %v851_v7 }
 0x112   : > { %1069 = vmatmul.bf16.gmra.mxu1 %v909_v9  ;;  %1238 = vmatmul.bf16.gmra.mxu2 %v909_v9 }
 0x113   : > { %v689_v10 = vpop.f32.mrf.mxu0 }
 0x114   : > { %v690_v12 = vadd.f32 %v8215_v3, %v689_v10 }
 0x116   : > { %6877 = vmatmul.msk.f32.gmra.mxu0 %vm437_vm0, %v398_v11  ;;  %v853_v17 = vmax.f32 %v690_v12, 0.0  ;;  %v406_v11 = vld [vmem:[%s8150_s26 + $0x130] sm:$0xff] }
 0x11b   : > { %v692_v13 = vpop.f32.mrf.mxu0 }
 0x11c   : > { %v693_v15 = vadd.f32 %v8215_v3, %v692_v13 }
 0x11e   : > { %v854_v18 = vmax.f32 %v693_v15, 0.0  ;;  %6878 = vmatmul.msk.f32.gmra.mxu0 %vm437_vm0, %v399_v14 }
 0x120   : > { %v910_v19 = vpack.c.bf16 %v854_v18, %v853_v17 }
 0x122   : > { %1074 = vmatmul.bf16.gmra.mxu1 %v910_v19  ;;  %1243 = vmatmul.bf16.gmra.mxu2 %v910_v19 }
 0x123   : > { %v695_v20 = vpop.f32.mrf.mxu0 }
 0x124   : > { %v696_v22 = vadd.f32 %v8215_v3, %v695_v20  ;;  %v407_v20 = vld [vmem:[%s8150_s26 + $0x138] sm:$0xff] }
 0x126   : > { %6879 = vmatmul.msk.f32.gmra.mxu0 %vm437_vm0, %v400_v21  ;;  %v855_v27 = vmax.f32 %v696_v22, 0.0 }
 0x12b   : > { %v698_v24 = vpop.f32.mrf.mxu0 }
 0x12c   : > { %v699_v26 = vadd.f32 %v8215_v3, %v698_v24 }
 0x12e   : > { %v856_v28 = vmax.f32 %v699_v26, 0.0  ;;  %6880 = vmatmul.msk.f32.gmra.mxu0 %vm437_vm0, %v401_v25 }
 0x12f   : > { %v1040_v30 = vpop.f32.mrf.mxu1 }
 0x130   : > { %v911_v31 = vpack.c.bf16 %v856_v28, %v855_v27 }
 0x132   : > { %1079 = vmatmul.bf16.gmra.mxu1 %v911_v31  ;;  %1248 = vmatmul.bf16.gmra.mxu2 %v911_v31 }
 0x133   : > { %v701_v32 = vpop.f32.mrf.mxu0 }
 0x134   : > { %v702_v39 = vadd.f32 %v8215_v3, %v701_v32 }
 0x135   : > { %v1209_v34 = vpop.f32.mrf.mxu2 }
 0x136   : > { %6881 = vmatmul.msk.f32.gmra.mxu0 %vm437_vm0, %v402_v33  ;;  %v857_v45 = vmax.f32 %v702_v39, 0.0 }
 0x137   : > { %v1042_v35 = vpop.f32.mrf.mxu1 }
 0x138   : > { %v8272_v37 = vpack.c.bf16 %v1042_v35, %v1040_v30  ;;  %v1433_v38 = vmax.f32 %v1040_v30, %v1042_v35 }
 0x13a   : > { %12136 = vst [vmem:[#allocation11_spill] sm:$0xff] %v8272_v37 }
 0x13b   : > { %v704_v40 = vpop.f32.mrf.mxu0 }
 0x13c   : > { %v705_v43 = vadd.f32 %v8215_v3, %v704_v40 }
 0x13d   : > { %v1211_v44 = vpop.f32.mrf.mxu2 }
 0x13e   : > { %v858_v46 = vmax.f32 %v705_v43, 0.0  ;;  %v8277_v47 = vpack.c.bf16 %v1211_v44, %v1209_v34  ;;  %v1442_v48 = vmax.f32 %v1209_v34, %v1211_v44  ;;  %6882 = vmatmul.msk.f32.gmra.mxu0 %vm437_vm0, %v403_v41 }
 0x13f   : > { %v1045_v50 = vpop.f32.mrf.mxu1 }
 0x140   : > { %v1434_v51 = vmax.f32 %v1433_v38, %v1045_v50  ;;  %v912_v52 = vpack.c.bf16 %v858_v46, %v857_v45  ;;  %v408_v38 = vld [vmem:[%s8150_s26 + $0x140] sm:$0xff] }
 0x142   : > { %1084 = vmatmul.bf16.gmra.mxu1 %v912_v52  ;;  %1253 = vmatmul.bf16.gmra.mxu2 %v912_v52 }
 0x143   : > { %v707_v53 = vpop.f32.mrf.mxu0 }
 0x144   : > { %v708_v61 = vadd.f32 %v8215_v3, %v707_v53 }
 0x145   : > { %v1214_v56 = vpop.f32.mrf.mxu2 }
 0x146   : > { %v1443_v57 = vmax.f32 %v1442_v48, %v1214_v56  ;;  %6883 = vmatmul.msk.f32.gmra.mxu0 %vm437_vm0, %v404_v54  ;;  %v859_v4 = vmax.f32 %v708_v61, 0.0  ;;  %v409_v54 = vld [vmem:[%s8150_s26 + $0x148] sm:$0xff] }
 0x147   : > { %v1047_v58 = vpop.f32.mrf.mxu1 }
 0x148   : > { %v8282_v59 = vpack.c.bf16 %v1047_v58, %v1045_v50  ;;  %v1435_v60 = vmax.f32 %v1434_v51, %v1047_v58 }
 0x14a   : > { %12137 = vst [vmem:[#allocation12_spill] sm:$0xff] %v8282_v59  ;;  %v1436_v18 = vrot.slane %v1435_v60, 4 }
 0x14b   : > { %v710_v63 = vpop.f32.mrf.mxu0 }
 0x14c   : > { %v711_v1 = vadd.f32 %v8215_v3, %v710_v63  ;;  %v1437_v28 = vmax.f32 %v1435_v60, %v1436_v18 }
 0x14d   : > { %v1216_v2 = vpop.f32.mrf.mxu2 }
 0x14e   : > { %v860_v5 = vmax.f32 %v711_v1, 0.0  ;;  %v8287_v6 = vpack.c.bf16 %v1216_v2, %v1214_v56  ;;  %v1444_v7 = vmax.f32 %v1443_v57, %v1216_v2  ;;  %6884 = vmatmul.msk.f32.gmra.mxu0 %vm437_vm0, %v405_v0  ;;  %v1438_v34 = vrot.slane %v1437_v28, 2 }
 0x14f   : > { %v1050_v8 = vpop.f32.mrf.mxu1 }
 0x150   : > { %12138 = vst [vmem:[#allocation13_spill] sm:$0xff] %v8287_v6  ;;  %v913_v9 = vpack.c.bf16 %v860_v5, %v859_v4  ;;  %v1445_v33 = vrot.slane %v1444_v7, 4  ;;  %v1439_v43 = vmax.f32 %v1437_v28, %v1438_v34 }
 0x152   : > { %1089 = vmatmul.bf16.gmra.mxu1 %v913_v9  ;;  %1258 = vmatmul.bf16.gmra.mxu2 %v913_v9  ;;  %v1446_v39 = vmax.f32 %v1444_v7, %v1445_v33  ;;  %v1440_v52 = vrot.slane %v1439_v43, 1 }
 0x153   : > { %v713_v10 = vpop.f32.mrf.mxu0 }
 0x154   : > { %v714_v17 = vadd.f32 %v8215_v3, %v713_v10  ;;  %v1447_v48 = vrot.slane %v1446_v39, 2  ;;  %v1441_v4 = vmax.f32 %v1439_v43, %v1440_v52 }
 0x155   : > { %v1219_v12 = vpop.f32.mrf.mxu2 }
 0x156   : > { %6885 = vmatmul.msk.f32.gmra.mxu0 %vm437_vm0, %v406_v11  ;;  %v861_v24 = vmax.f32 %v714_v17, 0.0  ;;  %v1448_v58 = vmax.f32 %v1446_v39, %v1447_v48  ;;  %v410_v17 = vld [vmem:[%s8150_s26 + $0x150] sm:$0xff] }
 0x157   : > { %v1052_v13 = vpop.f32.mrf.mxu1 }
 0x158   : > { %v8292_v14 = vpack.c.bf16 %v1052_v13, %v1050_v8  ;;  %v1451_v15 = vmax.f32 %v1050_v8, %v1052_v13  ;;  %v1449_v10 = vrot.slane %v1448_v58, 1  ;;  %v1721_v13 = vpack.c.bf16 %v1441_v4, %v1441_v4 }
 0x15a   : > { %12139 = vst [vmem:[#allocation14_spill] sm:$0xff] %v8292_v14 }
 0x15b   : > { %v716_v19 = vpop.f32.mrf.mxu0 }
 0x15c   : > { %v717_v21 = vadd.f32 %v8215_v3, %v716_v19 }
 0x15d   : > { %v1221_v22 = vpop.f32.mrf.mxu2 }
 0x15e   : > { %v862_v25 = vmax.f32 %v717_v21, 0.0  ;;  %v8297_v26 = vpack.c.bf16 %v1221_v22, %v1219_v12  ;;  %v1460_v27 = vmax.f32 %v1219_v12, %v1221_v22  ;;  %6886 = vmatmul.msk.f32.gmra.mxu0 %vm437_vm0, %v407_v20  ;;  %v1450_v20 = vmax.f32 %v1448_v58, %v1449_v10  ;;  %v413_v10 = vld [vmem:[%s8150_s26 + $0x168] sm:$0xff] }
 0x15f   : > { %v1055_v30 = vpop.f32.mrf.mxu1 }
 0x160   : > { %12140 = vst [vmem:[#allocation15_spill] sm:$0xff] %v8297_v26  ;;  %v1452_v31 = vmax.f32 %v1451_v15, %v1055_v30  ;;  %v914_v32 = vpack.c.bf16 %v862_v25, %v861_v24  ;;  %v1859_v25 = vunpack.c.l.b16 %v1721_v13  ;;  %v1722_v33 = vpack.c.bf16 %v1450_v20, %v1450_v20 }
 0x162   : > { %1094 = vmatmul.bf16.gmra.mxu1 %v914_v32  ;;  %1263 = vmatmul.bf16.gmra.mxu2 %v914_v32 }
 0x163   : > { %v719_v35 = vpop.f32.mrf.mxu0 }
 0x164   : > { %v720_v50 = vadd.f32 %v8215_v3, %v719_v35 }
 0x165   : > { %v1224_v40 = vpop.f32.mrf.mxu2 }
 0x166   : > { %v1461_v41 = vmax.f32 %v1460_v27, %v1224_v40  ;;  %6887 = vmatmul.msk.f32.gmra.mxu0 %vm437_vm0, %v408_v38  ;;  %v863_v60 = vmax.f32 %v720_v50, 0.0 }
 0x167   : > { %v1057_v44 = vpop.f32.mrf.mxu1 }
 0x168   : > { %v8302_v45 = vpack.c.bf16 %v1057_v44, %v1055_v30  ;;  %v1453_v46 = vmax.f32 %v1452_v31, %v1057_v44  ;;  %v1860_v44 = vunpack.c.l.b16 %v1722_v33 }
 0x16a   : > { %12141 = vst [vmem:[#allocation16_spill] sm:$0xff] %v8302_v45  ;;  %v1454_v51 = vrot.slane %v1453_v46, 4 }
 0x16b   : > { %v722_v53 = vpop.f32.mrf.mxu0 }
 0x16c   : > { %v1455_v56 = vmax.f32 %v1453_v46, %v1454_v51  ;;  %v723_v57 = vadd.f32 %v8215_v3, %v722_v53 }
 0x16d   : > { %v1226_v61 = vpop.f32.mrf.mxu2 }
 0x16e   : > { %v1456_v63 = vrot.slane %v1455_v56, 2  ;;  %v864_v0 = vmax.f32 %v723_v57, 0.0  ;;  %v8307_v1 = vpack.c.bf16 %v1226_v61, %v1224_v40  ;;  %v1462_v2 = vmax.f32 %v1461_v41, %v1226_v61  ;;  %6888 = vmatmul.msk.f32.gmra.mxu0 %vm437_vm0, %v409_v54  ;;  %v411_v40 = vld [vmem:[%s8150_s26 + $0x158] sm:$0xff]  ;;  %v412_v61 = vld [vmem:[%s8150_s26 + $0x160] sm:$0xff] }
 0x16f   : > { %v1060_v5 = vpop.f32.mrf.mxu1 }
 0x170   : > { %v1457_v7 = vmax.f32 %v1455_v56, %v1456_v63  ;;  %v1463_v8 = vrot.slane %v1462_v2, 4  ;;  %v915_v9 = vpack.c.bf16 %v864_v0, %v863_v60 }
 0x172   : > { %v1458_v11 = vrot.slane %v1457_v7, 1  ;;  %v1464_v12 = vmax.f32 %v1462_v2, %v1463_v8  ;;  %1099 = vmatmul.bf16.gmra.mxu1 %v915_v9  ;;  %1268 = vmatmul.bf16.gmra.mxu2 %v915_v9 }
 0x173   : > { %v725_v15 = vpop.f32.mrf.mxu0 }
 0x174   : > { %v1459_v18 = vmax.f32 %v1457_v7, %v1458_v11  ;;  %v1465_v19 = vrot.slane %v1464_v12, 2  ;;  %v726_v34 = vadd.f32 %v8215_v3, %v725_v15 }
 0x175   : > { %v1229_v21 = vpop.f32.mrf.mxu2 }
 0x176   : > { %v1723_v22 = vpack.c.bf16 %v1459_v18, %v1459_v18  ;;  %v1466_v24 = vmax.f32 %v1464_v12, %v1465_v19  ;;  %6889 = vmatmul.msk.f32.gmra.mxu0 %vm437_vm0, %v410_v17  ;;  %v865_v46 = vmax.f32 %v726_v34, 0.0 }
 0x177   : > { %v1062_v27 = vpop.f32.mrf.mxu1 }
 0x178   : > { %v1861_v28 = vunpack.c.l.b16 %v1723_v22  ;;  %v1467_v30 = vrot.slane %v1466_v24, 1  ;;  %v8312_v31 = vpack.c.bf16 %v1062_v27, %v1060_v5  ;;  %v1469_v32 = vmax.f32 %v1060_v5, %v1062_v27 }
 0x17a   : > { %12142 = vst [vmem:[#allocation17_spill] sm:$0xff] %v8312_v31  ;;  %v8316_v35 = vsel %vm1891_vm1, %v1861_v28, %v1859_v25  ;;  %v1468_v38 = vmax.f32 %v1466_v24, %v1467_v30 }
 0x17b   : > { %v728_v39 = vpop.f32.mrf.mxu0 }
 0x17c   : > { %v1724_v41 = vpack.c.bf16 %v1468_v38, %v1468_v38  ;;  %v729_v43 = vadd.f32 %v8215_v3, %v728_v39 }
 0x17d   : > { %v1231_v48 = vpop.f32.mrf.mxu2 }
 0x17e   : > { %v1862_v50 = vunpack.c.l.b16 %v1724_v41  ;;  %v866_v51 = vmax.f32 %v729_v43, 0.0  ;;  %v8320_v52 = vpack.c.bf16 %v1231_v48, %v1229_v21  ;;  %v1478_v53 = vmax.f32 %v1229_v21, %v1231_v48  ;;  %6890 = vmatmul.msk.f32.gmra.mxu0 %vm437_vm0, %v411_v40 }
 0x17f   : > { %v1065_v54 = vpop.f32.mrf.mxu1 }
 0x180   : > { %v8324_v56 = vsel %vm1891_vm1, %v1862_v50, %v1860_v44  ;;  %v1470_v57 = vmax.f32 %v1469_v32, %v1065_v54  ;;  %v916_v58 = vpack.c.bf16 %v866_v51, %v865_v46  ;;  %v414_v32 = vld [vmem:[%s8150_s26 + $0x170] sm:$0xff] }
 0x182   : > { %1104 = vmatmul.bf16.gmra.mxu1 %v916_v58  ;;  %1273 = vmatmul.bf16.gmra.mxu2 %v916_v58 }
 0x183   : > { %v731_v60 = vpop.f32.mrf.mxu0 }
 0x184   : > { %v732_v7 = vadd.f32 %v8215_v3, %v731_v60 }
 0x185   : > { %v1234_v63 = vpop.f32.mrf.mxu2 }
 0x186   : > { %v1479_v0 = vmax.f32 %v1478_v53, %v1234_v63  ;;  %6891 = vmatmul.msk.f32.gmra.mxu0 %vm437_vm0, %v412_v61  ;;  %v867_v13 = vmax.f32 %v732_v7, 0.0 }
 0x187   : > { %v1067_v2 = vpop.f32.mrf.mxu1 }
 0x188   : > { %v8328_v4 = vpack.c.bf16 %v1067_v2, %v1065_v54  ;;  %v1471_v5 = vmax.f32 %v1470_v57, %v1067_v2  ;;  %v415_v57 = vld [vmem:[%s8150_s26 + $0x178] sm:$0xff] }
 0x18a   : > { %12143 = vst [vmem:[#allocation18_spill] sm:$0xff] %v8328_v4  ;;  %v1472_v8 = vrot.slane %v1471_v5, 4 }
 0x18b   : > { %v734_v9 = vpop.f32.mrf.mxu0 }
 0x18c   : > { %v1473_v11 = vmax.f32 %v1471_v5, %v1472_v8  ;;  %v735_v12 = vadd.f32 %v8215_v3, %v734_v9 }
 0x18d   : > { %v1236_v15 = vpop.f32.mrf.mxu2 }
 0x18e   : > { %v1474_v17 = vrot.slane %v1473_v11, 2  ;;  %v868_v18 = vmax.f32 %v735_v12, 0.0  ;;  %v8333_v19 = vpack.c.bf16 %v1236_v15, %v1234_v63  ;;  %v1480_v20 = vmax.f32 %v1479_v0, %v1236_v15  ;;  %6892 = vmatmul.msk.f32.gmra.mxu0 %vm437_vm0, %v413_v10  ;;  %v416_v12 = vld [vmem:[%s8150_s26 + $0x180] sm:$0xff] }
 0x18f   : > { %v1070_v21 = vpop.f32.mrf.mxu1 }
 0x190   : > { %12144 = vst [vmem:[#allocation19_spill] sm:$0xff] %v8333_v19  ;;  %v1475_v22 = vmax.f32 %v1473_v11, %v1474_v17  ;;  %v1481_v24 = vrot.slane %v1480_v20, 4  ;;  %v917_v25 = vpack.c.bf16 %v868_v18, %v867_v13 }
 0x192   : > { %v1476_v27 = vrot.slane %v1475_v22, 1  ;;  %v1482_v28 = vmax.f32 %v1480_v20, %v1481_v24  ;;  %1109 = vmatmul.bf16.gmra.mxu1 %v917_v25  ;;  %1278 = vmatmul.bf16.gmra.mxu2 %v917_v25  ;;  %v417_v24 = vld [vmem:[%s8150_s26 + $0x188] sm:$0xff] }
 0x193   : > { %v737_v30 = vpop.f32.mrf.mxu0 }
 0x194   : > { %v1477_v33 = vmax.f32 %v1475_v22, %v1476_v27  ;;  %v1483_v34 = vrot.slane %v1482_v28, 2  ;;  %v738_v50 = vadd.f32 %v8215_v3, %v737_v30 }
 0x195   : > { %v1239_v38 = vpop.f32.mrf.mxu2 }
 0x196   : > { %v1725_v39 = vpack.c.bf16 %v1477_v33, %v1477_v33  ;;  %v1484_v40 = vmax.f32 %v1482_v28, %v1483_v34  ;;  %6893 = vmatmul.msk.f32.gmra.mxu0 %vm437_vm0, %v414_v32  ;;  %v869_v61 = vmax.f32 %v738_v50, 0.0 }
 0x197   : > { %v1072_v41 = vpop.f32.mrf.mxu1 }
 0x198   : > { %v1863_v43 = vunpack.c.l.b16 %v1725_v39  ;;  %v1485_v44 = vrot.slane %v1484_v40, 1  ;;  %v8338_v46 = vpack.c.bf16 %v1072_v41, %v1070_v21  ;;  %v1487_v48 = vmax.f32 %v1070_v21, %v1072_v41 }
 0x19a   : > { %12145 = vst [vmem:[#allocation20_spill] sm:$0xff] %v8338_v46  ;;  %v8343_v51 = vsel %vm1893_vm2, %v1863_v43, %v8316_v35  ;;  %v1486_v53 = vmax.f32 %v1484_v40, %v1485_v44 }
 0x19b   : > { %v740_v54 = vpop.f32.mrf.mxu0 }
 0x19c   : > { %v1726_v58 = vpack.c.bf16 %v1486_v53, %v1486_v53  ;;  %v741_v60 = vadd.f32 %v8215_v3, %v740_v54  ;;  %v418_v53 = vld [vmem:[%s8150_s26 + $0x190] sm:$0xff] }
 0x19d   : > { %v1241_v63 = vpop.f32.mrf.mxu2 }
 0x19e   : > { %v1864_v0 = vunpack.c.l.b16 %v1726_v58  ;;  %v870_v2 = vmax.f32 %v741_v60, 0.0  ;;  %v8347_v5 = vpack.c.bf16 %v1241_v63, %v1239_v38  ;;  %v1496_v7 = vmax.f32 %v1239_v38, %v1241_v63  ;;  %6894 = vmatmul.msk.f32.gmra.mxu0 %vm437_vm0, %v415_v57  ;;  %v7473_v58 = vld [vmem:[%s11942_s5 + $0x1e0] sm:$0xf]  ;;  %v7762_v60 = vld [vmem:[%s11942_s5 + $0x1ec] sm:$0xf0] }
 0x19f   : > { %v1075_v8 = vpop.f32.mrf.mxu1  ;;  %v7474_v63 = vor.u32 %v7762_v60, %v7473_v58  ;;  %v420_v58 = vld [vmem:[%s8150_s26 + $0x1a0] sm:$0xff]  ;;  %v7746_v60 = vld [vmem:[%s11942_s5 + $0x16c] sm:$0xf0] }
 0x1a0   : > { %12146 = vst [vmem:[#allocation21_spill] sm:$0xff] %v8347_v5  ;;  %v8352_v35 = vsel %vm1893_vm2, %v1864_v0, %v8324_v56  ;;  %v1488_v9 = vmax.f32 %v1487_v48, %v1075_v8  ;;  %v918_v10 = vpack.c.bf16 %v870_v2, %v869_v61 }
 0x1a1   : > { %2915 = vmatpush.bf16.msrb.mxu0 %v7474_v63 }
 0x1a2   : > { %1114 = vmatmul.bf16.gmra.mxu1 %v918_v10  ;;  %1283 = vmatmul.bf16.gmra.mxu2 %v918_v10 }
 0x1a3   : > { %v743_v11 = vpop.f32.mrf.mxu0 }
 0x1a4   : > { %v744_v21 = vadd.f32 %v8215_v3, %v743_v11 }
 0x1a5   : > { %v1244_v13 = vpop.f32.mrf.mxu2 }
 0x1a6   : > { %v1497_v15 = vmax.f32 %v1496_v7, %v1244_v13  ;;  %6895 = vmatmul.msk.f32.gmra.mxu0 %vm437_vm0, %v416_v12  ;;  %v871_v28 = vmax.f32 %v744_v21, 0.0  ;;  %v7457_v12 = vld [vmem:[%s11942_s5 + $0x1c0] sm:$0xf] }
 0x1a7   : > { %v1077_v17 = vpop.f32.mrf.mxu1 }
 0x1a8   : > { %v8356_v18 = vpack.c.bf16 %v1077_v17, %v1075_v8  ;;  %v1489_v20 = vmax.f32 %v1488_v9, %v1077_v17 }
 0x1aa   : > { %12147 = vst [vmem:[#allocation22_spill] sm:$0xff] %v8356_v18  ;;  %v1490_v22 = vrot.slane %v1489_v20, 4 }
 0x1ab   : > { %v746_v56 = vpop.f32.mrf.mxu0 }
 0x1ac   : > { %v1491_v25 = vmax.f32 %v1489_v20, %v1490_v22  ;;  %v747_v27 = vadd.f32 %v8215_v3, %v746_v56  ;;  %v419_v56 = vld [vmem:[%s8150_s26 + $0x198] sm:$0xff] }
 0x1ad   : > { %v1246_v30 = vpop.f32.mrf.mxu2 }
 0x1ae   : > { %v1492_v32 = vrot.slane %v1491_v25, 2  ;;  %v872_v33 = vmax.f32 %v747_v27, 0.0  ;;  %v8361_v34 = vpack.c.bf16 %v1246_v30, %v1244_v13  ;;  %v1498_v38 = vmax.f32 %v1497_v15, %v1246_v30  ;;  %6896 = vmatmul.msk.f32.gmra.mxu0 %vm437_vm0, %v417_v24  ;;  %v7758_v13 = vld [vmem:[%s11942_s5 + $0x1cc] sm:$0xf0]  ;;  %v7441_v27 = vld [vmem:[%s11942_s5 + $0x1a0] sm:$0xf] }
 0x1af   : > { %v1080_v39 = vpop.f32.mrf.mxu1  ;;  %v7458_v17 = vor.u32 %v7758_v13, %v7457_v12  ;;  %v7742_v12 = vld [vmem:[%s11942_s5 + $0x14c] sm:$0xf0] }
 0x1b0   : > { %12148 = vst [vmem:[#allocation23_spill] sm:$0xff] %v8361_v34  ;;  %v1493_v40 = vmax.f32 %v1491_v25, %v1492_v32  ;;  %v1499_v41 = vrot.slane %v1498_v38, 4  ;;  %v919_v43 = vpack.c.bf16 %v872_v33, %v871_v28  ;;  %v7754_v28 = vld [vmem:[%s11942_s5 + $0x1ac] sm:$0xf0] }
 0x1b1   : > { %2916 = vmatpush.bf16.msrb.mxu0 %v7458_v17  ;;  %v7442_v33 = vor.u32 %v7754_v28, %v7441_v27  ;;  %v7738_v27 = vld [vmem:[%s11942_s5 + $0x12c] sm:$0xf0] }
 0x1b2   : > { %v1494_v44 = vrot.slane %v1493_v40, 1  ;;  %v1500_v48 = vmax.f32 %v1498_v38, %v1499_v41  ;;  %1119 = vmatmul.bf16.gmra.mxu1 %v919_v43  ;;  %1288 = vmatmul.bf16.gmra.mxu2 %v919_v43 }
 0x1b3   : > { %v749_v50 = vpop.f32.mrf.mxu0 }
 0x1b4   : > { %v1495_v54 = vmax.f32 %v1493_v40, %v1494_v44  ;;  %v1501_v57 = vrot.slane %v1500_v48, 2  ;;  %v750_v15 = vadd.f32 %v8215_v3, %v749_v50  ;;  %v7425_v50 = vld [vmem:[%s11942_s5 + $0x180] sm:$0xf] }
 0x1b5   : > { %v1249_v61 = vpop.f32.mrf.mxu2  ;;  %2917 = vmatpush.bf16.msrb.mxu0 %v7442_v33 }
 0x1b6   : > { %v1727_v0 = vpack.c.bf16 %v1495_v54, %v1495_v54  ;;  %v1502_v2 = vmax.f32 %v1500_v48, %v1501_v57  ;;  %6897 = vmatmul.msk.f32.gmra.mxu0 %vm437_vm0, %v418_v53  ;;  %v873_v30 = vmax.f32 %v750_v15, 0.0  ;;  %v7750_v53 = vld [vmem:[%s11942_s5 + $0x18c] sm:$0xf0] }
 0x1b7   : > { %v1082_v7 = vpop.f32.mrf.mxu1  ;;  %v7426_v54 = vor.u32 %v7750_v53, %v7425_v50  ;;  %v7734_v53 = vld [vmem:[%s11942_s5 + $0x10c] sm:$0xf0] }
 0x1b8   : > { %v1865_v8 = vunpack.c.l.b16 %v1727_v0  ;;  %v1503_v9 = vrot.slane %v1502_v2, 1  ;;  %v8372_v10 = vpack.c.bf16 %v1082_v7, %v1080_v39  ;;  %v1505_v11 = vmax.f32 %v1080_v39, %v1082_v7  ;;  %v426_v7 = vld [vmem:[%s8150_s26 + $0x1d0] sm:$0xff] }
 0x1b9   : > { %2918 = vmatpush.bf16.msrb.mxu0 %v7426_v54  ;;  %6905 = vmatmul.msk.f32.vlgmr.msra.gmra.mxu3 %vm437_vm0, %v426_v7 }
 0x1ba   : > { %12149 = vst [vmem:[#allocation24_spill] sm:$0xff] %v8372_v10  ;;  %v8383_v20 = vsel %vm1895_vm3, %v1865_v8, %v8343_v51  ;;  %v1504_v21 = vmax.f32 %v1502_v2, %v1503_v9  ;;  %7806 = vmatpush.bf16.msra.mxu3 %v8175_v16 }
 0x1bb   : > { %v752_v22 = vpop.f32.mrf.mxu0 }
 0x1bc   : > { %v1728_v24 = vpack.c.bf16 %v1504_v21, %v1504_v21  ;;  %v753_v25 = vadd.f32 %v8215_v3, %v752_v22  ;;  %v421_v22 = vld [vmem:[%s8150_s26 + $0x1a8] sm:$0xff] }
 0x1bd   : > { %v1251_v32 = vpop.f32.mrf.mxu2 }
 0x1be   : > { %v1866_v51 = vunpack.c.l.b16 %v1728_v24  ;;  %v874_v38 = vmax.f32 %v753_v25, 0.0  ;;  %v8393_v39 = vpack.c.bf16 %v1251_v32, %v1249_v61  ;;  %v1514_v40 = vmax.f32 %v1249_v61, %v1251_v32  ;;  %6898 = vmatmul.msk.f32.gmra.mxu0 %vm437_vm0, %v419_v56  ;;  %v7377_v25 = vld [vmem:[%s11942_s5 + $0x120] sm:$0xf]  ;;  %7807 = vmatpush.bf16.msra.mxu3 %v8180_v23 }
 0x1bf   : > { %v1085_v41 = vpop.f32.mrf.mxu1  ;;  %v7378_v32 = vor.u32 %v7738_v27, %v7377_v25  ;;  %v7361_v23 = vld [vmem:[%s11942_s5 + $0x100] sm:$0xf] }
 0x1c0   : > { %12150 = vst [vmem:[#allocation25_spill] sm:$0xff] %v8393_v39  ;;  %v8398_v43 = vsel %vm1895_vm3, %v1866_v51, %v8352_v35  ;;  %v1506_v44 = vmax.f32 %v1505_v11, %v1085_v41  ;;  %v920_v48 = vpack.c.bf16 %v874_v38, %v873_v30  ;;  %v7409_v35 = vld [vmem:[%s11942_s5 + $0x160] sm:$0xf]  ;;  %v7362_v54 = vor.u32 %v7734_v53, %v7361_v23 }
 0x1c1   : > { %v7410_v63 = vor.u32 %v7746_v60, %v7409_v35  ;;  %v7393_v11 = vld [vmem:[%s11942_s5 + $0x140] sm:$0xf]  ;;  %v422_v60 = vld [vmem:[%s8150_s26 + $0x1b0] sm:$0xff] }
 0x1c2   : > { %1124 = vmatmul.bf16.gmra.mxu1 %v920_v48  ;;  %1293 = vmatmul.bf16.gmra.mxu2 %v920_v48  ;;  %v7394_v15 = vor.u32 %v7742_v12, %v7393_v11 }
 0x1c3   : > { %v755_v57 = vpop.f32.mrf.mxu0  ;;  %2919 = vmatpush.bf16.msrb.mxu0 %v7410_v63  ;;  %7808 = vmatpush.bf16.msra.mxu3 %v8183_v29 }
 0x1c4   : > { %v756_v13 = vadd.f32 %v8215_v3, %v755_v57 }
 0x1c5   : > { %v1254_v61 = vpop.f32.mrf.mxu2 }
 0x1c6   : > { %v1515_v0 = vmax.f32 %v1514_v40, %v1254_v61  ;;  %6899 = vmatmul.msk.f32.gmra.mxu0 %vm437_vm0, %v420_v58  ;;  %v875_v28 = vmax.f32 %v756_v13, 0.0 }
 0x1c7   : > { %v1087_v2 = vpop.f32.mrf.mxu1  ;;  %2920 = vmatpush.bf16.msrb.mxu0 %v7394_v15  ;;  %7809 = vmatpush.bf16.msra.mxu3 %v8188_v36 }
 0x1c8   : > { %v8415_v8 = vpack.c.bf16 %v1087_v2, %v1085_v41  ;;  %v1507_v9 = vmax.f32 %v1506_v44, %v1087_v2  ;;  %v427_v41 = vld [vmem:[%s8150_s26 + $0x1d8] sm:$0xff] }
 0x1c9   : > { %6906 = vmatmul.msk.f32.gmra.mxu3 %vm437_vm0, %v427_v41 }
 0x1ca   : > { %12151 = vst [vmem:[#allocation26_spill] sm:$0xff] %v8415_v8  ;;  %v1508_v17 = vrot.slane %v1507_v9, 4 }
 0x1cb   : > { %v758_v21 = vpop.f32.mrf.mxu0  ;;  %2921 = vmatpush.bf16.msrb.mxu0 %v7378_v32  ;;  %7810 = vmatpush.bf16.msra.mxu3 %v8191_v42 }
 0x1cc   : > { %v1509_v56 = vmax.f32 %v1507_v9, %v1508_v17  ;;  %v759_v24 = vadd.f32 %v8215_v3, %v758_v21  ;;  %v428_v9 = vld [vmem:[%s8150_s26 + $0x1e0] sm:$0xff] }
 0x1cd   : > { %v1256_v30 = vpop.f32.mrf.mxu2 }
 0x1ce   : > { %v1510_v16 = vrot.slane %v1509_v56, 2  ;;  %v876_v33 = vmax.f32 %v759_v24, 0.0  ;;  %v8435_v51 = vpack.c.bf16 %v1256_v30, %v1254_v61  ;;  %v1516_v38 = vmax.f32 %v1515_v0, %v1256_v30  ;;  %6900 = vmatmul.msk.f32.gmra.mxu0 %vm437_vm0, %v421_v22 }
 0x1cf   : > { %v1090_v40 = vpop.f32.mrf.mxu1  ;;  %2922 = vmatpush.bf16.msrb.mxu0 %v7362_v54  ;;  %7811 = vmatpush.bf16.msra.mxu3 %v8196_v49 }
 0x1d0   : > { %12152 = vst [vmem:[#allocation27_spill] sm:$0xff] %v8435_v51  ;;  %v1511_v44 = vmax.f32 %v1509_v56, %v1510_v16  ;;  %v1517_v48 = vrot.slane %v1516_v38, 4  ;;  %v921_v50 = vpack.c.bf16 %v876_v33, %v875_v28  ;;  %v423_v56 = vld [vmem:[%s8150_s26 + $0x1b8] sm:$0xff]  ;;  %v429_v33 = vld [vmem:[%s8150_s26 + $0x1e8] sm:$0xff] }
 0x1d1   : > { %6907 = vmatmul.msk.f32.gmra.mxu3 %vm437_vm0, %v428_v9 }
 0x1d2   : > { %v1512_v57 = vrot.slane %v1511_v44, 1  ;;  %v1518_v58 = vmax.f32 %v1516_v38, %v1517_v48  ;;  %1129 = vmatmul.bf16.gmra.mxu1 %v921_v50  ;;  %1298 = vmatmul.bf16.gmra.mxu2 %v921_v50 }
 0x1d3   : > { %v761_v35 = vpop.f32.mrf.mxu0  ;;  %7812 = vmatpush.bf16.msra.mxu3 %v8199_v55 }
 0x1d4   : > { %v1513_v61 = vmax.f32 %v1511_v44, %v1512_v57  ;;  %v1519_v63 = vrot.slane %v1518_v58, 2  ;;  %v762_v17 = vadd.f32 %v8215_v3, %v761_v35  ;;  %v424_v44 = vld [vmem:[%s8150_s26 + $0x1c0] sm:$0xff]  ;;  %v425_v35 = vld [vmem:[%s8150_s26 + $0x1c8] sm:$0xff] }
 0x1d5   : > { %v1259_v0 = vpop.f32.mrf.mxu2 }
 0x1d6   : > { %v1729_v2 = vpack.c.bf16 %v1513_v61, %v1513_v61  ;;  %v1520_v7 = vmax.f32 %v1518_v58, %v1519_v63  ;;  %6901 = vmatmul.msk.f32.gmra.mxu0 %vm437_vm0, %v422_v60  ;;  %v877_v27 = vmax.f32 %v762_v17, 0.0 }
 0x1d7   : > { %v1092_v29 = vpop.f32.mrf.mxu1  ;;  %7813 = vmatpush.bf16.msra.mxu3 %v8204_v62  ;;  %v8485_v62 = vld [vmem:[%s11939_s2] ss:$0 sm:$0xff] }
 0x1d8   : > { %v1867_v11 = vunpack.c.l.b16 %v1729_v2  ;;  %v1521_v12 = vrot.slane %v1520_v7, 1  ;;  %v8451_v13 = vpack.c.bf16 %v1092_v29, %v1090_v40  ;;  %v1523_v15 = vmax.f32 %v1090_v40, %v1092_v29 }
 0x1d9   : > { %6908 = vmatmul.msk.f32.gmra.mxu3 %vm437_vm0, %v429_v33 }
 0x1da   : > { %12153 = vst [vmem:[#allocation28_spill] sm:$0xff] %v8451_v13  ;;  %v8458_v36 = vsel %vm1897_vm4, %v1867_v11, %v8383_v20  ;;  %v1522_v21 = vmax.f32 %v1520_v7, %v1521_v12  ;;  %v431_v11 = vld [vmem:[%s8150_s26 + $0x1f8] sm:$0xff] }
 0x1db   : > { %v764_v22 = vpop.f32.mrf.mxu0 }
 0x1dc   : > { %v1730_v24 = vpack.c.bf16 %v1522_v21, %v1522_v21  ;;  %v765_v25 = vadd.f32 %v8215_v3, %v764_v22 }
 0x1dd   : > { %v1261_v28 = vpop.f32.mrf.mxu2 }
 0x1de   : > { %v1868_v30 = vunpack.c.l.b16 %v1730_v24  ;;  %v878_v32 = vmax.f32 %v765_v25, 0.0  ;;  %v8463_v16 = vpack.c.bf16 %v1261_v28, %v1259_v0  ;;  %v1532_v42 = vmax.f32 %v1259_v0, %v1261_v28  ;;  %6902 = vmatmul.msk.f32.gmra.mxu0 %vm437_vm0, %v423_v56 }
 0x1df   : > { %v1095_v20 = vpop.f32.mrf.mxu1 }
 0x1e0   : > { %12154 = vst [vmem:[#allocation29_spill] sm:$0xff] %v8463_v16  ;;  %v8469_v38 = vsel %vm1897_vm4, %v1868_v30, %v8398_v43  ;;  %v1524_v40 = vmax.f32 %v1523_v15, %v1095_v20  ;;  %v922_v41 = vpack.c.bf16 %v878_v32, %v877_v27  ;;  %v430_v43 = vld [vmem:[%s8150_s26 + $0x1f0] sm:$0xff]  ;;  %s7959_s26 = scalar_lea.hbm %s7958_s28, 16 }
 0x1e1   : > { %6909 = vmatmul.msk.f32.gmra.mxu3 %vm437_vm0, %v430_v43  ;;  %p7960_p0 = scmp.ne.s32.totalorder %s7958_s28, %s7959_s26  ;;  %p7965_p4 = scmp.lt.s32.totalorder %s7963_s17, %s7959_s26 }
 0x1e2   : > { %1134 = vmatmul.bf16.gmra.mxu1 %v922_v41  ;;  %1303 = vmatmul.bf16.gmra.mxu2 %v922_v41 }
 0x1e3   : > { %v767_v49 = vpop.f32.mrf.mxu0  ;;  %p7961_p1 = pnand %p7960_p0, %p8111_p5  ;;  %p7966_p7 = por %p7965_p4, %p7964_p3 }
 0x1e4   : > { %v768_v55 = vadd.f32 %v8215_v3, %v767_v49 }
 0x1e5   : > { %v1264_v48 = vpop.f32.mrf.mxu2  ;;  %p7962_p2 = pneg %p7961_p1 }
 0x1e6   : > { %v1533_v50 = vmax.f32 %v1532_v42, %v1264_v48  ;;  %6903 = vmatmul.msk.f32.gmra.mxu0 %vm437_vm0, %v424_v44  ;;  %v879_v63 = vmax.f32 %v768_v55, 0.0 }
 0x1e7   : > { %v1097_v23 = vpop.f32.mrf.mxu1  ;;  %p7967_p8 = pnand %p7966_p7, %p7962_p2 }
 0x1e8   : > { %v8477_v53 = vpack.c.bf16 %v1097_v23, %v1095_v20  ;;  %v1525_v54 = vmax.f32 %v1524_v40, %v1097_v23 }
 0x1e9   : > { %6910 = vmatmul.msk.f32.gmra.mxu3 %vm437_vm0, %v431_v11 }
 0x1ea   : > { %12155 = vst [vmem:[#allocation30_spill] sm:$0xff] %v8477_v53  ;;  %v1526_v57 = vrot.slane %v1525_v54, 4 }
 0x1eb   : > { %v770_v58 = vpop.f32.mrf.mxu0 }
 0x1ec   : > { %v1527_v60 = vmax.f32 %v1525_v54, %v1526_v57  ;;  %v771_v61 = vadd.f32 %v8485_v62, %v770_v58 }
 0x1ed   : > { %v1266_v0 = vpop.f32.mrf.mxu2 }
 0x1ee   : > { %v1528_v2 = vrot.slane %v1527_v60, 2  ;;  %v880_v7 = vmax.f32 %v771_v61, 0.0  ;;  %v8488_v29 = vpack.c.bf16 %v1266_v0, %v1264_v48  ;;  %v1534_v9 = vmax.f32 %v1533_v50, %v1266_v0  ;;  %6904 = vmatmul.msk.f32.gmra.mxu0 %vm437_vm0, %v425_v35 }
 0x1ef   : > { %v1100_v3 = vpop.f32.mrf.mxu1  ;;  %vm4150_vm0 = vcmask 1046529  }
 0x1f0   : > { %12156 = vst [vmem:[#allocation31_spill] sm:$0xff] %v8488_v29  ;;  %v1529_v12 = vmax.f32 %v1527_v60, %v1528_v2  ;;  %v1535_v15 = vrot.slane %v1534_v9, 4  ;;  %v923_v17 = vpack.c.bf16 %v880_v7, %v879_v63 }
 0x1f2   : > { %v1530_v21 = vrot.slane %v1529_v12, 1  ;;  %v1536_v22 = vmax.f32 %v1534_v9, %v1535_v15  ;;  %1139 = vmatmul.bf16.gmra.mxu1 %v923_v17  ;;  %1308 = vmatmul.bf16.gmra.mxu2 %v923_v17 }
 0x1f3   : > { %v773_v56 = vpop.f32.mrf.mxu0 }
 0x1f4   : > { %v1531_v24 = vmax.f32 %v1529_v12, %v1530_v21  ;;  %v1537_v25 = vrot.slane %v1536_v22, 2  ;;  %v774_v41 = vadd.f32 %v8485_v62, %v773_v56 }
 0x1f5   : > { %v1269_v27 = vpop.f32.mrf.mxu2 }
 0x1f6   : > { %v1731_v28 = vpack.c.bf16 %v1531_v24, %v1531_v24  ;;  %v1538_v30 = vmax.f32 %v1536_v22, %v1537_v25  ;;  %2923 = vmatmul.bf16.vlgmr.msrb.gmra.mxu0 %v8277_v47  ;;  %v881_v43 = vmax.f32 %v774_v41, 0.0 }
 0x1f7   : > { %v1102_v32 = vpop.f32.mrf.mxu1 }
 0x1f8   : > { %v1869_v42 = vunpack.c.l.b16 %v1731_v28  ;;  %v1539_v20 = vrot.slane %v1538_v30, 1  ;;  %v8494_v33 = vpack.c.bf16 %v1102_v32, %v1100_v3  ;;  %v1541_v40 = vmax.f32 %v1100_v3, %v1102_v32 }
 0x1fa   : > { %12157 = vst [vmem:[#allocation32_spill] sm:$0xff] %v8494_v33  ;;  %v1540_v49 = vmax.f32 %v1538_v30, %v1539_v20  ;;  %v1900_v44 = vsel %vm1899_vm5, %v1869_v42, %v8458_v36 }
 0x1fb   : > { %v776_v48 = vpop.f32.mrf.mxu0 }
 0x1fc   : > { %v1732_v50 = vpack.c.bf16 %v1540_v49, %v1540_v49  ;;  %v777_v23 = vadd.f32 %v8485_v62, %v776_v48 }
 0x1fd   : > { %v1271_v54 = vpop.f32.mrf.mxu2 }
 0x1fe   : > { %v1870_v55 = vunpack.c.l.b16 %v1732_v50  ;;  %v882_v57 = vmax.f32 %v777_v23, 0.0  ;;  %v8500_v58 = vpack.c.bf16 %v1271_v54, %v1269_v27  ;;  %v1550_v35 = vmax.f32 %v1269_v27, %v1271_v54 }
 0x1ff   : > { %v1105_v60 = vpop.f32.mrf.mxu1 }
 0x200   : > { %12158 = vst [vmem:[#allocation33_spill] sm:$0xff] %v8500_v58  ;;  %v1909_v61 = vsel %vm1899_vm5, %v1870_v55, %v8469_v38  ;;  %v1542_v63 = vmax.f32 %v1541_v40, %v1105_v60  ;;  %v924_v0 = vpack.c.bf16 %v882_v57, %v881_v43 }
 0x202   : > { %1144 = vmatmul.bf16.gmra.mxu1 %v924_v0  ;;  %1313 = vmatmul.bf16.gmra.mxu2 %v924_v0 }
 0x203   : > { %v779_v36 = vpop.f32.mrf.mxu0 }
 0x204   : > { %v780_v12 = vadd.f32 %v8485_v62, %v779_v36 }
 0x205   : > { %v1274_v2 = vpop.f32.mrf.mxu2 }
 0x206   : > { %v1551_v7 = vmax.f32 %v1550_v35, %v1274_v2  ;;  %2928 = vmatmul.bf16.gmra.mxu0 %v8287_v6  ;;  %v883_v22 = vmax.f32 %v780_v12, 0.0 }
 0x207   : > { %v1107_v9 = vpop.f32.mrf.mxu1 }
 0x208   : > { %v8505_v3 = vpack.c.bf16 %v1107_v9, %v1105_v60  ;;  %v1543_v11 = vmax.f32 %v1542_v63, %v1107_v9 }
 0x20a   : > { %12159 = vst [vmem:[#allocation34_spill] sm:$0xff] %v8505_v3  ;;  %v1544_v15 = vrot.slane %v1543_v11, 4 }
 0x20b   : > { %v782_v17 = vpop.f32.mrf.mxu0 }
 0x20c   : > { %v1545_v21 = vmax.f32 %v1543_v11, %v1544_v15  ;;  %v783_v38 = vadd.f32 %v8485_v62, %v782_v17 }
 0x20d   : > { %v1276_v56 = vpop.f32.mrf.mxu2 }
 0x20e   : > { %v1546_v24 = vrot.slane %v1545_v21, 2  ;;  %v884_v25 = vmax.f32 %v783_v38, 0.0  ;;  %v8509_v27 = vpack.c.bf16 %v1276_v56, %v1274_v2  ;;  %v1552_v28 = vmax.f32 %v1551_v7, %v1276_v56 }
 0x20f   : > { %v1110_v30 = vpop.f32.mrf.mxu1 }
 0x210   : > { %12160 = vst [vmem:[#allocation35_spill] sm:$0xff] %v8509_v27  ;;  %v1547_v32 = vmax.f32 %v1545_v21, %v1546_v24  ;;  %v1553_v42 = vrot.slane %v1552_v28, 4  ;;  %v925_v20 = vpack.c.bf16 %v884_v25, %v883_v22 }
 0x212   : > { %v1548_v40 = vrot.slane %v1547_v32, 1  ;;  %v1554_v41 = vmax.f32 %v1552_v28, %v1553_v42  ;;  %1149 = vmatmul.bf16.gmra.mxu1 %v925_v20  ;;  %1318 = vmatmul.bf16.gmra.mxu2 %v925_v20 }
 0x213   : > { %v785_v49 = vpop.f32.mrf.mxu0 }
 0x214   : > { %v1549_v48 = vmax.f32 %v1547_v32, %v1548_v40  ;;  %v1555_v50 = vrot.slane %v1554_v41, 2  ;;  %v786_v0 = vadd.f32 %v8485_v62, %v785_v49 }
 0x215   : > { %v1279_v23 = vpop.f32.mrf.mxu2 }
 0x216   : > { %v1733_v43 = vpack.c.bf16 %v1549_v48, %v1549_v48  ;;  %v1556_v54 = vmax.f32 %v1554_v41, %v1555_v50  ;;  %2933 = vmatmul.bf16.gmra.mxu0 %v8297_v26  ;;  %v885_v12 = vmax.f32 %v786_v0, 0.0 }
 0x217   : > { %v1112_v55 = vpop.f32.mrf.mxu1 }
 0x218   : > { %v1871_v57 = vunpack.c.l.b16 %v1733_v43  ;;  %v1557_v35 = vrot.slane %v1556_v54, 1  ;;  %v8512_v60 = vpack.c.bf16 %v1112_v55, %v1110_v30  ;;  %v1559_v63 = vmax.f32 %v1110_v30, %v1112_v55 }
 0x21a   : > { %12161 = vst [vmem:[#allocation36_spill] sm:$0xff] %v8512_v60  ;;  %v1558_v36 = vmax.f32 %v1556_v54, %v1557_v35  ;;  %v8516_v2 = vsel %vm1901_vm6, %v1871_v57, %v1900_v44 }
 0x21b   : > { %v788_v7 = vpop.f32.mrf.mxu0 }
 0x21c   : > { %v1734_v9 = vpack.c.bf16 %v1558_v36, %v1558_v36  ;;  %v789_v11 = vadd.f32 %v8485_v62, %v788_v7 }
 0x21d   : > { %v1281_v15 = vpop.f32.mrf.mxu2 }
 0x21e   : > { %v1872_v17 = vunpack.c.l.b16 %v1734_v9  ;;  %v886_v21 = vmax.f32 %v789_v11, 0.0  ;;  %v8519_v38 = vpack.c.bf16 %v1281_v15, %v1279_v23  ;;  %v1568_v22 = vmax.f32 %v1279_v23, %v1281_v15  ;;  %v7728_v9 = vld [vmem:[%s11942_s5 + $0xe4] sm:$0xf]  ;;  %v7347_v11 = vld [vmem:[%s11942_s5 + $0xf0] sm:$0xf0] }
 0x21f   : > { %v1115_v56 = vpop.f32.mrf.mxu1  ;;  %v7760_v15 = vld [vmem:[%s11942_s5 + $0x1e4] sm:$0xf] }
 0x220   : > { %12162 = vst [vmem:[#allocation37_spill] sm:$0xff] %v8519_v38  ;;  %v8522_v24 = vsel %vm1901_vm6, %v1872_v17, %v1909_v61  ;;  %v1560_v25 = vmax.f32 %v1559_v63, %v1115_v56  ;;  %v926_v28 = vpack.c.bf16 %v886_v21, %v885_v12  ;;  %v7350_v12 = vor.u32 %v7728_v9, %v7347_v11  ;;  %v7475_v17 = vld [vmem:[%s11942_s5 + $0x1f0] sm:$0xf0]  ;;  %v7752_v11 = vld [vmem:[%s11942_s5 + $0x1a4] sm:$0xf] }
 0x222   : > { %1154 = vmatmul.bf16.gmra.mxu1 %v926_v28  ;;  %1323 = vmatmul.bf16.gmra.mxu2 %v926_v28 }
 0x223   : > { %v791_v44 = vpop.f32.mrf.mxu0  ;;  %3084 = vmatpush.bf16.msrb.mxu1 %v7350_v12 }
 0x224   : > { %v792_v41 = vadd.f32 %v8485_v62, %v791_v44 }
 0x225   : > { %v1284_v30 = vpop.f32.mrf.mxu2 }
 0x226   : > { %v1569_v32 = vmax.f32 %v1568_v22, %v1284_v30  ;;  %2938 = vmatmul.bf16.gmra.mxu0 %v8307_v1  ;;  %v887_v23 = vmax.f32 %v792_v41, 0.0  ;;  %v7756_v41 = vld [vmem:[%s11942_s5 + $0x1c4] sm:$0xf] }
 0x227   : > { %v1117_v42 = vpop.f32.mrf.mxu1 }
 0x228   : > { %v8525_v20 = vpack.c.bf16 %v1117_v42, %v1115_v56  ;;  %v1561_v40 = vmax.f32 %v1560_v25, %v1117_v42  ;;  %v7478_v56 = vor.u32 %v7760_v15, %v7475_v17 }
 0x22a   : > { %12163 = vst [vmem:[#allocation38_spill] sm:$0xff] %v8525_v20  ;;  %v1562_v49 = vrot.slane %v1561_v40, 4  ;;  %3253 = vmatpush.bf16.msrb.mxu2 %v7478_v56 }
 0x22b   : > { %v794_v48 = vpop.f32.mrf.mxu0 }
 0x22c   : > { %v1563_v50 = vmax.f32 %v1561_v40, %v1562_v49  ;;  %v795_v61 = vadd.f32 %v8485_v62, %v794_v48  ;;  %v7459_v49 = vld [vmem:[%s11942_s5 + $0x1d0] sm:$0xf0] }
 0x22d   : > { %v1286_v43 = vpop.f32.mrf.mxu2 }
 0x22e   : > { %v1564_v54 = vrot.slane %v1563_v50, 2  ;;  %v888_v55 = vmax.f32 %v795_v61, 0.0  ;;  %v8529_v57 = vpack.c.bf16 %v1286_v43, %v1284_v30  ;;  %v1570_v35 = vmax.f32 %v1569_v32, %v1286_v43  ;;  %v7724_v30 = vld [vmem:[%s11942_s5 + $0xc4] sm:$0xf]  ;;  %v7331_v32 = vld [vmem:[%s11942_s5 + $0xd0] sm:$0xf0] }
 0x22f   : > { %v8531_v63 = vpop.f32.mrf.mxu1  ;;  %v7334_v40 = vor.u32 %v7724_v30, %v7331_v32  ;;  %v7462_v61 = vor.u32 %v7756_v41, %v7459_v49 }
 0x230   : > { %12164 = vst [vmem:[#allocation39_spill] sm:$0xff] %v8529_v57  ;;  %v1565_v0 = vmax.f32 %v1563_v50, %v1564_v54  ;;  %v1571_v36 = vrot.slane %v1570_v35, 4  ;;  %v927_v7 = vpack.c.bf16 %v888_v55, %v887_v23 }
 0x231   : > { %3085 = vmatpush.bf16.msrb.mxu1 %v7334_v40  ;;  %3254 = vmatpush.bf16.msrb.mxu2 %v7462_v61  ;;  %v7427_v40 = vld [vmem:[%s11942_s5 + $0x190] sm:$0xf0] }
 0x232   : > { %v1566_v21 = vrot.slane %v1565_v0, 1  ;;  %v1572_v22 = vmax.f32 %v1570_v35, %v1571_v36  ;;  %1159 = vmatmul.bf16.gmra.mxu1 %v927_v7  ;;  %1328 = vmatmul.bf16.gmra.mxu2 %v927_v7  ;;  %v7315_v36 = vld [vmem:[%s11942_s5 + $0xb0] sm:$0xf0] }
 0x233   : > { %v797_v25 = vpop.f32.mrf.mxu0 }
 0x234   : > { %v1567_v28 = vmax.f32 %v1565_v0, %v1566_v21  ;;  %v1573_v44 = vrot.slane %v1572_v22, 2  ;;  %v7720_v0 = vld [vmem:[%s11942_s5 + $0xa4] sm:$0xf]  ;;  %v798_v7 = vadd.f32 %v8485_v62, %v797_v25 }
 0x235   : > { %v8551_v42 = vpop.f32.mrf.mxu2  ;;  %v7318_v9 = vor.u32 %v7720_v0, %v7315_v36  ;;  %v7716_v25 = vld [vmem:[%s11942_s5 + $0x84] sm:$0xf]  ;;  %v7283_v36 = vld [vmem:[%s11942_s5 + $0x70] sm:$0xf0] }
 0x236   : > { %v1735_v48 = vpack.c.bf16 %v1567_v28, %v1567_v28  ;;  %v1574_v50 = vmax.f32 %v1572_v22, %v1573_v44  ;;  %2943 = vmatmul.bf16.gmra.mxu0 %v8320_v52  ;;  %v7299_v28 = vld [vmem:[%s11942_s5 + $0x90] sm:$0xf0]  ;;  %v7748_v44 = vld [vmem:[%s11942_s5 + $0x184] sm:$0xf] }
 0x237   : > { %v1122_v23 = vpop.f32.mrf.mxu1  ;;  %3086 = vmatpush.bf16.msrb.mxu1 %v7318_v9  ;;  %v7302_v32 = vor.u32 %v7716_v25, %v7299_v28  ;;  %v7712_v0 = vld [vmem:[%s11942_s5 + $0x64] sm:$0xf] }
 0x238   : > { %v1873_v43 = vunpack.c.l.b16 %v1735_v48  ;;  %v1575_v54 = vrot.slane %v1574_v50, 1  ;;  %v8561_v55 = vpack.c.bf16 %v1122_v23, %v8531_v63  ;;  %v1577_v35 = vmax.f32 %v8531_v63, %v1122_v23  ;;  %v7443_v63 = vld [vmem:[%s11942_s5 + $0x1b0] sm:$0xf0] }
 0x239   : > { %v7446_v15 = vor.u32 %v7752_v11, %v7443_v63  ;;  %v7430_v23 = vor.u32 %v7748_v44, %v7427_v40  ;;  %v7286_v9 = vor.u32 %v7712_v0, %v7283_v36  ;;  %v7251_v40 = vld [vmem:[%s11942_s5 + $0x30] sm:$0xf0]  ;;  %v7700_v0 = vld [vmem:[%s11942_s5 + $0x4] sm:$0xf] }
 0x23a   : > { %12165 = vst [vmem:[#allocation40_spill] sm:$0xff] %v8561_v55  ;;  %v1576_v12 = vmax.f32 %v1574_v50, %v1575_v54  ;;  %v8579_v17 = vsel %vm1903_vm7, %v1873_v43, %v8516_v2  ;;  %v889_v2 = vmax.f32 %v798_v7, 0.0  ;;  %v7744_v7 = vld [vmem:[%s11942_s5 + $0x164] sm:$0xf]  ;;  %v7235_v36 = vld [vmem:[%s11942_s5 + $0x10] sm:$0xf0] }
 0x23b   : > { %v800_v21 = vpop.f32.mrf.mxu0  ;;  %3255 = vmatpush.bf16.msrb.mxu2 %v7446_v15  ;;  %3087 = vmatpush.bf16.msrb.mxu1 %v7302_v32  ;;  %v7740_v15 = vld [vmem:[%s11942_s5 + $0x144] sm:$0xf] }
 0x23c   : > { %v1736_v22 = vpack.c.bf16 %v1576_v12, %v1576_v12  ;;  %v801_v56 = vadd.f32 %v8485_v62, %v800_v21  ;;  %v7708_v12 = vld [vmem:[%s11942_s5 + $0x44] sm:$0xf] }
 0x23d   : > { %v1291_v30 = vpop.f32.mrf.mxu2  ;;  %v7704_v32 = vld [vmem:[%s11942_s5 + $0x24] sm:$0xf] }
 0x23e   : > { %v1874_v41 = vunpack.c.l.b16 %v1736_v22  ;;  %v890_v49 = vmax.f32 %v801_v56, 0.0  ;;  %v8595_v48 = vpack.c.bf16 %v1291_v30, %v8551_v42  ;;  %v1586_v50 = vmax.f32 %v8551_v42, %v1291_v30  ;;  %v7395_v56 = vld [vmem:[%s11942_s5 + $0x150] sm:$0xf0] }
 0x23f   : > { %v1125_v61 = vpop.f32.mrf.mxu1  ;;  %3256 = vmatpush.bf16.msrb.mxu2 %v7430_v23  ;;  %3088 = vmatpush.bf16.msrb.mxu1 %v7286_v9  ;;  %v7398_v28 = vor.u32 %v7740_v15, %v7395_v56 }
 0x240   : > { %12166 = vst [vmem:[#allocation41_spill] sm:$0xff] %v8595_v48  ;;  %v1578_v43 = vmax.f32 %v1577_v35, %v1125_v61  ;;  %v928_v54 = vpack.c.bf16 %v890_v49, %v889_v2  ;;  %v8609_v42 = vsel %vm1903_vm7, %v1874_v41, %v8522_v24  ;;  %v7411_v35 = vld [vmem:[%s11942_s5 + $0x170] sm:$0xf0]  ;;  %v7736_v41 = vld [vmem:[%s11942_s5 + $0x124] sm:$0xf]  ;;  %v7254_v49 = vor.u32 %v7704_v32, %v7251_v40 }
 0x241   : > { %12167 = vst [vmem:[#allocation42_spill] sm:$0xff] %v8609_v42  ;;  %v7414_v11 = vor.u32 %v7744_v7, %v7411_v35  ;;  %v7267_v24 = vld [vmem:[%s11942_s5 + $0x50] sm:$0xf0]  ;;  %v7732_v7 = vld [vmem:[%s11942_s5 + $0x104] sm:$0xf]  ;;  %v7238_v35 = vor.u32 %v7700_v0, %v7235_v36 }
 0x242   : > { %1164 = vmatmul.bf16.gmra.mxu1 %v928_v54  ;;  %1333 = vmatmul.bf16.gmra.mxu2 %v928_v54  ;;  %v7270_v22 = vor.u32 %v7708_v12, %v7267_v24 }
 0x243   : > { %v803_v63 = vpop.f32.mrf.mxu0  ;;  %3257 = vmatpush.bf16.msrb.mxu2 %v7414_v11  ;;  %v7363_v11 = vld [vmem:[%s11942_s5 + $0x110] sm:$0xf0] }
 0x244   : > { %3089 = vmatpush.bf16.msrb.mxu1 %v7270_v22  ;;  %v7366_v56 = vor.u32 %v7732_v7, %v7363_v11 }
 0x245   : > { %v1294_v21 = vpop.f32.mrf.mxu2 }
 0x246   : > { %v1587_v25 = vmax.f32 %v1586_v50, %v1294_v21  ;;  %2948 = vmatmul.bf16.gmra.mxu0 %v8333_v19  ;;  %v7379_v50 = vld [vmem:[%s11942_s5 + $0x130] sm:$0xf0] }
 0x247   : > { %v1127_v44 = vpop.f32.mrf.mxu1  ;;  %3258 = vmatpush.bf16.msrb.mxu2 %v7398_v28  ;;  %v7382_v23 = vor.u32 %v7736_v41, %v7379_v50 }
 0x248   : > { %v8627_v2 = vpack.c.bf16 %v1127_v44, %v1125_v61  ;;  %v1579_v30 = vmax.f32 %v1578_v43, %v1127_v44  ;;  %v804_v61 = vadd.f32 %v8485_v62, %v803_v63  ;;  %3090 = vmatpush.bf16.msrb.mxu1 %v7254_v49 }
 0x24a   : > { %12168 = vst [vmem:[#allocation43_spill] sm:$0xff] %v8627_v2  ;;  %v891_v63 = vmax.f32 %v804_v61, 0.0 }
 0x24b   : > { %v806_v43 = vpop.f32.mrf.mxu0  ;;  %3259 = vmatpush.bf16.msrb.mxu2 %v7382_v23 }
 0x24c   : > { %v807_v54 = vadd.f32 %v8485_v62, %v806_v43  ;;  %3091 = vmatpush.bf16.msrb.mxu1 %v7238_v35 }
 0x24d   : > { %v1296_v9 = vpop.f32.mrf.mxu2 }
 0x24e   : > { %v892_v12 = vmax.f32 %v807_v54, 0.0  ;;  %v8655_v24 = vpack.c.bf16 %v1296_v9, %v1294_v21  ;;  %v1588_v15 = vmax.f32 %v1587_v25, %v1296_v9  ;;  %v1580_v21 = vrot.slane %v1579_v30, 4 }
 0x24f   : > { %v1130_v22 = vpop.f32.mrf.mxu1  ;;  %3260 = vmatpush.bf16.msrb.mxu2 %v7366_v56 }
 0x250   : > { %12169 = vst [vmem:[#allocation44_spill] sm:$0xff] %v8655_v24  ;;  %v929_v28 = vpack.c.bf16 %v892_v12, %v891_v63  ;;  %v1581_v7 = vmax.f32 %v1579_v30, %v1580_v21  ;;  %v1589_v63 = vrot.slane %v1588_v15, 4  ;;  %v821_v12 = vpop.f32.mrf.mxu3 }
 0x252   : > { %1169 = vmatmul.bf16.gmra.mxu1 %v929_v28  ;;  %1338 = vmatmul.bf16.gmra.mxu2 %v929_v28  ;;  %v1590_v28 = vmax.f32 %v1588_v15, %v1589_v63 }
 0x253   : > { %v809_v44 = vpop.f32.mrf.mxu0 }
 0x254   : > { %v810_v50 = vadd.f32 %v8485_v62, %v809_v44  ;;  %v1591_v30 = vrot.slane %v1590_v28, 2 }
 0x255   : > { %v1299_v32 = vpop.f32.mrf.mxu2 }
 0x256   : > { %2953 = vmatmul.bf16.gmra.mxu0 %v8347_v5  ;;  %v893_v43 = vmax.f32 %v810_v50, 0.0  ;;  %v1592_v15 = vmax.f32 %v1590_v28, %v1591_v30 }
 0x257   : > { %v1132_v40 = vpop.f32.mrf.mxu1 }
 0x258   : > { %v8658_v41 = vpack.c.bf16 %v1132_v40, %v1130_v22  ;;  %v1595_v49 = vmax.f32 %v1130_v22, %v1132_v40  ;;  %v1582_v22 = vrot.slane %v1581_v7, 2  ;;  %v1593_v55 = vrot.slane %v1592_v15, 1 }
 0x25a   : > { %12170 = vst [vmem:[#allocation45_spill] sm:$0xff] %v8658_v41  ;;  %v1583_v50 = vmax.f32 %v1581_v7, %v1582_v22  ;;  %v824_v41 = vpop.f32.mrf.mxu3 }
 0x25b   : > { %v812_v61 = vpop.f32.mrf.mxu0 }
 0x25c   : > { %v813_v25 = vadd.f32 %v8485_v62, %v812_v61 }
 0x25d   : > { %v1301_v23 = vpop.f32.mrf.mxu2 }
 0x25e   : > { %v894_v54 = vmax.f32 %v813_v25, 0.0  ;;  %v8662_v0 = vpack.c.bf16 %v1301_v23, %v1299_v32  ;;  %v1604_v36 = vmax.f32 %v1299_v32, %v1301_v23  ;;  %v1584_v23 = vrot.slane %v1583_v50, 1 }
 0x25f   : > { %v1135_v9 = vpop.f32.mrf.mxu1 }
 0x260   : > { %12171 = vst [vmem:[#allocation46_spill] sm:$0xff] %v8662_v0  ;;  %v1596_v35 = vmax.f32 %v1595_v49, %v1135_v9  ;;  %v930_v11 = vpack.c.bf16 %v894_v54, %v893_v43  ;;  %v1585_v22 = vmax.f32 %v1583_v50, %v1584_v23 }
 0x262   : > { %1174 = vmatmul.bf16.gmra.mxu1 %v930_v11  ;;  %1343 = vmatmul.bf16.gmra.mxu2 %v930_v11  ;;  %v1737_v28 = vpack.c.bf16 %v1585_v22, %v1585_v22 }
 0x263   : > { %v815_v56 = vpop.f32.mrf.mxu0 }
 0x264   : > { %v816_v49 = vadd.f32 %v8485_v62, %v815_v56  ;;  %v1875_v23 = vunpack.c.l.b16 %v1737_v28 }
 0x265   : > { %v1304_v44 = vpop.f32.mrf.mxu2 }
 0x266   : > { %v1605_v40 = vmax.f32 %v1604_v36, %v1304_v44  ;;  %2958 = vmatmul.bf16.gmra.mxu0 %v8361_v34  ;;  %v895_v63 = vmax.f32 %v816_v49, 0.0  ;;  %v1594_v49 = vmax.f32 %v1592_v15, %v1593_v55 }
 0x267   : > { %v1137_v61 = vpop.f32.mrf.mxu1 }
 0x268   : > { %v8665_v25 = vpack.c.bf16 %v1137_v61, %v1135_v9  ;;  %v1597_v32 = vmax.f32 %v1596_v35, %v1137_v61 }
 0x26a   : > { %12172 = vst [vmem:[#allocation47_spill] sm:$0xff] %v8665_v25  ;;  %v1598_v21 = vrot.slane %v1597_v32, 4 }
 0x26b   : > { %v818_v43 = vpop.f32.mrf.mxu0 }
 0x26c   : > { %v1599_v54 = vmax.f32 %v1597_v32, %v1598_v21  ;;  %v819_v11 = vadd.f32 %v8485_v62, %v818_v43  ;;  %v825_v43 = vadd.f32 %v8485_v62, %v824_v41 }
 0x26d   : > { %v1306_v36 = vpop.f32.mrf.mxu2 }
 0x26e   : > { %v1600_v2 = vrot.slane %v1599_v54, 2  ;;  %v896_v42 = vmax.f32 %v819_v11, 0.0  ;;  %v8669_v7 = vpack.c.bf16 %v1306_v36, %v1304_v44  ;;  %v1606_v9 = vmax.f32 %v1605_v40, %v1306_v36 }
 0x26f   : > { %v1140_v35 = vpop.f32.mrf.mxu1  ;;  %v898_v28 = vmax.f32 %v825_v43, 0.0 }
 0x270   : > { %12173 = vst [vmem:[#allocation48_spill] sm:$0xff] %v8669_v7  ;;  %v1601_v61 = vmax.f32 %v1599_v54, %v1600_v2  ;;  %v1607_v25 = vrot.slane %v1606_v9, 4  ;;  %v8671_v56 = vpack.c.bf16 %v896_v42, %v895_v63  ;;  %v827_v42 = vpop.f32.mrf.mxu3 }
 0x272   : > { %v1602_v20 = vrot.slane %v1601_v61, 1  ;;  %v1608_v32 = vmax.f32 %v1606_v9, %v1607_v25  ;;  %1179 = vmatmul.bf16.vlgmr.msrb.gmra.mxu3 %v8671_v56  ;;  %3092 = vmatmul.bf16.vlgmr.msrb.gmra.mxu1 %v8272_v37  ;;  %v822_v25 = vadd.f32 %v8485_v62, %v821_v12 }
 0x273   : > { %3261 = vmatmul.bf16.vlgmr.msrb.gmra.mxu2 %v8277_v47  ;;  %v8676_v30 = vpop.f32.mrf.mxu0 }
 0x274   : > { %12174 = vst [vmem:[#allocation49_spill] sm:$0xff] %v8676_v30  ;;  %v1603_v44 = vmax.f32 %v1601_v61, %v1602_v20  ;;  %v1609_v40 = vrot.slane %v1608_v32, 2  ;;  %v1738_v20 = vpack.c.bf16 %v1594_v49, %v1594_v49  ;;  %v897_v61 = vmax.f32 %v822_v25, 0.0 }
 0x275   : > { %v1309_v50 = vpop.f32.mrf.mxu2 }
 0x276   : > { %v1739_v2 = vpack.c.bf16 %v1603_v44, %v1603_v44  ;;  %v1610_v21 = vmax.f32 %v1608_v32, %v1609_v40  ;;  %2963 = vmatmul.bf16.gmra.mxu0 %v8393_v39  ;;  %v1876_v12 = vunpack.c.l.b16 %v1738_v20  ;;  %v8691_v49 = vpack.c.bf16 %v898_v28, %v897_v61 }
 0x277   : > { %v1142_v54 = vpop.f32.mrf.mxu1 }
 0x278   : > { %v1877_v11 = vunpack.c.l.b16 %v1739_v2  ;;  %v1611_v63 = vrot.slane %v1610_v21, 1  ;;  %v8681_v36 = vpack.c.bf16 %v1142_v54, %v1140_v35  ;;  %v1613_v9 = vmax.f32 %v1140_v35, %v1142_v54 }
 0x279   : > { %v828_v54 = vadd.f32 %v8485_v62, %v827_v42 }
 0x27a   : > { %12175 = vst [vmem:[#allocation50_spill] sm:$0xff] %v8681_v36  ;;  %v8684_v22 = vsel %vm1891_vm1, %v1877_v11, %v1875_v23  ;;  %v1612_v55 = vmax.f32 %v1610_v21, %v1611_v63  ;;  %v830_v23 = vpop.f32.mrf.mxu3 }
 0x27b   : > { %v8686_v15 = vpop.f32.mrf.mxu0  ;;  %v831_v11 = vadd.f32 %v8485_v62, %v830_v23 }
 0x27c   : > { %12176 = vst [vmem:[#allocation51_spill] sm:$0xff] %v8686_v15  ;;  %v1740_v32 = vpack.c.bf16 %v1612_v55, %v1612_v55 }
 0x27d   : > { %v1311_v44 = vpop.f32.mrf.mxu2  ;;  %v900_v28 = vmax.f32 %v831_v11, 0.0 }
 0x27e   : > { %v1878_v40 = vunpack.c.l.b16 %v1740_v32  ;;  %v8688_v41 = vpack.c.bf16 %v1311_v44, %v1309_v50  ;;  %v1622_v2 = vmax.f32 %v1309_v50, %v1311_v44  ;;  %v899_v32 = vmax.f32 %v828_v54, 0.0 }
 0x27f   : > { %v1145_v30 = vpop.f32.mrf.mxu1 }
 0x280   : > { %12177 = vst [vmem:[#allocation52_spill] sm:$0xff] %v8688_v41  ;;  %v1919_v37 = vsel %vm1891_vm1, %v1878_v40, %v1876_v12  ;;  %v1614_v35 = vmax.f32 %v1613_v9, %v1145_v30 }
 0x282   : > { %1184 = vmatmul.bf16.gmra.mxu3 %v8691_v49  ;;  %3097 = vmatmul.bf16.gmra.mxu1 %v8282_v59  ;;  %v833_v55 = vpop.f32.mrf.mxu3 }
 0x283   : > { %3266 = vmatmul.bf16.gmra.mxu2 %v8287_v6  ;;  %v8696_v21 = vpop.f32.mrf.mxu0  ;;  %v8707_v6 = vpack.c.bf16 %v900_v28, %v899_v32 }
 0x284   : > { %12178 = vst [vmem:[#allocation53_spill] sm:$0xff] %v8696_v21 }
 0x285   : > { %v1314_v25 = vpop.f32.mrf.mxu2 }
 0x286   : > { %v1623_v43 = vmax.f32 %v1622_v2, %v1314_v25  ;;  %2968 = vmatmul.bf16.gmra.mxu0 %v8435_v51 }
 0x287   : > { %v1147_v50 = vpop.f32.mrf.mxu1 }
 0x288   : > { %v8701_v63 = vpack.c.bf16 %v1147_v50, %v1145_v30  ;;  %v1615_v9 = vmax.f32 %v1614_v35, %v1147_v50 }
 0x28a   : > { %12179 = vst [vmem:[#allocation54_spill] sm:$0xff] %v8701_v63  ;;  %v1616_v20 = vrot.slane %v1615_v9, 4 }
 0x28b   : > { %v8703_v61 = vpop.f32.mrf.mxu0 }
 0x28c   : > { %12180 = vst [vmem:[#allocation55_spill] sm:$0xff] %v8703_v61  ;;  %v1617_v44 = vmax.f32 %v1615_v9, %v1616_v20  ;;  %v834_v20 = vadd.f32 %v8485_v62, %v833_v55 }
 0x28d   : > { %v1316_v12 = vpop.f32.mrf.mxu2 }
 0x28e   : > { %v1618_v40 = vrot.slane %v1617_v44, 2  ;;  %v8705_v2 = vpack.c.bf16 %v1316_v12, %v1314_v25  ;;  %v1624_v21 = vmax.f32 %v1623_v43, %v1316_v12  ;;  %v836_v25 = vpop.f32.mrf.mxu3 }
 0x28f   : > { %v1150_v15 = vpop.f32.mrf.mxu1 }
 0x290   : > { %12181 = vst [vmem:[#allocation56_spill] sm:$0xff] %v8705_v2  ;;  %v1619_v59 = vmax.f32 %v1617_v44, %v1618_v40  ;;  %v1625_v42 = vrot.slane %v1624_v21, 4 }
 0x292   : > { %v1620_v30 = vrot.slane %v1619_v59, 1  ;;  %v1626_v23 = vmax.f32 %v1624_v21, %v1625_v42  ;;  %1189 = vmatmul.bf16.gmra.mxu3 %v8707_v6  ;;  %3102 = vmatmul.bf16.gmra.mxu1 %v8292_v14  ;;  %v837_v21 = vadd.f32 %v8485_v62, %v836_v25 }
 0x293   : > { %3271 = vmatmul.bf16.gmra.mxu2 %v8297_v26  ;;  %v8712_v35 = vpop.f32.mrf.mxu0 }
 0x294   : > { %12182 = vst [vmem:[#allocation57_spill] sm:$0xff] %v8712_v35  ;;  %v1621_v50 = vmax.f32 %v1619_v59, %v1620_v30  ;;  %v1627_v54 = vrot.slane %v1626_v23, 2 }
 0x295   : > { %v1319_v11 = vpop.f32.mrf.mxu2 }
 0x296   : > { %v1741_v43 = vpack.c.bf16 %v1621_v50, %v1621_v50  ;;  %v1628_v9 = vmax.f32 %v1626_v23, %v1627_v54  ;;  %2973 = vmatmul.bf16.gmra.mxu0 %v8463_v16  ;;  %v901_v50 = vmax.f32 %v834_v20, 0.0  ;;  %v902_v54 = vmax.f32 %v837_v21, 0.0 }
 0x297   : > { %v1152_v32 = vpop.f32.mrf.mxu1 }
 0x298   : > { %v1879_v28 = vunpack.c.l.b16 %v1741_v43  ;;  %v1629_v44 = vrot.slane %v1628_v9, 1  ;;  %v8717_v12 = vpack.c.bf16 %v1152_v32, %v1150_v15  ;;  %v1631_v40 = vmax.f32 %v1150_v15, %v1152_v32 }
 0x299   : > { %v8726_v26 = vpack.c.bf16 %v902_v54, %v901_v50 }
 0x29a   : > { %12183 = vst [vmem:[#allocation58_spill] sm:$0xff] %v8717_v12  ;;  %v1913_v59 = vsel %vm1893_vm2, %v1879_v28, %v8684_v22  ;;  %v1630_v42 = vmax.f32 %v1628_v9, %v1629_v44 }
 0x29b   : > { %v8721_v30 = vpop.f32.mrf.mxu0 }
 0x29c   : > { %12184 = vst [vmem:[#allocation59_spill] sm:$0xff] %v8721_v30  ;;  %v1742_v23 = vpack.c.bf16 %v1630_v42, %v1630_v42 }
 0x29d   : > { %v1321_v35 = vpop.f32.mrf.mxu2 }
 0x29e   : > { %v1880_v61 = vunpack.c.l.b16 %v1742_v23  ;;  %v8723_v55 = vpack.c.bf16 %v1321_v35, %v1319_v11  ;;  %v1640_v62 = vmax.f32 %v1319_v11, %v1321_v35 }
 0x29f   : > { %v1155_v25 = vpop.f32.mrf.mxu1 }
 0x2a0   : > { %12185 = vst [vmem:[#allocation60_spill] sm:$0xff] %v8723_v55  ;;  %v1920_v43 = vsel %vm1893_vm2, %v1880_v61, %v1919_v37  ;;  %v1632_v14 = vmax.f32 %v1631_v40, %v1155_v25 }
 0x2a2   : > { %1194 = vmatmul.bf16.gmra.mxu3 %v8726_v26  ;;  %3107 = vmatmul.bf16.gmra.mxu1 %v8302_v45 }
 0x2a3   : > { %3276 = vmatmul.bf16.gmra.mxu2 %v8307_v1  ;;  %v8731_v22 = vpop.f32.mrf.mxu0 }
 0x2a4   : > { %12186 = vst [vmem:[#allocation61_spill] sm:$0xff] %v8731_v22 }
 0x2a5   : > { %v1324_v15 = vpop.f32.mrf.mxu2 }
 0x2a6   : > { %v1641_v9 = vmax.f32 %v1640_v62, %v1324_v15  ;;  %2978 = vmatmul.bf16.gmra.mxu0 %v8488_v29 }
 0x2a7   : > { %v1157_v20 = vpop.f32.mrf.mxu1 }
 0x2a8   : > { %v8734_v35 = vpack.c.bf16 %v1157_v20, %v1155_v25  ;;  %v1633_v11 = vmax.f32 %v1632_v14, %v1157_v20 }
 0x2aa   : > { %12187 = vst [vmem:[#allocation62_spill] sm:$0xff] %v8734_v35  ;;  %v1634_v37 = vrot.slane %v1633_v11, 4 }
 0x2ab   : > { %v8736_v61 = vpop.f32.mrf.mxu0 }
 0x2ac   : > { %12188 = vst [vmem:[#allocation63_spill] sm:$0xff] %v8736_v61  ;;  %v1635_v21 = vmax.f32 %v1633_v11, %v1634_v37 }
 0x2ad   : > { %v1326_v32 = vpop.f32.mrf.mxu2 }
 0x2ae   : > { %v1636_v28 = vrot.slane %v1635_v21, 2  ;;  %v8738_v44 = vpack.c.bf16 %v1326_v32, %v1324_v15  ;;  %v1642_v40 = vmax.f32 %v1641_v9, %v1326_v32 }
 0x2af   : > { %v8740_v42 = vpop.f32.mrf.mxu1 }
 0x2b0   : > { %12189 = vst [vmem:[#allocation64_spill] sm:$0xff] %v8738_v44  ;;  %v1637_v50 = vmax.f32 %v1635_v21, %v1636_v28  ;;  %v1643_v23 = vrot.slane %v1642_v40, 4 }
 0x2b2   : > { %v1638_v54 = vrot.slane %v1637_v50, 1  ;;  %v1644_v62 = vmax.f32 %v1642_v40, %v1643_v23  ;;  %1348 = vmatmul.bf16.vlgmr.msra.gmra.mxu3 %v8671_v56  ;;  %3112 = vmatmul.bf16.gmra.mxu1 %v8312_v31 }
 0x2b3   : > { %3281 = vmatmul.bf16.gmra.mxu2 %v8320_v52  ;;  %v8745_v14 = vpop.f32.mrf.mxu0 }
 0x2b4   : > { %12190 = vst [vmem:[#allocation65_spill] sm:$0xff] %v8745_v14  ;;  %v1639_v25 = vmax.f32 %v1637_v50, %v1638_v54  ;;  %v1645_v20 = vrot.slane %v1644_v62, 2 }
 0x2b5   : > { %v1329_v11 = vpop.f32.mrf.mxu2 }
 0x2b6   : > { %v1743_v15 = vpack.c.bf16 %v1639_v25, %v1639_v25  ;;  %v1646_v37 = vmax.f32 %v1644_v62, %v1645_v20  ;;  %2983 = vmatmul.bf16.gmra.mxu0 %v8500_v58 }
 0x2b7   : > { %v8748_v9 = vpop.f32.mrf.mxu1 }
 0x2b8   : > { %v1881_v21 = vunpack.c.l.b16 %v1743_v15  ;;  %v1647_v32 = vrot.slane %v1646_v37, 1  ;;  %v8752_v56 = vpack.c.bf16 %v8748_v9, %v8740_v42 }
 0x2ba   : > { %12191 = vst [vmem:[#allocation66_spill] sm:$0xff] %v8752_v56  ;;  %v8755_v28 = vsel %vm1895_vm3, %v1881_v21, %v1913_v59  ;;  %v1648_v40 = vmax.f32 %v1646_v37, %v1647_v32 }
 0x2bb   : > { %v8757_v23 = vpop.f32.mrf.mxu0 }
 0x2bc   : > { %12192 = vst [vmem:[#allocation67_spill] sm:$0xff] %v8757_v23  ;;  %v1744_v50 = vpack.c.bf16 %v1648_v40, %v1648_v40 }
 0x2bd   : > { %v1331_v54 = vpop.f32.mrf.mxu2 }
 0x2be   : > { %v1882_v25 = vunpack.c.l.b16 %v1744_v50  ;;  %v8759_v62 = vpack.c.bf16 %v1331_v54, %v1329_v11  ;;  %v1658_v20 = vmax.f32 %v1329_v11, %v1331_v54 }
 0x2bf   : > { %v8761_v14 = vpop.f32.mrf.mxu1 }
 0x2c0   : > { %12193 = vst [vmem:[#allocation68_spill] sm:$0xff] %v8759_v62  ;;  %v1921_v15 = vsel %vm1895_vm3, %v1882_v25, %v1920_v43 }
 0x2c2   : > { %1353 = vmatmul.bf16.gmra.mxu3 %v8691_v49  ;;  %3117 = vmatmul.bf16.gmra.mxu1 %v8328_v4 }
 0x2c3   : > { %3286 = vmatmul.bf16.gmra.mxu2 %v8333_v19  ;;  %v8767_v59 = vpop.f32.mrf.mxu0 }
 0x2c4   : > { %12194 = vst [vmem:[#allocation69_spill] sm:$0xff] %v8767_v59 }
 0x2c5   : > { %v1334_v37 = vpop.f32.mrf.mxu2 }
 0x2c6   : > { %v1659_v21 = vmax.f32 %v1658_v20, %v1334_v37  ;;  %2988 = vmatmul.bf16.gmra.mxu0 %v8509_v27 }
 0x2c7   : > { %v8770_v32 = vpop.f32.mrf.mxu1 }
 0x2c8   : > { %v8774_v11 = vpack.c.bf16 %v8770_v32, %v8761_v14 }
 0x2ca   : > { %12195 = vst [vmem:[#allocation70_spill] sm:$0xff] %v8774_v11 }
 0x2cb   : > { %v8776_v40 = vpop.f32.mrf.mxu0 }
 0x2cc   : > { %12196 = vst [vmem:[#allocation71_spill] sm:$0xff] %v8776_v40 }
 0x2cd   : > { %v1336_v43 = vpop.f32.mrf.mxu2 }
 0x2ce   : > { %v8778_v49 = vpack.c.bf16 %v1336_v43, %v1334_v37  ;;  %v1660_v50 = vmax.f32 %v1659_v21, %v1336_v43 }
 0x2cf   : > { %v8780_v54 = vpop.f32.mrf.mxu1 }
 0x2d0   : > { %12197 = vst [vmem:[#allocation72_spill] sm:$0xff] %v8778_v49  ;;  %v1661_v25 = vrot.slane %v1660_v50, 4 }
 0x2d2   : > { %v1662_v59 = vmax.f32 %v1660_v50, %v1661_v25  ;;  %1358 = vmatmul.bf16.gmra.mxu3 %v8707_v6  ;;  %3122 = vmatmul.bf16.gmra.mxu1 %v8338_v46 }
 0x2d3   : > { %3291 = vmatmul.bf16.gmra.mxu2 %v8347_v5  ;;  %v8785_v20 = vpop.f32.mrf.mxu0 }
 0x2d4   : > { %12198 = vst [vmem:[#allocation73_spill] sm:$0xff] %v8785_v20  ;;  %v1663_v23 = vrot.slane %v1662_v59, 2 }
 0x2d5   : > { %v1339_v61 = vpop.f32.mrf.mxu2 }
 0x2d6   : > { %v1664_v22 = vmax.f32 %v1662_v59, %v1663_v23  ;;  %2993 = vmatmul.bf16.gmra.mxu0 %v8519_v38 }
 0x2d7   : > { %v8788_v37 = vpop.f32.mrf.mxu1 }
 0x2d8   : > { %v1665_v21 = vrot.slane %v1664_v22, 1  ;;  %v8792_v43 = vpack.c.bf16 %v8788_v37, %v8780_v54 }
 0x2da   : > { %12199 = vst [vmem:[#allocation74_spill] sm:$0xff] %v8792_v43  ;;  %v1666_v50 = vmax.f32 %v1664_v22, %v1665_v21 }
 0x2db   : > { %v8794_v6 = vpop.f32.mrf.mxu0 }
 0x2dc   : > { %12200 = vst [vmem:[#allocation75_spill] sm:$0xff] %v8794_v6  ;;  %v1746_v25 = vpack.c.bf16 %v1666_v50, %v1666_v50 }
 0x2dd   : > { %v1341_v40 = vpop.f32.mrf.mxu2 }
 0x2de   : > { %v1884_v30 = vunpack.c.l.b16 %v1746_v25  ;;  %v8796_v46 = vpack.c.bf16 %v1341_v40, %v1339_v61  ;;  %v1676_v20 = vmax.f32 %v1339_v61, %v1341_v40 }
 0x2df   : > { %v8798_v4 = vpop.f32.mrf.mxu1 }
 0x2e0   : > { %12201 = vst [vmem:[#allocation76_spill] sm:$0xff] %v8796_v46  ;;  %v1922_v23 = vsel %vm1897_vm4, %v1884_v30, %v1921_v15 }
 0x2e2   : > { %1363 = vmatmul.bf16.gmra.mxu3 %v8726_v26  ;;  %3127 = vmatmul.bf16.gmra.mxu1 %v8356_v18 }
 0x2e3   : > { %3296 = vmatmul.bf16.gmra.mxu2 %v8361_v34  ;;  %v8804_v59 = vpop.f32.mrf.mxu0 }
 0x2e4   : > { %12202 = vst [vmem:[#allocation77_spill] sm:$0xff] %v8804_v59 }
 0x2e5   : > { %v1344_v22 = vpop.f32.mrf.mxu2 }
 0x2e6   : > { %v1677_v21 = vmax.f32 %v1676_v20, %v1344_v22  ;;  %2998 = vmatmul.bf16.gmra.mxu0 %v8529_v57 }
 0x2e7   : > { %v8807_v50 = vpop.f32.mrf.mxu1 }
 0x2e8   : > { %v8811_v61 = vpack.c.bf16 %v8807_v50, %v8798_v4 }
 0x2ea   : > { %12203 = vst [vmem:[#allocation78_spill] sm:$0xff] %v8811_v61 }
 0x2eb   : > { %v8813_v40 = vpop.f32.mrf.mxu0 }
 0x2ec   : > { %12204 = vst [vmem:[#allocation79_spill] sm:$0xff] %v8813_v40 }
 0x2ed   : > { %v1346_v30 = vpop.f32.mrf.mxu2 }
 0x2ee   : > { %v8815_v26 = vpack.c.bf16 %v1346_v30, %v1344_v22  ;;  %v1678_v15 = vmax.f32 %v1677_v21, %v1346_v30 }
 0x2ef   : > { %v3093_v25 = vpop.f32.mrf.mxu1 }
 0x2f0   : > { %12205 = vst [vmem:[#allocation80_spill] sm:$0xff] %v8815_v26  ;;  %v1679_v6 = vrot.slane %v1678_v15, 4 }
 0x2f2   : > { %v1680_v18 = vmax.f32 %v1678_v15, %v1679_v6  ;;  %3132 = vmatmul.bf16.gmra.mxu1 %v8372_v10 }
 0x2f3   : > { %3301 = vmatmul.bf16.gmra.mxu2 %v8393_v39  ;;  %v8819_v20 = vpop.f32.mrf.mxu0 }
 0x2f4   : > { %12206 = vst [vmem:[#allocation81_spill] sm:$0xff] %v8819_v20  ;;  %v1681_v59 = vrot.slane %v1680_v18, 2 }
 0x2f5   : > { %v8821_v31 = vpop.f32.mrf.mxu3 }
 0x2f6   : > { %v1682_v34 = vmax.f32 %v1680_v18, %v1681_v59  ;;  %v3262_v45 = vpop.f32.mrf.mxu2  ;;  %3003 = vmatmul.bf16.gmra.mxu0 %v8595_v48 }
 0x2f7   : > { %v8824_v40 = vadd.f32 %v3262_v45, %v3093_v25  ;;  %v3095_v22 = vpop.f32.mrf.mxu1  ;;  %v7089_v45 = vld [vmem:[%s11941_s4 + $0xe0] sm:$0xf] }
 0x2f8   : > { %v1683_v21 = vrot.slane %v1682_v34, 1 }
 0x2f9   : > { %12207 = vst [vmem:[#allocation82_spill] sm:$0xff] %v8824_v40 }
 0x2fa   : > { %v1684_v30 = vmax.f32 %v1682_v34, %v1683_v21  ;;  %v7666_v34 = vld [vmem:[%s11941_s4 + $0xec] sm:$0xf0] }
 0x2fb   : > { %v8826_v5 = vpop.f32.mrf.mxu0 }
 0x2fc   : > { %12208 = vst [vmem:[#allocation83_spill] sm:$0xff] %v8826_v5  ;;  %v1748_v6 = vpack.c.bf16 %v1684_v30, %v1684_v30 }
 0x2fd   : > { %v8828_v15 = vpop.f32.mrf.mxu3 }
 0x2fe   : > { %v1886_v10 = vunpack.c.l.b16 %v1748_v6  ;;  %v3264_v39 = vpop.f32.mrf.mxu2 }
 0x2ff   : > { %v8830_v20 = vadd.f32 %v3264_v39, %v3095_v22  ;;  %v3098_v19 = vpop.f32.mrf.mxu1  ;;  %v7090_v39 = vor.u32 %v7666_v34, %v7089_v45  ;;  %v7662_v22 = vld [vmem:[%s11941_s4 + $0xcc] sm:$0xf0]  ;;  %v7057_v45 = vld [vmem:[%s11941_s4 + $0xa0] sm:$0xf] }
 0x300   : > { %v8833_v18 = vsel %vm1899_vm5, %v1886_v10, %v1922_v23  ;;  %v7073_v23 = vld [vmem:[%s11941_s4 + $0xc0] sm:$0xf]  ;;  %v7658_v34 = vld [vmem:[%s11941_s4 + $0xac] sm:$0xf0] }
 0x301   : > { %12209 = vst [vmem:[#allocation84_spill] sm:$0xff] %v8830_v20  ;;  %2250 = vmatpush.bf16.msrb.mxu3 %v7090_v39  ;;  %v7074_v6 = vor.u32 %v7662_v22, %v7073_v23 }
 0x302   : > { %3137 = vmatmul.bf16.gmra.mxu1 %v8415_v8 }
 0x303   : > { %3306 = vmatmul.bf16.gmra.mxu2 %v8435_v51  ;;  %v8843_v59 = vpop.f32.mrf.mxu0 }
 0x304   : > { %12210 = vst [vmem:[#allocation85_spill] sm:$0xff] %v8843_v59  ;;  %v7058_v59 = vor.u32 %v7658_v34, %v7057_v45  ;;  %v7650_v45 = vld [vmem:[%s11941_s4 + $0x6c] sm:$0xf0] }
 0x305   : > { %v8845_v25 = vpop.f32.mrf.mxu3  ;;  %2251 = vmatpush.bf16.msrb.mxu3 %v7074_v6 }
 0x306   : > { %v3267_v10 = vpop.f32.mrf.mxu2  ;;  %3008 = vmatmul.bf16.gmra.mxu0 %v8655_v24 }
 0x307   : > { %v8854_v21 = vadd.f32 %v3267_v10, %v3098_v19  ;;  %v3100_v30 = vpop.f32.mrf.mxu1  ;;  %v7041_v19 = vld [vmem:[%s11941_s4 + $0x80] sm:$0xf]  ;;  %v7654_v10 = vld [vmem:[%s11941_s4 + $0x8c] sm:$0xf0] }
 0x308   : > { %v7042_v6 = vor.u32 %v7654_v10, %v7041_v19  ;;  %v1667_v19 = vmax.f32 %v8780_v54, %v8788_v37 }
 0x309   : > { %12211 = vst [vmem:[#allocation86_spill] sm:$0xff] %v8854_v21  ;;  %2252 = vmatpush.bf16.msrb.mxu3 %v7058_v59  ;;  %v7025_v59 = vld [vmem:[%s11941_s4 + $0x60] sm:$0xf] }
 0x30a   : > { %v1668_v37 = vmax.f32 %v1667_v19, %v8798_v4 }
 0x30b   : > { %v8862_v39 = vpop.f32.mrf.mxu0 }
 0x30c   : > { %12212 = vst [vmem:[#allocation87_spill] sm:$0xff] %v8862_v39  ;;  %v7026_v39 = vor.u32 %v7650_v45, %v7025_v59  ;;  %v7646_v59 = vld [vmem:[%s11941_s4 + $0x4c] sm:$0xf0] }
 0x30d   : > { %v8864_v5 = vpop.f32.mrf.mxu3  ;;  %2253 = vmatpush.bf16.msrb.mxu3 %v7042_v6  ;;  %v7009_v6 = vld [vmem:[%s11941_s4 + $0x40] sm:$0xf] }
 0x30e   : > { %v3269_v8 = vpop.f32.mrf.mxu2  ;;  %v7010_v54 = vor.u32 %v7646_v59, %v7009_v6 }
 0x30f   : > { %v8872_v23 = vadd.f32 %v3269_v8, %v3100_v30  ;;  %v3103_v22 = vpop.f32.mrf.mxu1  ;;  %v1649_v8 = vmax.f32 %v8740_v42, %v8748_v9  ;;  %v1685_v42 = vmax.f32 %v8821_v31, %v8828_v15 }
 0x311   : > { %12213 = vst [vmem:[#allocation88_spill] sm:$0xff] %v8872_v23  ;;  %2254 = vmatpush.bf16.msrb.mxu3 %v7026_v39  ;;  %v1650_v45 = vmax.f32 %v1649_v8, %v8761_v14  ;;  %v1669_v23 = vmax.f32 %v1668_v37, %v8807_v50  ;;  %v6993_v14 = vld [vmem:[%s11941_s4 + $0x20] sm:$0xf] }
 0x312   : > { %3142 = vmatmul.bf16.gmra.mxu1 %v8451_v13  ;;  %v1686_v13 = vmax.f32 %v1685_v42, %v8845_v25  ;;  %v6977_v50 = vld [vmem:[%s11941_s4] sm:$0xf] }
 0x313   : > { %3311 = vmatmul.bf16.gmra.mxu2 %v8463_v16  ;;  %v8882_v34 = vpop.f32.mrf.mxu0  ;;  %v1670_v6 = vrot.slane %v1669_v23, 4 }
 0x314   : > { %12214 = vst [vmem:[#allocation89_spill] sm:$0xff] %v8882_v34  ;;  %v1651_v34 = vmax.f32 %v1650_v45, %v8770_v32  ;;  %v1687_v8 = vmax.f32 %v1686_v13, %v8864_v5  ;;  %v7638_v45 = vld [vmem:[%s11941_s4 + $0xc] sm:$0xf0] }
 0x315   : > { %v8886_v30 = vpop.f32.mrf.mxu3  ;;  %2255 = vmatpush.bf16.msrb.mxu3 %v7010_v54  ;;  %v6978_v37 = vor.u32 %v7638_v45, %v6977_v50 }
 0x316   : > { %v3272_v10 = vpop.f32.mrf.mxu2  ;;  %3013 = vmatmul.bf16.gmra.mxu0 %v8662_v0  ;;  %v1652_v19 = vrot.slane %v1651_v34, 4  ;;  %v1688_v42 = vrot.slane %v1687_v8, 4 }
 0x317   : > { %v8900_v9 = vadd.f32 %v3272_v10, %v3103_v22  ;;  %v3105_v39 = vpop.f32.mrf.mxu1  ;;  %v7642_v22 = vld [vmem:[%s11941_s4 + $0x2c] sm:$0xf0] }
 0x318   : > { %v6994_v4 = vor.u32 %v7642_v22, %v6993_v14  ;;  %v1653_v14 = vmax.f32 %v1651_v34, %v1652_v19  ;;  %v1671_v22 = vmax.f32 %v1669_v23, %v1670_v6  ;;  %v7217_v23 = vld [vmem:[%s11941_s4 + $0x1e0] sm:$0xf] }
 0x319   : > { %12215 = vst [vmem:[#allocation90_spill] sm:$0xff] %v8900_v9 }
 0x31a   : > { %2256 = vmatpush.bf16.msrb.mxu3 %v6994_v4  ;;  %v1689_v4 = vmax.f32 %v1687_v8, %v1688_v42  ;;  %v1654_v9 = vrot.slane %v1653_v14, 2  ;;  %v1672_v20 = vrot.slane %v1671_v22, 2  ;;  %v7698_v8 = vld [vmem:[%s11941_s4 + $0x1ec] sm:$0xf0] }
 0x31b   : > { %v8913_v10 = vpop.f32.mrf.mxu0  ;;  %v7218_v19 = vor.u32 %v7698_v8, %v7217_v23 }
 0x31c   : > { %12216 = vst [vmem:[#allocation91_spill] sm:$0xff] %v8913_v10  ;;  %v1655_v6 = vmax.f32 %v1653_v14, %v1654_v9  ;;  %v1673_v50 = vmax.f32 %v1671_v22, %v1672_v20 }
 0x31d   : > { %v8915_v32 = vpop.f32.mrf.mxu3 }
 0x31e   : > { %v3274_v59 = vpop.f32.mrf.mxu2  ;;  %2257 = vmatpush.bf16.msrb.mxu3 %v6978_v37  ;;  %v1703_v45 = vmax.f32 %v8886_v30, %v8915_v32  ;;  %v1656_v9 = vrot.slane %v1655_v6, 1  ;;  %v1674_v14 = vrot.slane %v1673_v50, 1 }
 0x31f   : > { %v8923_v54 = vadd.f32 %v3274_v59, %v3105_v39  ;;  %v3108_v13 = vpop.f32.mrf.mxu1  ;;  %v1690_v39 = vrot.slane %v1689_v4, 2 }
 0x321   : > { %12217 = vst [vmem:[#allocation92_spill] sm:$0xff] %v8923_v54  ;;  %v1691_v42 = vmax.f32 %v1689_v4, %v1690_v39 }
 0x322   : > { %3147 = vmatmul.bf16.gmra.mxu1 %v8477_v53  ;;  %2264 = vmatpush.bf16.msra.mxu3 %v7218_v19  ;;  %v1657_v53 = vmax.f32 %v1655_v6, %v1656_v9 }
 0x323   : > { %3316 = vmatmul.bf16.gmra.mxu2 %v8488_v29  ;;  %v8927_v10 = vpop.f32.mrf.mxu0  ;;  %v1692_v39 = vrot.slane %v1691_v42, 1 }
 0x324   : > { %12218 = vst [vmem:[#allocation93_spill] sm:$0xff] %v8927_v10 }
 0x325   : > { %v8929_v21 = vpop.f32.mrf.mxu3 }
 0x326   : > { %v3277_v40 = vpop.f32.mrf.mxu2  ;;  %3018 = vmatmul.bf16.gmra.mxu0 %v8669_v7  ;;  %v1704_v10 = vmax.f32 %v1703_v45, %v8929_v21  ;;  %v7690_v45 = vld [vmem:[%s11941_s4 + $0x1ac] sm:$0xf0] }
 0x327   : > { %v8932_v59 = vadd.f32 %v3277_v40, %v3108_v13  ;;  %v3110_v34 = vpop.f32.mrf.mxu1  ;;  %v7201_v40 = vld [vmem:[%s11941_s4 + $0x1c0] sm:$0xf]  ;;  %v7694_v13 = vld [vmem:[%s11941_s4 + $0x1cc] sm:$0xf0] }
 0x328   : > { %v7202_v23 = vor.u32 %v7694_v13, %v7201_v40 }
 0x329   : > { %12219 = vst [vmem:[#allocation94_spill] sm:$0xff] %v8932_v59  ;;  %v1675_v59 = vmax.f32 %v1673_v50, %v1674_v14  ;;  %v1745_v50 = vpack.c.bf16 %v1657_v53, %v1657_v53  ;;  %v7682_v53 = vld [vmem:[%s11941_s4 + $0x16c] sm:$0xf0] }
 0x32a   : > { %2265 = vmatpush.bf16.msra.mxu3 %v7202_v23  ;;  %v7169_v23 = vld [vmem:[%s11941_s4 + $0x180] sm:$0xf] }
 0x32b   : > { %v8942_v37 = vpop.f32.mrf.mxu0  ;;  %v1747_v14 = vpack.c.bf16 %v1675_v59, %v1675_v59  ;;  %v1883_v59 = vunpack.c.l.b16 %v1745_v50 }
 0x32c   : > { %12220 = vst [vmem:[#allocation95_spill] sm:$0xff] %v8942_v37  ;;  %v7185_v37 = vld [vmem:[%s11941_s4 + $0x1a0] sm:$0xf] }
 0x32d   : > { %v8951_v20 = vpop.f32.mrf.mxu3  ;;  %v7186_v13 = vor.u32 %v7690_v45, %v7185_v37 }
 0x32e   : > { %v1705_v22 = vmax.f32 %v1704_v10, %v8951_v20  ;;  %v3279_v4 = vpop.f32.mrf.mxu2  ;;  %v1693_v10 = vmax.f32 %v1691_v42, %v1692_v39 }
 0x32f   : > { %v8954_v8 = vadd.f32 %v3279_v4, %v3110_v34  ;;  %v3113_v19 = vpop.f32.mrf.mxu1  ;;  %2266 = vmatpush.bf16.msra.mxu3 %v7186_v13  ;;  %v7686_v4 = vld [vmem:[%s11941_s4 + $0x18c] sm:$0xf0]  ;;  %v7153_v13 = vld [vmem:[%s11941_s4 + $0x160] sm:$0xf] }
 0x330   : > { %v1706_v40 = vrot.slane %v1705_v22, 4  ;;  %v7170_v6 = vor.u32 %v7686_v4, %v7169_v23  ;;  %v1749_v39 = vpack.c.bf16 %v1693_v10, %v1693_v10  ;;  %v7154_v4 = vor.u32 %v7682_v53, %v7153_v13  ;;  %v7678_v10 = vld [vmem:[%s11941_s4 + $0x14c] sm:$0xf0] }
 0x331   : > { %v1915_v13 = vsel %vm1897_vm4, %v1883_v59, %v8755_v28  ;;  %v7674_v28 = vld [vmem:[%s11941_s4 + $0x12c] sm:$0xf0] }
 0x332   : > { %v1707_v54 = vmax.f32 %v1705_v22, %v1706_v40  ;;  %3152 = vmatmul.bf16.gmra.mxu1 %v8494_v33 }
 0x333   : > { %3321 = vmatmul.bf16.gmra.mxu2 %v8500_v58  ;;  %v8964_v34 = vpop.f32.mrf.mxu0  ;;  %2267 = vmatpush.bf16.msra.mxu3 %v7170_v6 }
 0x334   : > { %12221 = vst [vmem:[#allocation96_spill] sm:$0xff] %v8964_v34  ;;  %v1708_v37 = vrot.slane %v1707_v54, 2  ;;  %v1887_v34 = vunpack.c.l.b16 %v1749_v39 }
 0x335   : > { %v8972_v9 = vpop.f32.mrf.mxu3 }
 0x336   : > { %v1709_v22 = vmax.f32 %v1707_v54, %v1708_v37  ;;  %v3282_v42 = vpop.f32.mrf.mxu2  ;;  %3023 = vmatmul.bf16.gmra.mxu0 %v8688_v41  ;;  %v1885_v54 = vunpack.c.l.b16 %v1747_v14 }
 0x337   : > { %v8975_v45 = vadd.f32 %v3282_v42, %v3113_v19  ;;  %v3115_v40 = vpop.f32.mrf.mxu1  ;;  %2268 = vmatpush.bf16.msra.mxu3 %v7154_v4  ;;  %v7137_v19 = vld [vmem:[%s11941_s4 + $0x140] sm:$0xf] }
 0x338   : > { %v1710_v23 = vrot.slane %v1709_v22, 1  ;;  %v7138_v33 = vor.u32 %v7678_v10, %v7137_v19  ;;  %v1916_v39 = vsel %vm1899_vm5, %v1885_v54, %v1915_v13 }
 0x339   : > { %v1917_v4 = vsel %vm1901_vm6, %v1887_v34, %v1916_v39  ;;  %v7105_v34 = vld [vmem:[%s11941_s4 + $0x100] sm:$0xf] }
 0x33a   : > { %v1711_v37 = vmax.f32 %v1709_v22, %v1710_v23 }
 0x33b   : > { %v8983_v6 = vpop.f32.mrf.mxu0  ;;  %2269 = vmatpush.bf16.msra.mxu3 %v7138_v33 }
 0x33c   : > { %12222 = vst [vmem:[#allocation97_spill] sm:$0xff] %v8983_v6  ;;  %v1751_v42 = vpack.c.bf16 %v1711_v37, %v1711_v37  ;;  %v7121_v37 = vld [vmem:[%s11941_s4 + $0x120] sm:$0xf] }
 0x33d   : > { %v8993_v50 = vpop.f32.mrf.mxu3  ;;  %v7122_v19 = vor.u32 %v7674_v28, %v7121_v37  ;;  %v7660_v37 = vld [vmem:[%s11941_s4 + $0xc4] sm:$0xf]  ;;  %v7075_v28 = vld [vmem:[%s11941_s4 + $0xd0] sm:$0xf0] }
 0x33e   : > { %v1889_v14 = vunpack.c.l.b16 %v1751_v42  ;;  %v3284_v22 = vpop.f32.mrf.mxu2  ;;  %v7091_v42 = vld [vmem:[%s11941_s4 + $0xf0] sm:$0xf0] }
 0x33f   : > { %v8996_v53 = vadd.f32 %v3284_v22, %v3115_v40  ;;  %v3118_v23 = vpop.f32.mrf.mxu1  ;;  %2270 = vmatpush.bf16.msra.mxu3 %v7122_v19  ;;  %v7670_v40 = vld [vmem:[%s11941_s4 + $0x10c] sm:$0xf0] }
 0x340   : > { %v1918_v59 = vsel %vm1903_vm7, %v1889_v14, %v1917_v4  ;;  %v7106_v54 = vor.u32 %v7670_v40, %v7105_v34  ;;  %v7656_v34 = vld [vmem:[%s11941_s4 + $0xa4] sm:$0xf] }
 0x341   : > { %12223 = vst [vmem:[#allocation98_spill] sm:$0xff] %v8996_v53  ;;  %v9007_v10 = vpack.c.b16 %v1918_v59, %v8579_v17  ;;  %v7664_v17 = vld [vmem:[%s11941_s4 + $0xe4] sm:$0xf]  ;;  %v7078_v59 = vor.u32 %v7660_v37, %v7075_v28  ;;  %v7043_v37 = vld [vmem:[%s11941_s4 + $0x90] sm:$0xf0] }
 0x342   : > { %3157 = vmatmul.bf16.gmra.mxu1 %v8505_v3  ;;  %v7094_v14 = vor.u32 %v7664_v17, %v7091_v42 }
 0x343   : > { %3326 = vmatmul.bf16.gmra.mxu2 %v8509_v27  ;;  %2258 = vmatmul.bf16.vlgmr.msrb.gmra.mxu3 %v9007_v10  ;;  %v9012_v33 = vpop.f32.mrf.mxu0 }
 0x344   : > { %12224 = vst [vmem:[#allocation99_spill] sm:$0xff] %v9012_v33  ;;  %2271 = vmatpush.bf16.msra.mxu3 %v7106_v54 }
 0x345   : > { %v9026_v13 = vpop.f32.mrf.mxu3 }
 0x346   : > { %v3287_v22 = vpop.f32.mrf.mxu2  ;;  %3028 = vmatmul.bf16.gmra.mxu0 %v8705_v2 }
 0x347   : > { %v9029_v39 = vadd.f32 %v3287_v22, %v3118_v23  ;;  %v3120_v4 = vpop.f32.mrf.mxu1  ;;  %v7059_v23 = vld [vmem:[%s11941_s4 + $0xb0] sm:$0xf0]  ;;  %v7652_v22 = vld [vmem:[%s11941_s4 + $0x84] sm:$0xf] }
 0x348   : > { %2278 = vmatpush.bf16.msrb.mxu3 %v7094_v14  ;;  %v7062_v54 = vor.u32 %v7656_v34, %v7059_v23  ;;  %v7046_v28 = vor.u32 %v7652_v22, %v7043_v37  ;;  %v7027_v34 = vld [vmem:[%s11941_s4 + $0x70] sm:$0xf0]  ;;  %v1694_v22 = vmax.f32 %v8972_v9, %v8993_v50 }
 0x349   : > { %12225 = vst [vmem:[#allocation100_spill] sm:$0xff] %v9029_v39 }
 0x34b   : > { %v9037_v19 = vpop.f32.mrf.mxu0 }
 0x34c   : > { %12226 = vst [vmem:[#allocation101_spill] sm:$0xff] %v9037_v19  ;;  %2279 = vmatpush.bf16.msrb.mxu3 %v7078_v59  ;;  %v7011_v19 = vld [vmem:[%s11941_s4 + $0x50] sm:$0xf0] }
 0x34d   : > { %v9045_v40 = vpop.f32.mrf.mxu3 }
 0x34e   : > { %v3289_v17 = vpop.f32.mrf.mxu2 }
 0x34f   : > { %v9047_v42 = vadd.f32 %v3289_v17, %v3120_v4  ;;  %v3123_v14 = vpop.f32.mrf.mxu1  ;;  %v7648_v4 = vld [vmem:[%s11941_s4 + $0x64] sm:$0xf] }
 0x350   : > { %2280 = vmatpush.bf16.msrb.mxu3 %v7062_v54  ;;  %v7030_v54 = vor.u32 %v7648_v4, %v7027_v34  ;;  %v1695_v4 = vmax.f32 %v1694_v22, %v9026_v13 }
 0x351   : > { %12227 = vst [vmem:[#allocation102_spill] sm:$0xff] %v9047_v42 }
 0x352   : > { %3162 = vmatmul.bf16.gmra.mxu1 %v8512_v60  ;;  %v1696_v33 = vmax.f32 %v1695_v4, %v9045_v40  ;;  %v6979_v4 = vld [vmem:[%s11941_s4 + $0x10] sm:$0xf0] }
 0x353   : > { %3331 = vmatmul.bf16.gmra.mxu2 %v8519_v38  ;;  %v9057_v59 = vpop.f32.mrf.mxu0 }
 0x354   : > { %12228 = vst [vmem:[#allocation103_spill] sm:$0xff] %v9057_v59  ;;  %2281 = vmatpush.bf16.msrb.mxu3 %v7046_v28  ;;  %v7644_v59 = vld [vmem:[%s11941_s4 + $0x44] sm:$0xf]  ;;  %v1697_v38 = vrot.slane %v1696_v33, 4 }
 0x355   : > { %v9065_v23 = vpop.f32.mrf.mxu3  ;;  %v7014_v34 = vor.u32 %v7644_v59, %v7011_v19  ;;  %v7636_v59 = vld [vmem:[%s11941_s4 + $0x4] sm:$0xf] }
 0x356   : > { %v3292_v17 = vpop.f32.mrf.mxu2  ;;  %3033 = vmatmul.bf16.gmra.mxu0 %v8723_v55  ;;  %v1698_v27 = vmax.f32 %v1696_v33, %v1697_v38 }
 0x357   : > { %v9070_v37 = vadd.f32 %v3292_v17, %v3123_v14  ;;  %v3125_v28 = vpop.f32.mrf.mxu1  ;;  %v7640_v14 = vld [vmem:[%s11941_s4 + $0x24] sm:$0xf] }
 0x358   : > { %2282 = vmatpush.bf16.msrb.mxu3 %v7030_v54  ;;  %v6995_v54 = vld [vmem:[%s11941_s4 + $0x30] sm:$0xf0] }
 0x359   : > { %12229 = vst [vmem:[#allocation104_spill] sm:$0xff] %v9070_v37  ;;  %v6998_v60 = vor.u32 %v7640_v14, %v6995_v54 }
 0x35b   : > { %v9080_v6 = vpop.f32.mrf.mxu0 }
 0x35c   : > { %12230 = vst [vmem:[#allocation105_spill] sm:$0xff] %v9080_v6  ;;  %2283 = vmatpush.bf16.msrb.mxu3 %v7014_v34  ;;  %v6982_v34 = vor.u32 %v7636_v59, %v6979_v4  ;;  %v12232_v6 = vld [vmem:[#allocation38_spill] sm:$0xff] }
 0x35d   : > { %v9088_v17 = vpop.f32.mrf.mxu3 }
 0x35e   : > { %v3294_v3 = vpop.f32.mrf.mxu2  ;;  %v1712_v59 = vmax.f32 %v9065_v23, %v9088_v17 }
 0x35f   : > { %v9090_v22 = vadd.f32 %v3294_v3, %v3125_v28  ;;  %v3128_v19 = vpop.f32.mrf.mxu1  ;;  %v1699_v28 = vrot.slane %v1698_v27, 2 }
 0x360   : > { %2284 = vmatpush.bf16.msrb.mxu3 %v6998_v60 }
 0x361   : > { %12231 = vst [vmem:[#allocation106_spill] sm:$0xff] %v9090_v22  ;;  %v1700_v4 = vmax.f32 %v1698_v27, %v1699_v28 }
 0x362   : > { %3167 = vmatmul.bf16.gmra.mxu1 %v12232_v6 }
 0x363   : > { %3336 = vmatmul.bf16.gmra.mxu2 %v8529_v57  ;;  %v9100_v14 = vpop.f32.mrf.mxu0  ;;  %v1701_v57 = vrot.slane %v1700_v4, 1 }
 0x364   : > { %12233 = vst [vmem:[#allocation107_spill] sm:$0xff] %v9100_v14  ;;  %2285 = vmatpush.bf16.msrb.mxu3 %v6982_v34 }
 0x365   : > { %v9102_v3 = vpop.f32.mrf.mxu3  ;;  %v1702_v42 = vmax.f32 %v1700_v4, %v1701_v57  ;;  %v7696_v57 = vld [vmem:[%s11941_s4 + $0x1e4] sm:$0xf]  ;;  %v7219_v4 = vld [vmem:[%s11941_s4 + $0x1f0] sm:$0xf0] }
 0x366   : > { %v3297_v60 = vpop.f32.mrf.mxu2  ;;  %3038 = vmatmul.bf16.gmra.mxu0 %v8738_v44  ;;  %v1713_v38 = vmax.f32 %v1712_v59, %v9102_v3 }
 0x367   : > { %v9105_v54 = vadd.f32 %v3297_v60, %v3128_v19  ;;  %v3130_v58 = vpop.f32.mrf.mxu1 }
 0x369   : > { %12234 = vst [vmem:[#allocation108_spill] sm:$0xff] %v9105_v54  ;;  %v12237_v54 = vld [vmem:[#allocation40_spill] sm:$0xff] }
 0x36b   : > { %v9109_v6 = vpop.f32.mrf.mxu0 }
 0x36c   : > { %12235 = vst [vmem:[#allocation109_spill] sm:$0xff] %v9109_v6 }
 0x36d   : > { %v9112_v33 = vpop.f32.mrf.mxu3 }
 0x36e   : > { %v1714_v34 = vmax.f32 %v1713_v38, %v9112_v33  ;;  %v3299_v14 = vpop.f32.mrf.mxu2  ;;  %v1750_v38 = vpack.c.bf16 %v1702_v42, %v1702_v42 }
 0x36f   : > { %v9115_v22 = vadd.f32 %v3299_v14, %v3130_v58  ;;  %v3133_v37 = vpop.f32.mrf.mxu1 }
 0x370   : > { %v1715_v19 = vrot.slane %v1714_v34, 4  ;;  %v1888_v53 = vunpack.c.l.b16 %v1750_v38  ;;  %v7222_v38 = vor.u32 %v7696_v57, %v7219_v4  ;;  %v7187_v57 = vld [vmem:[%s11941_s4 + $0x1b0] sm:$0xf0] }
 0x371   : > { %12236 = vst [vmem:[#allocation110_spill] sm:$0xff] %v9115_v22 }
 0x372   : > { %v1716_v60 = vmax.f32 %v1714_v34, %v1715_v19  ;;  %3172 = vmatmul.bf16.gmra.mxu1 %v12237_v54 }
 0x373   : > { %3341 = vmatmul.bf16.gmra.mxu2 %v8595_v48  ;;  %v9119_v27 = vpop.f32.mrf.mxu0  ;;  %v12247_v48 = vld [vmem:[#allocation47_spill] sm:$0xff] }
 0x374   : > { %12238 = vst [vmem:[#allocation111_spill] sm:$0xff] %v9119_v27  ;;  %v1717_v28 = vrot.slane %v1716_v60, 2  ;;  %v12241_v27 = vld [vmem:[#allocation43_spill] sm:$0xff] }
 0x376   : > { %v1718_v59 = vmax.f32 %v1716_v60, %v1717_v28  ;;  %v3302_v6 = vpop.f32.mrf.mxu2  ;;  %3043 = vmatmul.bf16.gmra.mxu0 %v8759_v62 }
 0x377   : > { %v9122_v39 = vadd.f32 %v3302_v6, %v3133_v37  ;;  %v3135_v58 = vpop.f32.mrf.mxu1  ;;  %v1924_v6 = vsel %vm1901_vm6, %v1888_v53, %v8833_v18 }
 0x378   : > { %v1719_v14 = vrot.slane %v1718_v59, 1 }
 0x37a   : > { %v1720_v22 = vmax.f32 %v1718_v59, %v1719_v14 }
 0x37b   : > { %v9124_v34 = vpop.f32.mrf.mxu0 }
 0x37c   : > { %12239 = vst [vmem:[#allocation112_spill] sm:$0xff] %v9124_v34  ;;  %v1752_v19 = vpack.c.bf16 %v1720_v22, %v1720_v22  ;;  %v12240_v22 = vld [vmem:[#allocation42_spill] sm:$0xff]  ;;  %v7692_v34 = vld [vmem:[%s11941_s4 + $0x1c4] sm:$0xf] }
 0x37e   : > { %v1890_v60 = vunpack.c.l.b16 %v1752_v19  ;;  %v3304_v28 = vpop.f32.mrf.mxu2  ;;  %v7203_v19 = vld [vmem:[%s11941_s4 + $0x1d0] sm:$0xf0] }
 0x37f   : > { %v9134_v42 = vadd.f32 %v3304_v28, %v3135_v58  ;;  %v3138_v37 = vpop.f32.mrf.mxu1  ;;  %v7206_v53 = vor.u32 %v7692_v34, %v7203_v19  ;;  %v7688_v58 = vld [vmem:[%s11941_s4 + $0x1a4] sm:$0xf]  ;;  %v7155_v19 = vld [vmem:[%s11941_s4 + $0x170] sm:$0xf0] }
 0x380   : > { %v1925_v59 = vsel %vm1903_vm7, %v1890_v60, %v1924_v6  ;;  %v7190_v6 = vor.u32 %v7688_v58, %v7187_v57  ;;  %v7684_v34 = vld [vmem:[%s11941_s4 + $0x184] sm:$0xf] }
 0x381   : > { %v9138_v14 = vpack.c.b16 %v1925_v59, %v12240_v22  ;;  %v7171_v59 = vld [vmem:[%s11941_s4 + $0x190] sm:$0xf0] }
 0x382   : > { %3177 = vmatmul.bf16.gmra.mxu1 %v12241_v27  ;;  %v7174_v22 = vor.u32 %v7684_v34, %v7171_v59  ;;  %v12244_v34 = vld [vmem:[#allocation45_spill] sm:$0xff]  ;;  %v7663_v27 = vld [vmem:[%s11941_s4 + $0xd4] sm:$0xf0] }
 0x383   : > { %3346 = vmatmul.bf16.gmra.mxu2 %v8655_v24  ;;  %2272 = vmatmul.bf16.vlgmr.msra.gmra.mxu3 %v9138_v14  ;;  %v9149_v18 = vpop.f32.mrf.mxu0 }
 0x384   : > { %12242 = vst [vmem:[#allocation42_spill] sm:$0xff] %v9149_v18  ;;  %2292 = vmatpush.bf16.msra.mxu3 %v7222_v38 }
 0x386   : > { %v3307_v4 = vpop.f32.mrf.mxu2  ;;  %3048 = vmatmul.bf16.gmra.mxu0 %v8778_v49 }
 0x387   : > { %v9158_v60 = vadd.f32 %v3307_v4, %v3138_v37  ;;  %v3140_v28 = vpop.f32.mrf.mxu1  ;;  %v7680_v37 = vld [vmem:[%s11941_s4 + $0x164] sm:$0xf] }
 0x388   : > { %2293 = vmatpush.bf16.msra.mxu3 %v7206_v53  ;;  %v7158_v4 = vor.u32 %v7680_v37, %v7155_v19  ;;  %v7123_v37 = vld [vmem:[%s11941_s4 + $0x130] sm:$0xf0] }
 0x38b   : > { %v9166_v38 = vpop.f32.mrf.mxu0 }
 0x38c   : > { %12243 = vst [vmem:[#allocation113_spill] sm:$0xff] %v9166_v38  ;;  %2294 = vmatpush.bf16.msra.mxu3 %v7190_v6  ;;  %v7676_v38 = vld [vmem:[%s11941_s4 + $0x144] sm:$0xf]  ;;  %v7139_v6 = vld [vmem:[%s11941_s4 + $0x150] sm:$0xf0] }
 0x38e   : > { %v3309_v53 = vpop.f32.mrf.mxu2 }
 0x38f   : > { %v9174_v58 = vadd.f32 %v3309_v53, %v3140_v28  ;;  %v3143_v57 = vpop.f32.mrf.mxu1  ;;  %v7142_v28 = vor.u32 %v7676_v38, %v7139_v6  ;;  %v7668_v38 = vld [vmem:[%s11941_s4 + $0x104] sm:$0xf]  ;;  %v7097_v6 = vld [vmem:[%s11941_s4 + $0xe8] sm:$0xf] }
 0x390   : > { %2295 = vmatpush.bf16.msra.mxu3 %v7174_v22  ;;  %v7672_v22 = vld [vmem:[%s11941_s4 + $0x124] sm:$0xf] }
 0x392   : > { %3182 = vmatmul.bf16.gmra.mxu1 %v12244_v34  ;;  %v7126_v34 = vor.u32 %v7672_v22, %v7123_v37 }
 0x393   : > { %3351 = vmatmul.bf16.gmra.mxu2 %v8662_v0  ;;  %2286 = vmatmul.bf16.vlgmr.msrb.gmra.mxu3 %v9007_v10  ;;  %v9185_v59 = vpop.f32.mrf.mxu0 }
 0x394   : > { %12245 = vst [vmem:[#allocation114_spill] sm:$0xff] %v9185_v59  ;;  %2296 = vmatpush.bf16.msra.mxu3 %v7158_v4  ;;  %v7107_v4 = vld [vmem:[%s11941_s4 + $0x110] sm:$0xf0]  ;;  %v7081_v59 = vld [vmem:[%s11941_s4 + $0xc8] sm:$0xf] }
 0x395   : > { %v7082_v24 = vor.u32 %v7663_v27, %v7081_v59  ;;  %v7049_v27 = vld [vmem:[%s11941_s4 + $0x88] sm:$0xf]  ;;  %v7655_v59 = vld [vmem:[%s11941_s4 + $0x94] sm:$0xf0] }
 0x396   : > { %v3312_v19 = vpop.f32.mrf.mxu2  ;;  %3053 = vmatmul.bf16.gmra.mxu0 %v8796_v46 }
 0x397   : > { %v9194_v53 = vadd.f32 %v3312_v19, %v3143_v57  ;;  %v3145_v18 = vpop.f32.mrf.mxu1  ;;  %v7667_v57 = vld [vmem:[%s11941_s4 + $0xf4] sm:$0xf0] }
 0x398   : > { %2297 = vmatpush.bf16.msra.mxu3 %v7142_v28  ;;  %v7110_v28 = vor.u32 %v7668_v38, %v7107_v4  ;;  %v7098_v22 = vor.u32 %v7667_v57, %v7097_v6  ;;  %v7659_v38 = vld [vmem:[%s11941_s4 + $0xb4] sm:$0xf0] }
 0x39b   : > { %v9208_v19 = vpop.f32.mrf.mxu0 }
 0x39c   : > { %12246 = vst [vmem:[#allocation115_spill] sm:$0xff] %v9208_v19  ;;  %2298 = vmatpush.bf16.msra.mxu3 %v7126_v34  ;;  %v7065_v34 = vld [vmem:[%s11941_s4 + $0xa8] sm:$0xf] }
 0x39d   : > { %v7066_v4 = vor.u32 %v7659_v38, %v7065_v34 }
 0x39e   : > { %v3314_v37 = vpop.f32.mrf.mxu2 }
 0x39f   : > { %v9216_v54 = vadd.f32 %v3314_v37, %v3145_v18  ;;  %v3148_v0 = vpop.f32.mrf.mxu1  ;;  %v7651_v37 = vld [vmem:[%s11941_s4 + $0x74] sm:$0xf0] }
 0x3a0   : > { %2299 = vmatpush.bf16.msra.mxu3 %v7110_v28 }
 0x3a2   : > { %3187 = vmatmul.bf16.gmra.mxu1 %v12247_v48  ;;  %v7209_v48 = vld [vmem:[%s11941_s4 + $0x1c8] sm:$0xf] }
 0x3a3   : > { %3356 = vmatmul.bf16.gmra.mxu2 %v8669_v7  ;;  %2300 = vmatmul.bf16.vlgmr.msra.gmra.mxu3 %v9138_v14  ;;  %v9227_v18 = vpop.f32.mrf.mxu0 }
 0x3a4   : > { %2306 = vmatpush.bf16.msrb.mxu3 %v7098_v22  ;;  %12248 = vst [vmem:[#allocation116_spill] sm:$0xff] %v9227_v18  ;;  %v7050_v22 = vor.u32 %v7655_v59, %v7049_v27 }
 0x3a6   : > { %v3317_v6 = vpop.f32.mrf.mxu2  ;;  %3058 = vmatmul.bf16.gmra.mxu0 %v8815_v26 }
 0x3a7   : > { %v9236_v57 = vadd.f32 %v3317_v6, %v3148_v0  ;;  %v3150_v28 = vpop.f32.mrf.mxu1  ;;  %v7017_v0 = vld [vmem:[%s11941_s4 + $0x48] sm:$0xf] }
 0x3a8   : > { %2307 = vmatpush.bf16.msrb.mxu3 %v7082_v24  ;;  %v7033_v24 = vld [vmem:[%s11941_s4 + $0x68] sm:$0xf] }
 0x3a9   : > { %v7034_v38 = vor.u32 %v7651_v37, %v7033_v24  ;;  %v7643_v24 = vld [vmem:[%s11941_s4 + $0x34] sm:$0xf0] }
 0x3ab   : > { %v9244_v34 = vpop.f32.mrf.mxu0 }
 0x3ac   : > { %2308 = vmatpush.bf16.msrb.mxu3 %v7066_v4  ;;  %12249 = vst [vmem:[#allocation117_spill] sm:$0xff] %v9244_v34  ;;  %v7647_v4 = vld [vmem:[%s11941_s4 + $0x54] sm:$0xf0] }
 0x3ad   : > { %v7018_v59 = vor.u32 %v7647_v4, %v7017_v0  ;;  %v7763_v0 = vld [vmem:[%s11942_s5 + $0x1f4] sm:$0xf0] }
 0x3ae   : > { %v3319_v18 = vpop.f32.mrf.mxu2  ;;  %v7699_v34 = vld [vmem:[%s11941_s4 + $0x1f4] sm:$0xf0] }
 0x3af   : > { %v9252_v6 = vadd.f32 %v3319_v18, %v3150_v28  ;;  %v3153_v27 = vpop.f32.mrf.mxu1  ;;  %v9266_v18 = vpack.c.bf16 %v8993_v50, %v8972_v9  ;;  %v7639_v9 = vld [vmem:[%s11941_s4 + $0x14] sm:$0xf0] }
 0x3b0   : > { %2309 = vmatpush.bf16.msrb.mxu3 %v7050_v22  ;;  %v7001_v22 = vld [vmem:[%s11941_s4 + $0x28] sm:$0xf] }
 0x3b1   : > { %12251 = vst [vmem:[#allocation119_spill] sm:$0xff] %v9266_v18  ;;  %v7002_v28 = vor.u32 %v7643_v24, %v7001_v22  ;;  %v7225_v24 = vld [vmem:[%s11941_s4 + $0x1e8] sm:$0xf] }
 0x3b2   : > { %3192 = vmatmul.bf16.gmra.mxu1 %v8681_v36  ;;  %v7465_v36 = vld [vmem:[%s11942_s5 + $0x1c8] sm:$0xf] }
 0x3b3   : > { %3361 = vmatmul.bf16.gmra.mxu2 %v8688_v41  ;;  %v9262_v37 = vpop.f32.mrf.mxu0 }
 0x3b4   : > { %2310 = vmatpush.bf16.msrb.mxu3 %v7034_v38  ;;  %12250 = vst [vmem:[#allocation118_spill] sm:$0xff] %v9262_v37  ;;  %v7481_v38 = vld [vmem:[%s11942_s5 + $0x1e8] sm:$0xf] }
 0x3b5   : > { %v6985_v37 = vld [vmem:[%s11941_s4 + $0x8] sm:$0xf]  ;;  %v7482_v50 = vor.u32 %v7763_v0, %v7481_v38  ;;  %v7226_v38 = vor.u32 %v7699_v34, %v7225_v24 }
 0x3b6   : > { %v3322_v4 = vpop.f32.mrf.mxu2  ;;  %3063 = vmatmul.bf16.gmra.mxu0 %v9266_v18  ;;  %v6986_v19 = vor.u32 %v7639_v9, %v6985_v37  ;;  %v7695_v37 = vld [vmem:[%s11941_s4 + $0x1d4] sm:$0xf0] }
 0x3b7   : > { %v3155_v22 = vpop.f32.mrf.mxu1  ;;  %3591 = vmatpush.bf16.msra.mxu0 %v7482_v50  ;;  %v7210_v9 = vor.u32 %v7695_v37, %v7209_v48  ;;  %v7751_v48 = vld [vmem:[%s11942_s5 + $0x194] sm:$0xf0] }
 0x3b8   : > { %2311 = vmatpush.bf16.msrb.mxu3 %v7018_v59  ;;  %v9281_v59 = vadd.f32 %v3322_v4, %v3153_v27  ;;  %v7759_v27 = vld [vmem:[%s11942_s5 + $0x1d4] sm:$0xf0] }
 0x3b9   : > { %v7466_v0 = vor.u32 %v7759_v27, %v7465_v36  ;;  %v7755_v36 = vld [vmem:[%s11942_s5 + $0x1b4] sm:$0xf0] }
 0x3bb   : > { %v9295_v4 = vpop.f32.mrf.mxu0  ;;  %3592 = vmatpush.bf16.msra.mxu0 %v7466_v0  ;;  %v7193_v0 = vld [vmem:[%s11941_s4 + $0x1a8] sm:$0xf] }
 0x3bc   : > { %2312 = vmatpush.bf16.msrb.mxu3 %v7002_v28  ;;  %12252 = vst [vmem:[#allocation120_spill] sm:$0xff] %v9295_v4  ;;  %v7449_v28 = vld [vmem:[%s11942_s5 + $0x1a8] sm:$0xf] }
 0x3bd   : > { %v7450_v50 = vor.u32 %v7755_v36, %v7449_v28  ;;  %v7177_v36 = vld [vmem:[%s11941_s4 + $0x188] sm:$0xf] }
 0x3be   : > { %v3324_v34 = vpop.f32.mrf.mxu2 }
 0x3bf   : > { %v9309_v24 = vadd.f32 %v3324_v34, %v3155_v22  ;;  %v3158_v27 = vpop.f32.mrf.mxu1  ;;  %3593 = vmatpush.bf16.msra.mxu0 %v7450_v50  ;;  %v7687_v34 = vld [vmem:[%s11941_s4 + $0x194] sm:$0xf0]  ;;  %v9336_v50 = vpack.c.bf16 %v9045_v40, %v9026_v13  ;;  %v7161_v13 = vld [vmem:[%s11941_s4 + $0x168] sm:$0xf] }
 0x3c0   : > { %2313 = vmatpush.bf16.msrb.mxu3 %v6986_v19  ;;  %v7691_v19 = vld [vmem:[%s11941_s4 + $0x1b4] sm:$0xf0] }
 0x3c1   : > { %v7194_v22 = vor.u32 %v7691_v19, %v7193_v0  ;;  %12254 = vst [vmem:[#allocation122_spill] sm:$0xff] %v9336_v50  ;;  %v7747_v0 = vld [vmem:[%s11942_s5 + $0x174] sm:$0xf0] }
 0x3c2   : > { %3197 = vmatmul.bf16.gmra.mxu1 %v8701_v63  ;;  %v7683_v40 = vld [vmem:[%s11941_s4 + $0x174] sm:$0xf0]  ;;  %v7369_v63 = vld [vmem:[%s11942_s5 + $0x108] sm:$0xf] }
 0x3c3   : > { %2314 = vmatmul.bf16.vlgmr.msrb.gmra.mxu3 %v9007_v10  ;;  %3366 = vmatmul.bf16.gmra.mxu2 %v8705_v2  ;;  %v9326_v28 = vpop.f32.mrf.mxu0  ;;  %v7726_v2 = vld [vmem:[%s11942_s5 + $0xcc] sm:$0xf0] }
 0x3c4   : > { %2320 = vmatpush.bf16.msra.mxu3 %v7226_v38  ;;  %v7433_v38 = vld [vmem:[%s11942_s5 + $0x188] sm:$0xf]  ;;  %12253 = vst [vmem:[#allocation121_spill] sm:$0xff] %v9326_v28 }
 0x3c5   : > { %v7434_v37 = vor.u32 %v7751_v48, %v7433_v38  ;;  %v7178_v38 = vor.u32 %v7687_v34, %v7177_v36 }
 0x3c6   : > { %v3327_v19 = vpop.f32.mrf.mxu2  ;;  %3068 = vmatmul.bf16.gmra.mxu0 %v9336_v50 }
 0x3c7   : > { %3594 = vmatpush.bf16.msra.mxu0 %v7434_v37  ;;  %v9345_v28 = vadd.f32 %v3327_v19, %v3158_v27  ;;  %v3160_v4 = vpop.f32.mrf.mxu1  ;;  %v7743_v37 = vld [vmem:[%s11942_s5 + $0x154] sm:$0xf0]  ;;  %v7162_v27 = vor.u32 %v7683_v40, %v7161_v13  ;;  %v7385_v19 = vld [vmem:[%s11942_s5 + $0x128] sm:$0xf] }
 0x3c8   : > { %2321 = vmatpush.bf16.msra.mxu3 %v7210_v9  ;;  %v7417_v9 = vld [vmem:[%s11942_s5 + $0x168] sm:$0xf] }
 0x3c9   : > { %v7418_v48 = vor.u32 %v7747_v0, %v7417_v9  ;;  %12255 = vst [vmem:[#allocation123_spill] sm:$0xff] %v9345_v28  ;;  %v7145_v9 = vld [vmem:[%s11941_s4 + $0x148] sm:$0xf]  ;;  %v7679_v0 = vld [vmem:[%s11941_s4 + $0x154] sm:$0xf0]  ;;  %v9684_v28 = vpack.c.bf16 %v8828_v15, %v8821_v31 }
 0x3ca   : > { %v7146_v13 = vor.u32 %v7679_v0, %v7145_v9 }
 0x3cb   : > { %3595 = vmatpush.bf16.msra.mxu0 %v7418_v48  ;;  %v9359_v34 = vpop.f32.mrf.mxu0  ;;  %12286 = vst [vmem:[#allocation149_spill] sm:$0xff] %v9684_v28 }
 0x3cc   : > { %2322 = vmatpush.bf16.msra.mxu3 %v7194_v22  ;;  %v7401_v22 = vld [vmem:[%s11942_s5 + $0x148] sm:$0xf]  ;;  %12256 = vst [vmem:[#allocation124_spill] sm:$0xff] %v9359_v34 }
 0x3cd   : > { %v7402_v36 = vor.u32 %v7743_v37, %v7401_v22  ;;  %v7129_v34 = vld [vmem:[%s11941_s4 + $0x128] sm:$0xf] }
 0x3ce   : > { %v3329_v48 = vpop.f32.mrf.mxu2 }
 0x3cf   : > { %3596 = vmatpush.bf16.msra.mxu0 %v7402_v36  ;;  %v9373_v22 = vadd.f32 %v3329_v48, %v3160_v4  ;;  %v3163_v37 = vpop.f32.mrf.mxu1  ;;  %v7675_v36 = vld [vmem:[%s11941_s4 + $0x134] sm:$0xf0]  ;;  %v9399_v48 = vpack.c.bf16 %v9088_v17, %v9065_v23  ;;  %v7661_v23 = vld [vmem:[%s11941_s4 + $0xcc] sm:$0xf]  ;;  %v7083_v17 = vld [vmem:[%s11941_s4 + $0xd8] sm:$0xf0] }
 0x3d0   : > { %2323 = vmatpush.bf16.msra.mxu3 %v7178_v38  ;;  %v7739_v38 = vld [vmem:[%s11942_s5 + $0x134] sm:$0xf0]  ;;  %v7130_v4 = vor.u32 %v7675_v36, %v7129_v34  ;;  %v7099_v34 = vld [vmem:[%s11941_s4 + $0xf8] sm:$0xf0] }
 0x3d1   : > { %v7386_v40 = vor.u32 %v7739_v38, %v7385_v19  ;;  %12257 = vst [vmem:[#allocation125_spill] sm:$0xff] %v9373_v22  ;;  %v7113_v19 = vld [vmem:[%s11941_s4 + $0x108] sm:$0xf]  ;;  %v7671_v38 = vld [vmem:[%s11941_s4 + $0x114] sm:$0xf0] }
 0x3d2   : > { %3202 = vmatmul.bf16.gmra.mxu1 %v8717_v12  ;;  %12259 = vst [vmem:[#allocation127_spill] sm:$0xff] %v9399_v48 }
 0x3d3   : > { %3597 = vmatpush.bf16.msra.mxu0 %v7386_v40  ;;  %3371 = vmatmul.bf16.gmra.mxu2 %v8723_v55  ;;  %v9389_v0 = vpop.f32.mrf.mxu0  ;;  %v7114_v40 = vor.u32 %v7671_v38, %v7113_v19  ;;  %v7067_v19 = vld [vmem:[%s11941_s4 + $0xb8] sm:$0xf0] }
 0x3d4   : > { %2324 = vmatpush.bf16.msra.mxu3 %v7162_v27  ;;  %v7735_v27 = vld [vmem:[%s11942_s5 + $0x114] sm:$0xf0]  ;;  %12258 = vst [vmem:[#allocation126_spill] sm:$0xff] %v9389_v0 }
 0x3d5   : > { %v7370_v9 = vor.u32 %v7735_v27, %v7369_v63  ;;  %v7665_v63 = vld [vmem:[%s11941_s4 + $0xec] sm:$0xf] }
 0x3d6   : > { %3073 = vmatmul.bf16.gmra.mxu0 %v9399_v48  ;;  %v7102_v0 = vor.u32 %v7665_v63, %v7099_v34 }
 0x3d7   : > { %3598 = vmatpush.bf16.msra.mxu0 %v7370_v9  ;;  %v3165_v27 = vpop.f32.mrf.mxu1 }
 0x3d8   : > { %2325 = vmatpush.bf16.msra.mxu3 %v7146_v13  ;;  %v3332_v13 = vpop.f32.mrf.mxu2 }
 0x3d9   : > { %v9408_v36 = vadd.f32 %v3332_v13, %v3163_v37  ;;  %v7657_v37 = vld [vmem:[%s11941_s4 + $0xac] sm:$0xf] }
 0x3da   : > { %v7070_v13 = vor.u32 %v7657_v37, %v7067_v19  ;;  %v7035_v37 = vld [vmem:[%s11941_s4 + $0x78] sm:$0xf0] }
 0x3db   : > { %12260 = vst [vmem:[#allocation128_spill] sm:$0xff] %v9408_v36  ;;  %v9416_v9 = vpop.f32.mrf.mxu0 }
 0x3dc   : > { %2326 = vmatpush.bf16.msra.mxu3 %v7130_v4  ;;  %12261 = vst [vmem:[#allocation129_spill] sm:$0xff] %v9416_v9  ;;  %v7086_v4 = vor.u32 %v7661_v23, %v7083_v17  ;;  %v9439_v17 = vpack.c.bf16 %v9112_v33, %v9102_v3  ;;  %v7645_v3 = vld [vmem:[%s11941_s4 + $0x4c] sm:$0xf]  ;;  %v7019_v33 = vld [vmem:[%s11941_s4 + $0x58] sm:$0xf0] }
 0x3de   : > { %12264 = vst [vmem:[#allocation132_spill] sm:$0xff] %v9439_v17 }
 0x3df   : > { %v3168_v34 = vpop.f32.mrf.mxu1 }
 0x3e0   : > { %2327 = vmatpush.bf16.msra.mxu3 %v7114_v40  ;;  %v3334_v38 = vpop.f32.mrf.mxu2  ;;  %v7051_v40 = vld [vmem:[%s11941_s4 + $0x98] sm:$0xf0] }
 0x3e1   : > { %v9425_v63 = vadd.f32 %v3334_v38, %v3165_v27 }
 0x3e2   : > { %3207 = vmatmul.bf16.gmra.mxu1 %v8734_v35  ;;  %v7211_v35 = vld [vmem:[%s11941_s4 + $0x1d8] sm:$0xf0] }
 0x3e3   : > { %2328 = vmatmul.bf16.vlgmr.msra.gmra.mxu3 %v9138_v14  ;;  %12262 = vst [vmem:[#allocation130_spill] sm:$0xff] %v9425_v63  ;;  %3376 = vmatmul.bf16.gmra.mxu2 %v8738_v44  ;;  %v9435_v23 = vpop.f32.mrf.mxu0 }
 0x3e4   : > { %2334 = vmatpush.bf16.msrb.mxu3 %v7102_v0  ;;  %v7653_v0 = vld [vmem:[%s11941_s4 + $0x8c] sm:$0xf]  ;;  %12263 = vst [vmem:[#allocation131_spill] sm:$0xff] %v9435_v23  ;;  %v7022_v23 = vor.u32 %v7645_v3, %v7019_v33  ;;  %v6987_v3 = vld [vmem:[%s11941_s4 + $0x18] sm:$0xf0] }
 0x3e5   : > { %v7054_v27 = vor.u32 %v7653_v0, %v7051_v40  ;;  %v7697_v33 = vld [vmem:[%s11941_s4 + $0x1ec] sm:$0xf] }
 0x3e6   : > { %3078 = vmatmul.bf16.gmra.mxu0 %v9439_v17 }
 0x3e8   : > { %2335 = vmatpush.bf16.msrb.mxu3 %v7086_v4  ;;  %v7649_v4 = vld [vmem:[%s11941_s4 + $0x6c] sm:$0xf]  ;;  %v3337_v19 = vpop.f32.mrf.mxu2 }
 0x3e9   : > { %v9448_v38 = vadd.f32 %v3337_v19, %v3168_v34  ;;  %v7038_v0 = vor.u32 %v7649_v4, %v7035_v37  ;;  %v7641_v34 = vld [vmem:[%s11941_s4 + $0x2c] sm:$0xf] }
 0x3eb   : > { %12265 = vst [vmem:[#allocation133_spill] sm:$0xff] %v9448_v38  ;;  %v9456_v40 = vpop.f32.mrf.mxu0 }
 0x3ec   : > { %2336 = vmatpush.bf16.msrb.mxu3 %v7070_v13  ;;  %v3170_v13 = vpop.f32.mrf.mxu1  ;;  %12266 = vst [vmem:[#allocation134_spill] sm:$0xff] %v9456_v40  ;;  %v7693_v40 = vld [vmem:[%s11941_s4 + $0x1cc] sm:$0xf] }
 0x3f0   : > { %2337 = vmatpush.bf16.msrb.mxu3 %v7054_v27  ;;  %v7003_v27 = vld [vmem:[%s11941_s4 + $0x38] sm:$0xf0]  ;;  %v3339_v4 = vpop.f32.mrf.mxu2 }
 0x3f1   : > { %v9464_v37 = vadd.f32 %v3339_v4, %v3170_v13  ;;  %v7006_v9 = vor.u32 %v7641_v34, %v7003_v27  ;;  %v7227_v13 = vld [vmem:[%s11941_s4 + $0x1f8] sm:$0xf0]  ;;  %v2259_v27 = vpop.f32.mrf.mxu3 }
 0x3f2   : > { %3212 = vmatmul.bf16.gmra.mxu1 %v8752_v56  ;;  %v7230_v4 = vor.u32 %v7697_v33, %v7227_v13 }
 0x3f3   : > { %12267 = vst [vmem:[#allocation135_spill] sm:$0xff] %v9464_v37  ;;  %3381 = vmatmul.bf16.gmra.mxu2 %v8759_v62 }
 0x3f4   : > { %2338 = vmatpush.bf16.msrb.mxu3 %v7038_v0  ;;  %v3173_v19 = vpop.f32.mrf.mxu1  ;;  %v7637_v0 = vld [vmem:[%s11941_s4 + $0xc] sm:$0xf] }
 0x3f5   : > { %v6990_v34 = vor.u32 %v7637_v0, %v6987_v3  ;;  %v7689_v0 = vld [vmem:[%s11941_s4 + $0x1ac] sm:$0xf]  ;;  %v7195_v3 = vld [vmem:[%s11941_s4 + $0x1b8] sm:$0xf0] }
 0x3f6   : > { %3599 = vmatmul.bf16.vlgmr.msra.gmra.mxu0 %v8277_v47  ;;  %v7198_v13 = vor.u32 %v7689_v0, %v7195_v3  ;;  %v7681_v3 = vld [vmem:[%s11941_s4 + $0x16c] sm:$0xf] }
 0x3f8   : > { %2339 = vmatpush.bf16.msrb.mxu3 %v7022_v23  ;;  %v9480_v23 = vpop.f32.mrf.mxu0  ;;  %v3342_v12 = vpop.f32.mrf.mxu2 }
 0x3f9   : > { %12268 = vst [vmem:[#allocation136_spill] sm:$0xff] %v9480_v23  ;;  %v9489_v56 = vadd.f32 %v3342_v12, %v3173_v19  ;;  %v7214_v23 = vor.u32 %v7693_v40, %v7211_v35  ;;  %v7685_v12 = vld [vmem:[%s11941_s4 + $0x18c] sm:$0xf]  ;;  %v7179_v35 = vld [vmem:[%s11941_s4 + $0x198] sm:$0xf0]  ;;  %v9511_v19 = vpop.f32.mrf.mxu3 }
 0x3fa   : > { %v9509_v40 = vld [vmem:[%s11943_s6] sm:$0xf] }
 0x3fb   : > { %12269 = vst [vmem:[#allocation137_spill] sm:$0xff] %v9489_v56  ;;  %v12026_v0 = vperm.slane %v9509_v40, 0  ;;  %v12285_v37 = vperm.slane %v9509_v40, 0 }
 0x3fc   : > { %2340 = vmatpush.bf16.msrb.mxu3 %v7006_v9  ;;  %v3175_v9 = vpop.f32.mrf.mxu1 }
 0x3fd   : > { %v2262_v38 = vadd.f32 %v9511_v19, %v12285_v37  ;;  %v7757_v37 = vld [vmem:[%s11942_s5 + $0x1cc] sm:$0xf] }
 0x400   : > { %2341 = vmatpush.bf16.msrb.mxu3 %v6990_v34  ;;  %v9498_v33 = vpop.f32.mrf.mxu0 }
 0x401   : > { %12270 = vst [vmem:[#allocation138_spill] sm:$0xff] %v9498_v33  ;;  %v7163_v33 = vld [vmem:[%s11941_s4 + $0x178] sm:$0xf0] }
 0x402   : > { %3217 = vmatmul.bf16.gmra.mxu1 %v8774_v11  ;;  %v12273_v11 = vld [vmem:[#allocation13_spill] sm:$0xff] }
 0x403   : > { %2342 = vmatmul.bf16.vlgmr.msrb.gmra.mxu3 %v9007_v10  ;;  %v3344_v10 = vpop.f32.mrf.mxu2  ;;  %3386 = vmatmul.bf16.gmra.mxu2 %v8778_v49 }
 0x404   : > { %2348 = vmatpush.bf16.msra.mxu3 %v7230_v4  ;;  %v9513_v34 = vadd.f32 %v3344_v10, %v3175_v9  ;;  %v7182_v4 = vor.u32 %v7685_v12, %v7179_v35  ;;  %v7166_v9 = vor.u32 %v7681_v3, %v7163_v33  ;;  %v7677_v12 = vld [vmem:[%s11941_s4 + $0x14c] sm:$0xf]  ;;  %v7147_v35 = vld [vmem:[%s11941_s4 + $0x158] sm:$0xf0] }
 0x405   : > { %v7131_v3 = vld [vmem:[%s11941_s4 + $0x138] sm:$0xf0] }
 0x406   : > { %12271 = vst [vmem:[#allocation139_spill] sm:$0xff] %v9513_v34  ;;  %v2273_v44 = vpop.f32.mrf.mxu3  ;;  %3604 = vmatmul.bf16.gmra.mxu0 %v12273_v11 }
 0x408   : > { %2349 = vmatpush.bf16.msra.mxu3 %v7214_v23  ;;  %v3178_v23 = vpop.f32.mrf.mxu1  ;;  %v9524_v62 = vpop.f32.mrf.mxu0 }
 0x409   : > { %12272 = vst [vmem:[#allocation140_spill] sm:$0xff] %v9524_v62 }
 0x40b   : > { %v3347_v10 = vpop.f32.mrf.mxu2 }
 0x40c   : > { %2350 = vmatpush.bf16.msra.mxu3 %v7198_v13  ;;  %v2260_v13 = vadd.f32 %v2259_v27, %v12026_v0  ;;  %v9535_v49 = vadd.f32 %v3347_v10, %v3178_v23  ;;  %v7673_v27 = vld [vmem:[%s11941_s4 + $0x12c] sm:$0xf]  ;;  %v7115_v23 = vld [vmem:[%s11941_s4 + $0x118] sm:$0xf0] }
 0x40d   : > { %v7134_v55 = vor.u32 %v7673_v27, %v7131_v3 }
 0x40e   : > { %12274 = vst [vmem:[#allocation13_spill] sm:$0xff] %v9535_v49  ;;  %v9537_v62 = vadd.f32 %v2273_v44, %v2260_v13  ;;  %v7669_v44 = vld [vmem:[%s11941_s4 + $0x10c] sm:$0xf]  ;;  %v9553_v13 = vpop.f32.mrf.mxu3 }
 0x40f   : > { %v7118_v27 = vor.u32 %v7669_v44, %v7115_v23  ;;  %v12278_v23 = vld [vmem:[#allocation15_spill] sm:$0xff] }
 0x410   : > { %2351 = vmatpush.bf16.msra.mxu3 %v7182_v4  ;;  %v3180_v33 = vpop.f32.mrf.mxu1  ;;  %v7150_v4 = vor.u32 %v7677_v12, %v7147_v35  ;;  %v9545_v0 = vpop.f32.mrf.mxu0  ;;  %v7345_v12 = vld [vmem:[%s11942_s5 + $0xe0] sm:$0xf]  ;;  %v7730_v35 = vld [vmem:[%s11942_s5 + $0xec] sm:$0xf0] }
 0x411   : > { %12275 = vst [vmem:[#allocation141_spill] sm:$0xff] %v9545_v0  ;;  %v7346_v3 = vor.u32 %v7730_v35, %v7345_v12  ;;  %v7329_v0 = vld [vmem:[%s11942_s5 + $0xc0] sm:$0xf]  ;;  %v7722_v12 = vld [vmem:[%s11942_s5 + $0xac] sm:$0xf0] }
 0x412   : > { %3222 = vmatmul.bf16.gmra.mxu1 %v8792_v43  ;;  %v7297_v43 = vld [vmem:[%s11942_s5 + $0x80] sm:$0xf] }
 0x413   : > { %3391 = vmatmul.bf16.gmra.mxu2 %v8796_v46  ;;  %v7281_v46 = vld [vmem:[%s11942_s5 + $0x60] sm:$0xf] }
 0x414   : > { %2352 = vmatpush.bf16.msra.mxu3 %v7166_v9  ;;  %v3349_v9 = vpop.f32.mrf.mxu2 }
 0x415   : > { %v9561_v10 = vadd.f32 %v3349_v9, %v3180_v33  ;;  %v7330_v33 = vor.u32 %v7726_v2, %v7329_v0  ;;  %v7313_v9 = vld [vmem:[%s11942_s5 + $0xa0] sm:$0xf]  ;;  %v7761_v2 = vld [vmem:[%s11942_s5 + $0x1ec] sm:$0xf]  ;;  %v7483_v0 = vld [vmem:[%s11942_s5 + $0x1f8] sm:$0xf0] }
 0x416   : > { %v2287_v44 = vpop.f32.mrf.mxu3  ;;  %3609 = vmatmul.bf16.gmra.mxu0 %v12278_v23 }
 0x417   : > { %12276 = vst [vmem:[#allocation142_spill] sm:$0xff] %v9561_v10 }
 0x418   : > { %2353 = vmatpush.bf16.msra.mxu3 %v7150_v4  ;;  %v3183_v4 = vpop.f32.mrf.mxu1  ;;  %v9571_v41 = vpop.f32.mrf.mxu0 }
 0x419   : > { %12277 = vst [vmem:[#allocation143_spill] sm:$0xff] %v9571_v41 }
 0x41c   : > { %2354 = vmatpush.bf16.msra.mxu3 %v7134_v55  ;;  %v3352_v55 = vpop.f32.mrf.mxu2 }
 0x41d   : > { %v9580_v35 = vadd.f32 %v3352_v55, %v3183_v4  ;;  %v7729_v55 = vld [vmem:[%s11942_s5 + $0xec] sm:$0xf] }
 0x41f   : > { %12279 = vst [vmem:[#allocation15_spill] sm:$0xff] %v9580_v35  ;;  %v1820_v35 = vperm.slane %v9509_v40, 1 }
 0x420   : > { %2355 = vmatpush.bf16.msra.mxu3 %v7118_v27  ;;  %v3185_v41 = vpop.f32.mrf.mxu1  ;;  %v7486_v27 = vor.u32 %v7761_v2, %v7483_v0  ;;  %v9595_v4 = vpop.f32.mrf.mxu0 }
 0x421   : > { %12280 = vst [vmem:[#allocation144_spill] sm:$0xff] %v9595_v4  ;;  %v2289_v0 = vpop.f32.mrf.mxu3 }
 0x422   : > { %3929 = vmatpush.bf16.msra.mxu2 %v7486_v27  ;;  %v7714_v27 = vld [vmem:[%s11942_s5 + $0x6c] sm:$0xf0]  ;;  %3227 = vmatmul.bf16.gmra.mxu1 %v8811_v61 }
 0x423   : > { %2356 = vmatmul.bf16.vlgmr.msra.gmra.mxu3 %v9138_v14  ;;  %v7718_v14 = vld [vmem:[%s11942_s5 + $0x8c] sm:$0xf0]  ;;  %3396 = vmatmul.bf16.gmra.mxu2 %v8815_v26 }
 0x424   : > { %2746 = vmatpush.bf16.msrb.mxu3 %v7346_v3  ;;  %v7314_v3 = vor.u32 %v7722_v12, %v7313_v9  ;;  %v7298_v12 = vor.u32 %v7718_v14, %v7297_v43  ;;  %v3354_v2 = vpop.f32.mrf.mxu2  ;;  %v7265_v43 = vld [vmem:[%s11942_s5 + $0x40] sm:$0xf] }
 0x425   : > { %v9609_v4 = vadd.f32 %v3354_v2, %v3185_v41  ;;  %v2288_v41 = vadd.f32 %v2287_v44, %v1820_v35  ;;  %v7706_v2 = vld [vmem:[%s11942_s5 + $0x2c] sm:$0xf0] }
 0x426   : > { %3614 = vmatmul.bf16.gmra.mxu0 %v8307_v1 }
 0x427   : > { %12281 = vst [vmem:[#allocation145_spill] sm:$0xff] %v9609_v4  ;;  %v2290_v4 = vadd.f32 %v2289_v0, %v1820_v35 }
 0x428   : > { %2747 = vmatpush.bf16.msrb.mxu3 %v7330_v33  ;;  %v7355_v33 = vld [vmem:[%s11942_s5 + $0xf8] sm:$0xf0]  ;;  %v3188_v7 = vpop.f32.mrf.mxu1  ;;  %v9620_v14 = vpop.f32.mrf.mxu0 }
 0x429   : > { %v7358_v9 = vor.u32 %v7729_v55, %v7355_v33  ;;  %v7282_v55 = vor.u32 %v7714_v27, %v7281_v46  ;;  %12282 = vst [vmem:[#allocation146_spill] sm:$0xff] %v9620_v14  ;;  %v7249_v46 = vld [vmem:[%s11942_s5 + $0x20] sm:$0xf] }
 0x42b   : > { %3760 = vmatpush.bf16.msra.mxu1 %v7358_v9 }
 0x42c   : > { %2748 = vmatpush.bf16.msrb.mxu3 %v7314_v3  ;;  %v7710_v3 = vld [vmem:[%s11942_s5 + $0x4c] sm:$0xf0]  ;;  %v3357_v9 = vpop.f32.mrf.mxu2 }
 0x42d   : > { %v7266_v33 = vor.u32 %v7710_v3, %v7265_v43  ;;  %v9629_v27 = vadd.f32 %v3357_v9, %v3188_v7  ;;  %v7233_v43 = vld [vmem:[%s11942_s5] sm:$0xf]  ;;  %v7702_v3 = vld [vmem:[%s11942_s5 + $0xc] sm:$0xf0]  ;;  %v7353_v7 = vld [vmem:[%s11942_s5 + $0xe8] sm:$0xf] }
 0x42e   : > { %v7234_v10 = vor.u32 %v7702_v3, %v7233_v43 }
 0x42f   : > { %12283 = vst [vmem:[#allocation147_spill] sm:$0xff] %v9629_v27 }
 0x430   : > { %2749 = vmatpush.bf16.msrb.mxu3 %v7298_v12  ;;  %v2301_v12 = vpop.f32.mrf.mxu3  ;;  %v3190_v26 = vpop.f32.mrf.mxu1 }
 0x431   : > { %v2302_v61 = vadd.f32 %v2301_v12, %v2288_v41  ;;  %v9637_v14 = vpop.f32.mrf.mxu0 }
 0x432   : > { %12284 = vst [vmem:[#allocation148_spill] sm:$0xff] %v9637_v14  ;;  %3232 = vmatmul.bf16.gmra.mxu1 %v9684_v28 }
 0x433   : > { %v4106_v44 = vrot.slane %v2302_v61, 7  ;;  %v7731_v61 = vld [vmem:[%s11942_s5 + $0xf4] sm:$0xf0]  ;;  %3401 = vmatmul.bf16.gmra.mxu2 %v9266_v18 }
 0x434   : > { %2750 = vmatpush.bf16.msrb.mxu3 %v7282_v55  ;;  %v7250_v55 = vor.u32 %v7706_v2, %v7249_v46  ;;  %v3359_v49 = vpop.f32.mrf.mxu2  ;;  %v7354_v56 = vor.u32 %v7731_v61, %v7353_v7  ;;  %v7721_v7 = vld [vmem:[%s11942_s5 + $0xac] sm:$0xf] }
 0x435   : > { %v9647_v41 = vsel %vm4112_vm8, %v9537_v62, %v4106_v44  ;;  %v9655_v9 = vsel %vm1893_vm2, %v9537_v62, %v4106_v44  ;;  %v9659_v12 = vsel %vm1895_vm3, %v9537_v62, %v4106_v44  ;;  %v9663_v46 = vsel %vm1897_vm4, %v9537_v62, %v4106_v44  ;;  %v7753_v61 = vld [vmem:[%s11942_s5 + $0x1ac] sm:$0xf] }
 0x436   : > { %v9667_v2 = vsel %vm1899_vm5, %v9537_v62, %v4106_v44  ;;  %v9671_v14 = vsel %vm1901_vm6, %v9537_v62, %v4106_v44  ;;  %v9675_v27 = vsel %vm4138_vm9, %v4106_v44, %v9537_v62  ;;  %v9680_v63 = vadd.f32 %v3359_v49, %v3190_v26  ;;  %3619 = vmatmul.bf16.gmra.mxu0 %v8320_v52 }
 0x438   : > { %2751 = vmatpush.bf16.msrb.mxu3 %v7266_v33  ;;  %v9651_v33 = vsel %vm1891_vm1, %v9537_v62, %v4106_v44  ;;  %v2303_v34 = vpop.f32.mrf.mxu3  ;;  %v3193_v22 = vpop.f32.mrf.mxu1  ;;  %v2276_v62 = vadd.f32 %v9553_v13, %v2262_v38  ;;  %v7339_v38 = vld [vmem:[%s11942_s5 + $0xd8] sm:$0xf0] }
 0x439   : > { %v2304_v36 = vadd.f32 %v2303_v34, %v2290_v4  ;;  %v9689_v0 = vpop.f32.mrf.mxu0  ;;  %v7467_v13 = vld [vmem:[%s11942_s5 + $0x1d8] sm:$0xf0] }
 0x43a   : > { %12287 = vst [vmem:[#allocation150_spill] sm:$0xff] %v9689_v0  ;;  %v7470_v44 = vor.u32 %v7757_v37, %v7467_v13  ;;  %v7307_v13 = vld [vmem:[%s11942_s5 + $0x98] sm:$0xf0]  ;;  %v9761_v0 = vpack.c.bf16 %v8864_v5, %v8845_v25 }
 0x43b   : > { %v4109_v35 = vrot.slane %v2304_v36, 7  ;;  %v12288_v36 = vld [vmem:[#allocation11_spill] sm:$0xff]  ;;  %v7419_v5 = vld [vmem:[%s11942_s5 + $0x178] sm:$0xf0] }
 0x43c   : > { %2752 = vmatpush.bf16.msrb.mxu3 %v7250_v55  ;;  %v3362_v19 = vpop.f32.mrf.mxu2  ;;  %3930 = vmatpush.bf16.msra.mxu2 %v7470_v44  ;;  %v7749_v44 = vld [vmem:[%s11942_s5 + $0x18c] sm:$0xf]  ;;  %12291 = vst [vmem:[#allocation153_spill] sm:$0xff] %v9761_v0 }
 0x43d   : > { %v9692_v49 = vsel %vm1899_vm5, %v2276_v62, %v4109_v35  ;;  %v9695_v26 = vsel %vm1901_vm6, %v2276_v62, %v4109_v35  ;;  %v9698_v31 = vsel %vm4138_vm9, %v4109_v35, %v2276_v62  ;;  %v9701_v15 = vsel %vm4112_vm8, %v2276_v62, %v4109_v35 }
 0x43e   : > { %v9720_v55 = vsel %vm1891_vm1, %v2276_v62, %v4109_v35  ;;  %v9723_v43 = vsel %vm1893_vm2, %v2276_v62, %v4109_v35  ;;  %v9726_v3 = vsel %vm1895_vm3, %v2276_v62, %v4109_v35 }
 0x440   : > { %2753 = vmatpush.bf16.msrb.mxu3 %v7234_v10  ;;  %v9717_v10 = vadd.f32 %v3362_v19, %v3193_v22  ;;  %v3195_v4 = vpop.f32.mrf.mxu1  ;;  %v7323_v22 = vld [vmem:[%s11942_s5 + $0xb8] sm:$0xf0] }
 0x441   : > { %v9740_v37 = vpop.f32.mrf.mxu0 }
 0x442   : > { %12289 = vst [vmem:[#allocation151_spill] sm:$0xff] %v9740_v37  ;;  %3237 = vmatmul.bf16.gmra.mxu1 %v9761_v0  ;;  %v7259_v0 = vld [vmem:[%s11942_s5 + $0x38] sm:$0xf0] }
 0x443   : > { %2754 = vmatmul.bf16.vlgmr.msrb.gmra.mxu3 %v12288_v36  ;;  %3406 = vmatmul.bf16.gmra.mxu2 %v9336_v50 }
 0x444   : > { %3422 = vmatpush.bf16.msra.mxu3 %v7354_v56  ;;  %v7725_v56 = vld [vmem:[%s11942_s5 + $0xcc] sm:$0xf] }
 0x445   : > { %v7342_v34 = vor.u32 %v7725_v56, %v7339_v38  ;;  %v7326_v56 = vor.u32 %v7721_v7, %v7323_v22  ;;  %v7451_v38 = vld [vmem:[%s11942_s5 + $0x1b8] sm:$0xf0]  ;;  %v3364_v7 = vpop.f32.mrf.mxu2 }
 0x446   : > { %v7454_v19 = vor.u32 %v7753_v61, %v7451_v38  ;;  %v7435_v61 = vld [vmem:[%s11942_s5 + $0x198] sm:$0xf0]  ;;  %v9757_v38 = vadd.f32 %v3364_v7, %v3195_v4 }
 0x447   : > { %3761 = vmatpush.bf16.msra.mxu1 %v7342_v34  ;;  %v7717_v34 = vld [vmem:[%s11942_s5 + $0x8c] sm:$0xf]  ;;  %v7438_v37 = vor.u32 %v7749_v44, %v7435_v61  ;;  %v7275_v7 = vld [vmem:[%s11942_s5 + $0x58] sm:$0xf0] }
 0x448   : > { %3931 = vmatpush.bf16.msra.mxu2 %v7454_v19  ;;  %v7310_v22 = vor.u32 %v7717_v34, %v7307_v13  ;;  %v3198_v19 = vpop.f32.mrf.mxu1  ;;  %v7713_v34 = vld [vmem:[%s11942_s5 + $0x6c] sm:$0xf]  ;;  %v7291_v13 = vld [vmem:[%s11942_s5 + $0x78] sm:$0xf0] }
 0x449   : > { %v9777_v25 = vpop.f32.mrf.mxu0  ;;  %v7709_v44 = vld [vmem:[%s11942_s5 + $0x4c] sm:$0xf] }
 0x44a   : > { %12292 = vst [vmem:[#allocation154_spill] sm:$0xff] %v9777_v25  ;;  %v7705_v25 = vld [vmem:[%s11942_s5 + $0x2c] sm:$0xf] }
 0x44b   : > { %3762 = vmatpush.bf16.msra.mxu1 %v7326_v56  ;;  %v9755_v56 = vsel %vm1897_vm4, %v2276_v62, %v4109_v35  ;;  %v7745_v62 = vld [vmem:[%s11942_s5 + $0x16c] sm:$0xf]  ;;  %v7294_v35 = vor.u32 %v7713_v34, %v7291_v13  ;;  %v12294_v34 = vld [vmem:[#allocation19_spill] sm:$0xff]  ;;  %v7278_v13 = vor.u32 %v7709_v44, %v7275_v7  ;;  %v7262_v7 = vor.u32 %v7705_v25, %v7259_v0  ;;  %v2315_v25 = vpop.f32.mrf.mxu3 }
 0x44c   : > { %12290 = vst [vmem:[#allocation152_spill] sm:$0xff] %v9755_v56  ;;  %3932 = vmatpush.bf16.msra.mxu2 %v7438_v37  ;;  %v7422_v4 = vor.u32 %v7745_v62, %v7419_v5  ;;  %v12293_v37 = vld [vmem:[#allocation12_spill] sm:$0xff]  ;;  %3624 = vmatmul.bf16.gmra.mxu0 %v12294_v34  ;;  %v7403_v62 = vld [vmem:[%s11942_s5 + $0x158] sm:$0xf0]  ;;  %v12306_v56 = vld [vmem:[#allocation23_spill] sm:$0xff] }
 0x44d   : > { %v3367_v61 = vpop.f32.mrf.mxu2  ;;  %v7737_v44 = vld [vmem:[%s11942_s5 + $0x12c] sm:$0xf] }
 0x44e   : > { %v7733_v0 = vld [vmem:[%s11942_s5 + $0x10c] sm:$0xf] }
 0x44f   : > { %3763 = vmatpush.bf16.msra.mxu1 %v7310_v22  ;;  %v7741_v22 = vld [vmem:[%s11942_s5 + $0x14c] sm:$0xf] }
 0x450   : > { %3933 = vmatpush.bf16.msra.mxu2 %v7422_v4  ;;  %v3200_v5 = vpop.f32.mrf.mxu1  ;;  %v7406_v4 = vor.u32 %v7741_v22, %v7403_v62  ;;  %v7243_v62 = vld [vmem:[%s11942_s5 + $0x18] sm:$0xf0] }
 0x451   : > { %v9807_v22 = vpop.f32.mrf.mxu0 }
 0x452   : > { %12295 = vst [vmem:[#allocation19_spill] sm:$0xff] %v9807_v22  ;;  %v9825_v22 = vpack.c.bf16 %v8915_v32, %v8886_v30 }
 0x453   : > { %2759 = vmatmul.bf16.gmra.mxu3 %v12293_v37  ;;  %3764 = vmatpush.bf16.msra.mxu1 %v7294_v35  ;;  %v9793_v35 = vadd.f32 %v3367_v61, %v3198_v19  ;;  %v7387_v19 = vld [vmem:[%s11942_s5 + $0x138] sm:$0xf0] }
 0x454   : > { %3934 = vmatpush.bf16.msra.mxu2 %v7406_v4  ;;  %v7390_v61 = vor.u32 %v7737_v44, %v7387_v19  ;;  %v7371_v44 = vld [vmem:[%s11942_s5 + $0x118] sm:$0xf0]  ;;  %12296 = vst [vmem:[#allocation155_spill] sm:$0xff] %v9825_v22  ;;  %3242 = vmatmul.bf16.gmra.mxu1 %v9825_v22 }
 0x455   : > { %v3369_v4 = vpop.f32.mrf.mxu2  ;;  %3411 = vmatmul.bf16.gmra.mxu2 %v9399_v48 }
 0x457   : > { %3765 = vmatpush.bf16.msra.mxu1 %v7278_v13  ;;  %v7701_v13 = vld [vmem:[%s11942_s5 + $0xc] sm:$0xf] }
 0x458   : > { %3935 = vmatpush.bf16.msra.mxu2 %v7390_v61  ;;  %v7246_v28 = vor.u32 %v7701_v13, %v7243_v62  ;;  %v3203_v19 = vpop.f32.mrf.mxu1  ;;  %v7374_v61 = vor.u32 %v7733_v0, %v7371_v44  ;;  %v12298_v13 = vld [vmem:[#allocation14_spill] sm:$0xff]  ;;  %v9841_v44 = vpop.f32.mrf.mxu3 }
 0x459   : > { %v9829_v50 = vpop.f32.mrf.mxu0  ;;  %v7727_v62 = vld [vmem:[%s11942_s5 + $0xd4] sm:$0xf0] }
 0x45a   : > { %12297 = vst [vmem:[#allocation156_spill] sm:$0xff] %v9829_v50 }
 0x45b   : > { %3766 = vmatpush.bf16.msra.mxu1 %v7262_v7  ;;  %v9821_v7 = vadd.f32 %v3369_v4, %v3200_v5  ;;  %v7337_v5 = vld [vmem:[%s11942_s5 + $0xc8] sm:$0xf] }
 0x45c   : > { %3936 = vmatpush.bf16.msra.mxu2 %v7374_v61  ;;  %v7338_v30 = vor.u32 %v7727_v62, %v7337_v5  ;;  %v12055_v61 = vperm.slane %v9509_v40, 2  ;;  %v9852_v62 = vpack.c.bf16 %v8951_v20, %v8929_v21 }
 0x45d   : > { %v3372_v32 = vpop.f32.mrf.mxu2 }
 0x45e   : > { %v9839_v0 = vadd.f32 %v3372_v32, %v3203_v19  ;;  %3423 = vmatpush.bf16.msra.mxu3 %v7338_v30  ;;  %v2316_v48 = vadd.f32 %v2315_v25, %v12055_v61  ;;  %12303 = vst [vmem:[#allocation159_spill] sm:$0xff] %v9852_v62  ;;  %v12311_v61 = vld [vmem:[#allocation17_spill] sm:$0xff] }
 0x45f   : > { %3767 = vmatpush.bf16.msra.mxu1 %v7246_v28  ;;  %v12299_v28 = vld [vmem:[#allocation21_spill] sm:$0xff] }
 0x460   : > { %3629 = vmatmul.bf16.gmra.mxu0 %v12299_v28  ;;  %12300 = vst [vmem:[#allocation21_spill] sm:$0xff] %v9839_v0  ;;  %v3205_v4 = vpop.f32.mrf.mxu1 }
 0x461   : > { %v9844_v50 = vpop.f32.mrf.mxu0 }
 0x462   : > { %12301 = vst [vmem:[#allocation157_spill] sm:$0xff] %v9844_v50  ;;  %v12305_v50 = vld [vmem:[#allocation16_spill] sm:$0xff] }
 0x463   : > { %2764 = vmatmul.bf16.gmra.mxu3 %v12298_v13 }
 0x464   : > { %3247 = vmatmul.bf16.gmra.mxu1 %v9852_v62  ;;  %v12312_v62 = vld [vmem:[#allocation25_spill] sm:$0xff] }
 0x465   : > { %v3374_v22 = vpop.f32.mrf.mxu2  ;;  %3416 = vmatmul.bf16.gmra.mxu2 %v9439_v17 }
 0x466   : > { %v9848_v18 = vadd.f32 %v3374_v22, %v3205_v4  ;;  %v2329_v19 = vpop.f32.mrf.mxu3 }
 0x467   : > { %v2330_v32 = vadd.f32 %v2329_v19, %v2316_v48 }
 0x468   : > { %12302 = vst [vmem:[#allocation158_spill] sm:$0xff] %v9848_v18  ;;  %v3208_v5 = vpop.f32.mrf.mxu1 }
 0x469   : > { %v9856_v30 = vpop.f32.mrf.mxu0 }
 0x46a   : > { %12304 = vst [vmem:[#allocation160_spill] sm:$0xff] %v9856_v30 }
 0x46d   : > { %v3377_v0 = vpop.f32.mrf.mxu2 }
 0x46e   : > { %v9860_v22 = vadd.f32 %v3377_v0, %v3208_v5 }
 0x470   : > { %3634 = vmatmul.bf16.gmra.mxu0 %v12306_v56  ;;  %12307 = vst [vmem:[#allocation161_spill] sm:$0xff] %v9860_v22  ;;  %v3210_v25 = vpop.f32.mrf.mxu1  ;;  %v2331_v56 = vpop.f32.mrf.mxu3  ;;  %v9910_v22 = vrot.slane %v2330_v32, 6 }
 0x471   : > { %v9862_v4 = vpop.f32.mrf.mxu0 }
 0x472   : > { %12308 = vst [vmem:[#allocation162_spill] sm:$0xff] %v9862_v4 }
 0x473   : > { %2769 = vmatmul.bf16.gmra.mxu3 %v12305_v50 }
 0x474   : > { %3768 = vmatmul.bf16.vlgmr.msra.gmra.mxu1 %v12288_v36 }
 0x475   : > { %v3379_v21 = vpop.f32.mrf.mxu2  ;;  %3937 = vmatmul.bf16.vlgmr.msra.gmra.mxu2 %v8277_v47 }
 0x476   : > { %v9864_v20 = vadd.f32 %v3379_v21, %v3210_v25 }
 0x478   : > { %12309 = vst [vmem:[#allocation163_spill] sm:$0xff] %v9864_v20  ;;  %v3213_v48 = vpop.f32.mrf.mxu1 }
 0x479   : > { %v9868_v19 = vpop.f32.mrf.mxu0 }
 0x47a   : > { %12310 = vst [vmem:[#allocation164_spill] sm:$0xff] %v9868_v19  ;;  %v12317_v19 = vld [vmem:[#allocation18_spill] sm:$0xff] }
 0x47d   : > { %v3382_v30 = vpop.f32.mrf.mxu2 }
 0x47e   : > { %v9872_v0 = vadd.f32 %v3382_v30, %v3213_v48 }
 0x480   : > { %3639 = vmatmul.bf16.gmra.mxu0 %v12312_v62  ;;  %12313 = vst [vmem:[#allocation165_spill] sm:$0xff] %v9872_v0  ;;  %v3215_v5 = vpop.f32.mrf.mxu1  ;;  %v12324_v0 = vperm.slane %v9509_v40, 2 }
 0x481   : > { %v9874_v17 = vpop.f32.mrf.mxu0 }
 0x482   : > { %12314 = vst [vmem:[#allocation166_spill] sm:$0xff] %v9874_v17  ;;  %v2318_v20 = vadd.f32 %v9841_v44, %v12324_v0 }
 0x483   : > { %2774 = vmatmul.bf16.gmra.mxu3 %v12311_v61 }
 0x484   : > { %3773 = vmatmul.bf16.gmra.mxu1 %v12293_v37 }
 0x485   : > { %v3384_v4 = vpop.f32.mrf.mxu2  ;;  %3942 = vmatmul.bf16.gmra.mxu2 %v12273_v11 }
 0x486   : > { %v9876_v25 = vadd.f32 %v3384_v4, %v3215_v5  ;;  %v2343_v17 = vpop.f32.mrf.mxu3 }
 0x488   : > { %12315 = vst [vmem:[#allocation167_spill] sm:$0xff] %v9876_v25  ;;  %v3218_v21 = vpop.f32.mrf.mxu1 }
 0x489   : > { %v9880_v47 = vpop.f32.mrf.mxu0 }
 0x48a   : > { %12316 = vst [vmem:[#allocation168_spill] sm:$0xff] %v9880_v47  ;;  %v12322_v47 = vld [vmem:[#allocation20_spill] sm:$0xff] }
 0x48d   : > { %v3387_v36 = vpop.f32.mrf.mxu2 }
 0x48e   : > { %v9884_v30 = vadd.f32 %v3387_v36, %v3218_v21  ;;  %v2345_v37 = vpop.f32.mrf.mxu3  ;;  %v7321_v36 = vld [vmem:[%s11942_s5 + $0xa8] sm:$0xf]  ;;  %v7723_v21 = vld [vmem:[%s11942_s5 + $0xb4] sm:$0xf0] }
 0x490   : > { %3644 = vmatmul.bf16.gmra.mxu0 %v8435_v51  ;;  %12318 = vst [vmem:[#allocation169_spill] sm:$0xff] %v9884_v30  ;;  %v3220_v48 = vpop.f32.mrf.mxu1 }
 0x491   : > { %v9886_v62 = vpop.f32.mrf.mxu0 }
 0x492   : > { %12319 = vst [vmem:[#allocation170_spill] sm:$0xff] %v9886_v62 }
 0x493   : > { %2779 = vmatmul.bf16.gmra.mxu3 %v12317_v19 }
 0x494   : > { %3778 = vmatmul.bf16.gmra.mxu1 %v12298_v13 }
 0x495   : > { %v3389_v4 = vpop.f32.mrf.mxu2  ;;  %3947 = vmatmul.bf16.gmra.mxu2 %v12278_v23 }
 0x496   : > { %v9888_v5 = vadd.f32 %v3389_v4, %v3220_v48  ;;  %v1822_v48 = vperm.slane %v9509_v40, 3  ;;  %v7322_v4 = vor.u32 %v7723_v21, %v7321_v36 }
 0x498   : > { %12320 = vst [vmem:[#allocation171_spill] sm:$0xff] %v9888_v5  ;;  %v3223_v25 = vpop.f32.mrf.mxu1  ;;  %3424 = vmatpush.bf16.msra.mxu3 %v7322_v4 }
 0x499   : > { %v9892_v11 = vpop.f32.mrf.mxu0 }
 0x49a   : > { %12321 = vst [vmem:[#allocation172_spill] sm:$0xff] %v9892_v11  ;;  %v2344_v11 = vadd.f32 %v2343_v17, %v1822_v48 }
 0x49d   : > { %v3392_v62 = vpop.f32.mrf.mxu2 }
 0x49e   : > { %v9903_v13 = vadd.f32 %v3392_v62, %v3223_v25  ;;  %v2332_v62 = vadd.f32 %v2331_v56, %v2318_v20 }
 0x4a0   : > { %3649 = vmatmul.bf16.gmra.mxu0 %v8463_v16  ;;  %v3225_v23 = vpop.f32.mrf.mxu1 }
 0x4a1   : > { %v9905_v30 = vpop.f32.mrf.mxu0 }
 0x4a2   : > { %12323 = vst [vmem:[#allocation173_spill] sm:$0xff] %v9905_v30  ;;  %v12332_v30 = vld [vmem:[#allocation88_spill] sm:$0xff] }
 0x4a3   : > { %2784 = vmatmul.bf16.gmra.mxu3 %v12322_v47 }
 0x4a4   : > { %3783 = vmatmul.bf16.gmra.mxu1 %v12305_v50 }
 0x4a5   : > { %v3394_v25 = vpop.f32.mrf.mxu2  ;;  %3952 = vmatmul.bf16.gmra.mxu2 %v8307_v1 }
 0x4a6   : > { %v2357_v51 = vpop.f32.mrf.mxu3  ;;  %v9914_v36 = vadd.f32 %v3394_v25, %v3225_v23 }
 0x4a7   : > { %v2358_v5 = vadd.f32 %v2357_v51, %v2344_v11 }
 0x4a8   : > { %v3228_v17 = vpop.f32.mrf.mxu1 }
 0x4a9   : > { %v9912_v18 = vrot.slane %v2358_v5, 5  ;;  %v2346_v5 = vadd.f32 %v2345_v37, %v1822_v48  ;;  %v9949_v37 = vpop.f32.mrf.mxu0  ;;  %v12328_v48 = vld [vmem:[#allocation82_spill] sm:$0xff] }
 0x4aa   : > { %12327 = vst [vmem:[#allocation176_spill] sm:$0xff] %v9949_v37  ;;  %v12337_v37 = vld [vmem:[#allocation94_spill] sm:$0xff] }
 0x4ab   : > { %v4114_v51 = vsel %vm1893_vm2, %v9910_v22, %v9912_v18  ;;  %v4118_v40 = vsel %vm1895_vm3, %v9910_v22, %v9912_v18  ;;  %v4123_v44 = vsel %vm1897_vm4, %v9910_v22, %v9912_v18  ;;  %v4128_v0 = vsel %vm1899_vm5, %v9910_v22, %v9912_v18 }
 0x4ac   : > { %v9927_v56 = vsel %vm4115_vm10, %v9647_v41, %v4114_v51  ;;  %v4120_v32 = vsel %vm4119_vm11, %v9651_v33, %v4118_v40  ;;  %v4125_v20 = vsel %vm4124_vm12, %v9655_v9, %v4123_v44  ;;  %v4130_v41 = vsel %vm4129_vm13, %v9659_v12, %v4128_v0  ;;  %v12329_v51 = vld [vmem:[#allocation84_spill] sm:$0xff]  ;;  %v12330_v12 = vld [vmem:[#allocation86_spill] sm:$0xff] }
 0x4ad   : > { %12325 = vst [vmem:[#allocation174_spill] sm:$0xff] %v9927_v56  ;;  %v4185_v11 = vperm.slane %v9927_v56, 1  ;;  %v9937_v21 = vrot.slane %v4120_v32, 1  ;;  %v4133_v33 = vsel %vm1901_vm6, %v9910_v22, %v9912_v18  ;;  %v4139_v9 = vsel %vm4138_vm9, %v9912_v18, %v9910_v22  ;;  %v12331_v0 = vld [vmem:[#allocation22_spill] sm:$0xff] }
 0x4ae   : > { %v2359_v4 = vpop.f32.mrf.mxu3  ;;  %v9960_v32 = vrot.slane %v2332_v62, 6  ;;  %v12335_v62 = vld [vmem:[#allocation92_spill] sm:$0xff] }
 0x4af   : > { %12326 = vst [vmem:[#allocation175_spill] sm:$0xff] %v9937_v21  ;;  %v2360_v23 = vadd.f32 %v2359_v4, %v2346_v5  ;;  %v9952_v25 = vadd.f32 %v4185_v11, %v12328_v48  ;;  %v9955_v40 = vadd.f32 %v4185_v11, %v12329_v51  ;;  %v9958_v44 = vadd.f32 %v4185_v11, %v12330_v12  ;;  %v3397_v4 = vpop.f32.mrf.mxu2  ;;  %v12333_v48 = vld [vmem:[#allocation90_spill] sm:$0xff] }
 0x4b0   : > { %v9964_v50 = vadd.f32 %v4185_v11, %v12332_v30  ;;  %v4189_v1 = vperm.slane %v9937_v21, 1  ;;  %3654 = vmatmul.bf16.gmra.mxu0 %v8488_v29  ;;  %v9979_v30 = vrot.slane %v4125_v20, 2  ;;  %v3398_v11 = vadd.f32 %v3397_v4, %v3228_v17 }
 0x4b1   : > { %v9967_v5 = vrot.slane %v2360_v23, 5 }
 0x4b2   : > { %v9971_v51 = vadd.f32 %v4189_v1, %v12333_v48  ;;  %v9974_v12 = vadd.f32 %v4189_v1, %v12335_v62  ;;  %v9977_v16 = vadd.f32 %v4189_v1, %v12337_v37  ;;  %12339 = vst [vmem:[#allocation88_spill] sm:$0xff] %v9979_v30  ;;  %v10001_v62 = vadd.f32 %v4189_v1, %v8954_v8  ;;  %v12349_v1 = vld [vmem:[#allocation102_spill] sm:$0xff] }
 0x4b3   : > { %2789 = vmatmul.bf16.gmra.mxu3 %v12331_v0  ;;  %v4173_v23 = vsel %vm4138_vm9, %v9967_v5, %v9960_v32  ;;  %v3230_v0 = vpop.f32.mrf.mxu1  ;;  %v4177_v29 = vsel %vm4112_vm8, %v9960_v32, %v9967_v5  ;;  %v4181_v48 = vsel %vm1891_vm1, %v9960_v32, %v9967_v5  ;;  %vm4134_vm9 = vcmask 1045508  }
 0x4b4   : > { %12334 = vst [vmem:[#allocation82_spill] sm:$0xff] %v9971_v51  ;;  %v4174_v37 = vsel %vm4140_vm14, %v9692_v49, %v4173_v23  ;;  %v4178_v20 = vsel %vm4145_vm15, %v4177_v29, %v9695_v26  ;;  %v9996_v17 = vsel %vm4150_vm0, %v4181_v48, %v9698_v31  ;;  %v10007_v51 = vpop.f32.mrf.mxu0  ;;  %v10009_v49 = vrot.slane %v4130_v41, 3  ;;  %v12344_v26 = vld [vmem:[#allocation98_spill] sm:$0xff]  ;;  %v12346_v23 = vld [vmem:[#allocation100_spill] sm:$0xff]  ;;  %3788 = vmatmul.bf16.gmra.mxu1 %v12311_v61 }
 0x4b5   : > { %12336 = vst [vmem:[#allocation84_spill] sm:$0xff] %v9974_v12  ;;  %v9998_v4 = vrot.slane %v4174_v37, 5  ;;  %3957 = vmatmul.bf16.gmra.mxu2 %v8320_v52  ;;  %v4154_v52 = vsel %vm1893_vm2, %v9960_v32, %v9967_v5 }
 0x4b6   : > { %12338 = vst [vmem:[#allocation86_spill] sm:$0xff] %v9977_v16  ;;  %v4193_v16 = vperm.slane %v9979_v30, 1 }
 0x4b7   : > { %12340 = vst [vmem:[#allocation90_spill] sm:$0xff] %v9998_v4  ;;  %v10005_v12 = vperm.slane %v9998_v4, 1  ;;  %v4197_v4 = vperm.slane %v10009_v49, 1  ;;  %v3399_v41 = vpop.f32.mrf.mxu2 }
 0x4b8   : > { %12341 = vst [vmem:[#allocation92_spill] sm:$0xff] %v10007_v51  ;;  %v10012_v29 = vadd.f32 %v4193_v16, %v8975_v45  ;;  %v10015_v31 = vadd.f32 %v4193_v16, %v12344_v26  ;;  %v10018_v48 = vadd.f32 %v4193_v16, %v12346_v23  ;;  %v10024_v37 = vadd.f32 %v4193_v16, %v12349_v1  ;;  %v12350_v45 = vld [vmem:[#allocation104_spill] sm:$0xff]  ;;  %v12351_v26 = vld [vmem:[#allocation106_spill] sm:$0xff] }
 0x4b9   : > { %12342 = vst [vmem:[#allocation94_spill] sm:$0xff] %v10009_v49  ;;  %v10021_v8 = vadd.f32 %v10005_v12, %v3398_v11  ;;  %v3400_v51 = vadd.f32 %v3399_v41, %v3230_v0  ;;  %v12352_v23 = vld [vmem:[#allocation108_spill] sm:$0xff]  ;;  %v12353_v11 = vld [vmem:[#allocation110_spill] sm:$0xff]  ;;  %v4135_v16 = vsel %vm4134_vm9, %v9663_v46, %v4133_v33  ;;  %v4141_v41 = vsel %vm4140_vm14, %v9667_v2, %v4139_v9 }
 0x4ba   : > { %12343 = vst [vmem:[#allocation177_spill] sm:$0xff] %v10012_v29  ;;  %v10028_v29 = vadd.f32 %v4197_v4, %v12350_v45  ;;  %v10044_v0 = vrot.slane %v4135_v16, 4  ;;  %v12359_v46 = vld [vmem:[#allocation24_spill] sm:$0xff]  ;;  %v4144_v33 = vsel %vm4112_vm8, %v9910_v22, %v9912_v18  ;;  %v4149_v2 = vsel %vm1891_vm1, %v9910_v22, %v9912_v18 }
 0x4bb   : > { %12345 = vst [vmem:[#allocation98_spill] sm:$0xff] %v10015_v31  ;;  %v3233_v30 = vpop.f32.mrf.mxu1  ;;  %v10031_v31 = vadd.f32 %v4197_v4, %v12351_v26  ;;  %v10042_v1 = vadd.f32 %v10005_v12, %v3400_v51  ;;  %v10052_v26 = vrot.slane %v4178_v20, 6  ;;  %v4146_v22 = vsel %vm4145_vm15, %v4144_v33, %v9671_v14 }
 0x4bc   : > { %12347 = vst [vmem:[#allocation100_spill] sm:$0xff] %v10018_v48  ;;  %v10034_v48 = vadd.f32 %v4197_v4, %v12352_v23  ;;  %v10050_v45 = vpop.f32.mrf.mxu0  ;;  %v10055_v23 = vrot.slane %v4141_v41, 5  ;;  %v12361_v41 = vld [vmem:[#allocation33_spill] sm:$0xff]  ;;  %v10105_v33 = vrot.slane %v4146_v22, 6 }
 0x4bd   : > { %12348 = vst [vmem:[#allocation178_spill] sm:$0xff] %v10021_v8  ;;  %v10037_v8 = vadd.f32 %v4197_v4, %v12353_v11  ;;  %v4201_v4 = vperm.slane %v10044_v0, 1 }
 0x4be   : > { %12354 = vst [vmem:[#allocation102_spill] sm:$0xff] %v10042_v1  ;;  %v4205_v18 = vperm.slane %v10055_v23, 1  ;;  %v12362_v1 = vld [vmem:[#allocation49_spill] sm:$0xff] }
 0x4bf   : > { %12355 = vst [vmem:[#allocation104_spill] sm:$0xff] %v10044_v0  ;;  %v10068_v9 = vadd.f32 %v4201_v4, %v9122_v39  ;;  %v10071_v51 = vadd.f32 %v4201_v4, %v9134_v42  ;;  %v10074_v20 = vadd.f32 %v4201_v4, %v9158_v60  ;;  %v10077_v11 = vadd.f32 %v4201_v4, %v9174_v58  ;;  %v3402_v16 = vpop.f32.mrf.mxu2 }
 0x4c0   : > { %12356 = vst [vmem:[#allocation106_spill] sm:$0xff] %v10050_v45  ;;  %3659 = vmatmul.bf16.gmra.mxu0 %v12361_v41  ;;  %v3403_v45 = vadd.f32 %v3402_v16, %v3233_v30  ;;  %v10084_v39 = vperm.slane %v10052_v26, 1  ;;  %v10091_v58 = vadd.f32 %v4205_v18, %v9194_v53  ;;  %v10094_v4 = vadd.f32 %v4205_v18, %v9216_v54 }
 0x4c1   : > { %12357 = vst [vmem:[#allocation108_spill] sm:$0xff] %v10052_v26  ;;  %v10100_v14 = vadd.f32 %v4205_v18, %v9236_v57  ;;  %v10103_v30 = vadd.f32 %v4205_v18, %v9252_v6  ;;  %v4151_v53 = vsel %vm4150_vm0, %v4149_v2, %v9675_v27  ;;  %v10118_v57 = vsel %vm4115_vm10, %v9701_v15, %v4154_v52  ;;  %v12370_v52 = vld [vmem:[#allocation123_spill] sm:$0xff]  ;;  %v12372_v26 = vld [vmem:[#allocation125_spill] sm:$0xff] }
 0x4c2   : > { %12358 = vst [vmem:[#allocation110_spill] sm:$0xff] %v10055_v23  ;;  %v10097_v23 = vadd.f32 %v10084_v39, %v3403_v45  ;;  %v4209_v45 = vperm.slane %v10105_v33, 1  ;;  %v4157_v6 = vsel %vm1895_vm3, %v9960_v32, %v9967_v5  ;;  %v4161_v27 = vsel %vm1897_vm4, %v9960_v32, %v9967_v5 }
 0x4c3   : > { %2794 = vmatmul.bf16.gmra.mxu3 %v12359_v46  ;;  %12360 = vst [vmem:[#allocation179_spill] sm:$0xff] %v10074_v20  ;;  %v3235_v61 = vpop.f32.mrf.mxu1  ;;  %v10088_v20 = vperm.slane %v9927_v56, 0 }
 0x4c4   : > { %12363 = vst [vmem:[#allocation33_spill] sm:$0xff] %v10097_v23  ;;  %v10110_v16 = vpop.f32.mrf.mxu0  ;;  %v10114_v23 = vrot.slane %v4151_v53, 7  ;;  %v10130_v22 = vadd.f32 %v4209_v45, %v9281_v59  ;;  %v10133_v15 = vadd.f32 %v4209_v45, %v9309_v24  ;;  %3793 = vmatmul.bf16.gmra.mxu1 %v12317_v19  ;;  %v12376_v24 = vld [vmem:[#allocation128_spill] sm:$0xff]  ;;  %v4573_v19 = vmax.f32 %v9955_v40, 0.0 }
 0x4c5   : > { %12364 = vst [vmem:[#allocation49_spill] sm:$0xff] %v10100_v14  ;;  %v12374_v14 = vld [vmem:[#allocation51_spill] sm:$0xff]  ;;  %3962 = vmatmul.bf16.gmra.mxu2 %v12294_v34  ;;  %v4158_v40 = vsel %vm4119_vm11, %v9720_v55, %v4157_v6 }
 0x4c6   : > { %v2755_v42 = vpop.f32.mrf.mxu3  ;;  %12365 = vst [vmem:[#allocation180_spill] sm:$0xff] %v10103_v30  ;;  %v4213_v30 = vperm.slane %v10114_v23, 1 }
 0x4c7   : > { %v2925_v60 = vadd.f32 %v12362_v1, %v2755_v42  ;;  %12366 = vst [vmem:[#allocation181_spill] sm:$0xff] %v10105_v33  ;;  %v4569_v42 = vmax.f32 %v9952_v25, 0.0  ;;  %v4165_v25 = vsel %vm1899_vm5, %v9960_v32, %v9967_v5  ;;  %v3404_v18 = vpop.f32.mrf.mxu2  ;;  %v10139_v33 = vadd.f32 %v4209_v45, %v12372_v26 }
 0x4c8   : > { %12367 = vst [vmem:[#allocation182_spill] sm:$0xff] %v10110_v16 }
 0x4c9   : > { %v4312_v1 = vadd.f32 %v10088_v20, %v2925_v60  ;;  %12368 = vst [vmem:[#allocation183_spill] sm:$0xff] %v10114_v23  ;;  %v10136_v60 = vadd.f32 %v4209_v45, %v12370_v52  ;;  %v10149_v52 = vadd.f32 %v4213_v30, %v12376_v24  ;;  %v12385_v24 = vld [vmem:[#allocation26_spill] sm:$0xff] }
 0x4ca   : > { %12369 = vst [vmem:[#allocation184_spill] sm:$0xff] %v10118_v57 }
 0x4cb   : > { %v4568_v54 = vmax.f32 %v4312_v1, 0.0  ;;  %12371 = vst [vmem:[#allocation123_spill] sm:$0xff] %v10136_v60  ;;  %v3405_v1 = vadd.f32 %v3404_v18, %v3235_v61  ;;  %v3238_v16 = vpop.f32.mrf.mxu1  ;;  %v12378_v61 = vld [vmem:[#allocation130_spill] sm:$0xff]  ;;  %v12380_v60 = vld [vmem:[#allocation133_spill] sm:$0xff] }
 0x4cc   : > { %12373 = vst [vmem:[#allocation125_spill] sm:$0xff] %v10139_v33  ;;  %v10152_v18 = vadd.f32 %v4213_v30, %v12378_v61  ;;  %v10155_v26 = vadd.f32 %v4213_v30, %v12380_v60  ;;  %v10158_v45 = vpop.f32.mrf.mxu0  ;;  %v12393_v33 = vld [vmem:[#allocation53_spill] sm:$0xff] }
 0x4cd   : > { %v4824_v2 = vpack.c.bf16 %v4569_v42, %v4568_v54  ;;  %v10144_v42 = vadd.f32 %v10084_v39, %v3405_v1  ;;  %12377 = vst [vmem:[#allocation128_spill] sm:$0xff] %v10149_v52 }
 0x4ce   : > { %v2757_v53 = vpop.f32.mrf.mxu3  ;;  %12379 = vst [vmem:[#allocation130_spill] sm:$0xff] %v10152_v18  ;;  %v12388_v18 = vld [vmem:[#allocation139_spill] sm:$0xff] }
 0x4cf   : > { %v2927_v54 = vadd.f32 %v12374_v14, %v2757_v53  ;;  %12375 = vst [vmem:[#allocation51_spill] sm:$0xff] %v10144_v42  ;;  %v12383_v14 = vld [vmem:[#allocation135_spill] sm:$0xff]  ;;  %v4217_v53 = vperm.slane %v10118_v57, 1  ;;  %v12386_v42 = vld [vmem:[#allocation137_spill] sm:$0xff]  ;;  %v3407_v52 = vpop.f32.mrf.mxu2  ;;  %v5145_v23 = vunpack.c.h.b16 %v4824_v2 }
 0x4d0   : > { %12381 = vst [vmem:[#allocation133_spill] sm:$0xff] %v10155_v26  ;;  %v10161_v1 = vadd.f32 %v4213_v30, %v12383_v14  ;;  %v12390_v26 = vld [vmem:[#allocation13_spill] sm:$0xff]  ;;  %v12391_v30 = vld [vmem:[#allocation35_spill] sm:$0xff]  ;;  %v12392_v14 = vld [vmem:[#allocation142_spill] sm:$0xff] }
 0x4d1   : > { %v4316_v59 = vadd.f32 %v10088_v20, %v2927_v54  ;;  %12382 = vst [vmem:[#allocation185_spill] sm:$0xff] %v10158_v45  ;;  %v10167_v61 = vadd.f32 %v4217_v53, %v12386_v42  ;;  %v10170_v60 = vadd.f32 %v4217_v53, %v12388_v18  ;;  %v10173_v34 = vadd.f32 %v4217_v53, %v12390_v26 }
 0x4d2   : > { %12384 = vst [vmem:[#allocation135_spill] sm:$0xff] %v10161_v1  ;;  %3664 = vmatmul.bf16.gmra.mxu0 %v12391_v30  ;;  %v10177_v57 = vadd.f32 %v4217_v53, %v12392_v14  ;;  %v3408_v1 = vadd.f32 %v3407_v52, %v3238_v16  ;;  %v4162_v53 = vsel %vm4124_vm12, %v9723_v43, %v4161_v27  ;;  %v12398_v27 = vld [vmem:[#allocation15_spill] sm:$0xff] }
 0x4d3   : > { %v4572_v54 = vmax.f32 %v4316_v59, 0.0  ;;  %2799 = vmatmul.bf16.gmra.mxu3 %v12385_v24  ;;  %12387 = vst [vmem:[#allocation137_spill] sm:$0xff] %v10167_v61  ;;  %v5144_v59 = vunpack.c.l.b16 %v4824_v2  ;;  %v3240_v61 = vpop.f32.mrf.mxu1  ;;  %v10194_v6 = vrot.slane %v4162_v53, 2  ;;  %v4166_v43 = vsel %vm4129_vm13, %v9726_v3, %v4165_v25 }
 0x4d4   : > { %12389 = vst [vmem:[#allocation139_spill] sm:$0xff] %v10170_v60  ;;  %v10196_v2 = vpop.f32.mrf.mxu0  ;;  %3798 = vmatmul.bf16.gmra.mxu1 %v12322_v47  ;;  %v12423_v47 = vld [vmem:[#allocation57_spill] sm:$0xff] }
 0x4d5   : > { %v4826_v45 = vpack.c.bf16 %v4573_v19, %v4572_v54  ;;  %v10183_v19 = vadd.f32 %v10084_v39, %v3408_v1  ;;  %v10185_v54 = vrot.slane %v4158_v40, 1  ;;  %12397 = vst [vmem:[#allocation53_spill] sm:$0xff] %v10196_v2  ;;  %v4225_v1 = vperm.slane %v10194_v6, 1  ;;  %3967 = vmatmul.bf16.gmra.mxu2 %v12299_v28 }
 0x4d6   : > { %v2760_v42 = vpop.f32.mrf.mxu3  ;;  %v10255_v28 = vadd.f32 %v10005_v12, %v9903_v13 }
 0x4d7   : > { %v5148_v18 = vunpack.c.l.b16 %v4826_v45  ;;  %v5149_v60 = vunpack.c.h.b16 %v4826_v45  ;;  %v2930_v26 = vadd.f32 %v12393_v33, %v2760_v42  ;;  %12394 = vst [vmem:[#allocation13_spill] sm:$0xff] %v10183_v19  ;;  %v4221_v33 = vperm.slane %v10185_v54, 1 }
 0x4d8   : > { %12395 = vst [vmem:[#allocation35_spill] sm:$0xff] %v10185_v54  ;;  %v4577_v45 = vmax.f32 %v9958_v44, 0.0  ;;  %v3409_v44 = vpop.f32.mrf.mxu2  ;;  %v10218_v53 = vadd.f32 %v4225_v1, %v9717_v10  ;;  %v10221_v3 = vadd.f32 %v4225_v1, %v9757_v38  ;;  %v10224_v25 = vadd.f32 %v4225_v1, %v9793_v35 }
 0x4d9   : > { %v10189_v14 = vpack.c.b16 %v5148_v18, %v5144_v59  ;;  %v10191_v55 = vpack.c.b16 %v5149_v60, %v5145_v23  ;;  %v4320_v16 = vadd.f32 %v10088_v20, %v2930_v26  ;;  %v10204_v40 = vadd.f32 %v4221_v33, %v12398_v27  ;;  %v12399_v23 = vld [vmem:[#allocation145_spill] sm:$0xff]  ;;  %v12400_v59 = vld [vmem:[#allocation147_spill] sm:$0xff]  ;;  %12412 = vst [vmem:[#allocation189_spill] sm:$0xff] %v10255_v28 }
 0x4da   : > { %v10207_v60 = vadd.f32 %v4221_v33, %v12399_v23  ;;  %v10210_v42 = vadd.f32 %v4221_v33, %v12400_v59  ;;  %v10213_v18 = vadd.f32 %v4221_v33, %v9680_v63  ;;  %12401 = vst [vmem:[#allocation15_spill] sm:$0xff] %v10221_v3  ;;  %v12403_v59 = vld [vmem:[#allocation55_spill] sm:$0xff]  ;;  %v10231_v33 = vadd.f32 %v4225_v1, %v9821_v7 }
 0x4db   : > { %12396 = vst [vmem:[#allocation142_spill] sm:$0xff] %v10189_v14  ;;  %v4576_v52 = vmax.f32 %v4320_v16, 0.0  ;;  %v3410_v16 = vadd.f32 %v3409_v44, %v3240_v61  ;;  %v3243_v23 = vpop.f32.mrf.mxu1  ;;  %v4169_v38 = vsel %vm1901_vm6, %v9960_v32, %v9967_v5  ;;  %v4581_v7 = vmax.f32 %v9964_v50, 0.0  ;;  %v7305_v44 = vld [vmem:[%s11942_s5 + $0x88] sm:$0xf] }
 0x4dc   : > { %12402 = vst [vmem:[#allocation145_spill] sm:$0xff] %v10224_v25  ;;  %v10259_v32 = vadd.f32 %v10005_v12, %v9914_v36  ;;  %v12419_v36 = vld [vmem:[#allocation161_spill] sm:$0xff] }
 0x4dd   : > { %v10215_v26 = vpack.c.bf16 %v4577_v45, %v4576_v52  ;;  %v10228_v63 = vadd.f32 %v10084_v39, %v3410_v16  ;;  %12405 = vst [vmem:[#allocation55_spill] sm:$0xff] %v10231_v33  ;;  %v10233_v52 = vrot.slane %v4166_v43, 3  ;;  %v10241_v35 = vpop.f32.mrf.mxu0  ;;  %v10244_v39 = vrot.slane %v9996_v17, 7  ;;  %v12409_v45 = vld [vmem:[#allocation28_spill] sm:$0xff]  ;;  %v12414_v17 = vld [vmem:[#allocation37_spill] sm:$0xff]  ;;  %v12461_v33 = vld [vmem:[#allocation67_spill] sm:$0xff] }
 0x4de   : > { %v2762_v27 = vpop.f32.mrf.mxu3  ;;  %12407 = vst [vmem:[#allocation187_spill] sm:$0xff] %v10241_v35  ;;  %v7719_v16 = vld [vmem:[%s11942_s5 + $0x94] sm:$0xf0]  ;;  %v12421_v35 = vld [vmem:[#allocation163_spill] sm:$0xff] }
 0x4df   : > { %v2932_v14 = vadd.f32 %v12403_v59, %v2762_v27  ;;  %12404 = vst [vmem:[#allocation147_spill] sm:$0xff] %v10228_v63  ;;  %v12415_v27 = vld [vmem:[#allocation21_spill] sm:$0xff]  ;;  %v12417_v59 = vld [vmem:[#allocation158_spill] sm:$0xff] }
 0x4e0   : > { %12406 = vst [vmem:[#allocation186_spill] sm:$0xff] %v10233_v52  ;;  %v3412_v50 = vpop.f32.mrf.mxu2 }
 0x4e1   : > { %v4324_v10 = vadd.f32 %v10088_v20, %v2932_v14  ;;  %12408 = vst [vmem:[#allocation188_spill] sm:$0xff] %v10244_v39  ;;  %v4229_v20 = vperm.slane %v10233_v52, 1  ;;  %v12410_v14 = vld [vmem:[#allocation152_spill] sm:$0xff]  ;;  %v12448_v52 = vld [vmem:[#allocation63_spill] sm:$0xff] }
 0x4e2   : > { %v4170_v1 = vsel %vm4134_vm9, %v12410_v14, %v4169_v38  ;;  %12413 = vst [vmem:[#allocation190_spill] sm:$0xff] %v10259_v32  ;;  %3669 = vmatmul.bf16.gmra.mxu0 %v12414_v17  ;;  %v3413_v38 = vadd.f32 %v3412_v50, %v3243_v23  ;;  %v5153_v23 = vunpack.c.h.b16 %v10215_v26 }
 0x4e3   : > { %v4580_v61 = vmax.f32 %v4324_v10, 0.0  ;;  %2804 = vmatmul.bf16.gmra.mxu3 %v12409_v45  ;;  %v10251_v43 = vrot.slane %v4170_v1, 4  ;;  %v10271_v13 = vadd.f32 %v4229_v20, %v12415_v27  ;;  %v10274_v10 = vadd.f32 %v4229_v20, %v12417_v59  ;;  %v3245_v14 = vpop.f32.mrf.mxu1 }
 0x4e4   : > { %v10277_v12 = vadd.f32 %v4229_v20, %v12419_v36  ;;  %v7306_v1 = vor.u32 %v7719_v16, %v7305_v44  ;;  %v10281_v2 = vadd.f32 %v4229_v20, %v12421_v35  ;;  %v4188_v27 = vperm.slane %v9937_v21, 0  ;;  %v12426_v44 = vld [vmem:[#allocation165_spill] sm:$0xff]  ;;  %v12428_v35 = vld [vmem:[#allocation167_spill] sm:$0xff] }
 0x4e5   : > { %12411 = vst [vmem:[#allocation152_spill] sm:$0xff] %v10251_v43  ;;  %v10261_v5 = vpack.c.bf16 %v4581_v7, %v4580_v61  ;;  %v4245_v61 = vperm.slane %v10244_v39, 1  ;;  %v4233_v59 = vperm.slane %v10251_v43, 1  ;;  %v10288_v32 = vpop.f32.mrf.mxu0  ;;  %v12433_v39 = vld [vmem:[#allocation171_spill] sm:$0xff] }
 0x4e6   : > { %12416 = vst [vmem:[#allocation37_spill] sm:$0xff] %v10271_v13  ;;  %v2765_v7 = vpop.f32.mrf.mxu3  ;;  %3425 = vmatpush.bf16.msra.mxu3 %v7306_v1 }
 0x4e7   : > { %12418 = vst [vmem:[#allocation21_spill] sm:$0xff] %v10274_v10  ;;  %v2935_v63 = vadd.f32 %v12423_v47, %v2765_v7  ;;  %v10285_v19 = vadd.f32 %v4245_v61, %v3413_v38  ;;  %v5157_v50 = vunpack.c.h.b16 %v10261_v5  ;;  %v10293_v16 = vadd.f32 %v4233_v59, %v12426_v44  ;;  %v12430_v7 = vld [vmem:[#allocation82_spill] sm:$0xff] }
 0x4e8   : > { %12420 = vst [vmem:[#allocation158_spill] sm:$0xff] %v10277_v12  ;;  %v10296_v20 = vadd.f32 %v4233_v59, %v12428_v35  ;;  %v4585_v38 = vmax.f32 %v12430_v7, 0.0  ;;  %v3414_v43 = vpop.f32.mrf.mxu2  ;;  %v12436_v12 = vld [vmem:[#allocation59_spill] sm:$0xff]  ;;  %v12438_v7 = vld [vmem:[#allocation22_spill] sm:$0xff] }
 0x4e9   : > { %12422 = vst [vmem:[#allocation161_spill] sm:$0xff] %v10281_v2  ;;  %v4328_v36 = vadd.f32 %v4188_v27, %v2935_v63  ;;  %v10303_v63 = vadd.f32 %v4233_v59, %v12433_v39  ;;  %v3415_v2 = vadd.f32 %v3414_v43, %v3245_v14  ;;  %3803 = vmatmul.bf16.gmra.mxu1 %v12438_v7  ;;  %v12443_v14 = vld [vmem:[#allocation39_spill] sm:$0xff] }
 0x4ea   : > { %12424 = vst [vmem:[#allocation163_spill] sm:$0xff] %v10285_v19  ;;  %v12431_v19 = vld [vmem:[#allocation169_spill] sm:$0xff] }
 0x4eb   : > { %12425 = vst [vmem:[#allocation57_spill] sm:$0xff] %v10288_v32  ;;  %v4584_v47 = vmax.f32 %v4328_v36, 0.0  ;;  %v10300_v1 = vadd.f32 %v4233_v59, %v12431_v19  ;;  %v10305_v32 = vpack.c.b16 %v5157_v50, %v5153_v23  ;;  %v12439_v19 = vld [vmem:[#allocation23_spill] sm:$0xff]  ;;  %v12441_v59 = vld [vmem:[#allocation84_spill] sm:$0xff]  ;;  %v12442_v50 = vld [vmem:[#allocation30_spill] sm:$0xff] }
 0x4ec   : > { %12427 = vst [vmem:[#allocation165_spill] sm:$0xff] %v10293_v16  ;;  %v3248_v16 = vpop.f32.mrf.mxu1  ;;  %3972 = vmatmul.bf16.gmra.mxu2 %v12439_v19  ;;  %v4589_v23 = vmax.f32 %v12441_v59, 0.0 }
 0x4ed   : > { %12429 = vst [vmem:[#allocation167_spill] sm:$0xff] %v10296_v20  ;;  %v10307_v28 = vpack.c.bf16 %v4585_v38, %v4584_v47  ;;  %v10310_v20 = vadd.f32 %v4245_v61, %v3415_v2 }
 0x4ee   : > { %12432 = vst [vmem:[#allocation82_spill] sm:$0xff] %v10300_v1  ;;  %v2767_v44 = vpop.f32.mrf.mxu3  ;;  %v10314_v1 = vpop.f32.mrf.mxu0 }
 0x4ef   : > { %12434 = vst [vmem:[#allocation169_spill] sm:$0xff] %v10303_v63  ;;  %v2937_v35 = vadd.f32 %v12436_v12, %v2767_v44  ;;  %v12444_v44 = vld [vmem:[#allocation61_spill] sm:$0xff] }
 0x4f0   : > { %12435 = vst [vmem:[#allocation171_spill] sm:$0xff] %v10305_v32  ;;  %v3417_v43 = vpop.f32.mrf.mxu2 }
 0x4f1   : > { %12437 = vst [vmem:[#allocation59_spill] sm:$0xff] %v10310_v20  ;;  %v4332_v36 = vadd.f32 %v4188_v27, %v2937_v35  ;;  %v3418_v12 = vadd.f32 %v3417_v43, %v3248_v16 }
 0x4f2   : > { %12440 = vst [vmem:[#allocation23_spill] sm:$0xff] %v10314_v1  ;;  %3674 = vmatmul.bf16.gmra.mxu0 %v12443_v14  ;;  %v12447_v1 = vld [vmem:[#allocation86_spill] sm:$0xff] }
 0x4f3   : > { %v4588_v39 = vmax.f32 %v4332_v36, 0.0  ;;  %2809 = vmatmul.bf16.gmra.mxu3 %v12442_v50  ;;  %v10322_v7 = vadd.f32 %v4245_v61, %v3418_v12  ;;  %v4593_v59 = vmax.f32 %v12447_v1, 0.0 }
 0x4f4   : > { %v3250_v38 = vpop.f32.mrf.mxu1 }
 0x4f5   : > { %v10318_v47 = vpack.c.bf16 %v4589_v23, %v4588_v39  ;;  %12445 = vst [vmem:[#allocation84_spill] sm:$0xff] %v10322_v7 }
 0x4f6   : > { %v2770_v2 = vpop.f32.mrf.mxu3  ;;  %v10324_v20 = vpop.f32.mrf.mxu0 }
 0x4f7   : > { %v2940_v35 = vadd.f32 %v12444_v44, %v2770_v2  ;;  %12446 = vst [vmem:[#allocation39_spill] sm:$0xff] %v10324_v20  ;;  %v5161_v2 = vunpack.c.h.b16 %v10307_v28  ;;  %v5165_v12 = vunpack.c.h.b16 %v10318_v47 }
 0x4f8   : > { %v3419_v39 = vpop.f32.mrf.mxu2 }
 0x4f9   : > { %v4336_v19 = vadd.f32 %v4188_v27, %v2940_v35  ;;  %v3420_v23 = vadd.f32 %v3419_v39, %v3250_v38  ;;  %3808 = vmatmul.bf16.gmra.mxu1 %v12359_v46  ;;  %v12450_v35 = vld [vmem:[#allocation25_spill] sm:$0xff]  ;;  %v5156_v39 = vunpack.c.l.b16 %v10261_v5 }
 0x4fb   : > { %v4592_v36 = vmax.f32 %v4336_v19, 0.0  ;;  %v10330_v43 = vadd.f32 %v4245_v61, %v3420_v23  ;;  %v10338_v19 = vpack.c.b16 %v5165_v12, %v5161_v2  ;;  %v12454_v61 = vld [vmem:[#allocation41_spill] sm:$0xff] }
 0x4fc   : > { %v3769_v13 = vpop.f32.mrf.mxu1  ;;  %3977 = vmatmul.bf16.gmra.mxu2 %v12450_v35  ;;  %v12455_v12 = vld [vmem:[#allocation65_spill] sm:$0xff] }
 0x4fd   : > { %v10327_v63 = vpack.c.bf16 %v4593_v59, %v4592_v36  ;;  %12449 = vst [vmem:[#allocation61_spill] sm:$0xff] %v10330_v43  ;;  %v4597_v36 = vmax.f32 %v10001_v62, 0.0  ;;  %v12453_v59 = vld [vmem:[#allocation32_spill] sm:$0xff] }
 0x4fe   : > { %v2772_v10 = vpop.f32.mrf.mxu3  ;;  %v10336_v1 = vpop.f32.mrf.mxu0  ;;  %12452 = vst [vmem:[#allocation63_spill] sm:$0xff] %v10338_v19 }
 0x4ff   : > { %v2942_v16 = vadd.f32 %v12448_v52, %v2772_v10  ;;  %12451 = vst [vmem:[#allocation86_spill] sm:$0xff] %v10336_v1  ;;  %v12456_v1 = vld [vmem:[#allocation88_spill] sm:$0xff] }
 0x500   : > { %v3938_v10 = vpop.f32.mrf.mxu2  ;;  %v4192_v62 = vperm.slane %v12456_v1, 0 }
 0x501   : > { %v4340_v44 = vadd.f32 %v4188_v27, %v2942_v16  ;;  %v5152_v27 = vunpack.c.l.b16 %v10215_v26  ;;  %v3939_v23 = vadd.f32 %v3938_v10, %v3769_v13  ;;  %v4187_v16 = vperm.slane %v9927_v56, 3  ;;  %v12460_v26 = vld [vmem:[#allocation177_spill] sm:$0xff] }
 0x502   : > { %3679 = vmatmul.bf16.gmra.mxu0 %v12454_v61  ;;  %v4601_v7 = vmax.f32 %v12460_v26, 0.0 }
 0x503   : > { %v4596_v38 = vmax.f32 %v4340_v44, 0.0  ;;  %2814 = vmatmul.bf16.gmra.mxu3 %v12453_v59  ;;  %v10350_v20 = vpack.c.b16 %v5156_v39, %v5152_v27  ;;  %v5169_v27 = vunpack.c.h.b16 %v10327_v63 }
 0x504   : > { %v3771_v2 = vpop.f32.mrf.mxu1 }
 0x505   : > { %v10342_v52 = vpack.c.bf16 %v4597_v36, %v4596_v38  ;;  %12457 = vst [vmem:[#allocation25_spill] sm:$0xff] %v10350_v20  ;;  %v10352_v38 = vadd.f32 %v4187_v16, %v3939_v23  ;;  %v5164_v20 = vunpack.c.l.b16 %v10318_v47 }
 0x506   : > { %v2775_v35 = vpop.f32.mrf.mxu3  ;;  %v10354_v46 = vpop.f32.mrf.mxu0 }
 0x507   : > { %v2945_v44 = vadd.f32 %v12455_v12, %v2775_v35  ;;  %12458 = vst [vmem:[#allocation41_spill] sm:$0xff] %v10352_v38  ;;  %v5173_v39 = vunpack.c.h.b16 %v10342_v52 }
 0x508   : > { %12459 = vst [vmem:[#allocation65_spill] sm:$0xff] %v10354_v46  ;;  %v3940_v13 = vpop.f32.mrf.mxu2 }
 0x509   : > { %v4344_v36 = vadd.f32 %v4192_v62, %v2945_v44  ;;  %v3941_v10 = vadd.f32 %v3940_v13, %v3771_v2  ;;  %3813 = vmatmul.bf16.gmra.mxu1 %v12385_v24  ;;  %v12463_v44 = vld [vmem:[#allocation27_spill] sm:$0xff]  ;;  %v12466_v2 = vld [vmem:[#allocation98_spill] sm:$0xff] }
 0x50a   : > { %v4605_v26 = vmax.f32 %v12466_v2, 0.0  ;;  %v12467_v13 = vld [vmem:[#allocation34_spill] sm:$0xff] }
 0x50b   : > { %v4600_v43 = vmax.f32 %v4344_v36, 0.0  ;;  %v10360_v12 = vadd.f32 %v4187_v16, %v3941_v10  ;;  %v12468_v10 = vld [vmem:[#allocation44_spill] sm:$0xff] }
 0x50c   : > { %v3774_v19 = vpop.f32.mrf.mxu1  ;;  %3982 = vmatmul.bf16.gmra.mxu2 %v12463_v44 }
 0x50d   : > { %v10357_v5 = vpack.c.bf16 %v4601_v7, %v4600_v43  ;;  %12462 = vst [vmem:[#allocation177_spill] sm:$0xff] %v10360_v12  ;;  %v10368_v7 = vpack.c.b16 %v5173_v39, %v5169_v27 }
 0x50e   : > { %v2777_v56 = vpop.f32.mrf.mxu3  ;;  %v10366_v36 = vpop.f32.mrf.mxu0 }
 0x50f   : > { %v2947_v35 = vadd.f32 %v12461_v33, %v2777_v56  ;;  %12464 = vst [vmem:[#allocation67_spill] sm:$0xff] %v10366_v36  ;;  %v12469_v36 = vld [vmem:[#allocation69_spill] sm:$0xff] }
 0x510   : > { %12465 = vst [vmem:[#allocation27_spill] sm:$0xff] %v10368_v7  ;;  %v3943_v33 = vpop.f32.mrf.mxu2 }
 0x511   : > { %v4348_v23 = vadd.f32 %v4192_v62, %v2947_v35  ;;  %v5160_v35 = vunpack.c.l.b16 %v10307_v28  ;;  %v3944_v46 = vadd.f32 %v3943_v33, %v3774_v19  ;;  %v12473_v33 = vld [vmem:[#allocation71_spill] sm:$0xff] }
 0x512   : > { %3684 = vmatmul.bf16.gmra.mxu0 %v12468_v10 }
 0x513   : > { %v4604_v43 = vmax.f32 %v4348_v23, 0.0  ;;  %2819 = vmatmul.bf16.gmra.mxu3 %v12467_v13  ;;  %v10378_v39 = vpack.c.b16 %v5164_v20, %v5160_v35  ;;  %v10380_v23 = vadd.f32 %v4187_v16, %v3944_v46  ;;  %v12475_v46 = vld [vmem:[#allocation29_spill] sm:$0xff] }
 0x514   : > { %v3776_v24 = vpop.f32.mrf.mxu1 }
 0x515   : > { %v10372_v56 = vpack.c.bf16 %v4605_v26, %v4604_v43  ;;  %12470 = vst [vmem:[#allocation98_spill] sm:$0xff] %v10378_v39  ;;  %v12472_v26 = vld [vmem:[#allocation100_spill] sm:$0xff] }
 0x516   : > { %v2780_v44 = vpop.f32.mrf.mxu3  ;;  %v10382_v12 = vpop.f32.mrf.mxu0  ;;  %v4609_v38 = vmax.f32 %v12472_v26, 0.0 }
 0x517   : > { %v2950_v27 = vadd.f32 %v12469_v36, %v2780_v44  ;;  %12471 = vst [vmem:[#allocation44_spill] sm:$0xff] %v10382_v12  ;;  %v4613_v44 = vmax.f32 %v10024_v37, 0.0  ;;  %v5168_v37 = vunpack.c.l.b16 %v10327_v63 }
 0x518   : > { %v3945_v28 = vpop.f32.mrf.mxu2 }
 0x519   : > { %v4352_v2 = vadd.f32 %v4192_v62, %v2950_v27  ;;  %v3946_v25 = vadd.f32 %v3945_v28, %v3776_v24  ;;  %3818 = vmatmul.bf16.gmra.mxu1 %v12409_v45  ;;  %v5177_v24 = vunpack.c.h.b16 %v10357_v5  ;;  %v4191_v28 = vperm.slane %v9937_v21, 3  ;;  %v12483_v21 = vld [vmem:[#allocation75_spill] sm:$0xff] }
 0x51b   : > { %v4608_v43 = vmax.f32 %v4352_v2, 0.0  ;;  %v10388_v3 = vadd.f32 %v4187_v16, %v3946_v25  ;;  %v7289_v25 = vld [vmem:[%s11942_s5 + $0x68] sm:$0xf]  ;;  %v5181_v16 = vunpack.c.h.b16 %v10372_v56 }
 0x51c   : > { %v3779_v19 = vpop.f32.mrf.mxu1  ;;  %3987 = vmatmul.bf16.gmra.mxu2 %v12475_v46  ;;  %v12479_v46 = vld [vmem:[#allocation73_spill] sm:$0xff] }
 0x51d   : > { %v10385_v7 = vpack.c.bf16 %v4609_v38, %v4608_v43  ;;  %12474 = vst [vmem:[#allocation69_spill] sm:$0xff] %v10388_v3  ;;  %v12477_v38 = vld [vmem:[#allocation36_spill] sm:$0xff]  ;;  %v12478_v43 = vld [vmem:[#allocation46_spill] sm:$0xff]  ;;  %v10412_v39 = vpack.c.b16 %v5181_v16, %v5177_v24  ;;  %v12492_v3 = vld [vmem:[#allocation79_spill] sm:$0xff] }
 0x51e   : > { %v2782_v47 = vpop.f32.mrf.mxu3  ;;  %v10392_v36 = vpop.f32.mrf.mxu0 }
 0x51f   : > { %v2952_v32 = vadd.f32 %v12473_v33, %v2782_v47  ;;  %12476 = vst [vmem:[#allocation100_spill] sm:$0xff] %v10392_v36 }
 0x520   : > { %v3948_v2 = vpop.f32.mrf.mxu2 }
 0x521   : > { %v4356_v20 = vadd.f32 %v4192_v62, %v2952_v32  ;;  %v7715_v32 = vld [vmem:[%s11942_s5 + $0x74] sm:$0xf0]  ;;  %v5172_v62 = vunpack.c.l.b16 %v10342_v52  ;;  %v3949_v26 = vadd.f32 %v3948_v2, %v3779_v19  ;;  %v4617_v19 = vmax.f32 %v10028_v29, 0.0 }
 0x522   : > { %3689 = vmatmul.bf16.gmra.mxu0 %v12478_v43  ;;  %v4621_v29 = vmax.f32 %v10031_v31, 0.0 }
 0x523   : > { %v4612_v35 = vmax.f32 %v4356_v20, 0.0  ;;  %2824 = vmatmul.bf16.gmra.mxu3 %v12477_v38  ;;  %v7290_v20 = vor.u32 %v7715_v32, %v7289_v25  ;;  %v10414_v36 = vpack.c.b16 %v5172_v62, %v5168_v37  ;;  %v10416_v12 = vadd.f32 %v4191_v28, %v3949_v26  ;;  %v12485_v62 = vld [vmem:[#allocation31_spill] sm:$0xff] }
 0x524   : > { %v3781_v33 = vpop.f32.mrf.mxu1 }
 0x525   : > { %v10397_v27 = vpack.c.bf16 %v4613_v44, %v4612_v35  ;;  %v4196_v44 = vperm.slane %v10009_v49, 0  ;;  %12480 = vst [vmem:[#allocation71_spill] sm:$0xff] %v10414_v36  ;;  %3426 = vmatpush.bf16.msra.mxu3 %v7290_v20 }
 0x526   : > { %v2785_v47 = vpop.f32.mrf.mxu3  ;;  %12481 = vst [vmem:[#allocation29_spill] sm:$0xff] %v10416_v12  ;;  %v10418_v45 = vpop.f32.mrf.mxu0 }
 0x527   : > { %v2955_v35 = vadd.f32 %v12479_v46, %v2785_v47  ;;  %12482 = vst [vmem:[#allocation46_spill] sm:$0xff] %v10418_v45 }
 0x528   : > { %v3950_v25 = vpop.f32.mrf.mxu2 }
 0x529   : > { %v4360_v63 = vadd.f32 %v4196_v44, %v2955_v35  ;;  %v3951_v32 = vadd.f32 %v3950_v25, %v3781_v33  ;;  %3823 = vmatmul.bf16.gmra.mxu1 %v12442_v50  ;;  %v12487_v35 = vld [vmem:[#allocation38_spill] sm:$0xff] }
 0x52b   : > { %v4616_v52 = vmax.f32 %v4360_v63, 0.0  ;;  %v10424_v16 = vadd.f32 %v4191_v28, %v3951_v32 }
 0x52c   : > { %v3784_v46 = vpop.f32.mrf.mxu1  ;;  %3992 = vmatmul.bf16.gmra.mxu2 %v12485_v62  ;;  %v12489_v62 = vld [vmem:[#allocation77_spill] sm:$0xff] }
 0x52d   : > { %v10421_v2 = vpack.c.bf16 %v4617_v19, %v4616_v52  ;;  %12484 = vst [vmem:[#allocation73_spill] sm:$0xff] %v10424_v16  ;;  %v12488_v52 = vld [vmem:[#allocation48_spill] sm:$0xff]  ;;  %v5180_v19 = vunpack.c.l.b16 %v10372_v56  ;;  %v4625_v56 = vmax.f32 %v10034_v48, 0.0  ;;  %v4629_v48 = vmax.f32 %v10037_v8, 0.0 }
 0x52e   : > { %v2787_v47 = vpop.f32.mrf.mxu3  ;;  %v10428_v26 = vpop.f32.mrf.mxu0 }
 0x52f   : > { %v2957_v24 = vadd.f32 %v12483_v21, %v2787_v47  ;;  %12486 = vst [vmem:[#allocation75_spill] sm:$0xff] %v10428_v26  ;;  %v5176_v21 = vunpack.c.l.b16 %v10357_v5 }
 0x530   : > { %v3953_v33 = vpop.f32.mrf.mxu2 }
 0x531   : > { %v4364_v37 = vadd.f32 %v4196_v44, %v2957_v24  ;;  %v3954_v25 = vadd.f32 %v3953_v33, %v3784_v46  ;;  %v5185_v24 = vunpack.c.h.b16 %v10385_v7  ;;  %v10440_v36 = vpack.c.b16 %v5180_v19, %v5176_v21 }
 0x532   : > { %3694 = vmatmul.bf16.gmra.mxu0 %v12488_v52 }
 0x533   : > { %v4620_v20 = vmax.f32 %v4364_v37, 0.0  ;;  %2829 = vmatmul.bf16.gmra.mxu3 %v12487_v35  ;;  %v5189_v37 = vunpack.c.h.b16 %v10397_v27  ;;  %12490 = vst [vmem:[#allocation31_spill] sm:$0xff] %v10440_v36 }
 0x534   : > { %v3786_v47 = vpop.f32.mrf.mxu1 }
 0x535   : > { %v10432_v63 = vpack.c.bf16 %v4621_v29, %v4620_v20  ;;  %v10442_v20 = vadd.f32 %v4191_v28, %v3954_v25  ;;  %v10444_v29 = vpack.c.b16 %v5189_v37, %v5185_v24  ;;  %v12494_v24 = vld [vmem:[#allocation40_spill] sm:$0xff] }
 0x536   : > { %v2790_v32 = vpop.f32.mrf.mxu3  ;;  %v10446_v45 = vpop.f32.mrf.mxu0 }
 0x537   : > { %v2960_v31 = vadd.f32 %v12489_v62, %v2790_v32  ;;  %12491 = vst [vmem:[#allocation48_spill] sm:$0xff] %v10446_v45  ;;  %v12495_v62 = vld [vmem:[#allocation52_spill] sm:$0xff]  ;;  %v5197_v8 = vunpack.c.h.b16 %v10432_v63 }
 0x538   : > { %v3955_v33 = vpop.f32.mrf.mxu2 }
 0x539   : > { %v4368_v26 = vadd.f32 %v4196_v44, %v2960_v31  ;;  %v3956_v50 = vadd.f32 %v3955_v33, %v3786_v47  ;;  %3828 = vmatmul.bf16.gmra.mxu1 %v12453_v59  ;;  %v5193_v31 = vunpack.c.h.b16 %v10421_v2  ;;  %v4200_v33 = vperm.slane %v10044_v0, 0  ;;  %v12510_v59 = vld [vmem:[#allocation87_spill] sm:$0xff] }
 0x53b   : > { %v4624_v5 = vmax.f32 %v4368_v26, 0.0  ;;  %v10452_v21 = vadd.f32 %v4191_v28, %v3956_v50  ;;  %v5188_v50 = vunpack.c.l.b16 %v10397_v27 }
 0x53c   : > { %v3789_v12 = vpop.f32.mrf.mxu1  ;;  %3997 = vmatmul.bf16.gmra.mxu2 %v12361_v41 }
 0x53d   : > { %v10449_v46 = vpack.c.bf16 %v4625_v56, %v4624_v5  ;;  %v12496_v5 = vld [vmem:[#allocation81_spill] sm:$0xff] }
 0x53e   : > { %v2792_v16 = vpop.f32.mrf.mxu3  ;;  %v10456_v25 = vpop.f32.mrf.mxu0 }
 0x53f   : > { %v2962_v32 = vadd.f32 %v12492_v3, %v2792_v16  ;;  %12493 = vst [vmem:[#allocation77_spill] sm:$0xff] %v10456_v25  ;;  %v5184_v3 = vunpack.c.l.b16 %v10385_v7  ;;  %v10474_v7 = vpack.c.b16 %v5197_v8, %v5193_v31  ;;  %v12503_v8 = vld [vmem:[#allocation43_spill] sm:$0xff] }
 0x540   : > { %v3958_v47 = vpop.f32.mrf.mxu2 }
 0x541   : > { %v4372_v19 = vadd.f32 %v4196_v44, %v2962_v32  ;;  %v3959_v28 = vadd.f32 %v3958_v47, %v3789_v12  ;;  %v4195_v44 = vperm.slane %v12456_v1, 3  ;;  %v10470_v32 = vpack.c.b16 %v5188_v50, %v5184_v3 }
 0x542   : > { %3699 = vmatmul.bf16.gmra.mxu0 %v12495_v62 }
 0x543   : > { %v4628_v26 = vmax.f32 %v4372_v19, 0.0  ;;  %2834 = vmatmul.bf16.gmra.mxu3 %v12494_v24  ;;  %12497 = vst [vmem:[#allocation79_spill] sm:$0xff] %v10470_v32  ;;  %v10472_v19 = vadd.f32 %v4195_v44, %v3959_v28 }
 0x544   : > { %v3791_v16 = vpop.f32.mrf.mxu1 }
 0x545   : > { %v10460_v37 = vpack.c.bf16 %v4629_v48, %v4628_v26  ;;  %12498 = vst [vmem:[#allocation52_spill] sm:$0xff] %v10472_v19  ;;  %v4633_v48 = vmax.f32 %v10068_v9, 0.0  ;;  %v4637_v9 = vmax.f32 %v10071_v51, 0.0 }
 0x546   : > { %v2795_v41 = vpop.f32.mrf.mxu3  ;;  %v10476_v12 = vpop.f32.mrf.mxu0 }
 0x547   : > { %v2965_v56 = vadd.f32 %v12496_v5, %v2795_v41  ;;  %12499 = vst [vmem:[#allocation81_spill] sm:$0xff] %v10476_v12  ;;  %v12500_v5 = vld [vmem:[#allocation83_spill] sm:$0xff] }
 0x548   : > { %v3960_v36 = vpop.f32.mrf.mxu2 }
 0x549   : > { %v4376_v27 = vadd.f32 %v4200_v33, %v2965_v56  ;;  %v3961_v25 = vadd.f32 %v3960_v36, %v3791_v16  ;;  %3833 = vmatmul.bf16.gmra.mxu1 %v12467_v13  ;;  %v12504_v16 = vld [vmem:[#allocation56_spill] sm:$0xff] }
 0x54b   : > { %v4632_v26 = vmax.f32 %v4376_v27, 0.0  ;;  %v10482_v3 = vadd.f32 %v4195_v44, %v3961_v25 }
 0x54c   : > { %v3794_v41 = vpop.f32.mrf.mxu1  ;;  %4002 = vmatmul.bf16.gmra.mxu2 %v12391_v30  ;;  %v5201_v30 = vunpack.c.h.b16 %v10449_v46 }
 0x54d   : > { %v10479_v47 = vpack.c.bf16 %v4633_v48, %v4632_v26  ;;  %12501 = vst [vmem:[#allocation83_spill] sm:$0xff] %v10482_v3  ;;  %v5205_v48 = vunpack.c.h.b16 %v10460_v37 }
 0x54e   : > { %v2797_v45 = vpop.f32.mrf.mxu3 }
 0x54f   : > { %v2967_v1 = vadd.f32 %v12500_v5, %v2797_v45  ;;  %v10486_v28 = vpop.f32.mrf.mxu0  ;;  %v5192_v45 = vunpack.c.l.b16 %v10421_v2  ;;  %v12505_v5 = vld [vmem:[#allocation85_spill] sm:$0xff] }
 0x550   : > { %12502 = vst [vmem:[#allocation191_spill] sm:$0xff] %v10486_v28  ;;  %v3963_v36 = vpop.f32.mrf.mxu2 }
 0x551   : > { %v4380_v50 = vadd.f32 %v4200_v33, %v2967_v1  ;;  %v5196_v1 = vunpack.c.l.b16 %v10432_v63  ;;  %v3964_v25 = vadd.f32 %v3963_v36, %v3794_v41  ;;  %v12509_v63 = vld [vmem:[#allocation179_spill] sm:$0xff] }
 0x552   : > { %3704 = vmatmul.bf16.gmra.mxu0 %v12504_v16  ;;  %v4641_v41 = vmax.f32 %v12509_v63, 0.0  ;;  %v5209_v63 = vunpack.c.h.b16 %v10479_v47 }
 0x553   : > { %v4636_v31 = vmax.f32 %v4380_v50, 0.0  ;;  %2839 = vmatmul.bf16.gmra.mxu3 %v12503_v8  ;;  %v10498_v50 = vpack.c.b16 %v5196_v1, %v5192_v45 }
 0x554   : > { %v3796_v26 = vpop.f32.mrf.mxu1 }
 0x555   : > { %v10490_v56 = vpack.c.bf16 %v4637_v9, %v4636_v31  ;;  %12506 = vst [vmem:[#allocation56_spill] sm:$0xff] %v10498_v50  ;;  %v10500_v31 = vadd.f32 %v4195_v44, %v3964_v25  ;;  %v10502_v9 = vpack.c.b16 %v5205_v48, %v5201_v30  ;;  %v4645_v30 = vmax.f32 %v10077_v11, 0.0  ;;  %v12513_v48 = vld [vmem:[#allocation45_spill] sm:$0xff] }
 0x556   : > { %v2800_v27 = vpop.f32.mrf.mxu3  ;;  %v5204_v11 = vunpack.c.l.b16 %v10460_v37 }
 0x557   : > { %v2970_v51 = vadd.f32 %v12505_v5, %v2800_v27  ;;  %12507 = vst [vmem:[#allocation85_spill] sm:$0xff] %v10500_v31  ;;  %v10504_v28 = vpop.f32.mrf.mxu0 }
 0x558   : > { %12508 = vst [vmem:[#allocation192_spill] sm:$0xff] %v10504_v28  ;;  %v3965_v12 = vpop.f32.mrf.mxu2 }
 0x559   : > { %v4384_v32 = vadd.f32 %v4200_v33, %v2970_v51  ;;  %v3966_v13 = vadd.f32 %v3965_v12, %v3796_v26  ;;  %3838 = vmatmul.bf16.gmra.mxu1 %v12477_v38  ;;  %v4199_v26 = vperm.slane %v10009_v49, 3  ;;  %v12520_v38 = vld [vmem:[#allocation91_spill] sm:$0xff] }
 0x55b   : > { %v4640_v2 = vmax.f32 %v4384_v32, 0.0  ;;  %v10510_v45 = vadd.f32 %v4195_v44, %v3966_v13  ;;  %v7273_v13 = vld [vmem:[%s11942_s5 + $0x48] sm:$0xf]  ;;  %v5200_v44 = vunpack.c.l.b16 %v10449_v46 }
 0x55c   : > { %v3799_v19 = vpop.f32.mrf.mxu1  ;;  %4007 = vmatmul.bf16.gmra.mxu2 %v12414_v17  ;;  %v7711_v17 = vld [vmem:[%s11942_s5 + $0x54] sm:$0xf0] }
 0x55d   : > { %v10507_v36 = vpack.c.bf16 %v4641_v41, %v4640_v2  ;;  %12511 = vst [vmem:[#allocation179_spill] sm:$0xff] %v10510_v45  ;;  %v7274_v2 = vor.u32 %v7711_v17, %v7273_v13  ;;  %v5213_v41 = vunpack.c.h.b16 %v10490_v56  ;;  %v10534_v50 = vpack.c.b16 %v5204_v11, %v5200_v44  ;;  %v12530_v45 = vld [vmem:[#allocation95_spill] sm:$0xff] }
 0x55e   : > { %v2802_v3 = vpop.f32.mrf.mxu3  ;;  %v4649_v13 = vmax.f32 %v10091_v58, 0.0  ;;  %v4653_v58 = vmax.f32 %v10094_v4, 0.0 }
 0x55f   : > { %v2972_v27 = vadd.f32 %v12510_v59, %v2802_v3  ;;  %v10514_v25 = vpop.f32.mrf.mxu0  ;;  %v12514_v59 = vld [vmem:[#allocation60_spill] sm:$0xff]  ;;  %3427 = vmatpush.bf16.msra.mxu3 %v7274_v2  ;;  %v10538_v46 = vpack.c.b16 %v5213_v41, %v5209_v63  ;;  %v12523_v41 = vld [vmem:[#allocation47_spill] sm:$0xff] }
 0x560   : > { %12512 = vst [vmem:[#allocation87_spill] sm:$0xff] %v10514_v25  ;;  %v3968_v12 = vpop.f32.mrf.mxu2 }
 0x561   : > { %v4388_v1 = vadd.f32 %v4200_v33, %v2972_v27  ;;  %v3969_v33 = vadd.f32 %v3968_v12, %v3799_v19  ;;  %v12515_v27 = vld [vmem:[#allocation89_spill] sm:$0xff]  ;;  %12517 = vst [vmem:[#allocation60_spill] sm:$0xff] %v10534_v50 }
 0x562   : > { %3709 = vmatmul.bf16.gmra.mxu0 %v12514_v59 }
 0x563   : > { %v4644_v32 = vmax.f32 %v4388_v1, 0.0  ;;  %2844 = vmatmul.bf16.gmra.mxu3 %v12513_v48  ;;  %v10536_v25 = vadd.f32 %v4199_v26, %v3969_v33 }
 0x564   : > { %v3801_v51 = vpop.f32.mrf.mxu1 }
 0x565   : > { %v10518_v5 = vpack.c.bf16 %v4645_v30, %v4644_v32  ;;  %v12516_v32 = vld [vmem:[#allocation110_spill] sm:$0xff]  ;;  %12518 = vst [vmem:[#allocation89_spill] sm:$0xff] %v10536_v25 }
 0x566   : > { %v2805_v3 = vpop.f32.mrf.mxu3  ;;  %v4204_v30 = vperm.slane %v12516_v32, 0 }
 0x567   : > { %v2975_v1 = vadd.f32 %v12515_v27, %v2805_v3  ;;  %v10540_v19 = vpop.f32.mrf.mxu0 }
 0x568   : > { %12519 = vst [vmem:[#allocation193_spill] sm:$0xff] %v10540_v19  ;;  %v3970_v28 = vpop.f32.mrf.mxu2 }
 0x569   : > { %v4392_v37 = vadd.f32 %v4204_v30, %v2975_v1  ;;  %v3971_v49 = vadd.f32 %v3970_v28, %v3801_v51  ;;  %3843 = vmatmul.bf16.gmra.mxu1 %v12487_v35  ;;  %v12524_v51 = vld [vmem:[#allocation64_spill] sm:$0xff] }
 0x56b   : > { %v4648_v12 = vmax.f32 %v4392_v37, 0.0  ;;  %v10546_v11 = vadd.f32 %v4199_v26, %v3971_v49  ;;  %v5208_v49 = vunpack.c.l.b16 %v10479_v47 }
 0x56c   : > { %v3804_v27 = vpop.f32.mrf.mxu1  ;;  %4012 = vmatmul.bf16.gmra.mxu2 %v12443_v14  ;;  %v5217_v14 = vunpack.c.h.b16 %v10507_v36 }
 0x56d   : > { %v10543_v17 = vpack.c.bf16 %v4649_v13, %v4648_v12  ;;  %12521 = vst [vmem:[#allocation91_spill] sm:$0xff] %v10546_v11 }
 0x56e   : > { %v2807_v3 = vpop.f32.mrf.mxu3 }
 0x56f   : > { %v2977_v44 = vadd.f32 %v12520_v38, %v2807_v3  ;;  %v10550_v2 = vpop.f32.mrf.mxu0  ;;  %v5212_v38 = vunpack.c.l.b16 %v10490_v56  ;;  %v5221_v3 = vunpack.c.h.b16 %v10518_v5  ;;  %v12529_v56 = vld [vmem:[#allocation49_spill] sm:$0xff] }
 0x570   : > { %12522 = vst [vmem:[#allocation194_spill] sm:$0xff] %v10550_v2  ;;  %v3973_v28 = vpop.f32.mrf.mxu2 }
 0x571   : > { %v4396_v33 = vadd.f32 %v4204_v30, %v2977_v44  ;;  %v3974_v37 = vadd.f32 %v3973_v28, %v3804_v27  ;;  %v12525_v44 = vld [vmem:[#allocation93_spill] sm:$0xff]  ;;  %v4657_v27 = vmax.f32 %v12529_v56, 0.0 }
 0x572   : > { %3714 = vmatmul.bf16.gmra.mxu0 %v12524_v51 }
 0x573   : > { %v4652_v63 = vmax.f32 %v4396_v33, 0.0  ;;  %2849 = vmatmul.bf16.gmra.mxu3 %v12523_v41  ;;  %v10562_v33 = vpack.c.b16 %v5212_v38, %v5208_v49 }
 0x574   : > { %v3806_v13 = vpop.f32.mrf.mxu1 }
 0x575   : > { %v10554_v1 = vpack.c.bf16 %v4653_v58, %v4652_v63  ;;  %12526 = vst [vmem:[#allocation64_spill] sm:$0xff] %v10562_v33  ;;  %v10564_v63 = vadd.f32 %v4199_v26, %v3974_v37  ;;  %v10566_v58 = vpack.c.b16 %v5221_v3, %v5217_v14  ;;  %v12533_v14 = vld [vmem:[#allocation180_spill] sm:$0xff] }
 0x576   : > { %v2810_v12 = vpop.f32.mrf.mxu3  ;;  %v4661_v3 = vmax.f32 %v12533_v14, 0.0  ;;  %v5225_v14 = vunpack.c.h.b16 %v10543_v17 }
 0x577   : > { %v2980_v4 = vadd.f32 %v12525_v44, %v2810_v12  ;;  %12527 = vst [vmem:[#allocation93_spill] sm:$0xff] %v10564_v63  ;;  %v10568_v2 = vpop.f32.mrf.mxu0  ;;  %v12534_v44 = vld [vmem:[#allocation50_spill] sm:$0xff] }
 0x578   : > { %12528 = vst [vmem:[#allocation195_spill] sm:$0xff] %v10568_v2  ;;  %v3975_v19 = vpop.f32.mrf.mxu2 }
 0x579   : > { %v4400_v50 = vadd.f32 %v4204_v30, %v2980_v4  ;;  %v3976_v35 = vadd.f32 %v3975_v19, %v3806_v13  ;;  %3848 = vmatmul.bf16.gmra.mxu1 %v12494_v24  ;;  %v12535_v13 = vld [vmem:[#allocation68_spill] sm:$0xff] }
 0x57b   : > { %v4656_v47 = vmax.f32 %v4400_v50, 0.0  ;;  %v10574_v49 = vadd.f32 %v4199_v26, %v3976_v35  ;;  %v5216_v35 = vunpack.c.l.b16 %v10507_v36 }
 0x57c   : > { %v3809_v25 = vpop.f32.mrf.mxu1  ;;  %4017 = vmatmul.bf16.gmra.mxu2 %v12454_v61 }
 0x57d   : > { %v10571_v28 = vpack.c.bf16 %v4657_v27, %v4656_v47  ;;  %12531 = vst [vmem:[#allocation49_spill] sm:$0xff] %v10574_v49  ;;  %v12536_v47 = vld [vmem:[#allocation96_spill] sm:$0xff]  ;;  %v12537_v27 = vld [vmem:[#allocation181_spill] sm:$0xff] }
 0x57e   : > { %v2812_v11 = vpop.f32.mrf.mxu3 }
 0x57f   : > { %v2982_v12 = vadd.f32 %v12530_v45, %v2812_v11  ;;  %v10578_v37 = vpop.f32.mrf.mxu0  ;;  %v5220_v45 = vunpack.c.l.b16 %v10518_v5 }
 0x580   : > { %12532 = vst [vmem:[#allocation95_spill] sm:$0xff] %v10578_v37  ;;  %v3978_v19 = vpop.f32.mrf.mxu2 }
 0x581   : > { %v4404_v38 = vadd.f32 %v4204_v30, %v2982_v12  ;;  %v3979_v26 = vadd.f32 %v3978_v19, %v3809_v25  ;;  %v4203_v30 = vperm.slane %v10044_v0, 3  ;;  %v4208_v12 = vperm.slane %v12537_v27, 0 }
 0x582   : > { %3719 = vmatmul.bf16.gmra.mxu0 %v12535_v13  ;;  %v4665_v19 = vmax.f32 %v10130_v22, 0.0  ;;  %v4669_v22 = vmax.f32 %v10133_v15, 0.0  ;;  %v5233_v15 = vunpack.c.h.b16 %v10571_v28 }
 0x583   : > { %v4660_v50 = vmax.f32 %v4404_v38, 0.0  ;;  %2854 = vmatmul.bf16.gmra.mxu3 %v12534_v44  ;;  %v10590_v38 = vpack.c.b16 %v5220_v45, %v5216_v35 }
 0x584   : > { %v3811_v11 = vpop.f32.mrf.mxu1 }
 0x585   : > { %v10582_v4 = vpack.c.bf16 %v4661_v3, %v4660_v50  ;;  %12538 = vst [vmem:[#allocation180_spill] sm:$0xff] %v10590_v38  ;;  %v10592_v50 = vadd.f32 %v4203_v30, %v3979_v26  ;;  %v5229_v3 = vunpack.c.h.b16 %v10554_v1  ;;  %v12541_v26 = vld [vmem:[#allocation97_spill] sm:$0xff] }
 0x586   : > { %v2815_v61 = vpop.f32.mrf.mxu3 }
 0x587   : > { %v2985_v56 = vadd.f32 %v12536_v47, %v2815_v61  ;;  %12539 = vst [vmem:[#allocation68_spill] sm:$0xff] %v10592_v50  ;;  %v10596_v33 = vpop.f32.mrf.mxu0  ;;  %v10598_v25 = vpack.c.b16 %v5229_v3, %v5225_v14  ;;  %v12544_v3 = vld [vmem:[#allocation54_spill] sm:$0xff] }
 0x588   : > { %12540 = vst [vmem:[#allocation96_spill] sm:$0xff] %v10596_v33  ;;  %v3980_v61 = vpop.f32.mrf.mxu2 }
 0x589   : > { %v4408_v36 = vadd.f32 %v4208_v12, %v2985_v56  ;;  %v3981_v47 = vadd.f32 %v3980_v61, %v3811_v11  ;;  %3853 = vmatmul.bf16.gmra.mxu1 %v12503_v8 }
 0x58b   : > { %v4664_v5 = vmax.f32 %v4408_v36, 0.0  ;;  %v10604_v2 = vadd.f32 %v4203_v30, %v3981_v47 }
 0x58c   : > { %v3814_v45 = vpop.f32.mrf.mxu1  ;;  %4022 = vmatmul.bf16.gmra.mxu2 %v12468_v10  ;;  %v12546_v10 = vld [vmem:[#allocation99_spill] sm:$0xff] }
 0x58d   : > { %v10601_v37 = vpack.c.bf16 %v4665_v19, %v4664_v5  ;;  %12542 = vst [vmem:[#allocation97_spill] sm:$0xff] %v10604_v2  ;;  %v12545_v5 = vld [vmem:[#allocation72_spill] sm:$0xff]  ;;  %v5224_v19 = vunpack.c.l.b16 %v10543_v17 }
 0x58e   : > { %v2817_v35 = vpop.f32.mrf.mxu3 }
 0x58f   : > { %v2987_v38 = vadd.f32 %v12541_v26, %v2817_v35  ;;  %v10608_v56 = vpop.f32.mrf.mxu0 }
 0x590   : > { %12543 = vst [vmem:[#allocation196_spill] sm:$0xff] %v10608_v56  ;;  %v3983_v11 = vpop.f32.mrf.mxu2 }
 0x591   : > { %v4412_v50 = vadd.f32 %v4208_v12, %v2987_v38  ;;  %v5228_v38 = vunpack.c.l.b16 %v10554_v1  ;;  %v3984_v61 = vadd.f32 %v3983_v11, %v3814_v45  ;;  %v12550_v1 = vld [vmem:[#allocation123_spill] sm:$0xff] }
 0x592   : > { %3724 = vmatmul.bf16.gmra.mxu0 %v12545_v5  ;;  %v4673_v45 = vmax.f32 %v12550_v1, 0.0 }
 0x593   : > { %v4668_v14 = vmax.f32 %v4412_v50, 0.0  ;;  %2859 = vmatmul.bf16.gmra.mxu3 %v12544_v3  ;;  %v10618_v56 = vpack.c.b16 %v5228_v38, %v5224_v19  ;;  %v10620_v50 = vadd.f32 %v4203_v30, %v3984_v61  ;;  %v12551_v61 = vld [vmem:[#allocation101_spill] sm:$0xff] }
 0x594   : > { %v3816_v35 = vpop.f32.mrf.mxu1 }
 0x595   : > { %v10612_v36 = vpack.c.bf16 %v4669_v22, %v4668_v14  ;;  %12547 = vst [vmem:[#allocation72_spill] sm:$0xff] %v10618_v56  ;;  %v5237_v14 = vunpack.c.h.b16 %v10582_v4 }
 0x596   : > { %v2820_v47 = vpop.f32.mrf.mxu3  ;;  %12548 = vst [vmem:[#allocation99_spill] sm:$0xff] %v10620_v50 }
 0x597   : > { %v2990_v26 = vadd.f32 %v12546_v10, %v2820_v47  ;;  %v10624_v33 = vpop.f32.mrf.mxu0  ;;  %v10626_v8 = vpack.c.b16 %v5237_v14, %v5233_v15  ;;  %v12554_v14 = vld [vmem:[#allocation125_spill] sm:$0xff] }
 0x598   : > { %12549 = vst [vmem:[#allocation197_spill] sm:$0xff] %v10624_v33  ;;  %v3985_v2 = vpop.f32.mrf.mxu2 }
 0x599   : > { %v4416_v22 = vadd.f32 %v4208_v12, %v2990_v26  ;;  %v3986_v47 = vadd.f32 %v3985_v2, %v3816_v35  ;;  %3858 = vmatmul.bf16.gmra.mxu1 %v12513_v48  ;;  %v12556_v35 = vld [vmem:[#allocation76_spill] sm:$0xff] }
 0x59b   : > { %v4672_v17 = vmax.f32 %v4416_v22, 0.0  ;;  %v10632_v56 = vadd.f32 %v4203_v30, %v3986_v47  ;;  %v4677_v22 = vmax.f32 %v12554_v14, 0.0  ;;  %v7257_v30 = vld [vmem:[%s11942_s5 + $0x28] sm:$0xf]  ;;  %v4207_v47 = vperm.slane %v12516_v32, 3 }
 0x59c   : > { %v3819_v38 = vpop.f32.mrf.mxu1  ;;  %4027 = vmatmul.bf16.gmra.mxu2 %v12478_v43  ;;  %v7707_v43 = vld [vmem:[%s11942_s5 + $0x34] sm:$0xf0] }
 0x59d   : > { %v10629_v11 = vpack.c.bf16 %v4673_v45, %v4672_v17  ;;  %12552 = vst [vmem:[#allocation123_spill] sm:$0xff] %v10632_v56  ;;  %v12555_v17 = vld [vmem:[#allocation58_spill] sm:$0xff] }
 0x59e   : > { %v2822_v19 = vpop.f32.mrf.mxu3 }
 0x59f   : > { %v2992_v10 = vadd.f32 %v12551_v61, %v2822_v19  ;;  %v10636_v26 = vpop.f32.mrf.mxu0 }
 0x5a0   : > { %12553 = vst [vmem:[#allocation101_spill] sm:$0xff] %v10636_v26  ;;  %v3988_v2 = vpop.f32.mrf.mxu2 }
 0x5a1   : > { %v4420_v50 = vadd.f32 %v4208_v12, %v2992_v10  ;;  %v5232_v12 = vunpack.c.l.b16 %v10571_v28  ;;  %v3989_v45 = vadd.f32 %v3988_v2, %v3819_v38  ;;  %v7258_v10 = vor.u32 %v7707_v43, %v7257_v30 }
 0x5a2   : > { %3729 = vmatmul.bf16.gmra.mxu0 %v12556_v35 }
 0x5a3   : > { %v4676_v15 = vmax.f32 %v4420_v50, 0.0  ;;  %2864 = vmatmul.bf16.gmra.mxu3 %v12555_v17  ;;  %v5236_v50 = vunpack.c.l.b16 %v10582_v4  ;;  %v10656_v48 = vadd.f32 %v4207_v47, %v3989_v45  ;;  %v12562_v4 = vld [vmem:[#allocation128_spill] sm:$0xff]  ;;  %v12566_v45 = vld [vmem:[#allocation130_spill] sm:$0xff] }
 0x5a4   : > { %v3821_v61 = vpop.f32.mrf.mxu1  ;;  %3428 = vmatpush.bf16.msra.mxu3 %v7258_v10  ;;  %v4681_v38 = vmax.f32 %v12562_v4, 0.0  ;;  %v4685_v10 = vmax.f32 %v12566_v45, 0.0  ;;  %v12568_v4 = vld [vmem:[#allocation80_spill] sm:$0xff]  ;;  %v12569_v45 = vld [vmem:[#allocation107_spill] sm:$0xff] }
 0x5a5   : > { %v10640_v1 = vpack.c.bf16 %v4677_v22, %v4676_v15  ;;  %v12557_v15 = vld [vmem:[#allocation103_spill] sm:$0xff]  ;;  %v10654_v33 = vpack.c.b16 %v5236_v50, %v5232_v12  ;;  %12560 = vst [vmem:[#allocation76_spill] sm:$0xff] %v10656_v48 }
 0x5a6   : > { %v2825_v19 = vpop.f32.mrf.mxu3  ;;  %v12558_v22 = vld [vmem:[#allocation183_spill] sm:$0xff] }
 0x5a7   : > { %v2995_v14 = vadd.f32 %v12557_v15, %v2825_v19  ;;  %v4212_v26 = vperm.slane %v12558_v22, 0  ;;  %12559 = vst [vmem:[#allocation125_spill] sm:$0xff] %v10654_v33  ;;  %v10658_v0 = vpop.f32.mrf.mxu0  ;;  %v12563_v19 = vld [vmem:[#allocation105_spill] sm:$0xff] }
 0x5a8   : > { %12561 = vst [vmem:[#allocation103_spill] sm:$0xff] %v10658_v0  ;;  %v3990_v32 = vpop.f32.mrf.mxu2 }
 0x5a9   : > { %v4424_v56 = vadd.f32 %v4212_v26, %v2995_v14  ;;  %v3991_v24 = vadd.f32 %v3990_v32, %v3821_v61  ;;  %3863 = vmatmul.bf16.gmra.mxu1 %v12523_v41  ;;  %v12567_v14 = vld [vmem:[#allocation62_spill] sm:$0xff]  ;;  %v5241_v32 = vunpack.c.h.b16 %v10601_v37  ;;  %v5245_v61 = vunpack.c.h.b16 %v10612_v36 }
 0x5ab   : > { %v4680_v28 = vmax.f32 %v4424_v56, 0.0  ;;  %v10664_v49 = vadd.f32 %v4207_v47, %v3991_v24 }
 0x5ac   : > { %v3824_v43 = vpop.f32.mrf.mxu1  ;;  %4032 = vmatmul.bf16.gmra.mxu2 %v12488_v52  ;;  %v5244_v52 = vunpack.c.l.b16 %v10612_v36 }
 0x5ad   : > { %v10661_v2 = vpack.c.bf16 %v4681_v38, %v4680_v28  ;;  %12564 = vst [vmem:[#allocation183_spill] sm:$0xff] %v10664_v49  ;;  %v5240_v38 = vunpack.c.l.b16 %v10601_v37  ;;  %v12573_v49 = vld [vmem:[#allocation133_spill] sm:$0xff] }
 0x5ae   : > { %v2827_v30 = vpop.f32.mrf.mxu3  ;;  %v4689_v48 = vmax.f32 %v12573_v49, 0.0 }
 0x5af   : > { %v2997_v15 = vadd.f32 %v12563_v19, %v2827_v30  ;;  %v10668_v50 = vpop.f32.mrf.mxu0 }
 0x5b0   : > { %12565 = vst [vmem:[#allocation128_spill] sm:$0xff] %v10668_v50  ;;  %v3993_v24 = vpop.f32.mrf.mxu2  ;;  %v10682_v50 = vpack.c.b16 %v5244_v52, %v5240_v38 }
 0x5b1   : > { %v4428_v12 = vadd.f32 %v4212_v26, %v2997_v15  ;;  %v3994_v30 = vadd.f32 %v3993_v24, %v3824_v43 }
 0x5b2   : > { %3734 = vmatmul.bf16.gmra.mxu0 %v12568_v4  ;;  %12570 = vst [vmem:[#allocation105_spill] sm:$0xff] %v10682_v50 }
 0x5b3   : > { %v4684_v56 = vmax.f32 %v4428_v12, 0.0  ;;  %2869 = vmatmul.bf16.gmra.mxu3 %v12567_v14  ;;  %v10679_v12 = vpack.c.b16 %v5245_v61, %v5241_v32  ;;  %v10684_v0 = vadd.f32 %v4207_v47, %v3994_v30  ;;  %v12574_v32 = vld [vmem:[#allocation109_spill] sm:$0xff]  ;;  %v12577_v30 = vld [vmem:[#allocation135_spill] sm:$0xff] }
 0x5b4   : > { %v3826_v15 = vpop.f32.mrf.mxu1  ;;  %v4693_v49 = vmax.f32 %v12577_v30, 0.0  ;;  %v12581_v30 = vld [vmem:[#allocation184_spill] sm:$0xff] }
 0x5b5   : > { %v10674_v28 = vpack.c.bf16 %v4685_v10, %v4684_v56  ;;  %12571 = vst [vmem:[#allocation130_spill] sm:$0xff] %v10684_v0  ;;  %v4216_v50 = vperm.slane %v12581_v30, 0 }
 0x5b6   : > { %v2830_v19 = vpop.f32.mrf.mxu3 }
 0x5b7   : > { %v3000_v33 = vadd.f32 %v12569_v45, %v2830_v19  ;;  %v10686_v10 = vpop.f32.mrf.mxu0  ;;  %v5253_v19 = vunpack.c.h.b16 %v10640_v1  ;;  %v12579_v45 = vld [vmem:[#allocation119_spill] sm:$0xff] }
 0x5b8   : > { %12572 = vst [vmem:[#allocation80_spill] sm:$0xff] %v10686_v10  ;;  %v3995_v36 = vpop.f32.mrf.mxu2 }
 0x5b9   : > { %v4432_v56 = vadd.f32 %v4212_v26, %v3000_v33  ;;  %v3996_v43 = vadd.f32 %v3995_v36, %v3826_v15  ;;  %3868 = vmatmul.bf16.gmra.mxu1 %v12534_v44  ;;  %v4211_v36 = vperm.slane %v12537_v27, 3  ;;  %v7779_v44 = vld [vmem:[#allocation5 + $0x78] sm:$0xff] }
 0x5ba   : > { %6017 = vmatpush.bf16.msrb.mxu0 %v7779_v44  ;;  %v5261_v44 = vunpack.c.h.b16 %v10674_v28 }
 0x5bb   : > { %v4688_v41 = vmax.f32 %v4432_v56, 0.0  ;;  %v10692_v31 = vadd.f32 %v4207_v47, %v3996_v43 }
 0x5bc   : > { %v3829_v63 = vpop.f32.mrf.mxu1  ;;  %4037 = vmatmul.bf16.gmra.mxu2 %v12495_v62  ;;  %v5252_v62 = vunpack.c.l.b16 %v10640_v1  ;;  %v12585_v1 = vld [vmem:[#allocation137_spill] sm:$0xff] }
 0x5bd   : > { %v10689_v37 = vpack.c.bf16 %v4689_v48, %v4688_v41  ;;  %12575 = vst [vmem:[#allocation107_spill] sm:$0xff] %v10692_v31  ;;  %v12578_v48 = vld [vmem:[#allocation66_spill] sm:$0xff]  ;;  %v5249_v41 = vunpack.c.h.b16 %v10629_v11 }
 0x5be   : > { %v2832_v24 = vpop.f32.mrf.mxu3 }
 0x5bf   : > { %v3002_v61 = vadd.f32 %v12574_v32, %v2832_v24  ;;  %v10696_v33 = vpop.f32.mrf.mxu0  ;;  %v10708_v32 = vpack.c.b16 %v5253_v19, %v5249_v41 }
 0x5c0   : > { %12576 = vst [vmem:[#allocation133_spill] sm:$0xff] %v10696_v33  ;;  %v3998_v47 = vpop.f32.mrf.mxu2 }
 0x5c1   : > { %v4436_v38 = vadd.f32 %v4212_v26, %v3002_v61  ;;  %v5248_v26 = vunpack.c.l.b16 %v10629_v11  ;;  %v3999_v56 = vadd.f32 %v3998_v47, %v3829_v63  ;;  %v12580_v61 = vld [vmem:[#allocation111_spill] sm:$0xff]  ;;  %v4697_v63 = vmax.f32 %v12585_v1, 0.0 }
 0x5c2   : > { %3739 = vmatmul.bf16.gmra.mxu0 %v12579_v45 }
 0x5c3   : > { %v4692_v52 = vmax.f32 %v4436_v38, 0.0  ;;  %2874 = vmatmul.bf16.gmra.mxu3 %v12578_v48 }
 0x5c4   : > { %v3831_v24 = vpop.f32.mrf.mxu1 }
 0x5c5   : > { %v10702_v15 = vpack.c.bf16 %v4693_v49, %v4692_v52  ;;  %v10712_v52 = vpack.c.b16 %v5252_v62, %v5248_v26  ;;  %v10714_v49 = vadd.f32 %v4211_v36, %v3999_v56  ;;  %v7778_v26 = vld [vmem:[#allocation5 + $0x70] sm:$0xff] }
 0x5c6   : > { %v2835_v43 = vpop.f32.mrf.mxu3  ;;  %6018 = vmatpush.bf16.msrb.mxu0 %v7778_v26  ;;  %v12592_v26 = vld [vmem:[#allocation42_spill] sm:$0xff] }
 0x5c7   : > { %v3005_v38 = vadd.f32 %v12580_v61, %v2835_v43  ;;  %12582 = vst [vmem:[#allocation109_spill] sm:$0xff] %v10712_v52  ;;  %v10716_v10 = vpop.f32.mrf.mxu0  ;;  %v12586_v43 = vld [vmem:[#allocation112_spill] sm:$0xff] }
 0x5c8   : > { %12583 = vst [vmem:[#allocation135_spill] sm:$0xff] %v10714_v49  ;;  %v4000_v27 = vpop.f32.mrf.mxu2 }
 0x5c9   : > { %v4440_v33 = vadd.f32 %v4216_v50, %v3005_v38  ;;  %12584 = vst [vmem:[#allocation66_spill] sm:$0xff] %v10716_v10  ;;  %v4001_v41 = vadd.f32 %v4000_v27, %v3831_v24  ;;  %3873 = vmatmul.bf16.gmra.mxu1 %v12544_v3  ;;  %v5257_v27 = vunpack.c.h.b16 %v10661_v2  ;;  %v7776_v3 = vld [vmem:[#allocation5 + $0x60] sm:$0xff] }
 0x5cb   : > { %v4696_v11 = vmax.f32 %v4440_v33, 0.0  ;;  %v10722_v62 = vadd.f32 %v4211_v36, %v4001_v41 }
 0x5cc   : > { %v3834_v31 = vpop.f32.mrf.mxu1  ;;  %4042 = vmatmul.bf16.gmra.mxu2 %v12504_v16  ;;  %v5256_v16 = vunpack.c.l.b16 %v10661_v2  ;;  %v4705_v2 = vmax.f32 %v10173_v34, 0.0 }
 0x5cd   : > { %v10719_v47 = vpack.c.bf16 %v4697_v63, %v4696_v11  ;;  %12587 = vst [vmem:[#allocation119_spill] sm:$0xff] %v10722_v62  ;;  %v12589_v11 = vld [vmem:[#allocation139_spill] sm:$0xff]  ;;  %v12590_v63 = vld [vmem:[#allocation70_spill] sm:$0xff] }
 0x5ce   : > { %v2837_v19 = vpop.f32.mrf.mxu3  ;;  %v4701_v1 = vmax.f32 %v12589_v11, 0.0 }
 0x5cf   : > { %v3007_v61 = vadd.f32 %v12586_v43, %v2837_v19  ;;  %v10726_v33 = vpop.f32.mrf.mxu0  ;;  %v12591_v19 = vld [vmem:[#allocation122_spill] sm:$0xff]  ;;  %v7777_v43 = vld [vmem:[#allocation5 + $0x68] sm:$0xff] }
 0x5d0   : > { %12588 = vst [vmem:[#allocation111_spill] sm:$0xff] %v10726_v33  ;;  %v4003_v41 = vpop.f32.mrf.mxu2  ;;  %v10737_v33 = vpack.c.b16 %v5261_v44, %v5257_v27  ;;  %6019 = vmatpush.bf16.msrb.mxu0 %v7777_v43  ;;  %v7775_v27 = vld [vmem:[#allocation5 + $0x58] sm:$0xff]  ;;  %v12595_v43 = vld [vmem:[#allocation113_spill] sm:$0xff] }
 0x5d1   : > { %v4444_v56 = vadd.f32 %v4216_v50, %v3007_v61  ;;  %v5260_v61 = vunpack.c.l.b16 %v10674_v28 }
 0x5d2   : > { %3744 = vmatmul.bf16.gmra.mxu0 %v12591_v19 }
 0x5d3   : > { %v4700_v38 = vmax.f32 %v4444_v56, 0.0  ;;  %2879 = vmatmul.bf16.gmra.mxu3 %v12590_v63  ;;  %v4004_v56 = vadd.f32 %v4003_v41, %v3834_v31  ;;  %v10740_v62 = vpack.c.b16 %v5260_v61, %v5256_v16  ;;  %v7774_v16 = vld [vmem:[#allocation5 + $0x50] sm:$0xff] }
 0x5d4   : > { %v3836_v11 = vpop.f32.mrf.mxu1  ;;  %6020 = vmatpush.bf16.msrb.mxu0 %v7776_v3  ;;  %v4709_v3 = vmax.f32 %v10177_v57, 0.0  ;;  %v7703_v57 = vld [vmem:[%s11942_s5 + $0x14] sm:$0xf0] }
 0x5d5   : > { %v10732_v24 = vpack.c.bf16 %v4701_v1, %v4700_v38  ;;  %12593 = vst [vmem:[#allocation184_spill] sm:$0xff] %v10740_v62  ;;  %v10742_v38 = vadd.f32 %v4211_v36, %v4004_v56  ;;  %v12598_v56 = vld [vmem:[#allocation74_spill] sm:$0xff] }
 0x5d6   : > { %v2840_v52 = vpop.f32.mrf.mxu3 }
 0x5d7   : > { %v3010_v10 = vadd.f32 %v12592_v26, %v2840_v52  ;;  %v10744_v49 = vpop.f32.mrf.mxu0 }
 0x5d8   : > { %12594 = vst [vmem:[#allocation137_spill] sm:$0xff] %v10744_v49  ;;  %v4005_v28 = vpop.f32.mrf.mxu2  ;;  %6021 = vmatpush.bf16.msrb.mxu0 %v7775_v27  ;;  %v5264_v27 = vunpack.c.l.b16 %v10689_v37  ;;  %v7772_v49 = vld [vmem:[#allocation5 + $0x40] sm:$0xff] }
 0x5d9   : > { %v4448_v1 = vadd.f32 %v4216_v50, %v3010_v10  ;;  %v4006_v44 = vadd.f32 %v4005_v28, %v3836_v11  ;;  %3878 = vmatmul.bf16.gmra.mxu1 %v12555_v17  ;;  %v5265_v11 = vunpack.c.h.b16 %v10689_v37  ;;  %v7773_v28 = vld [vmem:[#allocation5 + $0x48] sm:$0xff] }
 0x5db   : > { %v4704_v0 = vmax.f32 %v4448_v1, 0.0  ;;  %v10750_v61 = vadd.f32 %v4211_v36, %v4006_v44  ;;  %v5269_v1 = vunpack.c.h.b16 %v10702_v15  ;;  %v5268_v44 = vunpack.c.l.b16 %v10702_v15 }
 0x5dc   : > { %v3839_v52 = vpop.f32.mrf.mxu1  ;;  %4047 = vmatmul.bf16.gmra.mxu2 %v12514_v59  ;;  %6022 = vmatpush.bf16.msrb.mxu0 %v7774_v16  ;;  %v7241_v59 = vld [vmem:[%s11942_s5 + $0x8] sm:$0xf] }
 0x5dd   : > { %v10747_v31 = vpack.c.bf16 %v4705_v2, %v4704_v0  ;;  %12596 = vst [vmem:[#allocation112_spill] sm:$0xff] %v10750_v61  ;;  %v10776_v17 = vpack.c.b16 %v5268_v44, %v5264_v27 }
 0x5de   : > { %v2842_v41 = vpop.f32.mrf.mxu3 }
 0x5df   : > { %v3012_v26 = vadd.f32 %v12595_v43, %v2842_v41  ;;  %v10754_v34 = vpop.f32.mrf.mxu0  ;;  %v4215_v43 = vperm.slane %v12558_v22, 3  ;;  %12601 = vst [vmem:[#allocation122_spill] sm:$0xff] %v10776_v17 }
 0x5e0   : > { %12597 = vst [vmem:[#allocation139_spill] sm:$0xff] %v10754_v34  ;;  %v4008_v36 = vpop.f32.mrf.mxu2  ;;  %v4220_v34 = vperm.slane %v10185_v54, 0  ;;  %6023 = vmatpush.bf16.msrb.mxu0 %v7773_v28  ;;  %v12604_v28 = vld [vmem:[#allocation115_spill] sm:$0xff] }
 0x5e1   : > { %v4452_v10 = vadd.f32 %v4216_v50, %v3012_v26  ;;  %v12599_v50 = vld [vmem:[#allocation127_spill] sm:$0xff]  ;;  %v4009_v41 = vadd.f32 %v4008_v36, %v3839_v52  ;;  %v4713_v36 = vmax.f32 %v10204_v40, 0.0  ;;  %v4717_v40 = vmax.f32 %v10207_v60, 0.0  ;;  %v12609_v60 = vld [vmem:[#allocation116_spill] sm:$0xff] }
 0x5e2   : > { %3749 = vmatmul.bf16.gmra.mxu0 %v12599_v50 }
 0x5e3   : > { %v4708_v0 = vmax.f32 %v4452_v10, 0.0  ;;  %2884 = vmatmul.bf16.gmra.mxu3 %v12598_v56  ;;  %v7242_v10 = vor.u32 %v7703_v57, %v7241_v59  ;;  %v10778_v61 = vadd.f32 %v4215_v43, %v4009_v41 }
 0x5e4   : > { %v3841_v16 = vpop.f32.mrf.mxu1  ;;  %6024 = vmatpush.bf16.msrb.mxu0 %v7772_v49  ;;  %v12607_v49 = vld [vmem:[#allocation78_spill] sm:$0xff] }
 0x5e5   : > { %v10760_v2 = vpack.c.bf16 %v4709_v3, %v4708_v0  ;;  %v10772_v0 = vpack.c.b16 %v5269_v1, %v5265_v11  ;;  %v12600_v3 = vld [vmem:[#allocation114_spill] sm:$0xff]  ;;  %12602 = vst [vmem:[#allocation42_spill] sm:$0xff] %v10778_v61  ;;  %3429 = vmatpush.bf16.msra.mxu3 %v7242_v10  ;;  %v5277_v10 = vunpack.c.h.b16 %v10732_v24 }
 0x5e6   : > { %v2845_v26 = vpop.f32.mrf.mxu3 }
 0x5e7   : > { %v3015_v62 = vadd.f32 %v12600_v3, %v2845_v26  ;;  %v10780_v15 = vpop.f32.mrf.mxu0 }
 0x5e8   : > { %12603 = vst [vmem:[#allocation113_spill] sm:$0xff] %v10780_v15  ;;  %v4010_v1 = vpop.f32.mrf.mxu2 }
 0x5e9   : > { %v4456_v37 = vadd.f32 %v4220_v34, %v3015_v62  ;;  %v4011_v59 = vadd.f32 %v4010_v1, %v3841_v16  ;;  %3883 = vmatmul.bf16.gmra.mxu1 %v12567_v14  ;;  %v5273_v16 = vunpack.c.h.b16 %v10719_v47  ;;  %v5272_v1 = vunpack.c.l.b16 %v10719_v47 }
 0x5ea   : > { %v4721_v14 = vmax.f32 %v10210_v42, 0.0  ;;  %v4725_v42 = vmax.f32 %v10213_v18, 0.0 }
 0x5eb   : > { %v4712_v52 = vmax.f32 %v4456_v37, 0.0  ;;  %v10786_v27 = vadd.f32 %v4215_v43, %v4011_v59 }
 0x5ec   : > { %v3844_v26 = vpop.f32.mrf.mxu1  ;;  %4052 = vmatmul.bf16.gmra.mxu2 %v12524_v51  ;;  %v5276_v51 = vunpack.c.l.b16 %v10732_v24 }
 0x5ed   : > { %v10783_v11 = vpack.c.bf16 %v4713_v36, %v4712_v52  ;;  %12605 = vst [vmem:[#allocation127_spill] sm:$0xff] %v10786_v27  ;;  %v12608_v36 = vld [vmem:[#allocation132_spill] sm:$0xff] }
 0x5ee   : > { %v2847_v57 = vpop.f32.mrf.mxu3  ;;  %v10804_v17 = vpack.c.b16 %v5276_v51, %v5272_v1 }
 0x5ef   : > { %v3017_v3 = vadd.f32 %v12604_v28, %v2847_v57  ;;  %v10790_v62 = vpop.f32.mrf.mxu0 }
 0x5f0   : > { %12606 = vst [vmem:[#allocation114_spill] sm:$0xff] %v10790_v62  ;;  %v4013_v52 = vpop.f32.mrf.mxu2 }
 0x5f1   : > { %v4460_v44 = vadd.f32 %v4220_v34, %v3017_v3  ;;  %v4014_v59 = vadd.f32 %v4013_v52, %v3844_v26  ;;  %v10801_v3 = vpack.c.b16 %v5277_v10, %v5273_v16  ;;  %12610 = vst [vmem:[#allocation115_spill] sm:$0xff] %v10804_v17  ;;  %v12612_v16 = vld [vmem:[#allocation117_spill] sm:$0xff]  ;;  %v12619_v17 = vld [vmem:[#allocation120_spill] sm:$0xff] }
 0x5f2   : > { %3754 = vmatmul.bf16.gmra.mxu0 %v12608_v36 }
 0x5f3   : > { %v4716_v41 = vmax.f32 %v4460_v44, 0.0  ;;  %2889 = vmatmul.bf16.gmra.mxu3 %v12607_v49  ;;  %v10806_v62 = vadd.f32 %v4215_v43, %v4014_v59 }
 0x5f4   : > { %v3846_v28 = vpop.f32.mrf.mxu1 }
 0x5f5   : > { %v10796_v37 = vpack.c.bf16 %v4717_v40, %v4716_v41 }
 0x5f6   : > { %v2850_v57 = vpop.f32.mrf.mxu3 }
 0x5f7   : > { %v3020_v44 = vadd.f32 %v12609_v60, %v2850_v57  ;;  %v10808_v40 = vpop.f32.mrf.mxu0  ;;  %v5285_v57 = vunpack.c.h.b16 %v10760_v2 }
 0x5f8   : > { %12611 = vst [vmem:[#allocation132_spill] sm:$0xff] %v10808_v40  ;;  %v4015_v24 = vpop.f32.mrf.mxu2 }
 0x5f9   : > { %v4464_v41 = vadd.f32 %v4220_v34, %v3020_v44  ;;  %v4016_v26 = vadd.f32 %v4015_v24, %v3846_v28  ;;  %3888 = vmatmul.bf16.gmra.mxu1 %v12578_v48  ;;  %v4219_v44 = vperm.slane %v12581_v30, 3 }
 0x5fb   : > { %v4720_v15 = vmax.f32 %v4464_v41, 0.0  ;;  %v10814_v61 = vadd.f32 %v4215_v43, %v4016_v26  ;;  %v12615_v26 = vld [vmem:[#allocation118_spill] sm:$0xff] }
 0x5fc   : > { %v3849_v27 = vpop.f32.mrf.mxu1  ;;  %4057 = vmatmul.bf16.gmra.mxu2 %v12535_v13  ;;  %v5284_v13 = vunpack.c.l.b16 %v10760_v2  ;;  %v4729_v2 = vmax.f32 %v10218_v53, 0.0 }
 0x5fd   : > { %v10811_v47 = vpack.c.bf16 %v4721_v14, %v4720_v15  ;;  %v12614_v14 = vld [vmem:[#allocation149_spill] sm:$0xff]  ;;  %v5281_v15 = vunpack.c.h.b16 %v10747_v31 }
 0x5fe   : > { %v2852_v52 = vpop.f32.mrf.mxu3 }
 0x5ff   : > { %v3022_v10 = vadd.f32 %v12612_v16, %v2852_v52  ;;  %v10818_v51 = vpop.f32.mrf.mxu0  ;;  %v10830_v24 = vpack.c.b16 %v5285_v57, %v5281_v15  ;;  %v4224_v16 = vperm.slane %v10194_v6, 0 }
 0x600   : > { %12613 = vst [vmem:[#allocation116_spill] sm:$0xff] %v10818_v51  ;;  %v4018_v43 = vpop.f32.mrf.mxu2 }
 0x601   : > { %v4468_v1 = vadd.f32 %v4220_v34, %v3022_v10  ;;  %v5280_v34 = vunpack.c.l.b16 %v10747_v31  ;;  %v4019_v60 = vadd.f32 %v4018_v43, %v3849_v27 }
 0x602   : > { %6025 = vmatmul.bf16.vlgmr.msrb.gmra.mxu0 %v10191_v55 }
 0x603   : > { %v4724_v59 = vmax.f32 %v4468_v1, 0.0  ;;  %2894 = vmatmul.bf16.gmra.mxu3 %v12614_v14  ;;  %v10834_v10 = vpack.c.b16 %v5284_v13, %v5280_v34  ;;  %v10836_v1 = vadd.f32 %v4219_v44, %v4019_v60 }
 0x604   : > { %v3851_v18 = vpop.f32.mrf.mxu1 }
 0x605   : > { %v10824_v28 = vpack.c.bf16 %v4725_v42, %v4724_v59  ;;  %12616 = vst [vmem:[#allocation117_spill] sm:$0xff] %v10834_v10 }
 0x606   : > { %v2855_v41 = vpop.f32.mrf.mxu3  ;;  %12617 = vst [vmem:[#allocation149_spill] sm:$0xff] %v10836_v1 }
 0x607   : > { %v3025_v52 = vadd.f32 %v12615_v26, %v2855_v41  ;;  %v10838_v59 = vpop.f32.mrf.mxu0 }
 0x608   : > { %12618 = vst [vmem:[#allocation118_spill] sm:$0xff] %v10838_v59  ;;  %v4020_v42 = vpop.f32.mrf.mxu2 }
 0x609   : > { %v4472_v55 = vadd.f32 %v4224_v16, %v3025_v52  ;;  %v4021_v43 = vadd.f32 %v4020_v42, %v3851_v18  ;;  %3893 = vmatmul.bf16.gmra.mxu1 %v12590_v63  ;;  %v12622_v52 = vld [vmem:[#allocation15_spill] sm:$0xff]  ;;  %v5289_v18 = vunpack.c.h.b16 %v10783_v11 }
 0x60a   : > { %v4733_v53 = vmax.f32 %v12622_v52, 0.0  ;;  %v12624_v42 = vld [vmem:[#allocation171_spill] sm:$0xff]  ;;  %v12625_v52 = vld [vmem:[#allocation121_spill] sm:$0xff] }
 0x60b   : > { %v4728_v31 = vmax.f32 %v4472_v55, 0.0  ;;  %v10844_v26 = vadd.f32 %v4219_v44, %v4021_v43  ;;  %v12623_v55 = vld [vmem:[#allocation153_spill] sm:$0xff]  ;;  %v5288_v43 = vunpack.c.l.b16 %v10783_v11 }
 0x60c   : > { %v3854_v57 = vpop.f32.mrf.mxu1  ;;  %4062 = vmatmul.bf16.gmra.mxu2 %v12545_v5  ;;  %v5292_v5 = vunpack.c.l.b16 %v10796_v37 }
 0x60d   : > { %v10841_v27 = vpack.c.bf16 %v4729_v2, %v4728_v31  ;;  %12620 = vst [vmem:[#allocation120_spill] sm:$0xff] %v10844_v26  ;;  %v5293_v31 = vunpack.c.h.b16 %v10796_v37 }
 0x60e   : > { %v2857_v15 = vpop.f32.mrf.mxu3  ;;  %v10862_v59 = vpack.c.b16 %v5292_v5, %v5288_v43 }
 0x60f   : > { %v3027_v41 = vadd.f32 %v12619_v17, %v2857_v15  ;;  %v10848_v13 = vpop.f32.mrf.mxu0  ;;  %v10859_v10 = vpack.c.b16 %v5293_v31, %v5289_v18  ;;  %v12630_v18 = vld [vmem:[#allocation124_spill] sm:$0xff] }
 0x610   : > { %12621 = vst [vmem:[#allocation198_spill] sm:$0xff] %v10848_v13  ;;  %v4023_v17 = vpop.f32.mrf.mxu2 }
 0x611   : > { %v4476_v34 = vadd.f32 %v4224_v16, %v3027_v41  ;;  %v4024_v15 = vadd.f32 %v4023_v17, %v3854_v57  ;;  %12626 = vst [vmem:[#allocation15_spill] sm:$0xff] %v10862_v59  ;;  %v12637_v59 = vld [vmem:[#allocation186_spill] sm:$0xff] }
 0x612   : > { %6030 = vmatmul.bf16.gmra.mxu0 %v12624_v42  ;;  %v12629_v42 = vld [vmem:[#allocation145_spill] sm:$0xff] }
 0x613   : > { %v4732_v60 = vmax.f32 %v4476_v34, 0.0  ;;  %2899 = vmatmul.bf16.gmra.mxu3 %v12623_v55  ;;  %v10864_v51 = vadd.f32 %v4219_v44, %v4024_v15  ;;  %v4737_v63 = vmax.f32 %v12629_v42, 0.0  ;;  %v12633_v15 = vld [vmem:[#allocation55_spill] sm:$0xff]  ;;  %v5296_v42 = vunpack.c.l.b16 %v10811_v47 }
 0x614   : > { %v3856_v34 = vpop.f32.mrf.mxu1 }
 0x615   : > { %v10854_v2 = vpack.c.bf16 %v4733_v53, %v4732_v60  ;;  %12627 = vst [vmem:[#allocation171_spill] sm:$0xff] %v10864_v51 }
 0x616   : > { %v2860_v41 = vpop.f32.mrf.mxu3 }
 0x617   : > { %v3030_v13 = vadd.f32 %v12625_v52, %v2860_v41  ;;  %v10866_v53 = vpop.f32.mrf.mxu0  ;;  %v4741_v41 = vmax.f32 %v12633_v15, 0.0 }
 0x618   : > { %12628 = vst [vmem:[#allocation121_spill] sm:$0xff] %v10866_v53  ;;  %v4025_v37 = vpop.f32.mrf.mxu2 }
 0x619   : > { %v4480_v60 = vadd.f32 %v4224_v16, %v3030_v13  ;;  %v4026_v57 = vadd.f32 %v4025_v37, %v3856_v34  ;;  %3898 = vmatmul.bf16.gmra.mxu1 %v12598_v56  ;;  %v5301_v34 = vunpack.c.h.b16 %v10824_v28 }
 0x61b   : > { %v4736_v40 = vmax.f32 %v4480_v60, 0.0  ;;  %v10872_v1 = vadd.f32 %v4219_v44, %v4026_v57  ;;  %v12635_v60 = vld [vmem:[#allocation63_spill] sm:$0xff]  ;;  %v4223_v57 = vperm.slane %v10185_v54, 3 }
 0x61c   : > { %v3859_v26 = vpop.f32.mrf.mxu1  ;;  %4067 = vmatmul.bf16.gmra.mxu2 %v12556_v35  ;;  %v5300_v35 = vunpack.c.l.b16 %v10824_v28 }
 0x61d   : > { %v10869_v11 = vpack.c.bf16 %v4737_v63, %v4736_v40  ;;  %12631 = vst [vmem:[#allocation145_spill] sm:$0xff] %v10872_v1  ;;  %v12634_v63 = vld [vmem:[#allocation155_spill] sm:$0xff]  ;;  %v5297_v40 = vunpack.c.h.b16 %v10811_v47  ;;  %v12642_v1 = vld [vmem:[#allocation129_spill] sm:$0xff] }
 0x61e   : > { %v2862_v17 = vpop.f32.mrf.mxu3 }
 0x61f   : > { %v3032_v31 = vadd.f32 %v12630_v18, %v2862_v17  ;;  %v10876_v13 = vpop.f32.mrf.mxu0 }
 0x620   : > { %12632 = vst [vmem:[#allocation124_spill] sm:$0xff] %v10876_v13  ;;  %v4028_v44 = vpop.f32.mrf.mxu2 }
 0x621   : > { %v4484_v43 = vadd.f32 %v4224_v16, %v3032_v31  ;;  %v7771_v16 = vld [vmem:[#allocation5 + $0x38] sm:$0xff]  ;;  %v4029_v37 = vadd.f32 %v4028_v44, %v3859_v26  ;;  %v10888_v31 = vpack.c.b16 %v5301_v34, %v5297_v40  ;;  %v12641_v26 = vld [vmem:[#allocation37_spill] sm:$0xff] }
 0x622   : > { %6035 = vmatmul.bf16.gmra.mxu0 %v12635_v60  ;;  %5848 = vmatpush.bf16.msrb.mxu3 %v7771_v16  ;;  %v4745_v44 = vmax.f32 %v12641_v26, 0.0  ;;  %v7795_v40 = vld [vmem:[#allocation5 + $0xf8] sm:$0xff]  ;;  %v12646_v26 = vld [vmem:[#allocation159_spill] sm:$0xff] }
 0x623   : > { %v4740_v5 = vmax.f32 %v4484_v43, 0.0  ;;  %2904 = vmatmul.bf16.gmra.mxu3 %v12634_v63  ;;  %v12636_v43 = vld [vmem:[#allocation126_spill] sm:$0xff]  ;;  %v10894_v60 = vadd.f32 %v4223_v57, %v4029_v37  ;;  %6355 = vmatpush.bf16.msrb.mxu2 %v7795_v40  ;;  %v5304_v40 = vunpack.c.l.b16 %v10841_v27 }
 0x624   : > { %v3861_v18 = vpop.f32.mrf.mxu1  ;;  %v7787_v34 = vld [vmem:[#allocation5 + $0xb8] sm:$0xff] }
 0x625   : > { %v10882_v52 = vpack.c.bf16 %v4741_v41, %v4740_v5  ;;  %v4228_v5 = vperm.slane %v12637_v59, 0  ;;  %v10892_v41 = vpack.c.b16 %v5300_v35, %v5296_v42  ;;  %12639 = vst [vmem:[#allocation63_spill] sm:$0xff] %v10894_v60  ;;  %6186 = vmatpush.bf16.msrb.mxu1 %v7787_v34 }
 0x626   : > { %v2865_v17 = vpop.f32.mrf.mxu3 }
 0x627   : > { %v3035_v15 = vadd.f32 %v12636_v43, %v2865_v17  ;;  %12638 = vst [vmem:[#allocation55_spill] sm:$0xff] %v10892_v41  ;;  %v10896_v47 = vpop.f32.mrf.mxu0 }
 0x628   : > { %12640 = vst [vmem:[#allocation126_spill] sm:$0xff] %v10896_v47  ;;  %v4030_v54 = vpop.f32.mrf.mxu2 }
 0x629   : > { %v4488_v13 = vadd.f32 %v4228_v5, %v3035_v15  ;;  %v4031_v56 = vadd.f32 %v4030_v54, %v3861_v18  ;;  %3903 = vmatmul.bf16.gmra.mxu1 %v12607_v49  ;;  %v12645_v15 = vld [vmem:[#allocation21_spill] sm:$0xff]  ;;  %v5305_v54 = vunpack.c.h.b16 %v10841_v27 }
 0x62b   : > { %v4744_v28 = vmax.f32 %v4488_v13, 0.0  ;;  %v10902_v42 = vadd.f32 %v4223_v57, %v4031_v56 }
 0x62c   : > { %v3864_v43 = vpop.f32.mrf.mxu1  ;;  %4072 = vmatmul.bf16.gmra.mxu2 %v12568_v4  ;;  %v5308_v4 = vunpack.c.l.b16 %v10854_v2 }
 0x62d   : > { %v10899_v53 = vpack.c.bf16 %v4745_v44, %v4744_v28  ;;  %12643 = vst [vmem:[#allocation37_spill] sm:$0xff] %v10902_v42  ;;  %v4749_v28 = vmax.f32 %v12645_v15, 0.0  ;;  %v12647_v44 = vld [vmem:[#allocation27_spill] sm:$0xff] }
 0x62e   : > { %v2867_v17 = vpop.f32.mrf.mxu3  ;;  %v12648_v15 = vld [vmem:[#allocation131_spill] sm:$0xff] }
 0x62f   : > { %v3037_v16 = vadd.f32 %v12642_v1, %v2867_v17  ;;  %v10906_v13 = vpop.f32.mrf.mxu0  ;;  %v5309_v1 = vunpack.c.h.b16 %v10854_v2 }
 0x630   : > { %12644 = vst [vmem:[#allocation129_spill] sm:$0xff] %v10906_v13  ;;  %v4033_v56 = vpop.f32.mrf.mxu2  ;;  %v10920_v13 = vpack.c.b16 %v5308_v4, %v5304_v40 }
 0x631   : > { %v4492_v35 = vadd.f32 %v4228_v5, %v3037_v16  ;;  %v4034_v34 = vadd.f32 %v4033_v56, %v3864_v43 }
 0x632   : > { %6040 = vmatmul.bf16.gmra.mxu0 %v12647_v44  ;;  %12649 = vst [vmem:[#allocation21_spill] sm:$0xff] %v10920_v13  ;;  %v12651_v44 = vld [vmem:[#allocation158_spill] sm:$0xff] }
 0x633   : > { %v4748_v37 = vmax.f32 %v4492_v35, 0.0  ;;  %2909 = vmatmul.bf16.gmra.mxu3 %v12646_v26  ;;  %v10917_v35 = vpack.c.b16 %v5309_v1, %v5305_v54  ;;  %v10922_v47 = vadd.f32 %v4223_v57, %v4034_v34  ;;  %v4753_v42 = vmax.f32 %v12651_v44, 0.0  ;;  %v12652_v54 = vld [vmem:[#allocation134_spill] sm:$0xff]  ;;  %v12654_v34 = vld [vmem:[#allocation161_spill] sm:$0xff] }
 0x634   : > { %v3866_v16 = vpop.f32.mrf.mxu1  ;;  %v10946_v44 = vperm.slane %v10194_v6, 3 }
 0x635   : > { %v10912_v18 = vpack.c.bf16 %v4749_v28, %v4748_v37 }
 0x636   : > { %v2870_v17 = vpop.f32.mrf.mxu3 }
 0x637   : > { %v3040_v41 = vadd.f32 %v12648_v15, %v2870_v17  ;;  %v10924_v28 = vpop.f32.mrf.mxu0  ;;  %v4757_v17 = vmax.f32 %v12654_v34, 0.0 }
 0x638   : > { %12650 = vst [vmem:[#allocation27_spill] sm:$0xff] %v10924_v28  ;;  %v4035_v2 = vpop.f32.mrf.mxu2 }
 0x639   : > { %v4496_v37 = vadd.f32 %v4228_v5, %v3040_v41  ;;  %v4036_v43 = vadd.f32 %v4035_v2, %v3866_v16  ;;  %3908 = vmatmul.bf16.gmra.mxu1 %v12614_v14  ;;  %v5317_v16 = vunpack.c.h.b16 %v10882_v52 }
 0x63b   : > { %v4752_v49 = vmax.f32 %v4496_v37, 0.0  ;;  %v10930_v51 = vadd.f32 %v4223_v57, %v4036_v43 }
 0x63c   : > { %v3869_v60 = vpop.f32.mrf.mxu1  ;;  %4077 = vmatmul.bf16.gmra.mxu2 %v12579_v45  ;;  %v5316_v45 = vunpack.c.l.b16 %v10882_v52 }
 0x63d   : > { %v10927_v27 = vpack.c.bf16 %v4753_v42, %v4752_v49  ;;  %v12655_v49 = vld [vmem:[#allocation11_spill] sm:$0xff]  ;;  %v5313_v42 = vunpack.c.h.b16 %v10869_v11 }
 0x63e   : > { %v2872_v56 = vpop.f32.mrf.mxu3 }
 0x63f   : > { %v3042_v1 = vadd.f32 %v12652_v54, %v2872_v56  ;;  %v10934_v41 = vpop.f32.mrf.mxu0  ;;  %v10950_v56 = vpack.c.b16 %v5317_v16, %v5313_v42  ;;  %v12656_v54 = vld [vmem:[#allocation136_spill] sm:$0xff] }
 0x640   : > { %12653 = vst [vmem:[#allocation131_spill] sm:$0xff] %v10934_v41  ;;  %v4038_v57 = vpop.f32.mrf.mxu2 }
 0x641   : > { %v4500_v40 = vadd.f32 %v4228_v5, %v3042_v1  ;;  %v5312_v5 = vunpack.c.l.b16 %v10869_v11  ;;  %v4039_v37 = vadd.f32 %v4038_v57, %v3869_v60 }
 0x642   : > { %6045 = vmatmul.bf16.gmra.mxu0 %v10412_v39 }
 0x643   : > { %v4756_v4 = vmax.f32 %v4500_v40, 0.0  ;;  %3430 = vmatmul.bf16.vlgmr.msra.gmra.mxu3 %v12655_v49  ;;  %v12657_v40 = vld [vmem:[#allocation152_spill] sm:$0xff]  ;;  %v10954_v34 = vpack.c.b16 %v5316_v45, %v5312_v5  ;;  %v10957_v39 = vadd.f32 %v10946_v44, %v4039_v37  ;;  %v12663_v37 = vld [vmem:[#allocation167_spill] sm:$0xff] }
 0x644   : > { %v10948_v43 = vpop.f32.mrf.mxu1 }
 0x645   : > { %v10940_v15 = vpack.c.bf16 %v4757_v17, %v4756_v4  ;;  %v4232_v4 = vperm.slane %v12657_v40, 0  ;;  %12658 = vst [vmem:[#allocation158_spill] sm:$0xff] %v10954_v34  ;;  %v12660_v17 = vld [vmem:[#allocation165_spill] sm:$0xff] }
 0x646   : > { %v2875_v2 = vpop.f32.mrf.mxu3  ;;  %v4761_v49 = vmax.f32 %v12660_v17, 0.0  ;;  %v5325_v17 = vunpack.c.h.b16 %v10912_v18 }
 0x647   : > { %v3045_v1 = vadd.f32 %v12656_v54, %v2875_v2  ;;  %v10959_v52 = vpop.f32.mrf.mxu0  ;;  %v12661_v2 = vld [vmem:[#allocation138_spill] sm:$0xff] }
 0x648   : > { %12659 = vst [vmem:[#allocation134_spill] sm:$0xff] %v10959_v52  ;;  %v10964_v13 = vpop.f32.mrf.mxu2 }
 0x649   : > { %v4504_v11 = vadd.f32 %v4232_v4, %v3045_v1  ;;  %3913 = vmatmul.bf16.gmra.mxu1 %v12623_v55  ;;  %v4765_v1 = vmax.f32 %v12663_v37, 0.0 }
 0x64b   : > { %v4760_v60 = vmax.f32 %v4504_v11, 0.0  ;;  %v12664_v11 = vld [vmem:[#allocation12_spill] sm:$0xff] }
 0x64c   : > { %v3874_v16 = vpop.f32.mrf.mxu1  ;;  %4082 = vmatmul.bf16.gmra.mxu2 %v12591_v19  ;;  %v5324_v19 = vunpack.c.l.b16 %v10912_v18 }
 0x64d   : > { %v10962_v57 = vpack.c.bf16 %v4761_v49, %v4760_v60  ;;  %v5321_v60 = vunpack.c.h.b16 %v10899_v53 }
 0x64e   : > { %v2877_v42 = vpop.f32.mrf.mxu3 }
 0x64f   : > { %v3047_v54 = vadd.f32 %v12661_v2, %v2877_v42  ;;  %v10969_v5 = vpop.f32.mrf.mxu0  ;;  %v5320_v42 = vunpack.c.l.b16 %v10899_v53  ;;  %v10982_v37 = vpack.c.b16 %v5325_v17, %v5321_v60  ;;  %v12669_v53 = vld [vmem:[#allocation82_spill] sm:$0xff]  ;;  %v12670_v17 = vld [vmem:[#allocation141_spill] sm:$0xff] }
 0x650   : > { %12662 = vst [vmem:[#allocation161_spill] sm:$0xff] %v10969_v5  ;;  %v4043_v34 = vpop.f32.mrf.mxu2  ;;  %v4769_v55 = vmax.f32 %v12669_v53, 0.0 }
 0x651   : > { %v4508_v41 = vadd.f32 %v4232_v4, %v3047_v54  ;;  %v4044_v2 = vadd.f32 %v4043_v34, %v3874_v16  ;;  %v10985_v52 = vpack.c.b16 %v5324_v19, %v5320_v42  ;;  %v12672_v19 = vld [vmem:[#allocation169_spill] sm:$0xff] }
 0x652   : > { %6050 = vmatmul.bf16.gmra.mxu0 %v10444_v29 }
 0x653   : > { %v4764_v45 = vmax.f32 %v4508_v41, 0.0  ;;  %3435 = vmatmul.bf16.gmra.mxu3 %v12664_v11  ;;  %v12666_v11 = vld [vmem:[#allocation140_spill] sm:$0xff]  ;;  %12667 = vst [vmem:[#allocation136_spill] sm:$0xff] %v10985_v52  ;;  %v12676_v52 = vld [vmem:[#allocation143_spill] sm:$0xff] }
 0x654   : > { %v10980_v41 = vpop.f32.mrf.mxu1 }
 0x655   : > { %v10975_v49 = vpack.c.bf16 %v4765_v1, %v4764_v45  ;;  %12665 = vst [vmem:[#allocation11_spill] sm:$0xff] %v10980_v41  ;;  %v10988_v45 = vadd.f32 %v10946_v44, %v4044_v2  ;;  %v4773_v2 = vmax.f32 %v12672_v19, 0.0 }
 0x656   : > { %v2880_v54 = vpop.f32.mrf.mxu3 }
 0x657   : > { %v3050_v5 = vadd.f32 %v12666_v11, %v2880_v54  ;;  %v10990_v28 = vpop.f32.mrf.mxu0  ;;  %v12673_v11 = vld [vmem:[#allocation14_spill] sm:$0xff] }
 0x658   : > { %12668 = vst [vmem:[#allocation165_spill] sm:$0xff] %v10990_v28  ;;  %v10995_v34 = vpop.f32.mrf.mxu2  ;;  %v12680_v28 = vld [vmem:[#allocation189_spill] sm:$0xff] }
 0x659   : > { %v4512_v1 = vadd.f32 %v4232_v4, %v3050_v5  ;;  %3918 = vmatmul.bf16.gmra.mxu1 %v12634_v63 }
 0x65b   : > { %v4768_v29 = vmax.f32 %v4512_v1, 0.0  ;;  %v5333_v1 = vunpack.c.h.b16 %v10940_v15 }
 0x65c   : > { %v3879_v60 = vpop.f32.mrf.mxu1  ;;  %4087 = vmatmul.bf16.gmra.mxu2 %v12599_v50  ;;  %v5332_v50 = vunpack.c.l.b16 %v10940_v15 }
 0x65d   : > { %v10993_v18 = vpack.c.bf16 %v4769_v55, %v4768_v29  ;;  %v5329_v55 = vunpack.c.h.b16 %v10927_v27 }
 0x65e   : > { %v2882_v16 = vpop.f32.mrf.mxu3 }
 0x65f   : > { %v3052_v41 = vadd.f32 %v12670_v17, %v2882_v16  ;;  %v11000_v42 = vpop.f32.mrf.mxu0  ;;  %v11012_v17 = vperm.slane %v12637_v59, 3  ;;  %v4777_v59 = vmax.f32 %v12680_v28, 0.0 }
 0x660   : > { %12671 = vst [vmem:[#allocation138_spill] sm:$0xff] %v11000_v42  ;;  %v4048_v53 = vpop.f32.mrf.mxu2 }
 0x661   : > { %v4516_v54 = vadd.f32 %v4232_v4, %v3052_v41  ;;  %v7770_v4 = vld [vmem:[#allocation5 + $0x30] sm:$0xff]  ;;  %v5328_v41 = vunpack.c.l.b16 %v10927_v27  ;;  %v4049_v16 = vadd.f32 %v4048_v53, %v3879_v60  ;;  %12674 = vst [vmem:[#allocation167_spill] sm:$0xff] %v11012_v17 }
 0x662   : > { %6055 = vmatmul.bf16.gmra.mxu0 %v10474_v7  ;;  %5849 = vmatpush.bf16.msrb.mxu3 %v7770_v4  ;;  %v12682_v4 = vld [vmem:[#allocation144_spill] sm:$0xff] }
 0x663   : > { %v4772_v5 = vmax.f32 %v4516_v54, 0.0  ;;  %3440 = vmatmul.bf16.gmra.mxu3 %v12673_v11  ;;  %v11016_v11 = vpack.c.b16 %v5333_v1, %v5329_v55  ;;  %v11020_v7 = vpack.c.b16 %v5332_v50, %v5328_v41  ;;  %v11023_v27 = vadd.f32 %v11012_v17, %v4049_v16  ;;  %v7794_v1 = vld [vmem:[#allocation5 + $0xf0] sm:$0xff] }
 0x664   : > { %v11014_v19 = vpop.f32.mrf.mxu1  ;;  %6356 = vmatpush.bf16.msrb.mxu2 %v7794_v1  ;;  %v5341_v1 = vunpack.c.h.b16 %v10975_v49 }
 0x665   : > { %v11006_v29 = vpack.c.bf16 %v4773_v2, %v4772_v5  ;;  %12675 = vst [vmem:[#allocation12_spill] sm:$0xff] %v11014_v19  ;;  %v12677_v2 = vld [vmem:[#allocation90_spill] sm:$0xff] }
 0x666   : > { %v2885_v54 = vpop.f32.mrf.mxu3  ;;  %v4236_v42 = vperm.slane %v12677_v2, 0  ;;  %12678 = vst [vmem:[#allocation140_spill] sm:$0xff] %v11020_v7 }
 0x667   : > { %v3055_v5 = vadd.f32 %v12676_v52, %v2885_v54  ;;  %v11025_v60 = vpop.f32.mrf.mxu0  ;;  %v7786_v52 = vld [vmem:[#allocation5 + $0xb0] sm:$0xff] }
 0x668   : > { %12679 = vst [vmem:[#allocation82_spill] sm:$0xff] %v11025_v60  ;;  %v11030_v55 = vpop.f32.mrf.mxu2  ;;  %6187 = vmatpush.bf16.msrb.mxu1 %v7786_v52  ;;  %v5336_v52 = vunpack.c.l.b16 %v10962_v57 }
 0x669   : > { %v4520_v15 = vadd.f32 %v4236_v42, %v3055_v5  ;;  %12681 = vst [vmem:[#allocation141_spill] sm:$0xff] %v11030_v55  ;;  %3923 = vmatmul.bf16.gmra.mxu1 %v12646_v26  ;;  %v12691_v26 = vld [vmem:[#allocation178_spill] sm:$0xff] }
 0x66b   : > { %v4776_v53 = vmax.f32 %v4520_v15, 0.0  ;;  %v12685_v15 = vld [vmem:[#allocation16_spill] sm:$0xff] }
 0x66c   : > { %v3884_v19 = vpop.f32.mrf.mxu1  ;;  %4092 = vmatmul.bf16.gmra.mxu2 %v12608_v36  ;;  %v5340_v36 = vunpack.c.l.b16 %v10975_v49 }
 0x66d   : > { %v11028_v63 = vpack.c.bf16 %v4777_v59, %v4776_v53  ;;  %v12684_v59 = vld [vmem:[#allocation190_spill] sm:$0xff]  ;;  %v5337_v53 = vunpack.c.h.b16 %v10962_v57  ;;  %v4785_v57 = vmax.f32 %v12691_v26, 0.0 }
 0x66e   : > { %v2887_v54 = vpop.f32.mrf.mxu3  ;;  %v4781_v5 = vmax.f32 %v12684_v59, 0.0 }
 0x66f   : > { %v3057_v41 = vadd.f32 %v12682_v4, %v2887_v54  ;;  %v11035_v16 = vpop.f32.mrf.mxu0 }
 0x670   : > { %12683 = vst [vmem:[#allocation169_spill] sm:$0xff] %v11035_v16  ;;  %v4053_v60 = vpop.f32.mrf.mxu2  ;;  %v11051_v16 = vpack.c.b16 %v5340_v36, %v5336_v52  ;;  %v12695_v36 = vld [vmem:[#allocation102_spill] sm:$0xff] }
 0x671   : > { %v4524_v50 = vadd.f32 %v4236_v42, %v3057_v41  ;;  %v4054_v54 = vadd.f32 %v4053_v60, %v3884_v19 }
 0x672   : > { %6060 = vmatmul.bf16.gmra.mxu0 %v10502_v9  ;;  %12688 = vst [vmem:[#allocation143_spill] sm:$0xff] %v11051_v16  ;;  %v5345_v16 = vunpack.c.h.b16 %v10993_v18 }
 0x673   : > { %v4780_v28 = vmax.f32 %v4524_v50, 0.0  ;;  %3445 = vmatmul.bf16.gmra.mxu3 %v12685_v15  ;;  %v12687_v50 = vld [vmem:[#allocation146_spill] sm:$0xff]  ;;  %v11049_v15 = vpack.c.b16 %v5341_v1, %v5337_v53 }
 0x674   : > { %v11046_v41 = vpop.f32.mrf.mxu1 }
 0x675   : > { %v11040_v7 = vpack.c.bf16 %v4781_v5, %v4780_v28  ;;  %12686 = vst [vmem:[#allocation14_spill] sm:$0xff] %v11046_v41  ;;  %v11054_v28 = vadd.f32 %v11012_v17, %v4054_v54  ;;  %v4789_v54 = vmax.f32 %v12695_v36, 0.0  ;;  %v12699_v36 = vld [vmem:[#allocation150_spill] sm:$0xff] }
 0x676   : > { %v2890_v4 = vpop.f32.mrf.mxu3 }
 0x677   : > { %v3060_v59 = vadd.f32 %v12687_v50, %v2890_v4  ;;  %12689 = vst [vmem:[#allocation189_spill] sm:$0xff] %v11054_v28  ;;  %v11056_v5 = vpop.f32.mrf.mxu0  ;;  %v12693_v4 = vld [vmem:[#allocation148_spill] sm:$0xff]  ;;  %v12706_v28 = vld [vmem:[#allocation151_spill] sm:$0xff] }
 0x678   : > { %12690 = vst [vmem:[#allocation144_spill] sm:$0xff] %v11056_v5  ;;  %v11061_v19 = vpop.f32.mrf.mxu2 }
 0x679   : > { %v4528_v9 = vadd.f32 %v4236_v42, %v3060_v59  ;;  %12692 = vst [vmem:[#allocation190_spill] sm:$0xff] %v11061_v19  ;;  %v12696_v59 = vld [vmem:[#allocation17_spill] sm:$0xff] }
 0x67b   : > { %v4784_v55 = vmax.f32 %v4528_v9, 0.0  ;;  %v5349_v9 = vunpack.c.h.b16 %v11006_v29 }
 0x67c   : > { %v3889_v41 = vpop.f32.mrf.mxu1 }
 0x67d   : > { %v11059_v49 = vpack.c.bf16 %v4785_v57, %v4784_v55  ;;  %v5344_v57 = vunpack.c.l.b16 %v10993_v18 }
 0x67e   : > { %v2892_v60 = vpop.f32.mrf.mxu3 }
 0x67f   : > { %v3062_v53 = vadd.f32 %v12693_v4, %v2892_v60  ;;  %v11064_v52 = vpop.f32.mrf.mxu0  ;;  %v11076_v4 = vperm.slane %v12657_v40, 3 }
 0x680   : > { %12694 = vst [vmem:[#allocation16_spill] sm:$0xff] %v11064_v52  ;;  %v4058_v55 = vpop.f32.mrf.mxu2  ;;  %v11082_v52 = vpack.c.b16 %v5349_v9, %v5345_v16 }
 0x681   : > { %v4532_v1 = vadd.f32 %v4236_v42, %v3062_v53  ;;  %v5348_v42 = vunpack.c.l.b16 %v11006_v29  ;;  %v4059_v60 = vadd.f32 %v4058_v55, %v3889_v41  ;;  %12697 = vst [vmem:[#allocation146_spill] sm:$0xff] %v11076_v4  ;;  %v12704_v41 = vld [vmem:[#allocation33_spill] sm:$0xff] }
 0x682   : > { %6065 = vmatmul.bf16.gmra.mxu0 %v10538_v46  ;;  %v4793_v55 = vmax.f32 %v12704_v41, 0.0 }
 0x683   : > { %v4788_v50 = vmax.f32 %v4532_v1, 0.0  ;;  %3450 = vmatmul.bf16.gmra.mxu3 %v12696_v59  ;;  %v11084_v46 = vpack.c.b16 %v5348_v42, %v5344_v57  ;;  %v11087_v5 = vadd.f32 %v11076_v4, %v4059_v60  ;;  %v12708_v42 = vld [vmem:[#allocation51_spill] sm:$0xff] }
 0x684   : > { %v11078_v1 = vpop.f32.mrf.mxu1  ;;  %v4797_v60 = vmax.f32 %v12708_v42, 0.0 }
 0x685   : > { %v11069_v26 = vpack.c.bf16 %v4789_v54, %v4788_v50  ;;  %12698 = vst [vmem:[#allocation178_spill] sm:$0xff] %v11078_v1  ;;  %v12700_v54 = vld [vmem:[#allocation108_spill] sm:$0xff] }
 0x686   : > { %v2895_v53 = vpop.f32.mrf.mxu3  ;;  %v4240_v50 = vperm.slane %v12700_v54, 0  ;;  %12701 = vst [vmem:[#allocation148_spill] sm:$0xff] %v11084_v46 }
 0x687   : > { %v3065_v59 = vadd.f32 %v12699_v36, %v2895_v53  ;;  %12702 = vst [vmem:[#allocation102_spill] sm:$0xff] %v11087_v5  ;;  %v11089_v29 = vpop.f32.mrf.mxu0  ;;  %v12715_v5 = vld [vmem:[#allocation13_spill] sm:$0xff] }
 0x688   : > { %12703 = vst [vmem:[#allocation17_spill] sm:$0xff] %v11089_v29  ;;  %v11094_v1 = vpop.f32.mrf.mxu2  ;;  %v5353_v29 = vunpack.c.h.b16 %v11028_v63 }
 0x689   : > { %v4536_v18 = vadd.f32 %v4240_v50, %v3065_v59  ;;  %12705 = vst [vmem:[#allocation150_spill] sm:$0xff] %v11094_v1  ;;  %v12709_v59 = vld [vmem:[#allocation18_spill] sm:$0xff] }
 0x68b   : > { %v4792_v40 = vmax.f32 %v4536_v18, 0.0  ;;  %v5357_v18 = vunpack.c.h.b16 %v11040_v7 }
 0x68c   : > { %v3894_v36 = vpop.f32.mrf.mxu1 }
 0x68d   : > { %v11092_v19 = vpack.c.bf16 %v4793_v55, %v4792_v40  ;;  %v5352_v55 = vunpack.c.l.b16 %v11028_v63  ;;  %v4801_v63 = vmax.f32 %v12715_v5, 0.0 }
 0x68e   : > { %v2897_v53 = vpop.f32.mrf.mxu3 }
 0x68f   : > { %v3067_v16 = vadd.f32 %v12706_v28, %v2897_v53  ;;  %v11097_v57 = vpop.f32.mrf.mxu0  ;;  %v5356_v28 = vunpack.c.l.b16 %v11040_v7 }
 0x690   : > { %12707 = vst [vmem:[#allocation33_spill] sm:$0xff] %v11097_v57  ;;  %v4063_v40 = vpop.f32.mrf.mxu2 }
 0x691   : > { %v4540_v9 = vadd.f32 %v4240_v50, %v3067_v16  ;;  %v4064_v53 = vadd.f32 %v4063_v40, %v3894_v36  ;;  %v11113_v1 = vpack.c.b16 %v5356_v28, %v5352_v55  ;;  %v12719_v28 = vld [vmem:[#allocation147_spill] sm:$0xff] }
 0x692   : > { %6070 = vmatmul.bf16.gmra.mxu0 %v10566_v58 }
 0x693   : > { %v4796_v46 = vmax.f32 %v4540_v9, 0.0  ;;  %3455 = vmatmul.bf16.gmra.mxu3 %v12709_v59  ;;  %v12711_v9 = vld [vmem:[#allocation154_spill] sm:$0xff]  ;;  %v11111_v59 = vpack.c.b16 %v5357_v18, %v5353_v29  ;;  %12712 = vst [vmem:[#allocation51_spill] sm:$0xff] %v11113_v1  ;;  %v5361_v1 = vunpack.c.h.b16 %v11059_v49 }
 0x694   : > { %v11108_v57 = vpop.f32.mrf.mxu1 }
 0x695   : > { %v11102_v41 = vpack.c.bf16 %v4797_v60, %v4796_v46  ;;  %12710 = vst [vmem:[#allocation151_spill] sm:$0xff] %v11108_v57  ;;  %v11116_v46 = vadd.f32 %v11076_v4, %v4064_v53  ;;  %v4805_v53 = vmax.f32 %v12719_v28, 0.0 }
 0x696   : > { %v2900_v16 = vpop.f32.mrf.mxu3 }
 0x697   : > { %v3070_v42 = vadd.f32 %v12711_v9, %v2900_v16  ;;  %12713 = vst [vmem:[#allocation18_spill] sm:$0xff] %v11116_v46  ;;  %v11118_v60 = vpop.f32.mrf.mxu0  ;;  %v12717_v16 = vld [vmem:[#allocation19_spill] sm:$0xff] }
 0x698   : > { %12714 = vst [vmem:[#allocation154_spill] sm:$0xff] %v11118_v60  ;;  %v11123_v36 = vpop.f32.mrf.mxu2  ;;  %v7793_v60 = vld [vmem:[#allocation5 + $0xe8] sm:$0xff] }
 0x699   : > { %v4544_v58 = vadd.f32 %v4240_v50, %v3070_v42  ;;  %12716 = vst [vmem:[#allocation13_spill] sm:$0xff] %v11123_v36  ;;  %v12720_v42 = vld [vmem:[#allocation20_spill] sm:$0xff]  ;;  %6357 = vmatpush.bf16.msrb.mxu2 %v7793_v60  ;;  %v7783_v60 = vld [vmem:[#allocation5 + $0x98] sm:$0xff] }
 0x69b   : > { %v4800_v17 = vmax.f32 %v4544_v58, 0.0  ;;  %v7769_v58 = vld [vmem:[#allocation5 + $0x28] sm:$0xff] }
 0x69c   : > { %v3899_v57 = vpop.f32.mrf.mxu1  ;;  %5850 = vmatpush.bf16.msrb.mxu3 %v7769_v58 }
 0x69d   : > { %v11121_v7 = vpack.c.bf16 %v4801_v63, %v4800_v17  ;;  %v7785_v63 = vld [vmem:[#allocation5 + $0xa8] sm:$0xff] }
 0x69e   : > { %v2902_v40 = vpop.f32.mrf.mxu3  ;;  %6188 = vmatpush.bf16.msrb.mxu1 %v7785_v63 }
 0x69f   : > { %v3072_v29 = vadd.f32 %v12717_v16, %v2902_v40  ;;  %v11126_v55 = vpop.f32.mrf.mxu0  ;;  %v5365_v40 = vunpack.c.h.b16 %v11069_v26  ;;  %v5364_v16 = vunpack.c.l.b16 %v11069_v26 }
 0x6a0   : > { %12718 = vst [vmem:[#allocation19_spill] sm:$0xff] %v11126_v55  ;;  %v4068_v17 = vpop.f32.mrf.mxu2  ;;  %v12724_v55 = vld [vmem:[#allocation188_spill] sm:$0xff] }
 0x6a1   : > { %v4548_v18 = vadd.f32 %v4240_v50, %v3072_v29  ;;  %v5360_v50 = vunpack.c.l.b16 %v11059_v49  ;;  %v4069_v29 = vadd.f32 %v4068_v17, %v3899_v57  ;;  %v11144_v36 = vpack.c.b16 %v5365_v40, %v5361_v1  ;;  %v12728_v17 = vld [vmem:[#allocation163_spill] sm:$0xff]  ;;  %v12730_v1 = vld [vmem:[#allocation157_spill] sm:$0xff] }
 0x6a2   : > { %6075 = vmatmul.bf16.gmra.mxu0 %v10598_v25  ;;  %v4244_v25 = vperm.slane %v12724_v55, 0 }
 0x6a3   : > { %v4804_v9 = vmax.f32 %v4548_v18, 0.0  ;;  %3460 = vmatmul.bf16.gmra.mxu3 %v12720_v42  ;;  %v11138_v18 = vperm.slane %v12677_v2, 3  ;;  %v11146_v46 = vpack.c.b16 %v5364_v16, %v5360_v50  ;;  %v4809_v2 = vmax.f32 %v12728_v17, 0.0  ;;  %v7784_v50 = vld [vmem:[#allocation5 + $0xa0] sm:$0xff] }
 0x6a4   : > { %v11140_v42 = vpop.f32.mrf.mxu1  ;;  %v7792_v16 = vld [vmem:[#allocation5 + $0xe0] sm:$0xff]  ;;  %6189 = vmatpush.bf16.msrb.mxu1 %v7784_v50 }
 0x6a5   : > { %v11131_v5 = vpack.c.bf16 %v4805_v53, %v4804_v9  ;;  %12721 = vst [vmem:[#allocation147_spill] sm:$0xff] %v11138_v18  ;;  %v12723_v53 = vld [vmem:[#allocation156_spill] sm:$0xff]  ;;  %v11149_v49 = vadd.f32 %v11138_v18, %v4069_v29  ;;  %6358 = vmatpush.bf16.msrb.mxu2 %v7792_v16 }
 0x6a6   : > { %v2905_v28 = vpop.f32.mrf.mxu3  ;;  %12722 = vst [vmem:[#allocation20_spill] sm:$0xff] %v11140_v42 }
 0x6a7   : > { %v3075_v9 = vadd.f32 %v12723_v53, %v2905_v28  ;;  %12725 = vst [vmem:[#allocation156_spill] sm:$0xff] %v11146_v46  ;;  %v11151_v57 = vpop.f32.mrf.mxu0  ;;  %v12732_v46 = vld [vmem:[#allocation59_spill] sm:$0xff] }
 0x6a8   : > { %12726 = vst [vmem:[#allocation199_spill] sm:$0xff] %v11149_v49  ;;  %v11156_v28 = vpop.f32.mrf.mxu2  ;;  %v4813_v17 = vmax.f32 %v12732_v46, 0.0  ;;  %6190 = vmatpush.bf16.msrb.mxu1 %v7783_v60  ;;  %v7790_v49 = vld [vmem:[#allocation5 + $0xd0] sm:$0xff] }
 0x6a9   : > { %v4552_v26 = vadd.f32 %v4244_v25, %v3075_v9  ;;  %12727 = vst [vmem:[#allocation200_spill] sm:$0xff] %v11151_v57  ;;  %v7791_v9 = vld [vmem:[#allocation5 + $0xd8] sm:$0xff] }
 0x6aa   : > { %12729 = vst [vmem:[#allocation163_spill] sm:$0xff] %v11156_v28  ;;  %6359 = vmatpush.bf16.msrb.mxu2 %v7791_v9  ;;  %v7781_v9 = vld [vmem:[#allocation5 + $0x88] sm:$0xff] }
 0x6ab   : > { %v4808_v42 = vmax.f32 %v4552_v26, 0.0 }
 0x6ac   : > { %v3904_v63 = vpop.f32.mrf.mxu1 }
 0x6ad   : > { %v11154_v4 = vpack.c.bf16 %v4809_v2, %v4808_v42  ;;  %v12733_v2 = vld [vmem:[#allocation22_spill] sm:$0xff]  ;;  %v5369_v42 = vunpack.c.h.b16 %v11092_v19 }
 0x6ae   : > { %v2907_v58 = vpop.f32.mrf.mxu3  ;;  %6360 = vmatpush.bf16.msrb.mxu2 %v7790_v49 }
 0x6af   : > { %v3077_v40 = vadd.f32 %v12730_v1, %v2907_v58  ;;  %v11159_v29 = vpop.f32.mrf.mxu0  ;;  %v5373_v58 = vunpack.c.h.b16 %v11102_v41  ;;  %v5368_v1 = vunpack.c.l.b16 %v11092_v19 }
 0x6b0   : > { %12731 = vst [vmem:[#allocation157_spill] sm:$0xff] %v11159_v29  ;;  %v4073_v28 = vpop.f32.mrf.mxu2 }
 0x6b1   : > { %v4556_v53 = vadd.f32 %v4244_v25, %v3077_v40  ;;  %v5372_v40 = vunpack.c.l.b16 %v11102_v41  ;;  %v4074_v50 = vadd.f32 %v4073_v28, %v3904_v63  ;;  %v11173_v29 = vpack.c.b16 %v5373_v58, %v5369_v42  ;;  %v12739_v41 = vld [vmem:[#allocation84_spill] sm:$0xff] }
 0x6b2   : > { %6080 = vmatmul.bf16.gmra.mxu0 %v10626_v8  ;;  %v4817_v28 = vmax.f32 %v12739_v41, 0.0  ;;  %v12744_v41 = vld [vmem:[#allocation24_spill] sm:$0xff] }
 0x6b3   : > { %v4812_v26 = vmax.f32 %v4556_v53, 0.0  ;;  %3465 = vmatmul.bf16.gmra.mxu3 %v12733_v2  ;;  %v12735_v53 = vld [vmem:[#allocation160_spill] sm:$0xff]  ;;  %v11178_v8 = vadd.f32 %v11138_v18, %v4074_v50 }
 0x6b4   : > { %v11170_v46 = vpop.f32.mrf.mxu1 }
 0x6b5   : > { %v11164_v57 = vpack.c.bf16 %v4813_v17, %v4812_v26  ;;  %12734 = vst [vmem:[#allocation59_spill] sm:$0xff] %v11170_v46  ;;  %v11175_v17 = vpack.c.b16 %v5372_v40, %v5368_v1  ;;  %v7782_v26 = vld [vmem:[#allocation5 + $0x90] sm:$0xff]  ;;  %v7789_v46 = vld [vmem:[#allocation5 + $0xc8] sm:$0xff]  ;;  %v12741_v40 = vld [vmem:[#allocation162_spill] sm:$0xff] }
 0x6b6   : > { %v2910_v16 = vpop.f32.mrf.mxu3  ;;  %12737 = vst [vmem:[#allocation160_spill] sm:$0xff] %v11178_v8  ;;  %6191 = vmatpush.bf16.msrb.mxu1 %v7782_v26  ;;  %6361 = vmatpush.bf16.msrb.mxu2 %v7789_v46  ;;  %v5381_v46 = vunpack.c.h.b16 %v11131_v5 }
 0x6b7   : > { %v3080_v2 = vadd.f32 %v12735_v53, %v2910_v16  ;;  %12736 = vst [vmem:[#allocation22_spill] sm:$0xff] %v11175_v17  ;;  %v11180_v19 = vpop.f32.mrf.mxu0  ;;  %v7780_v53 = vld [vmem:[#allocation5 + $0x80] sm:$0xff] }
 0x6b8   : > { %12738 = vst [vmem:[#allocation201_spill] sm:$0xff] %v11180_v19  ;;  %v11185_v42 = vpop.f32.mrf.mxu2 }
 0x6b9   : > { %v4560_v60 = vadd.f32 %v4244_v25, %v3080_v2  ;;  %12740 = vst [vmem:[#allocation84_spill] sm:$0xff] %v11185_v42  ;;  %v7788_v2 = vld [vmem:[#allocation5 + $0xc0] sm:$0xff] }
 0x6ba   : > { %6192 = vmatpush.bf16.msrb.mxu1 %v7781_v9  ;;  %6362 = vmatpush.bf16.msrb.mxu2 %v7788_v2  ;;  %v5380_v9 = vunpack.c.l.b16 %v11131_v5 }
 0x6bb   : > { %v4816_v63 = vmax.f32 %v4560_v60, 0.0  ;;  %v12743_v60 = vld [vmem:[#allocation61_spill] sm:$0xff] }
 0x6bc   : > { %v3909_v1 = vpop.f32.mrf.mxu1  ;;  %v4821_v26 = vmax.f32 %v12743_v60, 0.0  ;;  %v12747_v60 = vld [vmem:[#allocation174_spill] sm:$0xff] }
 0x6bd   : > { %v11183_v16 = vpack.c.bf16 %v4817_v28, %v4816_v63  ;;  %v5377_v28 = vunpack.c.h.b16 %v11121_v7 }
 0x6be   : > { %v2912_v58 = vpop.f32.mrf.mxu3  ;;  %6193 = vmatpush.bf16.msrb.mxu1 %v7780_v53  ;;  %v12746_v53 = vld [vmem:[#allocation164_spill] sm:$0xff] }
 0x6bf   : > { %v3082_v50 = vadd.f32 %v12741_v40, %v2912_v58  ;;  %v11188_v19 = vpop.f32.mrf.mxu0 }
 0x6c0   : > { %12742 = vst [vmem:[#allocation162_spill] sm:$0xff] %v11188_v19  ;;  %v4078_v42 = vpop.f32.mrf.mxu2 }
 0x6c1   : > { %v4564_v17 = vadd.f32 %v4244_v25, %v3082_v50  ;;  %v5376_v25 = vunpack.c.l.b16 %v11121_v7  ;;  %v4079_v58 = vadd.f32 %v4078_v42, %v3909_v1  ;;  %v12751_v42 = vld [vmem:[#allocation41_spill] sm:$0xff] }
 0x6c2   : > { %6085 = vmatmul.bf16.gmra.mxu0 %v10679_v12  ;;  %v4571_v1 = vmax.f32 %v12751_v42, 0.0  ;;  %v5388_v42 = vunpack.c.l.b16 %v11164_v57 }
 0x6c3   : > { %v4820_v49 = vmax.f32 %v4564_v17, 0.0  ;;  %3470 = vmatmul.bf16.gmra.mxu3 %v12744_v41  ;;  %v11200_v17 = vperm.slane %v12700_v54, 3  ;;  %v11208_v12 = vpack.c.b16 %v5380_v9, %v5376_v25 }
 0x6c4   : > { %v11202_v50 = vpop.f32.mrf.mxu1 }
 0x6c5   : > { %v11193_v63 = vpack.c.bf16 %v4821_v26, %v4820_v49  ;;  %12745 = vst [vmem:[#allocation61_spill] sm:$0xff] %v11202_v50  ;;  %v4186_v26 = vperm.slane %v12747_v60, 2  ;;  %v11206_v49 = vpack.c.b16 %v5381_v46, %v5377_v28  ;;  %v11211_v41 = vadd.f32 %v11200_v17, %v4079_v58  ;;  %v12754_v46 = vld [vmem:[#allocation177_spill] sm:$0xff] }
 0x6c6   : > { %v3431_v40 = vpop.f32.mrf.mxu3  ;;  %12748 = vst [vmem:[#allocation24_spill] sm:$0xff] %v11208_v12  ;;  %v4575_v25 = vmax.f32 %v12754_v46, 0.0  ;;  %v12755_v12 = vld [vmem:[#allocation26_spill] sm:$0xff] }
 0x6c7   : > { %v3601_v2 = vadd.f32 %v12746_v53, %v3431_v40  ;;  %12749 = vst [vmem:[#allocation164_spill] sm:$0xff] %v11211_v41  ;;  %v11213_v5 = vpop.f32.mrf.mxu0  ;;  %v12753_v53 = vld [vmem:[#allocation166_spill] sm:$0xff] }
 0x6c8   : > { %12750 = vst [vmem:[#allocation174_spill] sm:$0xff] %v11213_v5  ;;  %v11216_v8 = vpop.f32.mrf.mxu2 }
 0x6c9   : > { %v4314_v7 = vadd.f32 %v4186_v26, %v3601_v2  ;;  %12752 = vst [vmem:[#allocation41_spill] sm:$0xff] %v11216_v8  ;;  %v12757_v8 = vld [vmem:[#allocation168_spill] sm:$0xff] }
 0x6cb   : > { %v4570_v19 = vmax.f32 %v4314_v7, 0.0  ;;  %v5389_v7 = vunpack.c.h.b16 %v11164_v57 }
 0x6cc   : > { %v3914_v40 = vpop.f32.mrf.mxu1 }
 0x6cd   : > { %v4825_v54 = vpack.c.bf16 %v4571_v1, %v4570_v19  ;;  %v5385_v19 = vunpack.c.h.b16 %v11154_v4 }
 0x6ce   : > { %v3433_v50 = vpop.f32.mrf.mxu3 }
 0x6cf   : > { %v3603_v60 = vadd.f32 %v12753_v53, %v3433_v50  ;;  %v11221_v58 = vpop.f32.mrf.mxu0  ;;  %v5146_v1 = vunpack.c.l.b16 %v4825_v54  ;;  %v5147_v50 = vunpack.c.h.b16 %v4825_v54 }
 0x6d0   : > { %12756 = vst [vmem:[#allocation166_spill] sm:$0xff] %v11221_v58  ;;  %v4083_v5 = vpop.f32.mrf.mxu2 }
 0x6d1   : > { %v4318_v28 = vadd.f32 %v4186_v26, %v3603_v60  ;;  %v4084_v53 = vadd.f32 %v4083_v5, %v3914_v40  ;;  %v4579_v5 = vmax.f32 %v10380_v23, 0.0  ;;  %v11247_v23 = vperm.slane %v12724_v55, 3 }
 0x6d2   : > { %6090 = vmatmul.bf16.gmra.mxu0 %v10708_v32 }
 0x6d3   : > { %v4574_v9 = vmax.f32 %v4318_v28, 0.0  ;;  %3475 = vmatmul.bf16.gmra.mxu3 %v12755_v12  ;;  %v5384_v28 = vunpack.c.l.b16 %v11154_v4  ;;  %v11234_v32 = vadd.f32 %v11200_v17, %v4084_v53 }
 0x6d5   : > { %v4827_v2 = vpack.c.bf16 %v4575_v25, %v4574_v9  ;;  %v11229_v25 = vpop.f32.mrf.mxu1  ;;  %v11231_v9 = vpack.c.b16 %v5389_v7, %v5385_v19  ;;  %v11236_v41 = vpack.c.b16 %v5388_v42, %v5384_v28  ;;  %v12762_v7 = vld [vmem:[#allocation170_spill] sm:$0xff]  ;;  %v12763_v42 = vld [vmem:[#allocation69_spill] sm:$0xff] }
 0x6d6   : > { %v3436_v60 = vpop.f32.mrf.mxu3  ;;  %12758 = vst [vmem:[#allocation177_spill] sm:$0xff] %v11229_v25  ;;  %v4583_v28 = vmax.f32 %v12763_v42, 0.0 }
 0x6d7   : > { %v5150_v46 = vunpack.c.l.b16 %v4827_v2  ;;  %v5151_v12 = vunpack.c.h.b16 %v4827_v2  ;;  %v3606_v58 = vadd.f32 %v12757_v8, %v3436_v60  ;;  %12759 = vst [vmem:[#allocation26_spill] sm:$0xff] %v11236_v41  ;;  %v11239_v2 = vpop.f32.mrf.mxu0 }
 0x6d8   : > { %12760 = vst [vmem:[#allocation168_spill] sm:$0xff] %v11239_v2  ;;  %v11241_v8 = vpop.f32.mrf.mxu2 }
 0x6d9   : > { %v5402_v57 = vpack.c.b16 %v5150_v46, %v5146_v1  ;;  %v5403_v18 = vpack.c.b16 %v5151_v12, %v5147_v50  ;;  %v4322_v54 = vadd.f32 %v4186_v26, %v3606_v58  ;;  %12761 = vst [vmem:[#allocation202_spill] sm:$0xff] %v11241_v8  ;;  %v12764_v50 = vld [vmem:[#allocation28_spill] sm:$0xff]  ;;  %v12765_v58 = vld [vmem:[#allocation175_spill] sm:$0xff] }
 0x6db   : > { %v4578_v40 = vmax.f32 %v4322_v54, 0.0  ;;  %6194 = vmatmul.bf16.vlgmr.msrb.gmra.mxu1 %v5402_v57  ;;  %6363 = vmatmul.bf16.vlgmr.msrb.gmra.mxu2 %v5403_v18  ;;  %v4190_v18 = vperm.slane %v12765_v58, 2  ;;  %v7768_v57 = vld [vmem:[#allocation5 + $0x20] sm:$0xff]  ;;  %v5393_v54 = vunpack.c.h.b16 %v11183_v16 }
 0x6dc   : > { %5851 = vmatpush.bf16.msrb.mxu3 %v7768_v57 }
 0x6dd   : > { %v4829_v4 = vpack.c.bf16 %v4579_v5, %v4578_v40  ;;  %v3919_v25 = vpop.f32.mrf.mxu1  ;;  %v5396_v5 = vunpack.c.l.b16 %v11193_v63 }
 0x6de   : > { %v3438_v19 = vpop.f32.mrf.mxu3 }
 0x6df   : > { %v3608_v60 = vadd.f32 %v12762_v7, %v3438_v19  ;;  %v5154_v7 = vunpack.c.l.b16 %v4829_v4  ;;  %v11255_v42 = vpop.f32.mrf.mxu0 }
 0x6e0   : > { %v4088_v12 = vpop.f32.mrf.mxu2  ;;  %12766 = vst [vmem:[#allocation170_spill] sm:$0xff] %v11255_v42  ;;  %v12835_v42 = vld [vmem:[#allocation107_spill] sm:$0xff] }
 0x6e1   : > { %v4326_v53 = vadd.f32 %v4186_v26, %v3608_v60  ;;  %v5397_v26 = vunpack.c.h.b16 %v11193_v63  ;;  %v4089_v40 = vadd.f32 %v4088_v12, %v3919_v25  ;;  %v5155_v60 = vunpack.c.h.b16 %v4829_v4  ;;  %v12769_v4 = vld [vmem:[#allocation29_spill] sm:$0xff] }
 0x6e2   : > { %6095 = vmatmul.bf16.gmra.mxu0 %v10737_v33  ;;  %v4587_v55 = vmax.f32 %v12769_v4, 0.0 }
 0x6e3   : > { %v4582_v1 = vmax.f32 %v4326_v53, 0.0  ;;  %3480 = vmatmul.bf16.gmra.mxu3 %v12764_v50  ;;  %v5392_v53 = vunpack.c.l.b16 %v11183_v16  ;;  %v12767_v50 = vld [vmem:[#allocation172_spill] sm:$0xff]  ;;  %v11258_v33 = vpack.c.b16 %v5397_v26, %v5393_v54  ;;  %v11261_v41 = vadd.f32 %v11247_v23, %v4089_v40  ;;  %v12770_v54 = vld [vmem:[#allocation173_spill] sm:$0xff] }
 0x6e5   : > { %v4831_v46 = vpack.c.bf16 %v4583_v28, %v4582_v1  ;;  %v11263_v2 = vpack.c.b16 %v5396_v5, %v5392_v53  ;;  %v11266_v8 = vpop.f32.mrf.mxu1  ;;  %v12772_v53 = vld [vmem:[#allocation73_spill] sm:$0xff] }
 0x6e6   : > { %v3441_v19 = vpop.f32.mrf.mxu3 }
 0x6e7   : > { %v3611_v28 = vadd.f32 %v12767_v50, %v3441_v19  ;;  %v5158_v1 = vunpack.c.l.b16 %v4831_v46  ;;  %v5159_v58 = vunpack.c.h.b16 %v4831_v46  ;;  %12768 = vst [vmem:[#allocation69_spill] sm:$0xff] %v11263_v2  ;;  %v11271_v40 = vpop.f32.mrf.mxu0  ;;  %v4591_v50 = vmax.f32 %v12772_v53, 0.0 }
 0x6e8   : > { %v11268_v46 = vpop.f32.mrf.mxu2  ;;  %12771 = vst [vmem:[#allocation28_spill] sm:$0xff] %v11271_v40 }
 0x6e9   : > { %v4330_v63 = vadd.f32 %v4190_v18, %v3611_v28  ;;  %v5406_v25 = vpack.c.b16 %v5158_v1, %v5154_v7  ;;  %v5407_v12 = vpack.c.b16 %v5159_v58, %v5155_v60  ;;  %v12773_v60 = vld [vmem:[#allocation30_spill] sm:$0xff] }
 0x6eb   : > { %v4586_v16 = vmax.f32 %v4330_v63, 0.0  ;;  %6199 = vmatmul.bf16.gmra.mxu1 %v5406_v25  ;;  %6368 = vmatmul.bf16.gmra.mxu2 %v5407_v12  ;;  %v12774_v12 = vld [vmem:[#allocation176_spill] sm:$0xff] }
 0x6ed   : > { %v4833_v19 = vpack.c.bf16 %v4587_v55, %v4586_v16  ;;  %v3924_v1 = vpop.f32.mrf.mxu1 }
 0x6ee   : > { %v3443_v57 = vpop.f32.mrf.mxu3 }
 0x6ef   : > { %v3613_v26 = vadd.f32 %v12770_v54, %v3443_v57  ;;  %v5162_v25 = vunpack.c.l.b16 %v4833_v19  ;;  %v5163_v57 = vunpack.c.h.b16 %v4833_v19  ;;  %v4599_v19 = vmax.f32 %v10452_v21, 0.0 }
 0x6f0   : > { %v4093_v58 = vpop.f32.mrf.mxu2 }
 0x6f1   : > { %v4334_v5 = vadd.f32 %v4190_v18, %v3613_v26  ;;  %v4094_v63 = vadd.f32 %v4093_v58, %v3924_v1  ;;  %v12776_v58 = vld [vmem:[#allocation92_spill] sm:$0xff] }
 0x6f2   : > { %6100 = vmatmul.bf16.gmra.mxu0 %v10772_v0 }
 0x6f3   : > { %v4590_v7 = vmax.f32 %v4334_v5, 0.0  ;;  %3485 = vmatmul.bf16.gmra.mxu3 %v12773_v60  ;;  %v11278_v26 = vadd.f32 %v11247_v23, %v4094_v63  ;;  %v12777_v63 = vld [vmem:[#allocation32_spill] sm:$0xff] }
 0x6f5   : > { %v4835_v28 = vpack.c.bf16 %v4591_v50, %v4590_v7  ;;  %v4595_v50 = vmax.f32 %v10442_v20, 0.0  ;;  %v11281_v7 = vpop.f32.mrf.mxu0 }
 0x6f6   : > { %v3446_v55 = vpop.f32.mrf.mxu3  ;;  %12775 = vst [vmem:[#allocation175_spill] sm:$0xff] %v11281_v7  ;;  %v12784_v7 = vld [vmem:[#allocation83_spill] sm:$0xff] }
 0x6f7   : > { %v3616_v4 = vadd.f32 %v12774_v12, %v3446_v55  ;;  %v5166_v16 = vunpack.c.l.b16 %v4835_v28  ;;  %v5167_v54 = vunpack.c.h.b16 %v4835_v28 }
 0x6f9   : > { %v4338_v53 = vadd.f32 %v4190_v18, %v3616_v4  ;;  %v5410_v5 = vpack.c.b16 %v5166_v16, %v5162_v25  ;;  %v5411_v2 = vpack.c.b16 %v5167_v54, %v5163_v57  ;;  %v12779_v16 = vld [vmem:[#allocation88_spill] sm:$0xff] }
 0x6fa   : > { %v4194_v57 = vperm.slane %v12779_v16, 2 }
 0x6fb   : > { %v4594_v60 = vmax.f32 %v4338_v53, 0.0  ;;  %6204 = vmatmul.bf16.gmra.mxu1 %v5410_v5  ;;  %6373 = vmatmul.bf16.gmra.mxu2 %v5411_v2  ;;  %v12780_v2 = vld [vmem:[#allocation106_spill] sm:$0xff] }
 0x6fd   : > { %v4837_v0 = vpack.c.bf16 %v4595_v50, %v4594_v60  ;;  %v11286_v4 = vpop.f32.mrf.mxu0 }
 0x6fe   : > { %v3448_v1 = vpop.f32.mrf.mxu3  ;;  %12778 = vst [vmem:[#allocation172_spill] sm:$0xff] %v11286_v4 }
 0x6ff   : > { %v3618_v55 = vadd.f32 %v12776_v58, %v3448_v1  ;;  %v5170_v54 = vunpack.c.l.b16 %v4837_v0  ;;  %v5171_v50 = vunpack.c.h.b16 %v4837_v0  ;;  %v12781_v58 = vld [vmem:[#allocation52_spill] sm:$0xff]  ;;  %v12785_v0 = vld [vmem:[#allocation34_spill] sm:$0xff] }
 0x701   : > { %v4342_v12 = vadd.f32 %v4190_v18, %v3618_v55  ;;  %v4603_v55 = vmax.f32 %v12781_v58, 0.0 }
 0x702   : > { %6105 = vmatmul.bf16.gmra.mxu0 %v10801_v3 }
 0x703   : > { %v4598_v28 = vmax.f32 %v4342_v12, 0.0  ;;  %3490 = vmatmul.bf16.gmra.mxu3 %v12777_v63  ;;  %v12783_v63 = vld [vmem:[#allocation182_spill] sm:$0xff] }
 0x705   : > { %v4839_v25 = vpack.c.bf16 %v4599_v19, %v4598_v28  ;;  %v11292_v3 = vpop.f32.mrf.mxu0 }
 0x706   : > { %v3451_v20 = vpop.f32.mrf.mxu3  ;;  %12782 = vst [vmem:[#allocation29_spill] sm:$0xff] %v11292_v3 }
 0x707   : > { %v3621_v53 = vadd.f32 %v12780_v2, %v3451_v20  ;;  %v5174_v5 = vunpack.c.l.b16 %v4839_v25  ;;  %v5175_v60 = vunpack.c.h.b16 %v4839_v25  ;;  %v4607_v20 = vmax.f32 %v12784_v7, 0.0 }
 0x709   : > { %v4346_v18 = vadd.f32 %v4194_v57, %v3621_v53  ;;  %v5414_v1 = vpack.c.b16 %v5174_v5, %v5170_v54  ;;  %v5415_v21 = vpack.c.b16 %v5175_v60, %v5171_v50  ;;  %v12786_v5 = vld [vmem:[#allocation185_spill] sm:$0xff] }
 0x70b   : > { %v4602_v12 = vmax.f32 %v4346_v18, 0.0  ;;  %6209 = vmatmul.bf16.gmra.mxu1 %v5414_v1  ;;  %6378 = vmatmul.bf16.gmra.mxu2 %v5415_v21 }
 0x70d   : > { %v4841_v19 = vpack.c.bf16 %v4603_v55, %v4602_v12  ;;  %v11299_v21 = vpop.f32.mrf.mxu0 }
 0x70e   : > { %v3453_v28 = vpop.f32.mrf.mxu3  ;;  %12787 = vst [vmem:[#allocation173_spill] sm:$0xff] %v11299_v21 }
 0x70f   : > { %v3623_v16 = vadd.f32 %v12783_v63, %v3453_v28  ;;  %v5178_v53 = vunpack.c.l.b16 %v4841_v19  ;;  %v5179_v18 = vunpack.c.h.b16 %v4841_v19  ;;  %v12788_v28 = vld [vmem:[#allocation85_spill] sm:$0xff] }
 0x710   : > { %v4611_v7 = vmax.f32 %v12788_v28, 0.0 }
 0x711   : > { %v4350_v4 = vadd.f32 %v4194_v57, %v3623_v16 }
 0x712   : > { %6110 = vmatmul.bf16.gmra.mxu0 %v10830_v24  ;;  %v12789_v24 = vld [vmem:[#allocation53_spill] sm:$0xff] }
 0x713   : > { %v4606_v2 = vmax.f32 %v4350_v4, 0.0  ;;  %3495 = vmatmul.bf16.gmra.mxu3 %v12785_v0  ;;  %v12790_v0 = vld [vmem:[#allocation179_spill] sm:$0xff] }
 0x715   : > { %v4843_v25 = vpack.c.bf16 %v4607_v20, %v4606_v2 }
 0x716   : > { %v3456_v54 = vpop.f32.mrf.mxu3 }
 0x717   : > { %v3626_v50 = vadd.f32 %v12786_v5, %v3456_v54  ;;  %v5182_v60 = vunpack.c.l.b16 %v4843_v25  ;;  %v5183_v1 = vunpack.c.h.b16 %v4843_v25  ;;  %v4615_v54 = vmax.f32 %v12790_v0, 0.0  ;;  %v11304_v5 = vpop.f32.mrf.mxu0  ;;  %v12792_v25 = vld [vmem:[#allocation36_spill] sm:$0xff] }
 0x718   : > { %12791 = vst [vmem:[#allocation73_spill] sm:$0xff] %v11304_v5 }
 0x719   : > { %v4354_v58 = vadd.f32 %v4194_v57, %v3626_v50  ;;  %v5418_v55 = vpack.c.b16 %v5182_v60, %v5178_v53  ;;  %v5419_v12 = vpack.c.b16 %v5183_v1, %v5179_v18  ;;  %v7767_v53 = vld [vmem:[#allocation5 + $0x18] sm:$0xff] }
 0x71a   : > { %v12793_v18 = vld [vmem:[#allocation94_spill] sm:$0xff]  ;;  %5852 = vmatpush.bf16.msrb.mxu3 %v7767_v53 }
 0x71b   : > { %v4610_v4 = vmax.f32 %v4354_v58, 0.0  ;;  %6214 = vmatmul.bf16.gmra.mxu1 %v5418_v55  ;;  %6383 = vmatmul.bf16.gmra.mxu2 %v5419_v12  ;;  %v4198_v1 = vperm.slane %v12793_v18, 2  ;;  %v12794_v55 = vld [vmem:[#allocation187_spill] sm:$0xff] }
 0x71d   : > { %v4845_v63 = vpack.c.bf16 %v4611_v7, %v4610_v4 }
 0x71e   : > { %v3458_v16 = vpop.f32.mrf.mxu3 }
 0x71f   : > { %v3628_v20 = vadd.f32 %v12789_v24, %v3458_v16  ;;  %v5186_v58 = vunpack.c.l.b16 %v4845_v63  ;;  %v5187_v7 = vunpack.c.h.b16 %v4845_v63 }
 0x721   : > { %v4358_v2 = vadd.f32 %v4194_v57, %v3628_v20  ;;  %v12795_v20 = vld [vmem:[#allocation89_spill] sm:$0xff] }
 0x722   : > { %6115 = vmatmul.bf16.gmra.mxu0 %v10859_v10  ;;  %v11311_v10 = vpop.f32.mrf.mxu0 }
 0x723   : > { %v4614_v19 = vmax.f32 %v4358_v2, 0.0  ;;  %3500 = vmatmul.bf16.gmra.mxu3 %v12792_v25  ;;  %v4619_v2 = vmax.f32 %v12795_v20, 0.0  ;;  %12796 = vst [vmem:[#allocation30_spill] sm:$0xff] %v11311_v10  ;;  %v12797_v25 = vld [vmem:[#allocation57_spill] sm:$0xff] }
 0x725   : > { %v4847_v50 = vpack.c.bf16 %v4615_v54, %v4614_v19 }
 0x726   : > { %v3461_v60 = vpop.f32.mrf.mxu3 }
 0x727   : > { %v3631_v12 = vadd.f32 %v12794_v55, %v3461_v60  ;;  %v5190_v28 = vunpack.c.l.b16 %v4847_v50  ;;  %v5191_v57 = vunpack.c.h.b16 %v4847_v50  ;;  %v12798_v60 = vld [vmem:[#allocation91_spill] sm:$0xff]  ;;  %v12799_v50 = vld [vmem:[#allocation38_spill] sm:$0xff] }
 0x728   : > { %v4623_v55 = vmax.f32 %v12798_v60, 0.0 }
 0x729   : > { %v4362_v4 = vadd.f32 %v4198_v1, %v3631_v12  ;;  %v5422_v16 = vpack.c.b16 %v5190_v28, %v5186_v58  ;;  %v5423_v24 = vpack.c.b16 %v5191_v57, %v5187_v7  ;;  %v12801_v7 = vld [vmem:[#allocation23_spill] sm:$0xff] }
 0x72a   : > { %v11317_v28 = vpop.f32.mrf.mxu0 }
 0x72b   : > { %v4618_v0 = vmax.f32 %v4362_v4, 0.0  ;;  %6219 = vmatmul.bf16.gmra.mxu1 %v5422_v16  ;;  %6388 = vmatmul.bf16.gmra.mxu2 %v5423_v24  ;;  %12800 = vst [vmem:[#allocation176_spill] sm:$0xff] %v11317_v28  ;;  %v12805_v28 = vld [vmem:[#allocation49_spill] sm:$0xff] }
 0x72d   : > { %v4849_v54 = vpack.c.bf16 %v4619_v2, %v4618_v0 }
 0x72e   : > { %v3463_v19 = vpop.f32.mrf.mxu3 }
 0x72f   : > { %v3633_v18 = vadd.f32 %v12797_v25, %v3463_v19  ;;  %v5194_v12 = vunpack.c.l.b16 %v4849_v54  ;;  %v5195_v16 = vunpack.c.h.b16 %v4849_v54  ;;  %v12802_v19 = vld [vmem:[#allocation93_spill] sm:$0xff]  ;;  %v12806_v54 = vld [vmem:[#allocation40_spill] sm:$0xff] }
 0x730   : > { %v4627_v25 = vmax.f32 %v12802_v19, 0.0 }
 0x731   : > { %v4366_v5 = vadd.f32 %v4198_v1, %v3633_v18 }
 0x732   : > { %6120 = vmatmul.bf16.gmra.mxu0 %v10888_v31  ;;  %v12803_v31 = vld [vmem:[#allocation39_spill] sm:$0xff] }
 0x733   : > { %v4622_v63 = vmax.f32 %v4366_v5, 0.0  ;;  %3505 = vmatmul.bf16.gmra.mxu3 %v12799_v50 }
 0x735   : > { %v4851_v53 = vpack.c.bf16 %v4623_v55, %v4622_v63  ;;  %v11322_v63 = vpop.f32.mrf.mxu0 }
 0x736   : > { %v3466_v58 = vpop.f32.mrf.mxu3  ;;  %12804 = vst [vmem:[#allocation92_spill] sm:$0xff] %v11322_v63 }
 0x737   : > { %v3636_v57 = vadd.f32 %v12801_v7, %v3466_v58  ;;  %v5198_v4 = vunpack.c.l.b16 %v4851_v53  ;;  %v5199_v24 = vunpack.c.h.b16 %v4851_v53  ;;  %v4631_v58 = vmax.f32 %v12805_v28, 0.0 }
 0x739   : > { %v4370_v20 = vadd.f32 %v4198_v1, %v3636_v57  ;;  %v5426_v2 = vpack.c.b16 %v5198_v4, %v5194_v12  ;;  %v5427_v0 = vpack.c.b16 %v5199_v24, %v5195_v16  ;;  %v12807_v57 = vld [vmem:[#allocation104_spill] sm:$0xff]  ;;  %v12808_v24 = vld [vmem:[#allocation86_spill] sm:$0xff] }
 0x73a   : > { %v4202_v4 = vperm.slane %v12807_v57, 2  ;;  %v12812_v57 = vld [vmem:[#allocation97_spill] sm:$0xff] }
 0x73b   : > { %v4626_v5 = vmax.f32 %v4370_v20, 0.0  ;;  %6224 = vmatmul.bf16.gmra.mxu1 %v5426_v2  ;;  %6393 = vmatmul.bf16.gmra.mxu2 %v5427_v0 }
 0x73d   : > { %v4853_v18 = vpack.c.bf16 %v4627_v25, %v4626_v5 }
 0x73e   : > { %v3468_v60 = vpop.f32.mrf.mxu3 }
 0x73f   : > { %v3638_v55 = vadd.f32 %v12803_v31, %v3468_v60  ;;  %v5202_v16 = vunpack.c.l.b16 %v4853_v18  ;;  %v5203_v0 = vunpack.c.h.b16 %v4853_v18  ;;  %v12809_v60 = vld [vmem:[#allocation68_spill] sm:$0xff]  ;;  %v11330_v31 = vpop.f32.mrf.mxu0  ;;  %v4639_v18 = vmax.f32 %v12812_v57, 0.0 }
 0x740   : > { %v4635_v28 = vmax.f32 %v12809_v60, 0.0  ;;  %12810 = vst [vmem:[#allocation32_spill] sm:$0xff] %v11330_v31  ;;  %v12819_v31 = vld [vmem:[#allocation123_spill] sm:$0xff] }
 0x741   : > { %v4374_v50 = vadd.f32 %v4198_v1, %v3638_v55 }
 0x742   : > { %6125 = vmatmul.bf16.gmra.mxu0 %v10917_v35 }
 0x743   : > { %v4630_v7 = vmax.f32 %v4374_v50, 0.0  ;;  %3510 = vmatmul.bf16.gmra.mxu3 %v12806_v54  ;;  %v11333_v54 = vpop.f32.mrf.mxu1 }
 0x745   : > { %v4855_v53 = vpack.c.bf16 %v4631_v58, %v4630_v7  ;;  %v12811_v58 = vld [vmem:[#allocation65_spill] sm:$0xff] }
 0x746   : > { %v3471_v12 = vpop.f32.mrf.mxu3 }
 0x747   : > { %v3641_v20 = vadd.f32 %v12808_v24, %v3471_v12  ;;  %v5206_v2 = vunpack.c.l.b16 %v4855_v53  ;;  %v5207_v19 = vunpack.c.h.b16 %v4855_v53  ;;  %v12813_v24 = vld [vmem:[#allocation43_spill] sm:$0xff] }
 0x749   : > { %v4378_v25 = vadd.f32 %v4202_v4, %v3641_v20  ;;  %v5430_v5 = vpack.c.b16 %v5206_v2, %v5202_v16  ;;  %v5431_v1 = vpack.c.b16 %v5207_v19, %v5203_v0  ;;  %v11337_v16 = vpop.f32.mrf.mxu0  ;;  %v11340_v2 = vpop.f32.mrf.mxu2 }
 0x74a   : > { %12814 = vst [vmem:[#allocation88_spill] sm:$0xff] %v11337_v16 }
 0x74b   : > { %v4634_v55 = vmax.f32 %v4378_v25, 0.0  ;;  %6229 = vmatmul.bf16.gmra.mxu1 %v5430_v5  ;;  %6398 = vmatmul.bf16.gmra.mxu2 %v5431_v1  ;;  %v12815_v25 = vld [vmem:[#allocation67_spill] sm:$0xff] }
 0x74d   : > { %v4857_v35 = vpack.c.bf16 %v4635_v28, %v4634_v55 }
 0x74e   : > { %v3473_v50 = vpop.f32.mrf.mxu3 }
 0x74f   : > { %v3643_v7 = vadd.f32 %v12811_v58, %v3473_v50  ;;  %v5210_v19 = vunpack.c.l.b16 %v4857_v35  ;;  %v5211_v60 = vunpack.c.h.b16 %v4857_v35 }
 0x751   : > { %v4382_v12 = vadd.f32 %v4202_v4, %v3643_v7  ;;  %v11348_v16 = vpop.f32.mrf.mxu0 }
 0x752   : > { %6130 = vmatmul.bf16.gmra.mxu0 %v10950_v56  ;;  %12817 = vst [vmem:[#allocation106_spill] sm:$0xff] %v11348_v16 }
 0x753   : > { %v4638_v53 = vmax.f32 %v4382_v12, 0.0  ;;  %3515 = vmatmul.bf16.gmra.mxu3 %v12813_v24  ;;  %v12816_v12 = vld [vmem:[#allocation99_spill] sm:$0xff] }
 0x754   : > { %v4643_v57 = vmax.f32 %v12816_v12, 0.0 }
 0x755   : > { %v4859_v20 = vpack.c.bf16 %v4639_v18, %v4638_v53 }
 0x756   : > { %v3476_v0 = vpop.f32.mrf.mxu3 }
 0x757   : > { %v3646_v5 = vadd.f32 %v12815_v25, %v3476_v0  ;;  %v5214_v1 = vunpack.c.l.b16 %v4859_v20  ;;  %v5215_v28 = vunpack.c.h.b16 %v4859_v20  ;;  %v12818_v0 = vld [vmem:[#allocation44_spill] sm:$0xff] }
 0x758   : > { %v11343_v55 = vpop.f32.mrf.mxu1 }
 0x759   : > { %v4386_v50 = vadd.f32 %v4202_v4, %v3646_v5  ;;  %v5434_v58 = vpack.c.b16 %v5214_v1, %v5210_v19  ;;  %v5435_v7 = vpack.c.b16 %v5215_v28, %v5211_v60  ;;  %v4647_v5 = vmax.f32 %v12819_v31, 0.0  ;;  %v12820_v1 = vld [vmem:[#allocation45_spill] sm:$0xff] }
 0x75a   : > { %v7766_v28 = vld [vmem:[#allocation5 + $0x10] sm:$0xff] }
 0x75b   : > { %v4642_v24 = vmax.f32 %v4386_v50, 0.0  ;;  %6234 = vmatmul.bf16.gmra.mxu1 %v5434_v58  ;;  %6403 = vmatmul.bf16.gmra.mxu2 %v5435_v7  ;;  %v12821_v58 = vld [vmem:[#allocation110_spill] sm:$0xff] }
 0x75c   : > { %v4206_v7 = vperm.slane %v12821_v58, 2  ;;  %5853 = vmatpush.bf16.msrb.mxu3 %v7766_v28 }
 0x75d   : > { %v4861_v56 = vpack.c.bf16 %v4643_v57, %v4642_v24  ;;  %v12822_v24 = vld [vmem:[#allocation100_spill] sm:$0xff] }
 0x75e   : > { %v3478_v18 = vpop.f32.mrf.mxu3  ;;  %v11346_v53 = vpop.f32.mrf.mxu2 }
 0x75f   : > { %v3648_v25 = vadd.f32 %v12818_v0, %v3478_v18  ;;  %v5218_v57 = vunpack.c.l.b16 %v4861_v56  ;;  %v5219_v16 = vunpack.c.h.b16 %v4861_v56 }
 0x760   : > { %v11351_v35 = vpop.f32.mrf.mxu1 }
 0x761   : > { %v4390_v20 = vadd.f32 %v4202_v4, %v3648_v25  ;;  %v11362_v25 = vpop.f32.mrf.mxu0 }
 0x762   : > { %6135 = vmatmul.bf16.gmra.mxu0 %v10982_v37  ;;  %12823 = vst [vmem:[#allocation52_spill] sm:$0xff] %v11362_v25 }
 0x763   : > { %v4646_v19 = vmax.f32 %v4390_v20, 0.0  ;;  %3520 = vmatmul.bf16.gmra.mxu3 %v12820_v1 }
 0x765   : > { %v4863_v60 = vpack.c.bf16 %v4647_v5, %v4646_v19  ;;  %v12824_v19 = vld [vmem:[#allocation76_spill] sm:$0xff] }
 0x766   : > { %v3481_v50 = vpop.f32.mrf.mxu3  ;;  %v11357_v12 = vpop.f32.mrf.mxu2  ;;  %v4651_v1 = vmax.f32 %v12824_v19, 0.0 }
 0x767   : > { %v3651_v18 = vadd.f32 %v12822_v24, %v3481_v50  ;;  %v5222_v0 = vunpack.c.l.b16 %v4863_v60  ;;  %v5223_v4 = vunpack.c.h.b16 %v4863_v60  ;;  %v12825_v50 = vld [vmem:[#allocation46_spill] sm:$0xff]  ;;  %v12826_v24 = vld [vmem:[#allocation183_spill] sm:$0xff] }
 0x768   : > { %v11360_v31 = vpop.f32.mrf.mxu1  ;;  %v4655_v3 = vmax.f32 %v12826_v24, 0.0 }
 0x769   : > { %v4394_v20 = vadd.f32 %v4206_v7, %v3651_v18  ;;  %v5438_v5 = vpack.c.b16 %v5222_v0, %v5218_v57  ;;  %v5439_v37 = vpack.c.b16 %v5223_v4, %v5219_v16  ;;  %v11371_v25 = vpop.f32.mrf.mxu0  ;;  %v12828_v16 = vld [vmem:[#allocation47_spill] sm:$0xff] }
 0x76a   : > { %12827 = vst [vmem:[#allocation182_spill] sm:$0xff] %v11371_v25 }
 0x76b   : > { %v4650_v63 = vmax.f32 %v4394_v20, 0.0  ;;  %6239 = vmatmul.bf16.gmra.mxu1 %v5438_v5  ;;  %6408 = vmatmul.bf16.gmra.mxu2 %v5439_v37  ;;  %v12829_v20 = vld [vmem:[#allocation75_spill] sm:$0xff] }
 0x76d   : > { %v4865_v58 = vpack.c.bf16 %v4651_v1, %v4650_v63 }
 0x76e   : > { %v3483_v10 = vpop.f32.mrf.mxu3  ;;  %v11365_v21 = vpop.f32.mrf.mxu2 }
 0x76f   : > { %v3653_v56 = vadd.f32 %v12825_v50, %v3483_v10  ;;  %v5226_v4 = vunpack.c.l.b16 %v4865_v58  ;;  %v5227_v37 = vunpack.c.h.b16 %v4865_v58 }
 0x770   : > { %v11368_v60 = vpop.f32.mrf.mxu1 }
 0x771   : > { %v4398_v28 = vadd.f32 %v4206_v7, %v3653_v56 }
 0x772   : > { %6140 = vmatmul.bf16.gmra.mxu0 %v11016_v11  ;;  %v11381_v11 = vpop.f32.mrf.mxu0 }
 0x773   : > { %v4654_v57 = vmax.f32 %v4398_v28, 0.0  ;;  %3525 = vmatmul.bf16.gmra.mxu3 %v12828_v16  ;;  %v12830_v28 = vld [vmem:[#allocation130_spill] sm:$0xff]  ;;  %12831 = vst [vmem:[#allocation83_spill] sm:$0xff] %v11381_v11 }
 0x774   : > { %v4659_v25 = vmax.f32 %v12830_v28, 0.0 }
 0x775   : > { %v4867_v18 = vpack.c.bf16 %v4655_v3, %v4654_v57 }
 0x776   : > { %v3486_v0 = vpop.f32.mrf.mxu3  ;;  %v11375_v63 = vpop.f32.mrf.mxu2 }
 0x777   : > { %v3656_v5 = vadd.f32 %v12829_v20, %v3486_v0  ;;  %v5230_v10 = vunpack.c.l.b16 %v4867_v18  ;;  %v5231_v19 = vunpack.c.h.b16 %v4867_v18  ;;  %v12833_v0 = vld [vmem:[#allocation48_spill] sm:$0xff] }
 0x778   : > { %v11378_v1 = vpop.f32.mrf.mxu1 }
 0x779   : > { %v4402_v50 = vadd.f32 %v4206_v7, %v3656_v5  ;;  %v5442_v56 = vpack.c.b16 %v5230_v10, %v5226_v4  ;;  %v5443_v24 = vpack.c.b16 %v5231_v19, %v5227_v37  ;;  %v4663_v5 = vmax.f32 %v12835_v42, 0.0  ;;  %v12836_v10 = vld [vmem:[#allocation50_spill] sm:$0xff] }
 0x77a   : > { %v11394_v28 = vpop.f32.mrf.mxu0 }
 0x77b   : > { %v4658_v16 = vmax.f32 %v4402_v50, 0.0  ;;  %6244 = vmatmul.bf16.gmra.mxu1 %v5442_v56  ;;  %6413 = vmatmul.bf16.gmra.mxu2 %v5443_v24  ;;  %v12837_v50 = vld [vmem:[#allocation181_spill] sm:$0xff]  ;;  %12839 = vst [vmem:[#allocation53_spill] sm:$0xff] %v11394_v28 }
 0x77c   : > { %v4210_v56 = vperm.slane %v12837_v50, 2  ;;  %v12842_v28 = vld [vmem:[#allocation81_spill] sm:$0xff] }
 0x77d   : > { %v4869_v3 = vpack.c.bf16 %v4659_v25, %v4658_v16  ;;  %v12840_v16 = vld [vmem:[#allocation77_spill] sm:$0xff] }
 0x77e   : > { %v3488_v57 = vpop.f32.mrf.mxu3  ;;  %v11383_v40 = vpop.f32.mrf.mxu2 }
 0x77f   : > { %12832 = vst [vmem:[#allocation34_spill] sm:$0xff] %v11383_v40  ;;  %v3658_v20 = vadd.f32 %v12833_v0, %v3488_v57  ;;  %v5234_v24 = vunpack.c.l.b16 %v4869_v3 }
 0x780   : > { %v11386_v58 = vpop.f32.mrf.mxu1 }
 0x781   : > { %12834 = vst [vmem:[#allocation185_spill] sm:$0xff] %v11386_v58  ;;  %v4406_v18 = vadd.f32 %v4206_v7, %v3658_v20  ;;  %v5235_v7 = vunpack.c.h.b16 %v4869_v3 }
 0x782   : > { %6145 = vmatmul.bf16.gmra.mxu0 %v11049_v15  ;;  %v11405_v3 = vpop.f32.mrf.mxu0 }
 0x783   : > { %v4662_v4 = vmax.f32 %v4406_v18, 0.0  ;;  %3530 = vmatmul.bf16.gmra.mxu3 %v12836_v10  ;;  %12843 = vst [vmem:[#allocation179_spill] sm:$0xff] %v11405_v3 }
 0x785   : > { %v4871_v37 = vpack.c.bf16 %v4663_v5, %v4662_v4  ;;  %v12841_v4 = vld [vmem:[#allocation135_spill] sm:$0xff] }
 0x786   : > { %v3491_v19 = vpop.f32.mrf.mxu3  ;;  %v11392_v25 = vpop.f32.mrf.mxu2  ;;  %v4667_v15 = vmax.f32 %v12841_v4, 0.0 }
 0x787   : > { %12838 = vst [vmem:[#allocation85_spill] sm:$0xff] %v11392_v25  ;;  %v3661_v57 = vadd.f32 %v12840_v16, %v3491_v19  ;;  %v5238_v0 = vunpack.c.l.b16 %v4871_v37  ;;  %v5239_v20 = vunpack.c.h.b16 %v4871_v37  ;;  %v12844_v16 = vld [vmem:[#allocation119_spill] sm:$0xff] }
 0x788   : > { %v11397_v42 = vpop.f32.mrf.mxu1 }
 0x789   : > { %v4410_v18 = vadd.f32 %v4210_v56, %v3661_v57  ;;  %v5446_v10 = vpack.c.b16 %v5238_v0, %v5234_v24  ;;  %v5447_v5 = vpack.c.b16 %v5239_v20, %v5235_v7  ;;  %v4671_v57 = vmax.f32 %v12844_v16, 0.0  ;;  %v12845_v0 = vld [vmem:[#allocation54_spill] sm:$0xff] }
 0x78b   : > { %v4666_v11 = vmax.f32 %v4410_v18, 0.0  ;;  %6249 = vmatmul.bf16.gmra.mxu1 %v5446_v10  ;;  %6418 = vmatmul.bf16.gmra.mxu2 %v5447_v5  ;;  %v12847_v10 = vld [vmem:[#allocation191_spill] sm:$0xff] }
 0x78d   : > { %v4873_v50 = vpack.c.bf16 %v4667_v15, %v4666_v11 }
 0x78e   : > { %v3493_v25 = vpop.f32.mrf.mxu3  ;;  %v11400_v40 = vpop.f32.mrf.mxu2 }
 0x78f   : > { %v3663_v58 = vadd.f32 %v12842_v28, %v3493_v25  ;;  %v5242_v18 = vunpack.c.l.b16 %v4873_v50  ;;  %v5243_v28 = vunpack.c.h.b16 %v4873_v50 }
 0x790   : > { %v11403_v19 = vpop.f32.mrf.mxu1 }
 0x791   : > { %v4414_v37 = vadd.f32 %v4210_v56, %v3663_v58 }
 0x792   : > { %6150 = vmatmul.bf16.gmra.mxu0 %v11082_v52 }
 0x793   : > { %v4670_v24 = vmax.f32 %v4414_v37, 0.0  ;;  %3535 = vmatmul.bf16.gmra.mxu3 %v12845_v0  ;;  %v4675_v37 = vmax.f32 %v10742_v38, 0.0  ;;  %v11416_v0 = vpop.f32.mrf.mxu0 }
 0x794   : > { %12849 = vst [vmem:[#allocation187_spill] sm:$0xff] %v11416_v0 }
 0x795   : > { %v4875_v7 = vpack.c.bf16 %v4671_v57, %v4670_v24 }
 0x796   : > { %v3496_v20 = vpop.f32.mrf.mxu3  ;;  %v11410_v11 = vpop.f32.mrf.mxu2 }
 0x797   : > { %12846 = vst [vmem:[#allocation36_spill] sm:$0xff] %v11410_v11  ;;  %v3666_v5 = vadd.f32 %v12847_v10, %v3496_v20  ;;  %v5246_v25 = vunpack.c.l.b16 %v4875_v7  ;;  %v5247_v4 = vunpack.c.h.b16 %v4875_v7  ;;  %v12851_v20 = vld [vmem:[#allocation192_spill] sm:$0xff] }
 0x798   : > { %v11413_v15 = vpop.f32.mrf.mxu1 }
 0x799   : > { %12848 = vst [vmem:[#allocation94_spill] sm:$0xff] %v11413_v15  ;;  %v4418_v58 = vadd.f32 %v4210_v56, %v3666_v5  ;;  %v5450_v3 = vpack.c.b16 %v5246_v25, %v5242_v18  ;;  %v5451_v16 = vpack.c.b16 %v5247_v4, %v5243_v28  ;;  %v12852_v15 = vld [vmem:[#allocation112_spill] sm:$0xff]  ;;  %v12853_v25 = vld [vmem:[#allocation58_spill] sm:$0xff] }
 0x79a   : > { %v4679_v5 = vmax.f32 %v12852_v15, 0.0 }
 0x79b   : > { %v4674_v57 = vmax.f32 %v4418_v58, 0.0  ;;  %6254 = vmatmul.bf16.gmra.mxu1 %v5450_v3  ;;  %6423 = vmatmul.bf16.gmra.mxu2 %v5451_v16  ;;  %v11425_v38 = vpop.f32.mrf.mxu0  ;;  %v7765_v3 = vld [vmem:[#allocation5 + $0x8] sm:$0xff]  ;;  %v4214_v58 = vperm.slane %v12558_v22, 2 }
 0x79c   : > { %12854 = vst [vmem:[#allocation57_spill] sm:$0xff] %v11425_v38  ;;  %5854 = vmatpush.bf16.msrb.mxu3 %v7765_v3  ;;  %v12861_v3 = vld [vmem:[#allocation127_spill] sm:$0xff] }
 0x79d   : > { %v4877_v52 = vpack.c.bf16 %v4675_v37, %v4674_v57  ;;  %v12856_v57 = vld [vmem:[#allocation87_spill] sm:$0xff] }
 0x79e   : > { %v3498_v24 = vpop.f32.mrf.mxu3  ;;  %v11418_v11 = vpop.f32.mrf.mxu2 }
 0x79f   : > { %12850 = vst [vmem:[#allocation89_spill] sm:$0xff] %v11418_v11  ;;  %v3668_v10 = vadd.f32 %v12851_v20, %v3498_v24  ;;  %v5250_v37 = vunpack.c.l.b16 %v4877_v52  ;;  %v5251_v20 = vunpack.c.h.b16 %v4877_v52 }
 0x7a0   : > { %v11421_v50 = vpop.f32.mrf.mxu1 }
 0x7a1   : > { %v4422_v7 = vadd.f32 %v4210_v56, %v3668_v10 }
 0x7a2   : > { %6155 = vmatmul.bf16.gmra.mxu0 %v11111_v59 }
 0x7a3   : > { %v4678_v18 = vmax.f32 %v4422_v7, 0.0  ;;  %3540 = vmatmul.bf16.gmra.mxu3 %v12853_v25  ;;  %v11437_v11 = vpop.f32.mrf.mxu0 }
 0x7a4   : > { %12859 = vst [vmem:[#allocation23_spill] sm:$0xff] %v11437_v11 }
 0x7a5   : > { %v4879_v28 = vpack.c.bf16 %v4679_v5, %v4678_v18  ;;  %v12858_v18 = vld [vmem:[#allocation42_spill] sm:$0xff] }
 0x7a6   : > { %v3501_v4 = vpop.f32.mrf.mxu3  ;;  %v11429_v16 = vpop.f32.mrf.mxu2  ;;  %v4683_v59 = vmax.f32 %v12858_v18, 0.0 }
 0x7a7   : > { %12855 = vst [vmem:[#allocation91_spill] sm:$0xff] %v11429_v16  ;;  %v3671_v24 = vadd.f32 %v12856_v57, %v3501_v4  ;;  %v5254_v56 = vunpack.c.l.b16 %v4879_v28  ;;  %v5255_v15 = vunpack.c.h.b16 %v4879_v28  ;;  %v12860_v4 = vld [vmem:[#allocation193_spill] sm:$0xff]  ;;  %v4687_v57 = vmax.f32 %v12861_v3, 0.0 }
 0x7a8   : > { %v11432_v7 = vpop.f32.mrf.mxu1  ;;  %v4691_v3 = vmax.f32 %v10806_v62, 0.0 }
 0x7a9   : > { %v4426_v10 = vadd.f32 %v4214_v58, %v3671_v24  ;;  %12857 = vst [vmem:[#allocation38_spill] sm:$0xff] %v11432_v7  ;;  %v5454_v25 = vpack.c.b16 %v5254_v56, %v5250_v37  ;;  %v5455_v5 = vpack.c.b16 %v5255_v15, %v5251_v20  ;;  %v12862_v37 = vld [vmem:[#allocation62_spill] sm:$0xff] }
 0x7ab   : > { %v4682_v38 = vmax.f32 %v4426_v10, 0.0  ;;  %6259 = vmatmul.bf16.gmra.mxu1 %v5454_v25  ;;  %6428 = vmatmul.bf16.gmra.mxu2 %v5455_v5  ;;  %v12863_v10 = vld [vmem:[#allocation194_spill] sm:$0xff] }
 0x7ad   : > { %v4881_v22 = vpack.c.bf16 %v4683_v59, %v4682_v38  ;;  %v11448_v59 = vpop.f32.mrf.mxu0 }
 0x7ae   : > { %v3503_v0 = vpop.f32.mrf.mxu3  ;;  %v11435_v16 = vpop.f32.mrf.mxu2  ;;  %12864 = vst [vmem:[#allocation93_spill] sm:$0xff] %v11448_v59 }
 0x7af   : > { %v3673_v52 = vadd.f32 %v12860_v4, %v3503_v0  ;;  %v5258_v15 = vunpack.c.l.b16 %v4881_v22  ;;  %v5259_v18 = vunpack.c.h.b16 %v4881_v22 }
 0x7b0   : > { %v11441_v7 = vpop.f32.mrf.mxu1 }
 0x7b1   : > { %v4430_v28 = vadd.f32 %v4214_v58, %v3673_v52 }
 0x7b2   : > { %6160 = vmatmul.bf16.gmra.mxu0 %v11144_v36 }
 0x7b3   : > { %v4686_v24 = vmax.f32 %v4430_v28, 0.0  ;;  %3545 = vmatmul.bf16.gmra.mxu3 %v12862_v37 }
 0x7b5   : > { %v4883_v56 = vpack.c.bf16 %v4687_v57, %v4686_v24  ;;  %v11457_v59 = vpop.f32.mrf.mxu0 }
 0x7b6   : > { %v3506_v20 = vpop.f32.mrf.mxu3  ;;  %v11445_v38 = vpop.f32.mrf.mxu2  ;;  %12866 = vst [vmem:[#allocation39_spill] sm:$0xff] %v11457_v59 }
 0x7b7   : > { %v3676_v25 = vadd.f32 %v12863_v10, %v3506_v20  ;;  %v5262_v5 = vunpack.c.l.b16 %v4883_v56  ;;  %v5263_v0 = vunpack.c.h.b16 %v4883_v56  ;;  %v12865_v20 = vld [vmem:[#allocation195_spill] sm:$0xff]  ;;  %v4695_v56 = vmax.f32 %v10814_v61, 0.0 }
 0x7b8   : > { %v11451_v57 = vpop.f32.mrf.mxu1 }
 0x7b9   : > { %v4434_v4 = vadd.f32 %v4214_v58, %v3676_v25  ;;  %v5458_v52 = vpack.c.b16 %v5262_v5, %v5258_v15  ;;  %v5459_v28 = vpack.c.b16 %v5263_v0, %v5259_v18  ;;  %v4218_v5 = vperm.slane %v12581_v30, 2 }
 0x7bb   : > { %v4690_v37 = vmax.f32 %v4434_v4, 0.0  ;;  %6264 = vmatmul.bf16.gmra.mxu1 %v5458_v52  ;;  %6433 = vmatmul.bf16.gmra.mxu2 %v5459_v28  ;;  %v12867_v4 = vld [vmem:[#allocation95_spill] sm:$0xff] }
 0x7bd   : > { %v4885_v36 = vpack.c.bf16 %v4691_v3, %v4690_v37 }
 0x7be   : > { %v3508_v24 = vpop.f32.mrf.mxu3  ;;  %v11453_v11 = vpop.f32.mrf.mxu2 }
 0x7bf   : > { %v3678_v10 = vadd.f32 %v12865_v20, %v3508_v24  ;;  %v5266_v18 = vunpack.c.l.b16 %v4885_v36  ;;  %v5267_v61 = vunpack.c.h.b16 %v4885_v36  ;;  %v12873_v36 = vld [vmem:[#allocation120_spill] sm:$0xff] }
 0x7c0   : > { %v11462_v0 = vpop.f32.mrf.mxu1 }
 0x7c1   : > { %v4438_v22 = vadd.f32 %v4214_v58, %v3678_v10 }
 0x7c2   : > { %6165 = vmatmul.bf16.gmra.mxu0 %v11173_v29  ;;  %v11468_v29 = vpop.f32.mrf.mxu0 }
 0x7c3   : > { %v4694_v15 = vmax.f32 %v4438_v22, 0.0  ;;  %3550 = vmatmul.bf16.gmra.mxu3 %v12578_v48  ;;  %v12869_v48 = vld [vmem:[#allocation149_spill] sm:$0xff]  ;;  %12870 = vst [vmem:[#allocation40_spill] sm:$0xff] %v11468_v29  ;;  %v12877_v29 = vld [vmem:[#allocation171_spill] sm:$0xff] }
 0x7c4   : > { %v4699_v10 = vmax.f32 %v12869_v48, 0.0 }
 0x7c5   : > { %v4887_v62 = vpack.c.bf16 %v4695_v56, %v4694_v15  ;;  %v12871_v15 = vld [vmem:[#allocation96_spill] sm:$0xff] }
 0x7c6   : > { %v3511_v25 = vpop.f32.mrf.mxu3  ;;  %v11465_v28 = vpop.f32.mrf.mxu2 }
 0x7c7   : > { %v3681_v52 = vadd.f32 %v12867_v4, %v3511_v25  ;;  %12868 = vst [vmem:[#allocation49_spill] sm:$0xff] %v11465_v28  ;;  %v5270_v58 = vunpack.c.l.b16 %v4887_v62  ;;  %v5271_v3 = vunpack.c.h.b16 %v4887_v62  ;;  %v4703_v62 = vmax.f32 %v12873_v36, 0.0 }
 0x7c8   : > { %v11471_v25 = vpop.f32.mrf.mxu1  ;;  %v4707_v36 = vmax.f32 %v12877_v29, 0.0 }
 0x7c9   : > { %v4442_v37 = vadd.f32 %v4218_v5, %v3681_v52  ;;  %v5462_v24 = vpack.c.b16 %v5270_v58, %v5266_v18  ;;  %v5463_v20 = vpack.c.b16 %v5271_v3, %v5267_v61  ;;  %v12874_v52 = vld [vmem:[#allocation70_spill] sm:$0xff] }
 0x7cb   : > { %v4698_v22 = vmax.f32 %v4442_v37, 0.0  ;;  %6269 = vmatmul.bf16.gmra.mxu1 %v5462_v24  ;;  %6438 = vmatmul.bf16.gmra.mxu2 %v5463_v20  ;;  %v11478_v37 = vpop.f32.mrf.mxu0  ;;  %v12876_v24 = vld [vmem:[#allocation196_spill] sm:$0xff] }
 0x7cc   : > { %12875 = vst [vmem:[#allocation86_spill] sm:$0xff] %v11478_v37  ;;  %v12879_v37 = vld [vmem:[#allocation197_spill] sm:$0xff] }
 0x7cd   : > { %v4889_v30 = vpack.c.bf16 %v4699_v10, %v4698_v22 }
 0x7ce   : > { %v3513_v56 = vpop.f32.mrf.mxu3  ;;  %v11473_v28 = vpop.f32.mrf.mxu2 }
 0x7cf   : > { %v3683_v59 = vadd.f32 %v12871_v15, %v3513_v56  ;;  %12872 = vst [vmem:[#allocation104_spill] sm:$0xff] %v11473_v28  ;;  %v5274_v3 = vunpack.c.l.b16 %v4889_v30  ;;  %v5275_v10 = vunpack.c.h.b16 %v4889_v30 }
 0x7d1   : > { %v4446_v4 = vadd.f32 %v4218_v5, %v3683_v59 }
 0x7d2   : > { %6170 = vmatmul.bf16.gmra.mxu0 %v11206_v49 }
 0x7d3   : > { %v4702_v18 = vmax.f32 %v4446_v4, 0.0  ;;  %3555 = vmatmul.bf16.gmra.mxu3 %v12874_v52  ;;  %v11482_v4 = vpop.f32.mrf.mxu1 }
 0x7d5   : > { %v4891_v58 = vpack.c.bf16 %v4703_v62, %v4702_v18 }
 0x7d6   : > { %v3516_v61 = vpop.f32.mrf.mxu3  ;;  %v11484_v62 = vpop.f32.mrf.mxu2 }
 0x7d7   : > { %v3686_v20 = vadd.f32 %v12876_v24, %v3516_v61  ;;  %v5278_v48 = vunpack.c.l.b16 %v4891_v58  ;;  %v5279_v22 = vunpack.c.h.b16 %v4891_v58  ;;  %12878 = vst [vmem:[#allocation68_spill] sm:$0xff] %v11484_v62  ;;  %v11487_v61 = vpop.f32.mrf.mxu0  ;;  %v12881_v58 = vld [vmem:[#allocation145_spill] sm:$0xff] }
 0x7d8   : > { %12880 = vst [vmem:[#allocation65_spill] sm:$0xff] %v11487_v61  ;;  %v4711_v24 = vmax.f32 %v12881_v58, 0.0  ;;  %v12887_v61 = vld [vmem:[#allocation63_spill] sm:$0xff] }
 0x7d9   : > { %v4450_v59 = vadd.f32 %v4218_v5, %v3686_v20  ;;  %v5466_v56 = vpack.c.b16 %v5278_v48, %v5274_v3  ;;  %v5467_v15 = vpack.c.b16 %v5279_v22, %v5275_v10  ;;  %v12882_v20 = vld [vmem:[#allocation74_spill] sm:$0xff]  ;;  %v7764_v22 = vld [vmem:[#allocation5] sm:$0xff] }
 0x7da   : > { %5855 = vmatpush.bf16.msrb.mxu3 %v7764_v22  ;;  %v12890_v22 = vld [vmem:[#allocation37_spill] sm:$0xff] }
 0x7db   : > { %v4706_v52 = vmax.f32 %v4450_v59, 0.0  ;;  %6274 = vmatmul.bf16.gmra.mxu1 %v5466_v56  ;;  %6443 = vmatmul.bf16.gmra.mxu2 %v5467_v15  ;;  %v11491_v29 = vpop.f32.mrf.mxu1  ;;  %v12885_v56 = vld [vmem:[#allocation35_spill] sm:$0xff] }
 0x7dc   : > { %12883 = vst [vmem:[#allocation97_spill] sm:$0xff] %v11491_v29  ;;  %v4222_v15 = vperm.slane %v12885_v56, 2 }
 0x7dd   : > { %v4893_v49 = vpack.c.bf16 %v4707_v36, %v4706_v52  ;;  %v12886_v36 = vld [vmem:[#allocation101_spill] sm:$0xff] }
 0x7de   : > { %v3518_v18 = vpop.f32.mrf.mxu3  ;;  %v11493_v10 = vpop.f32.mrf.mxu2 }
 0x7df   : > { %v3688_v28 = vadd.f32 %v12879_v37, %v3518_v18  ;;  %12884 = vst [vmem:[#allocation43_spill] sm:$0xff] %v11493_v10  ;;  %v5282_v37 = vunpack.c.l.b16 %v4893_v49 }
 0x7e1   : > { %v4454_v30 = vadd.f32 %v4218_v5, %v3688_v28  ;;  %v5283_v28 = vunpack.c.h.b16 %v4893_v49 }
 0x7e2   : > { %6175 = vmatmul.bf16.gmra.mxu0 %v11231_v9 }
 0x7e3   : > { %v4710_v3 = vmax.f32 %v4454_v30, 0.0  ;;  %3560 = vmatmul.bf16.gmra.mxu3 %v12882_v20  ;;  %v11501_v56 = vpop.f32.mrf.mxu1 }
 0x7e5   : > { %v4895_v48 = vpack.c.bf16 %v4711_v24, %v4710_v3  ;;  %v4715_v24 = vmax.f32 %v12887_v61, 0.0  ;;  %v11499_v3 = vpop.f32.mrf.mxu0 }
 0x7e6   : > { %v3521_v59 = vpop.f32.mrf.mxu3  ;;  %12888 = vst [vmem:[#allocation67_spill] sm:$0xff] %v11499_v3  ;;  %v11503_v62 = vpop.f32.mrf.mxu2 }
 0x7e7   : > { %v3691_v52 = vadd.f32 %v12886_v36, %v3521_v59  ;;  %v5286_v5 = vunpack.c.l.b16 %v4895_v48  ;;  %v5287_v18 = vunpack.c.h.b16 %v4895_v48  ;;  %v12889_v59 = vld [vmem:[#allocation103_spill] sm:$0xff]  ;;  %v4719_v36 = vmax.f32 %v12890_v22, 0.0 }
 0x7e8   : > { %v4723_v22 = vmax.f32 %v10922_v47, 0.0  ;;  %v4226_v47 = vperm.slane %v10194_v6, 2 }
 0x7e9   : > { %v4458_v30 = vadd.f32 %v4222_v15, %v3691_v52  ;;  %v5470_v58 = vpack.c.b16 %v5286_v5, %v5282_v37  ;;  %v5471_v20 = vpack.c.b16 %v5287_v18, %v5283_v28  ;;  %v12891_v52 = vld [vmem:[#allocation78_spill] sm:$0xff]  ;;  %v12893_v18 = vld [vmem:[#allocation128_spill] sm:$0xff] }
 0x7eb   : > { %v4714_v10 = vmax.f32 %v4458_v30, 0.0  ;;  %6279 = vmatmul.bf16.gmra.mxu1 %v5470_v58  ;;  %6448 = vmatmul.bf16.gmra.mxu2 %v5471_v20  ;;  %v11512_v3 = vpop.f32.mrf.mxu1 }
 0x7ed   : > { %v4897_v9 = vpack.c.bf16 %v4715_v24, %v4714_v10  ;;  %v11508_v61 = vpop.f32.mrf.mxu0 }
 0x7ee   : > { %v3523_v29 = vpop.f32.mrf.mxu3  ;;  %12892 = vst [vmem:[#allocation99_spill] sm:$0xff] %v11508_v61 }
 0x7ef   : > { %v3693_v49 = vadd.f32 %v12889_v59, %v3523_v29  ;;  %v5290_v10 = vunpack.c.l.b16 %v4897_v9  ;;  %v5291_v20 = vunpack.c.h.b16 %v4897_v9  ;;  %v11514_v29 = vpop.f32.mrf.mxu2  ;;  %v4727_v9 = vmax.f32 %v10930_v51, 0.0 }
 0x7f0   : > { %12894 = vst [vmem:[#allocation44_spill] sm:$0xff] %v11514_v29 }
 0x7f1   : > { %v4462_v48 = vadd.f32 %v4222_v15, %v3693_v49 }
 0x7f2   : > { %6180 = vmatmul.bf16.gmra.mxu0 %v11258_v33 }
 0x7f3   : > { %v4718_v37 = vmax.f32 %v4462_v48, 0.0  ;;  %3565 = vmatmul.bf16.gmra.mxu3 %v12891_v52 }
 0x7f5   : > { %v4899_v5 = vpack.c.bf16 %v4719_v36, %v4718_v37  ;;  %v12895_v37 = vld [vmem:[#allocation80_spill] sm:$0xff] }
 0x7f6   : > { %v3526_v28 = vpop.f32.mrf.mxu3 }
 0x7f7   : > { %v3696_v30 = vadd.f32 %v12893_v18, %v3526_v28  ;;  %v5294_v58 = vunpack.c.l.b16 %v4899_v5  ;;  %v5295_v24 = vunpack.c.h.b16 %v4899_v5  ;;  %v11519_v5 = vpop.f32.mrf.mxu1  ;;  %v11521_v18 = vpop.f32.mrf.mxu2 }
 0x7f9   : > { %v4466_v59 = vadd.f32 %v4222_v15, %v3696_v30  ;;  %v5474_v49 = vpack.c.b16 %v5294_v58, %v5290_v10  ;;  %v5475_v48 = vpack.c.b16 %v5295_v24, %v5291_v20  ;;  %v12896_v20 = vld [vmem:[#allocation133_spill] sm:$0xff] }
 0x7fb   : > { %v4722_v52 = vmax.f32 %v4466_v59, 0.0  ;;  %6284 = vmatmul.bf16.gmra.mxu1 %v5474_v49  ;;  %6453 = vmatmul.bf16.gmra.mxu2 %v5475_v48 }
 0x7fd   : > { %v4901_v33 = vpack.c.bf16 %v4723_v22, %v4722_v52  ;;  %v4731_v22 = vmax.f32 %v10957_v39, 0.0  ;;  %v4041_v52 = vadd.f32 %v10964_v13, %v10948_v43  ;;  %v12898_v39 = vld [vmem:[#allocation153_spill] sm:$0xff] }
 0x7fe   : > { %v3528_v36 = vpop.f32.mrf.mxu3 }
 0x7ff   : > { %v3698_v61 = vadd.f32 %v12895_v37, %v3528_v36  ;;  %v5298_v58 = vunpack.c.l.b16 %v4901_v33  ;;  %v5299_v49 = vunpack.c.h.b16 %v4901_v33  ;;  %v11531_v6 = vpop.f32.mrf.mxu2  ;;  %v4479_v33 = vadd.f32 %v10946_v44, %v4041_v52 }
 0x801   : > { %v4470_v28 = vadd.f32 %v4222_v15, %v3698_v61 }
 0x803   : > { %v4726_v29 = vmax.f32 %v4470_v28, 0.0  ;;  %3570 = vmatmul.bf16.gmra.mxu3 %v12614_v14  ;;  %v11529_v14 = vpop.f32.mrf.mxu1  ;;  %v12897_v28 = vld [vmem:[#allocation66_spill] sm:$0xff] }
 0x805   : > { %v4903_v10 = vpack.c.bf16 %v4727_v9, %v4726_v29 }
 0x806   : > { %v3531_v30 = vpop.f32.mrf.mxu3 }
 0x807   : > { %v3701_v24 = vadd.f32 %v12896_v20, %v3531_v30  ;;  %v5302_v59 = vunpack.c.l.b16 %v4903_v10  ;;  %v5303_v48 = vunpack.c.h.b16 %v4903_v10  ;;  %v4735_v30 = vmax.f32 %v4479_v33, 0.0  ;;  %v12900_v33 = vld [vmem:[#allocation11_spill] sm:$0xff] }
 0x809   : > { %v4474_v15 = vadd.f32 %v4226_v47, %v3701_v24  ;;  %v5478_v61 = vpack.c.b16 %v5302_v59, %v5298_v58  ;;  %v5479_v51 = vpack.c.b16 %v5303_v48, %v5299_v49  ;;  %v11538_v59 = vpop.f32.mrf.mxu2  ;;  %v12899_v49 = vld [vmem:[#allocation111_spill] sm:$0xff] }
 0x80b   : > { %v4730_v36 = vmax.f32 %v4474_v15, 0.0  ;;  %6289 = vmatmul.bf16.gmra.mxu1 %v5478_v61  ;;  %6458 = vmatmul.bf16.gmra.mxu2 %v5479_v51  ;;  %v11536_v24 = vpop.f32.mrf.mxu1 }
 0x80d   : > { %v4905_v29 = vpack.c.bf16 %v4731_v22, %v4730_v36 }
 0x80e   : > { %v3533_v37 = vpop.f32.mrf.mxu3 }
 0x80f   : > { %v3703_v9 = vadd.f32 %v12897_v28, %v3533_v37  ;;  %v5306_v43 = vunpack.c.l.b16 %v4905_v29  ;;  %v5307_v61 = vunpack.c.h.b16 %v4905_v29  ;;  %v4739_v37 = vmax.f32 %v10988_v45, 0.0  ;;  %v12903_v45 = vld [vmem:[#allocation155_spill] sm:$0xff] }
 0x810   : > { %v4046_v28 = vadd.f32 %v10995_v34, %v12900_v33 }
 0x811   : > { %v4478_v10 = vadd.f32 %v4226_v47, %v3703_v9  ;;  %v11548_v29 = vpop.f32.mrf.mxu2 }
 0x812   : > { %12902 = vst [vmem:[#allocation123_spill] sm:$0xff] %v11548_v29 }
 0x813   : > { %v4734_v58 = vmax.f32 %v4478_v10, 0.0  ;;  %3575 = vmatmul.bf16.gmra.mxu3 %v12898_v39  ;;  %v12901_v39 = vld [vmem:[#allocation137_spill] sm:$0xff] }
 0x815   : > { %v4907_v20 = vpack.c.bf16 %v4735_v30, %v4734_v58  ;;  %v4487_v58 = vadd.f32 %v10946_v44, %v4046_v28 }
 0x816   : > { %v3536_v13 = vpop.f32.mrf.mxu3 }
 0x817   : > { %v3706_v48 = vadd.f32 %v12899_v49, %v3536_v13  ;;  %v5310_v15 = vunpack.c.l.b16 %v4907_v20  ;;  %v5311_v51 = vunpack.c.h.b16 %v4907_v20  ;;  %v11546_v49 = vpop.f32.mrf.mxu1 }
 0x819   : > { %v4482_v22 = vadd.f32 %v4226_v47, %v3706_v48  ;;  %v5482_v52 = vpack.c.b16 %v5310_v15, %v5306_v43  ;;  %v5483_v36 = vpack.c.b16 %v5311_v51, %v5307_v61  ;;  %v4743_v43 = vmax.f32 %v4487_v58, 0.0  ;;  %v12904_v61 = vld [vmem:[#allocation186_spill] sm:$0xff]  ;;  %v12907_v58 = vld [vmem:[#allocation141_spill] sm:$0xff] }
 0x81a   : > { %v4230_v51 = vperm.slane %v12904_v61, 2  ;;  %v12910_v61 = vld [vmem:[#allocation167_spill] sm:$0xff] }
 0x81b   : > { %v4738_v9 = vmax.f32 %v4482_v22, 0.0  ;;  %6294 = vmatmul.bf16.gmra.mxu1 %v5482_v52  ;;  %6463 = vmatmul.bf16.gmra.mxu2 %v5483_v36  ;;  %v12905_v52 = vld [vmem:[#allocation139_spill] sm:$0xff] }
 0x81d   : > { %v4909_v10 = vpack.c.bf16 %v4739_v37, %v4738_v9 }
 0x81e   : > { %v3538_v30 = vpop.f32.mrf.mxu3 }
 0x81f   : > { %v3708_v13 = vadd.f32 %v12901_v39, %v3538_v30  ;;  %v5314_v22 = vunpack.c.l.b16 %v4909_v10  ;;  %v5315_v44 = vunpack.c.h.b16 %v4909_v10  ;;  %v4747_v39 = vmax.f32 %v11023_v27, 0.0  ;;  %v12912_v27 = vld [vmem:[#allocation159_spill] sm:$0xff] }
 0x821   : > { %v4486_v20 = vadd.f32 %v4226_v47, %v3708_v13  ;;  %v12906_v47 = vld [vmem:[#allocation12_spill] sm:$0xff] }
 0x822   : > { %v4051_v13 = vadd.f32 %v12907_v58, %v12906_v47 }
 0x823   : > { %v4742_v48 = vmax.f32 %v4486_v20, 0.0  ;;  %3580 = vmatmul.bf16.gmra.mxu3 %v12903_v45  ;;  %v11556_v20 = vpop.f32.mrf.mxu1 }
 0x824   : > { %12908 = vst [vmem:[#allocation45_spill] sm:$0xff] %v11556_v20  ;;  %v4495_v10 = vadd.f32 %v12910_v61, %v4051_v13 }
 0x825   : > { %v4911_v15 = vpack.c.bf16 %v4743_v43, %v4742_v48  ;;  %v11558_v43 = vpop.f32.mrf.mxu2 }
 0x826   : > { %v3541_v34 = vpop.f32.mrf.mxu3  ;;  %12909 = vst [vmem:[#allocation110_spill] sm:$0xff] %v11558_v43 }
 0x827   : > { %v3711_v36 = vadd.f32 %v12905_v52, %v3541_v34  ;;  %v5318_v37 = vunpack.c.l.b16 %v4911_v15  ;;  %v5319_v33 = vunpack.c.h.b16 %v4911_v15  ;;  %v12911_v15 = vld [vmem:[#allocation113_spill] sm:$0xff] }
 0x829   : > { %v4490_v28 = vadd.f32 %v4230_v51, %v3711_v36  ;;  %v5486_v9 = vpack.c.b16 %v5318_v37, %v5314_v22  ;;  %v5487_v30 = vpack.c.b16 %v5319_v33, %v5315_v44  ;;  %v4751_v36 = vmax.f32 %v4495_v10, 0.0 }
 0x82b   : > { %v4746_v48 = vmax.f32 %v4490_v28, 0.0  ;;  %6299 = vmatmul.bf16.gmra.mxu1 %v5486_v9  ;;  %6468 = vmatmul.bf16.gmra.mxu2 %v5487_v30  ;;  %v11563_v44 = vpop.f32.mrf.mxu1  ;;  %v12915_v9 = vld [vmem:[#allocation114_spill] sm:$0xff] }
 0x82c   : > { %12913 = vst [vmem:[#allocation100_spill] sm:$0xff] %v11563_v44 }
 0x82d   : > { %v4913_v45 = vpack.c.bf16 %v4747_v39, %v4746_v48  ;;  %v11565_v33 = vpop.f32.mrf.mxu2 }
 0x82e   : > { %v3543_v34 = vpop.f32.mrf.mxu3  ;;  %12914 = vst [vmem:[#allocation76_spill] sm:$0xff] %v11565_v33 }
 0x82f   : > { %v3713_v52 = vadd.f32 %v12911_v15, %v3543_v34  ;;  %v5322_v28 = vunpack.c.l.b16 %v4913_v45  ;;  %v5323_v48 = vunpack.c.h.b16 %v4913_v45  ;;  %v12916_v15 = vld [vmem:[#allocation189_spill] sm:$0xff]  ;;  %v12921_v45 = vld [vmem:[#allocation132_spill] sm:$0xff] }
 0x830   : > { %v4755_v10 = vmax.f32 %v12916_v15, 0.0 }
 0x831   : > { %v4494_v22 = vadd.f32 %v4230_v51, %v3713_v52  ;;  %v12917_v52 = vld [vmem:[#allocation14_spill] sm:$0xff] }
 0x833   : > { %v4750_v37 = vmax.f32 %v4494_v22, 0.0  ;;  %3585 = vmatmul.bf16.gmra.mxu3 %v12912_v27  ;;  %v12918_v22 = vld [vmem:[#allocation190_spill] sm:$0xff]  ;;  %v11572_v44 = vpop.f32.mrf.mxu1 }
 0x834   : > { %v4056_v27 = vadd.f32 %v12918_v22, %v12917_v52  ;;  %12919 = vst [vmem:[#allocation46_spill] sm:$0xff] %v11572_v44 }
 0x835   : > { %v4915_v47 = vpack.c.bf16 %v4751_v36, %v4750_v37 }
 0x836   : > { %v3546_v58 = vpop.f32.mrf.mxu3  ;;  %v4503_v37 = vadd.f32 %v12910_v61, %v4056_v27 }
 0x837   : > { %v3716_v30 = vadd.f32 %v12915_v9, %v3546_v58  ;;  %v5326_v39 = vunpack.c.l.b16 %v4915_v47  ;;  %v5327_v43 = vunpack.c.h.b16 %v4915_v47  ;;  %v11574_v58 = vpop.f32.mrf.mxu2 }
 0x838   : > { %12920 = vst [vmem:[#allocation183_spill] sm:$0xff] %v11574_v58 }
 0x839   : > { %v4498_v13 = vadd.f32 %v4230_v51, %v3716_v30  ;;  %v5490_v20 = vpack.c.b16 %v5326_v39, %v5322_v28  ;;  %v5491_v34 = vpack.c.b16 %v5327_v43, %v5323_v48  ;;  %v4759_v43 = vmax.f32 %v4503_v37, 0.0  ;;  %v12922_v30 = vld [vmem:[#allocation142_spill] sm:$0xff] }
 0x83b   : > { %v4754_v29 = vmax.f32 %v4498_v13, 0.0  ;;  %6304 = vmatmul.bf16.gmra.mxu1 %v5490_v20  ;;  %6473 = vmatmul.bf16.gmra.mxu2 %v5491_v34  ;;  %v12923_v13 = vld [vmem:[#allocation152_spill] sm:$0xff]  ;;  %v11580_v22 = vpop.f32.mrf.mxu1 }
 0x83c   : > { %v4234_v20 = vperm.slane %v12923_v13, 2  ;;  %12925 = vst [vmem:[#allocation47_spill] sm:$0xff] %v11580_v22 }
 0x83d   : > { %v4917_v33 = vpack.c.bf16 %v4755_v10, %v4754_v29  ;;  %v12924_v29 = vld [vmem:[#allocation116_spill] sm:$0xff] }
 0x83e   : > { %v3548_v36 = vpop.f32.mrf.mxu3 }
 0x83f   : > { %v3718_v47 = vadd.f32 %v12921_v45, %v3548_v36  ;;  %v5330_v34 = vunpack.c.l.b16 %v4917_v33  ;;  %v5331_v61 = vunpack.c.h.b16 %v4917_v33  ;;  %v11582_v27 = vpop.f32.mrf.mxu2  ;;  %v12927_v45 = vld [vmem:[#allocation102_spill] sm:$0xff] }
 0x840   : > { %12926 = vst [vmem:[#allocation75_spill] sm:$0xff] %v11582_v27 }
 0x841   : > { %v4502_v28 = vadd.f32 %v4230_v51, %v3718_v47  ;;  %v4763_v47 = vmax.f32 %v12927_v45, 0.0 }
 0x843   : > { %v4758_v9 = vmax.f32 %v4502_v28, 0.0  ;;  %5856 = vmatmul.bf16.vlgmr.msrb.gmra.mxu3 %v12922_v30  ;;  %v12928_v28 = vld [vmem:[#allocation178_spill] sm:$0xff]  ;;  %v11589_v27 = vpop.f32.mrf.mxu1 }
 0x844   : > { %12932 = vst [vmem:[#allocation130_spill] sm:$0xff] %v11589_v27 }
 0x845   : > { %v4919_v39 = vpack.c.bf16 %v4759_v43, %v4758_v9  ;;  %v12929_v43 = vld [vmem:[#allocation150_spill] sm:$0xff] }
 0x846   : > { %v3551_v48 = vpop.f32.mrf.mxu3  ;;  %v4061_v9 = vadd.f32 %v12929_v43, %v12928_v28 }
 0x847   : > { %v3721_v15 = vadd.f32 %v12924_v29, %v3551_v48  ;;  %v5334_v10 = vunpack.c.l.b16 %v4919_v39  ;;  %v5335_v52 = vunpack.c.h.b16 %v4919_v39  ;;  %v12930_v29 = vld [vmem:[#allocation146_spill] sm:$0xff] }
 0x848   : > { %v4511_v33 = vadd.f32 %v12930_v29, %v4061_v9  ;;  %v12931_v39 = vld [vmem:[#allocation118_spill] sm:$0xff] }
 0x849   : > { %v4506_v36 = vadd.f32 %v4234_v20, %v3721_v15  ;;  %v5494_v51 = vpack.c.b16 %v5334_v10, %v5330_v34  ;;  %v5495_v37 = vpack.c.b16 %v5335_v52, %v5331_v61  ;;  %v11591_v34 = vpop.f32.mrf.mxu2  ;;  %v12934_v10 = vld [vmem:[#allocation25_spill] sm:$0xff] }
 0x84a   : > { %v4767_v44 = vmax.f32 %v4511_v33, 0.0  ;;  %12933 = vst [vmem:[#allocation48_spill] sm:$0xff] %v11591_v34  ;;  %v12937_v33 = vld [vmem:[#allocation151_spill] sm:$0xff] }
 0x84b   : > { %v4762_v30 = vmax.f32 %v4506_v36, 0.0  ;;  %6309 = vmatmul.bf16.gmra.mxu1 %v5494_v51  ;;  %6478 = vmatmul.bf16.gmra.mxu2 %v5495_v37  ;;  %v12935_v51 = vld [vmem:[#allocation198_spill] sm:$0xff] }
 0x84d   : > { %v4921_v13 = vpack.c.bf16 %v4763_v47, %v4762_v30 }
 0x84e   : > { %v3553_v48 = vpop.f32.mrf.mxu3 }
 0x84f   : > { %v3723_v58 = vadd.f32 %v12931_v39, %v3553_v48  ;;  %v5338_v36 = vunpack.c.l.b16 %v4921_v13  ;;  %v5339_v47 = vunpack.c.h.b16 %v4921_v13  ;;  %v12938_v39 = vld [vmem:[#allocation13_spill] sm:$0xff] }
 0x850   : > { %v4066_v27 = vadd.f32 %v12938_v39, %v12937_v33 }
 0x851   : > { %v4510_v22 = vadd.f32 %v4234_v20, %v3723_v58  ;;  %v12936_v58 = vld [vmem:[#allocation18_spill] sm:$0xff] }
 0x852   : > { %v4771_v48 = vmax.f32 %v12936_v58, 0.0  ;;  %v4519_v13 = vadd.f32 %v12930_v29, %v4066_v27 }
 0x853   : > { %v4766_v15 = vmax.f32 %v4510_v22, 0.0  ;;  %5861 = vmatmul.bf16.gmra.mxu3 %v12934_v10  ;;  %v11598_v22 = vpop.f32.mrf.mxu1 }
 0x854   : > { %12939 = vst [vmem:[#allocation107_spill] sm:$0xff] %v11598_v22  ;;  %v12950_v22 = vld [vmem:[#allocation147_spill] sm:$0xff] }
 0x855   : > { %v4923_v61 = vpack.c.bf16 %v4767_v44, %v4766_v15  ;;  %v11600_v44 = vpop.f32.mrf.mxu2 }
 0x856   : > { %v3556_v52 = vpop.f32.mrf.mxu3  ;;  %12940 = vst [vmem:[#allocation50_spill] sm:$0xff] %v11600_v44 }
 0x857   : > { %v3726_v37 = vadd.f32 %v12935_v51, %v3556_v52  ;;  %v5342_v45 = vunpack.c.l.b16 %v4923_v61  ;;  %v5343_v28 = vunpack.c.h.b16 %v4923_v61  ;;  %v12941_v61 = vld [vmem:[#allocation121_spill] sm:$0xff]  ;;  %v4775_v51 = vmax.f32 %v4519_v13, 0.0 }
 0x859   : > { %v4514_v43 = vadd.f32 %v4234_v20, %v3726_v37  ;;  %v5498_v9 = vpack.c.b16 %v5342_v45, %v5338_v36  ;;  %v5499_v30 = vpack.c.b16 %v5343_v28, %v5339_v47  ;;  %v12942_v45 = vld [vmem:[#allocation98_spill] sm:$0xff] }
 0x85b   : > { %v4770_v34 = vmax.f32 %v4514_v43, 0.0  ;;  %6314 = vmatmul.bf16.gmra.mxu1 %v5498_v9  ;;  %6483 = vmatmul.bf16.gmra.mxu2 %v5499_v30  ;;  %v12943_v43 = vld [vmem:[#allocation90_spill] sm:$0xff]  ;;  %v11606_v58 = vpop.f32.mrf.mxu1 }
 0x85c   : > { %v4238_v9 = vperm.slane %v12943_v43, 2  ;;  %12944 = vst [vmem:[#allocation181_spill] sm:$0xff] %v11606_v58  ;;  %v12951_v58 = vld [vmem:[#allocation126_spill] sm:$0xff] }
 0x85d   : > { %v4925_v15 = vpack.c.bf16 %v4771_v48, %v4770_v34  ;;  %v11608_v33 = vpop.f32.mrf.mxu2  ;;  %v12946_v34 = vld [vmem:[#allocation124_spill] sm:$0xff] }
 0x85e   : > { %v3558_v10 = vpop.f32.mrf.mxu3  ;;  %12945 = vst [vmem:[#allocation77_spill] sm:$0xff] %v11608_v33 }
 0x85f   : > { %v3728_v52 = vadd.f32 %v12941_v61, %v3558_v10  ;;  %v5346_v30 = vunpack.c.l.b16 %v4925_v15  ;;  %v5347_v27 = vunpack.c.h.b16 %v4925_v15  ;;  %v12947_v61 = vld [vmem:[#allocation199_spill] sm:$0xff] }
 0x861   : > { %v4518_v36 = vadd.f32 %v4234_v20, %v3728_v52  ;;  %v4779_v52 = vmax.f32 %v12947_v61, 0.0 }
 0x863   : > { %v4774_v37 = vmax.f32 %v4518_v36, 0.0  ;;  %5866 = vmatmul.bf16.gmra.mxu3 %v12942_v45  ;;  %v12948_v36 = vld [vmem:[#allocation20_spill] sm:$0xff] }
 0x865   : > { %v4927_v47 = vpack.c.bf16 %v4775_v51, %v4774_v37  ;;  %v12949_v51 = vld [vmem:[#allocation163_spill] sm:$0xff]  ;;  %v11618_v15 = vpop.f32.mrf.mxu2 }
 0x866   : > { %v3561_v28 = vpop.f32.mrf.mxu3  ;;  %v4071_v37 = vadd.f32 %v12949_v51, %v12948_v36  ;;  %12953 = vst [vmem:[#allocation81_spill] sm:$0xff] %v11618_v15  ;;  %v12958_v15 = vld [vmem:[#allocation84_spill] sm:$0xff] }
 0x867   : > { %v3731_v48 = vadd.f32 %v12946_v34, %v3561_v28  ;;  %v5350_v39 = vunpack.c.l.b16 %v4927_v47  ;;  %v5351_v29 = vunpack.c.h.b16 %v4927_v47  ;;  %v11616_v34 = vpop.f32.mrf.mxu1 }
 0x868   : > { %v4527_v33 = vadd.f32 %v12950_v22, %v4071_v37  ;;  %12952 = vst [vmem:[#allocation135_spill] sm:$0xff] %v11616_v34  ;;  %v12957_v34 = vld [vmem:[#allocation59_spill] sm:$0xff] }
 0x869   : > { %v4522_v10 = vadd.f32 %v4238_v9, %v3731_v48  ;;  %v5502_v20 = vpack.c.b16 %v5350_v39, %v5346_v30  ;;  %v5503_v13 = vpack.c.b16 %v5351_v29, %v5347_v27  ;;  %v12954_v39 = vld [vmem:[#allocation71_spill] sm:$0xff] }
 0x86a   : > { %v4783_v30 = vmax.f32 %v4527_v33, 0.0 }
 0x86b   : > { %v4778_v45 = vmax.f32 %v4522_v10, 0.0  ;;  %6319 = vmatmul.bf16.gmra.mxu1 %v5502_v20  ;;  %6488 = vmatmul.bf16.gmra.mxu2 %v5503_v13  ;;  %v12955_v20 = vld [vmem:[#allocation129_spill] sm:$0xff] }
 0x86d   : > { %v4929_v43 = vpack.c.bf16 %v4779_v52, %v4778_v45 }
 0x86e   : > { %v3563_v44 = vpop.f32.mrf.mxu3 }
 0x86f   : > { %v3733_v28 = vadd.f32 %v12951_v58, %v3563_v44  ;;  %v5354_v10 = vunpack.c.l.b16 %v4929_v43  ;;  %v5355_v52 = vunpack.c.h.b16 %v4929_v43  ;;  %v12956_v58 = vld [vmem:[#allocation160_spill] sm:$0xff]  ;;  %v11625_v33 = vpop.f32.mrf.mxu1 }
 0x870   : > { %v4787_v45 = vmax.f32 %v12956_v58, 0.0  ;;  %v12965_v58 = vld [vmem:[#allocation131_spill] sm:$0xff] }
 0x871   : > { %v4526_v47 = vadd.f32 %v4238_v9, %v3733_v28  ;;  %v4076_v28 = vadd.f32 %v12958_v15, %v12957_v34 }
 0x873   : > { %v4782_v48 = vmax.f32 %v4526_v47, 0.0  ;;  %5871 = vmatmul.bf16.gmra.mxu3 %v12954_v39  ;;  %v11627_v47 = vpop.f32.mrf.mxu2  ;;  %v4535_v43 = vadd.f32 %v12950_v22, %v4076_v28 }
 0x874   : > { %12959 = vst [vmem:[#allocation119_spill] sm:$0xff] %v11627_v47 }
 0x875   : > { %v4931_v27 = vpack.c.bf16 %v4783_v30, %v4782_v48 }
 0x876   : > { %v3566_v29 = vpop.f32.mrf.mxu3 }
 0x877   : > { %v3736_v13 = vadd.f32 %v12955_v20, %v3566_v29  ;;  %v5358_v61 = vunpack.c.l.b16 %v4931_v27  ;;  %v5359_v36 = vunpack.c.h.b16 %v4931_v27  ;;  %v12960_v27 = vld [vmem:[#allocation27_spill] sm:$0xff]  ;;  %v4791_v20 = vmax.f32 %v4535_v43, 0.0 }
 0x879   : > { %v4530_v51 = vadd.f32 %v4238_v9, %v3736_v13  ;;  %v5506_v37 = vpack.c.b16 %v5358_v61, %v5354_v10  ;;  %v5507_v44 = vpack.c.b16 %v5359_v36, %v5355_v52  ;;  %v12961_v61 = vld [vmem:[#allocation31_spill] sm:$0xff]  ;;  %v11632_v52 = vpop.f32.mrf.mxu1 }
 0x87a   : > { %12962 = vst [vmem:[#allocation54_spill] sm:$0xff] %v11632_v52 }
 0x87b   : > { %v4786_v30 = vmax.f32 %v4530_v51, 0.0  ;;  %6324 = vmatmul.bf16.gmra.mxu1 %v5506_v37  ;;  %6493 = vmatmul.bf16.gmra.mxu2 %v5507_v44  ;;  %v11634_v34 = vpop.f32.mrf.mxu2  ;;  %v12964_v51 = vld [vmem:[#allocation108_spill] sm:$0xff] }
 0x87c   : > { %12963 = vst [vmem:[#allocation191_spill] sm:$0xff] %v11634_v34  ;;  %v4242_v37 = vperm.slane %v12964_v51, 2 }
 0x87d   : > { %v4933_v48 = vpack.c.bf16 %v4787_v45, %v4786_v30 }
 0x87e   : > { %v3568_v39 = vpop.f32.mrf.mxu3 }
 0x87f   : > { %v3738_v29 = vadd.f32 %v12960_v27, %v3568_v39  ;;  %v5362_v44 = vunpack.c.l.b16 %v4933_v48  ;;  %v5363_v22 = vunpack.c.h.b16 %v4933_v48  ;;  %v12966_v27 = vld [vmem:[#allocation164_spill] sm:$0xff]  ;;  %v12970_v48 = vld [vmem:[#allocation134_spill] sm:$0xff] }
 0x881   : > { %v4534_v10 = vadd.f32 %v4238_v9, %v3738_v29  ;;  %v4795_v29 = vmax.f32 %v12966_v27, 0.0  ;;  %v11642_v34 = vpop.f32.mrf.mxu1 }
 0x883   : > { %v4790_v13 = vmax.f32 %v4534_v10, 0.0  ;;  %5876 = vmatmul.bf16.gmra.mxu3 %v12961_v61  ;;  %v12967_v10 = vld [vmem:[#allocation61_spill] sm:$0xff] }
 0x884   : > { %v12968_v61 = vld [vmem:[#allocation41_spill] sm:$0xff] }
 0x885   : > { %v4935_v15 = vpack.c.bf16 %v4791_v20, %v4790_v13  ;;  %v4081_v52 = vadd.f32 %v12968_v61, %v12967_v10 }
 0x886   : > { %v3571_v36 = vpop.f32.mrf.mxu3 }
 0x887   : > { %v3741_v45 = vadd.f32 %v12965_v58, %v3571_v36  ;;  %v5366_v30 = vunpack.c.l.b16 %v4935_v15  ;;  %v5367_v28 = vunpack.c.h.b16 %v4935_v15  ;;  %v4543_v51 = vadd.f32 %v11200_v17, %v4081_v52  ;;  %v11644_v36 = vpop.f32.mrf.mxu2 }
 0x888   : > { %12969 = vst [vmem:[#allocation192_spill] sm:$0xff] %v11644_v36 }
 0x889   : > { %v4538_v39 = vadd.f32 %v4242_v37, %v3741_v45  ;;  %v5510_v9 = vpack.c.b16 %v5366_v30, %v5362_v44  ;;  %v5511_v43 = vpack.c.b16 %v5367_v28, %v5363_v22  ;;  %v4799_v58 = vmax.f32 %v4543_v51, 0.0  ;;  %v12971_v30 = vld [vmem:[#allocation79_spill] sm:$0xff]  ;;  %v11649_v52 = vpop.f32.mrf.mxu1 }
 0x88a   : > { %12973 = vst [vmem:[#allocation112_spill] sm:$0xff] %v11649_v52  ;;  %v4803_v51 = vmax.f32 %v11234_v32, 0.0  ;;  %v12978_v32 = vld [vmem:[#allocation56_spill] sm:$0xff] }
 0x88b   : > { %v4794_v47 = vmax.f32 %v4538_v39, 0.0  ;;  %6329 = vmatmul.bf16.gmra.mxu1 %v5510_v9  ;;  %6498 = vmatmul.bf16.gmra.mxu2 %v5511_v43  ;;  %v12972_v9 = vld [vmem:[#allocation161_spill] sm:$0xff] }
 0x88d   : > { %v4937_v20 = vpack.c.bf16 %v4795_v29, %v4794_v47 }
 0x88e   : > { %v3573_v13 = vpop.f32.mrf.mxu3 }
 0x88f   : > { %v3743_v15 = vadd.f32 %v12970_v48, %v3573_v13  ;;  %v5370_v39 = vunpack.c.l.b16 %v4937_v20  ;;  %v5371_v27 = vunpack.c.h.b16 %v4937_v20  ;;  %v11651_v10 = vpop.f32.mrf.mxu2  ;;  %v12975_v48 = vld [vmem:[#allocation177_spill] sm:$0xff] }
 0x890   : > { %12974 = vst [vmem:[#allocation58_spill] sm:$0xff] %v11651_v10 }
 0x891   : > { %v4542_v44 = vadd.f32 %v4242_v37, %v3743_v15  ;;  %v12976_v15 = vld [vmem:[#allocation202_spill] sm:$0xff]  ;;  %v11658_v10 = vpop.f32.mrf.mxu1 }
 0x893   : > { %v4798_v45 = vmax.f32 %v4542_v44, 0.0  ;;  %5881 = vmatmul.bf16.gmra.mxu3 %v12971_v30  ;;  %v4086_v44 = vadd.f32 %v12976_v15, %v12975_v48 }
 0x895   : > { %v4939_v22 = vpack.c.bf16 %v4799_v58, %v4798_v45  ;;  %v4551_v20 = vadd.f32 %v11200_v17, %v4086_v44 }
 0x896   : > { %v3576_v28 = vpop.f32.mrf.mxu3 }
 0x897   : > { %v3746_v43 = vadd.f32 %v12972_v9, %v3576_v28  ;;  %v5374_v47 = vunpack.c.l.b16 %v4939_v22  ;;  %v5375_v29 = vunpack.c.h.b16 %v4939_v22  ;;  %v12977_v22 = vld [vmem:[#allocation165_spill] sm:$0xff]  ;;  %v4807_v52 = vmax.f32 %v4551_v20, 0.0 }
 0x898   : > { %v4091_v20 = vadd.f32 %v11268_v46, %v11266_v8 }
 0x899   : > { %v4546_v61 = vadd.f32 %v4242_v37, %v3746_v43  ;;  %v5514_v36 = vpack.c.b16 %v5374_v47, %v5370_v39  ;;  %v5515_v13 = vpack.c.b16 %v5375_v29, %v5371_v27  ;;  %v11660_v39 = vpop.f32.mrf.mxu2  ;;  %v12979_v29 = vld [vmem:[#allocation188_spill] sm:$0xff] }
 0x89b   : > { %v4802_v58 = vmax.f32 %v4546_v61, 0.0  ;;  %6334 = vmatmul.bf16.gmra.mxu1 %v5514_v36  ;;  %6503 = vmatmul.bf16.gmra.mxu2 %v5515_v13  ;;  %v4246_v36 = vperm.slane %v12979_v29, 2  ;;  %v12980_v13 = vld [vmem:[#allocation138_spill] sm:$0xff] }
 0x89d   : > { %v4941_v45 = vpack.c.bf16 %v4803_v51, %v4802_v58 }
 0x89e   : > { %v3578_v30 = vpop.f32.mrf.mxu3 }
 0x89f   : > { %v3748_v28 = vadd.f32 %v12977_v22, %v3578_v30  ;;  %v5378_v61 = vunpack.c.l.b16 %v4941_v45  ;;  %v5379_v17 = vunpack.c.h.b16 %v4941_v45  ;;  %v4811_v30 = vmax.f32 %v11261_v41, 0.0  ;;  %v12982_v41 = vld [vmem:[#allocation60_spill] sm:$0xff] }
 0x8a0   : > { %v4559_v45 = vadd.f32 %v11247_v23, %v4091_v20 }
 0x8a1   : > { %v4550_v9 = vadd.f32 %v4242_v37, %v3748_v28  ;;  %v11670_v28 = vpop.f32.mrf.mxu2 }
 0x8a2   : > { %v4815_v29 = vmax.f32 %v4559_v45, 0.0  ;;  %v4096_v45 = vadd.f32 %v11340_v2, %v11333_v54 }
 0x8a3   : > { %v4806_v43 = vmax.f32 %v4550_v9, 0.0  ;;  %5886 = vmatmul.bf16.gmra.mxu3 %v12978_v32  ;;  %v12981_v32 = vld [vmem:[#allocation82_spill] sm:$0xff] }
 0x8a5   : > { %v4943_v47 = vpack.c.bf16 %v4807_v52, %v4806_v43  ;;  %v11668_v52 = vpop.f32.mrf.mxu1 }
 0x8a6   : > { %v3581_v27 = vpop.f32.mrf.mxu3 }
 0x8a7   : > { %v3751_v51 = vadd.f32 %v12980_v13, %v3581_v27  ;;  %v5382_v48 = vunpack.c.l.b16 %v4943_v47  ;;  %v5383_v15 = vunpack.c.h.b16 %v4943_v47 }
 0x8a9   : > { %v4554_v44 = vadd.f32 %v4246_v36, %v3751_v51  ;;  %v5518_v37 = vpack.c.b16 %v5382_v48, %v5378_v61  ;;  %v5519_v58 = vpack.c.b16 %v5383_v15, %v5379_v17  ;;  %v11677_v48 = vpop.f32.mrf.mxu2  ;;  %v12983_v17 = vld [vmem:[#allocation169_spill] sm:$0xff] }
 0x8ab   : > { %v4810_v22 = vmax.f32 %v4554_v44, 0.0  ;;  %6339 = vmatmul.bf16.gmra.mxu1 %v5518_v37  ;;  %6508 = vmatmul.bf16.gmra.mxu2 %v5519_v58 }
 0x8ad   : > { %v4945_v9 = vpack.c.bf16 %v4811_v30, %v4810_v22  ;;  %v11675_v51 = vpop.f32.mrf.mxu1 }
 0x8ae   : > { %v3583_v43 = vpop.f32.mrf.mxu3 }
 0x8af   : > { %v3753_v47 = vadd.f32 %v12981_v32, %v3583_v43  ;;  %v5386_v46 = vunpack.c.l.b16 %v4945_v9  ;;  %v5387_v37 = vunpack.c.h.b16 %v4945_v9  ;;  %v4819_v43 = vmax.f32 %v11278_v26, 0.0  ;;  %v12985_v26 = vld [vmem:[#allocation64_spill] sm:$0xff] }
 0x8b1   : > { %v4558_v27 = vadd.f32 %v4246_v36, %v3753_v47  ;;  %v11687_v9 = vpop.f32.mrf.mxu2 }
 0x8b3   : > { %v4814_v61 = vmax.f32 %v4558_v27, 0.0  ;;  %5891 = vmatmul.bf16.gmra.mxu3 %v12982_v41 }
 0x8b5   : > { %v4947_v13 = vpack.c.bf16 %v4815_v29, %v4814_v61  ;;  %v4567_v29 = vadd.f32 %v11247_v23, %v4096_v45  ;;  %v12984_v61 = vld [vmem:[#allocation144_spill] sm:$0xff] }
 0x8b6   : > { %v3586_v8 = vpop.f32.mrf.mxu3 }
 0x8b7   : > { %v3756_v15 = vadd.f32 %v12983_v17, %v3586_v8  ;;  %v5390_v44 = vunpack.c.l.b16 %v4947_v13  ;;  %v5391_v58 = vunpack.c.h.b16 %v4947_v13  ;;  %v11685_v8 = vpop.f32.mrf.mxu1 }
 0x8b9   : > { %v4562_v30 = vadd.f32 %v4246_v36, %v3756_v15  ;;  %v5522_v20 = vpack.c.b16 %v5390_v44, %v5386_v46  ;;  %v5523_v22 = vpack.c.b16 %v5391_v58, %v5387_v37  ;;  %v4823_v46 = vmax.f32 %v4567_v29, 0.0 }
 0x8bb   : > { %v4818_v32 = vmax.f32 %v4562_v30, 0.0  ;;  %6344 = vmatmul.bf16.gmra.mxu1 %v5522_v20  ;;  %6513 = vmatmul.bf16.gmra.mxu2 %v5523_v22  ;;  %v11692_v22 = vpop.f32.mrf.mxu2 }
 0x8bd   : > { %v4949_v47 = vpack.c.bf16 %v4819_v43, %v4818_v32  ;;  %v12986_v43 = vld [vmem:[#allocation16_spill] sm:$0xff] }
 0x8be   : > { %v3588_v27 = vpop.f32.mrf.mxu3 }
 0x8bf   : > { %v3758_v41 = vadd.f32 %v12984_v61, %v3588_v27  ;;  %v5394_v2 = vunpack.c.l.b16 %v4949_v47  ;;  %v5395_v37 = vunpack.c.h.b16 %v4949_v47  ;;  %v11690_v23 = vpop.f32.mrf.mxu1  ;;  %v12987_v27 = vld [vmem:[#allocation17_spill] sm:$0xff] }
 0x8c1   : > { %v4566_v13 = vadd.f32 %v4246_v36, %v3758_v41 }
 0x8c3   : > { %v4822_v17 = vmax.f32 %v4566_v13, 0.0  ;;  %5896 = vmatmul.bf16.gmra.mxu3 %v12985_v26  ;;  %v12988_v13 = vld [vmem:[#allocation180_spill] sm:$0xff]  ;;  %v12989_v26 = vld [vmem:[#allocation33_spill] sm:$0xff] }
 0x8c5   : > { %v4951_v15 = vpack.c.bf16 %v4823_v46, %v4822_v17 }
 0x8c6   : > { %v5857_v54 = vpop.f32.mrf.mxu3 }
 0x8c7   : > { %v5398_v44 = vunpack.c.l.b16 %v4951_v15  ;;  %v5399_v58 = vunpack.c.h.b16 %v4951_v15  ;;  %v6027_v45 = vadd.f32 %v12986_v43, %v5857_v54  ;;  %v12992_v43 = vld [vmem:[#allocation19_spill] sm:$0xff] }
 0x8c9   : > { %v5526_v30 = vpack.c.b16 %v5398_v44, %v5394_v2  ;;  %v5527_v20 = vpack.c.b16 %v5399_v58, %v5395_v37  ;;  %v6196_v32 = vadd.f32 %v11343_v55, %v6027_v45  ;;  %v12990_v37 = vld [vmem:[#allocation154_spill] sm:$0xff] }
 0x8cb   : > { %6349 = vmatmul.bf16.gmra.mxu1 %v5526_v30  ;;  %6518 = vmatmul.bf16.gmra.mxu2 %v5527_v20  ;;  %v6365_v47 = vadd.f32 %v11346_v53, %v6196_v32  ;;  %v12991_v30 = vld [vmem:[#allocation72_spill] sm:$0xff] }
 0x8ce   : > { %v5859_v36 = vpop.f32.mrf.mxu3 }
 0x8cf   : > { %v6029_v29 = vadd.f32 %v12987_v27, %v5859_v36 }
 0x8d1   : > { %v6198_v61 = vadd.f32 %v11351_v35, %v6029_v29 }
 0x8d3   : > { %v6367_v41 = vadd.f32 %v11357_v12, %v6198_v61  ;;  %5901 = vmatmul.bf16.gmra.mxu3 %v12988_v13  ;;  %v12995_v61 = vld [vmem:[#allocation34_spill] sm:$0xff] }
 0x8d5   : > { %v6524_v46 = vmax.f32 %v6365_v47, %v6367_v41  ;;  %v12996_v41 = vld [vmem:[#allocation85_spill] sm:$0xff] }
 0x8d6   : > { %v5862_v17 = vpop.f32.mrf.mxu3 }
 0x8d7   : > { %v6032_v15 = vadd.f32 %v12989_v26, %v5862_v17  ;;  %v12998_v17 = vld [vmem:[#allocation157_spill] sm:$0xff] }
 0x8d9   : > { %v6201_v54 = vadd.f32 %v11360_v31, %v6032_v15  ;;  %v12993_v31 = vld [vmem:[#allocation200_spill] sm:$0xff] }
 0x8db   : > { %v6370_v2 = vadd.f32 %v11365_v21, %v6201_v54  ;;  %v12994_v21 = vld [vmem:[#allocation185_spill] sm:$0xff] }
 0x8dd   : > { %v6525_v44 = vmax.f32 %v6524_v46, %v6370_v2 }
 0x8de   : > { %v5864_v55 = vpop.f32.mrf.mxu3 }
 0x8df   : > { %v6034_v58 = vadd.f32 %v12990_v37, %v5864_v55  ;;  %v12999_v55 = vld [vmem:[#allocation201_spill] sm:$0xff] }
 0x8e1   : > { %v6203_v35 = vadd.f32 %v11368_v60, %v6034_v58  ;;  %v12997_v60 = vld [vmem:[#allocation125_spill] sm:$0xff] }
 0x8e3   : > { %v6372_v53 = vadd.f32 %v11375_v63, %v6203_v35  ;;  %5906 = vmatmul.bf16.gmra.mxu3 %v12991_v30 }
 0x8e5   : > { %v6526_v12 = vmax.f32 %v6525_v44, %v6372_v53  ;;  %v13000_v53 = vld [vmem:[#allocation36_spill] sm:$0xff] }
 0x8e6   : > { %v5867_v20 = vpop.f32.mrf.mxu3 }
 0x8e7   : > { %v6037_v45 = vadd.f32 %v12992_v43, %v5867_v20  ;;  %v6527_v2 = vrot.slane %v6526_v12, 4  ;;  %v13001_v20 = vld [vmem:[#allocation105_spill] sm:$0xff] }
 0x8e9   : > { %v6206_v32 = vadd.f32 %v11378_v1, %v6037_v45  ;;  %v6528_v58 = vmax.f32 %v6526_v12, %v6527_v2  ;;  %v13003_v12 = vld [vmem:[#allocation94_spill] sm:$0xff] }
 0x8eb   : > { %v6375_v47 = vadd.f32 %v12995_v61, %v6206_v32  ;;  %v6529_v43 = vrot.slane %v6528_v58, 2 }
 0x8ee   : > { %v5869_v36 = vpop.f32.mrf.mxu3 }
 0x8ef   : > { %v6039_v27 = vadd.f32 %v12993_v31, %v5869_v36  ;;  %v6530_v31 = vmax.f32 %v6528_v58, %v6529_v43 }
 0x8f1   : > { %v6208_v29 = vadd.f32 %v12994_v21, %v6039_v27 }
 0x8f3   : > { %v6377_v13 = vadd.f32 %v12996_v41, %v6208_v29  ;;  %5911 = vmatmul.bf16.gmra.mxu3 %v12997_v60  ;;  %v6531_v29 = vrot.slane %v6530_v31, 1 }
 0x8f5   : > { %v6533_v63 = vmax.f32 %v6375_v47, %v6377_v13 }
 0x8f6   : > { %v5872_v46 = vpop.f32.mrf.mxu3 }
 0x8f7   : > { %v6042_v26 = vadd.f32 %v12998_v17, %v5872_v46  ;;  %v11728_v46 = vld [vmem:[%s11945_s8] ss:$0 sm:$0xff] }
 0x8f9   : > { %v6211_v15 = vadd.f32 %v11397_v42, %v6042_v26 }
 0x8fb   : > { %v6380_v54 = vadd.f32 %v11400_v40, %v6211_v15  ;;  %v13002_v40 = vld [vmem:[#allocation162_spill] sm:$0xff] }
 0x8fd   : > { %v6534_v1 = vmax.f32 %v6533_v63, %v6380_v54  ;;  %v6532_v63 = vmax.f32 %v6530_v31, %v6531_v29  ;;  %v13005_v54 = vld [vmem:[#allocation89_spill] sm:$0xff]  ;;  %v13011_v29 = vld [vmem:[#allocation184_spill] sm:$0xff] }
 0x8fe   : > { %v5874_v44 = vpop.f32.mrf.mxu3 }
 0x8ff   : > { %v6044_v37 = vadd.f32 %v12999_v55, %v5874_v44  ;;  %v13007_v55 = vld [vmem:[#allocation109_spill] sm:$0xff] }
 0x901   : > { %v6213_v35 = vadd.f32 %v11403_v19, %v6044_v37  ;;  %v13004_v19 = vld [vmem:[#allocation174_spill] sm:$0xff]  ;;  %v6672_v37 = vadd.f32 %v11728_v46, %v6532_v63 }
 0x903   : > { %v6382_v30 = vadd.f32 %v13000_v53, %v6213_v35  ;;  %5916 = vmatmul.bf16.gmra.mxu3 %v13001_v20  ;;  %v13008_v20 = vld [vmem:[#allocation166_spill] sm:$0xff] }
 0x905   : > { %v6535_v45 = vmax.f32 %v6534_v1, %v6382_v30  ;;  %v13006_v1 = vld [vmem:[#allocation91_spill] sm:$0xff] }
 0x906   : > { %v5877_v36 = vpop.f32.mrf.mxu3 }
 0x907   : > { %v6536_v32 = vrot.slane %v6535_v45, 4  ;;  %v6047_v21 = vadd.f32 %v13002_v40, %v5877_v36 }
 0x909   : > { %v6537_v42 = vmax.f32 %v6535_v45, %v6536_v32  ;;  %v6216_v13 = vadd.f32 %v13003_v12, %v6047_v21  ;;  %v13009_v45 = vld [vmem:[#allocation38_spill] sm:$0xff] }
 0x90b   : > { %v6538_v27 = vrot.slane %v6537_v42, 2  ;;  %v6385_v2 = vadd.f32 %v13005_v54, %v6216_v13 }
 0x90d   : > { %v6539_v61 = vmax.f32 %v6537_v42, %v6538_v27  ;;  %v13010_v42 = vld [vmem:[#allocation168_spill] sm:$0xff] }
 0x90e   : > { %v5879_v47 = vpop.f32.mrf.mxu3 }
 0x90f   : > { %v6540_v41 = vrot.slane %v6539_v61, 1  ;;  %v6049_v60 = vadd.f32 %v13004_v19, %v5879_v47  ;;  %v13012_v19 = vld [vmem:[#allocation170_spill] sm:$0xff] }
 0x911   : > { %v6541_v17 = vmax.f32 %v6539_v61, %v6540_v41  ;;  %v6218_v26 = vadd.f32 %v11421_v50, %v6049_v60 }
 0x913   : > { %v6673_v15 = vadd.f32 %v11728_v46, %v6541_v17  ;;  %v6387_v44 = vadd.f32 %v13006_v1, %v6218_v26  ;;  %5921 = vmatmul.bf16.gmra.mxu3 %v13007_v55 }
 0x915   : > { %v6704_v58 = vrot.slane %v6673_v15, 7  ;;  %v6542_v35 = vmax.f32 %v6385_v2, %v6387_v44  ;;  %v13013_v15 = vld [vmem:[#allocation28_spill] sm:$0xff]  ;;  %v13014_v44 = vld [vmem:[#allocation49_spill] sm:$0xff] }
 0x916   : > { %v5882_v53 = vpop.f32.mrf.mxu3 }
 0x917   : > { %v6705_v30 = vsel %vm1891_vm1, %v6704_v58, %v6672_v37  ;;  %v6052_v43 = vadd.f32 %v13008_v20, %v5882_v53  ;;  %v13015_v37 = vld [vmem:[#allocation122_spill] sm:$0xff] }
 0x919   : > { %v6221_v36 = vadd.f32 %v13009_v45, %v6052_v43  ;;  %v13016_v43 = vld [vmem:[#allocation175_spill] sm:$0xff] }
 0x91b   : > { %v6390_v50 = vadd.f32 %v11435_v16, %v6221_v36  ;;  %v13017_v36 = vld [vmem:[#allocation104_spill] sm:$0xff] }
 0x91d   : > { %v6543_v32 = vmax.f32 %v6542_v35, %v6390_v50 }
 0x91e   : > { %v5884_v31 = vpop.f32.mrf.mxu3 }
 0x91f   : > { %v6054_v27 = vadd.f32 %v13010_v42, %v5884_v31  ;;  %v13018_v31 = vld [vmem:[#allocation172_spill] sm:$0xff] }
 0x921   : > { %v6223_v40 = vadd.f32 %v11441_v7, %v6054_v27  ;;  %v13019_v27 = vld [vmem:[#allocation68_spill] sm:$0xff] }
 0x923   : > { %v6392_v21 = vadd.f32 %v11445_v38, %v6223_v40  ;;  %5926 = vmatmul.bf16.gmra.mxu3 %v13011_v29 }
 0x925   : > { %v6544_v61 = vmax.f32 %v6543_v32, %v6392_v21  ;;  %v13020_v21 = vld [vmem:[#allocation115_spill] sm:$0xff] }
 0x926   : > { %v5887_v47 = vpop.f32.mrf.mxu3 }
 0x927   : > { %v6545_v41 = vrot.slane %v6544_v61, 4  ;;  %v6057_v60 = vadd.f32 %v13012_v19, %v5887_v47 }
 0x929   : > { %v6546_v12 = vmax.f32 %v6544_v61, %v6545_v41  ;;  %v6226_v26 = vadd.f32 %v11451_v57, %v6057_v60 }
 0x92b   : > { %v6547_v13 = vrot.slane %v6546_v12, 2  ;;  %v6395_v1 = vadd.f32 %v11453_v11, %v6226_v26 }
 0x92d   : > { %v6548_v63 = vmax.f32 %v6546_v12, %v6547_v13  ;;  %v13021_v12 = vld [vmem:[#allocation29_spill] sm:$0xff] }
 0x92e   : > { %v5889_v17 = vpop.f32.mrf.mxu3 }
 0x92f   : > { %v6549_v16 = vrot.slane %v6548_v63, 1  ;;  %v6059_v54 = vadd.f32 %v13013_v15, %v5889_v17 }
 0x931   : > { %v6550_v2 = vmax.f32 %v6548_v63, %v6549_v16  ;;  %v6228_v7 = vadd.f32 %v11462_v0, %v6059_v54  ;;  %v13022_v63 = vld [vmem:[#allocation97_spill] sm:$0xff] }
 0x932   : > { %v13023_v16 = vld [vmem:[#allocation173_spill] sm:$0xff] }
 0x933   : > { %v6674_v38 = vadd.f32 %v11728_v46, %v6550_v2  ;;  %v6397_v55 = vadd.f32 %v13014_v44, %v6228_v7  ;;  %5931 = vmatmul.bf16.gmra.mxu3 %v13015_v37  ;;  %v13024_v2 = vld [vmem:[#allocation43_spill] sm:$0xff] }
 0x935   : > { %v6706_v58 = vrot.slane %v6674_v38, 6  ;;  %v6551_v35 = vmax.f32 %v6395_v1, %v6397_v55  ;;  %v13025_v1 = vld [vmem:[#allocation117_spill] sm:$0xff] }
 0x936   : > { %v5892_v53 = vpop.f32.mrf.mxu3 }
 0x937   : > { %v6707_v20 = vsel %vm1893_vm2, %v6706_v58, %v6705_v30  ;;  %v6062_v57 = vadd.f32 %v13016_v43, %v5892_v53 }
 0x939   : > { %v6231_v45 = vadd.f32 %v11471_v25, %v6062_v57  ;;  %v13027_v57 = vld [vmem:[#allocation44_spill] sm:$0xff] }
 0x93b   : > { %v6400_v50 = vadd.f32 %v13017_v36, %v6231_v45 }
 0x93d   : > { %v6552_v0 = vmax.f32 %v6551_v35, %v6400_v50  ;;  %v13026_v35 = vld [vmem:[#allocation73_spill] sm:$0xff]  ;;  %v13028_v50 = vld [vmem:[#allocation30_spill] sm:$0xff] }
 0x93e   : > { %v5894_v32 = vpop.f32.mrf.mxu3 }
 0x93f   : > { %v6064_v42 = vadd.f32 %v13018_v31, %v5894_v32  ;;  %v13029_v31 = vld [vmem:[#allocation15_spill] sm:$0xff] }
 0x941   : > { %v6233_v11 = vadd.f32 %v11482_v4, %v6064_v42 }
 0x943   : > { %v6402_v40 = vadd.f32 %v13019_v27, %v6233_v11  ;;  %5936 = vmatmul.bf16.gmra.mxu3 %v13020_v21  ;;  %v13030_v21 = vld [vmem:[#allocation176_spill] sm:$0xff] }
 0x945   : > { %v6553_v29 = vmax.f32 %v6552_v0, %v6402_v40 }
 0x946   : > { %v5897_v61 = vpop.f32.mrf.mxu3 }
 0x947   : > { %v6554_v47 = vrot.slane %v6553_v29, 4  ;;  %v6067_v13 = vadd.f32 %v13021_v12, %v5897_v61 }
 0x949   : > { %v6555_v30 = vmax.f32 %v6553_v29, %v6554_v47  ;;  %v6236_v17 = vadd.f32 %v13022_v63, %v6067_v13 }
 0x94b   : > { %v6556_v41 = vrot.slane %v6555_v30, 2  ;;  %v6405_v7 = vadd.f32 %v13024_v2, %v6236_v17 }
 0x94d   : > { %v6557_v25 = vmax.f32 %v6555_v30, %v6556_v41  ;;  %v13031_v41 = vld [vmem:[#allocation92_spill] sm:$0xff] }
 0x94e   : > { %v5899_v19 = vpop.f32.mrf.mxu3 }
 0x94f   : > { %v6558_v60 = vrot.slane %v6557_v25, 1  ;;  %v6069_v26 = vadd.f32 %v13023_v16, %v5899_v19 }
 0x951   : > { %v6559_v15 = vmax.f32 %v6557_v25, %v6558_v60  ;;  %v6238_v4 = vadd.f32 %v11501_v56, %v6069_v26  ;;  %v13032_v60 = vld [vmem:[#allocation55_spill] sm:$0xff] }
 0x953   : > { %v6675_v54 = vadd.f32 %v11728_v46, %v6559_v15  ;;  %v6407_v38 = vadd.f32 %v11503_v62, %v6238_v4  ;;  %5941 = vmatmul.bf16.gmra.mxu3 %v13025_v1  ;;  %v13033_v15 = vld [vmem:[#allocation32_spill] sm:$0xff] }
 0x955   : > { %v6708_v44 = vrot.slane %v6675_v54, 5  ;;  %v6560_v55 = vmax.f32 %v6405_v7, %v6407_v38  ;;  %v13034_v54 = vld [vmem:[#allocation123_spill] sm:$0xff]  ;;  %v13035_v38 = vld [vmem:[#allocation88_spill] sm:$0xff] }
 0x956   : > { %v5902_v37 = vpop.f32.mrf.mxu3 }
 0x957   : > { %v6709_v58 = vsel %vm1895_vm3, %v6708_v44, %v6707_v20  ;;  %v6072_v53 = vadd.f32 %v13026_v35, %v5902_v37  ;;  %v13038_v37 = vld [vmem:[#allocation21_spill] sm:$0xff] }
 0x959   : > { %v6241_v43 = vadd.f32 %v11512_v3, %v6072_v53 }
 0x95b   : > { %v6410_v45 = vadd.f32 %v13027_v57, %v6241_v43 }
 0x95d   : > { %v6561_v56 = vmax.f32 %v6560_v55, %v6410_v45  ;;  %v13039_v45 = vld [vmem:[#allocation106_spill] sm:$0xff] }
 0x95e   : > { %v5904_v36 = vpop.f32.mrf.mxu3 }
 0x95f   : > { %v6074_v0 = vadd.f32 %v13028_v50, %v5904_v36 }
 0x961   : > { %v6243_v32 = vadd.f32 %v11519_v5, %v6074_v0  ;;  %v13040_v0 = vld [vmem:[#allocation100_spill] sm:$0xff] }
 0x963   : > { %v6412_v62 = vadd.f32 %v11521_v18, %v6243_v32  ;;  %5946 = vmatmul.bf16.gmra.mxu3 %v13029_v31 }
 0x965   : > { %v6562_v42 = vmax.f32 %v6561_v56, %v6412_v62  ;;  %v13041_v62 = vld [vmem:[#allocation52_spill] sm:$0xff] }
 0x966   : > { %v5907_v11 = vpop.f32.mrf.mxu3 }
 0x967   : > { %v6563_v27 = vrot.slane %v6562_v42, 4  ;;  %v6077_v29 = vadd.f32 %v13030_v21, %v5907_v11  ;;  %v13042_v11 = vld [vmem:[#allocation46_spill] sm:$0xff] }
 0x969   : > { %v6564_v20 = vmax.f32 %v6562_v42, %v6563_v27  ;;  %v6246_v30 = vadd.f32 %v11529_v14, %v6077_v29  ;;  %v13044_v29 = vld [vmem:[#allocation183_spill] sm:$0xff] }
 0x96b   : > { %v6565_v40 = vrot.slane %v6564_v20, 2  ;;  %v6415_v25 = vadd.f32 %v11531_v6, %v6246_v30  ;;  %v13036_v6 = vld [vmem:[#allocation45_spill] sm:$0xff] }
 0x96d   : > { %v6566_v3 = vmax.f32 %v6564_v20, %v6565_v40  ;;  %v13043_v40 = vld [vmem:[#allocation76_spill] sm:$0xff] }
 0x96e   : > { %v5909_v61 = vpop.f32.mrf.mxu3 }
 0x96f   : > { %v6567_v47 = vrot.slane %v6566_v3, 1  ;;  %v6079_v12 = vadd.f32 %v13031_v41, %v5909_v61  ;;  %v13045_v61 = vld [vmem:[#allocation158_spill] sm:$0xff] }
 0x971   : > { %v6568_v13 = vmax.f32 %v6566_v3, %v6567_v47  ;;  %v6248_v5 = vadd.f32 %v11536_v24, %v6079_v12 }
 0x973   : > { %v6676_v18 = vadd.f32 %v11728_v46, %v6568_v13  ;;  %v6417_v19 = vadd.f32 %v11538_v59, %v6248_v5  ;;  %5951 = vmatmul.bf16.gmra.mxu3 %v13032_v60  ;;  %v13037_v59 = vld [vmem:[#allocation110_spill] sm:$0xff] }
 0x974   : > { %v13046_v13 = vld [vmem:[#allocation182_spill] sm:$0xff] }
 0x975   : > { %v6710_v63 = vrot.slane %v6676_v18, 4  ;;  %v6569_v17 = vmax.f32 %v6415_v25, %v6417_v19  ;;  %v13047_v18 = vld [vmem:[#allocation47_spill] sm:$0xff] }
 0x976   : > { %v5912_v16 = vpop.f32.mrf.mxu3  ;;  %v13048_v19 = vld [vmem:[#allocation75_spill] sm:$0xff] }
 0x977   : > { %v6711_v26 = vsel %vm1897_vm4, %v6710_v63, %v6709_v58  ;;  %v6082_v14 = vadd.f32 %v13033_v15, %v5912_v16  ;;  %v13049_v16 = vld [vmem:[#allocation136_spill] sm:$0xff]  ;;  %v13050_v15 = vld [vmem:[#allocation83_spill] sm:$0xff] }
 0x979   : > { %v6251_v4 = vadd.f32 %v11546_v49, %v6082_v14 }
 0x97b   : > { %v6420_v2 = vadd.f32 %v13034_v54, %v6251_v4  ;;  %v13051_v54 = vld [vmem:[#allocation130_spill] sm:$0xff] }
 0x97d   : > { %v6570_v24 = vmax.f32 %v6569_v17, %v6420_v2 }
 0x97e   : > { %v5914_v7 = vpop.f32.mrf.mxu3 }
 0x97f   : > { %v6084_v1 = vadd.f32 %v13035_v38, %v5914_v7 }
 0x981   : > { %v6253_v44 = vadd.f32 %v13036_v6, %v6084_v1 }
 0x983   : > { %v6422_v55 = vadd.f32 %v13037_v59, %v6253_v44  ;;  %5956 = vmatmul.bf16.gmra.mxu3 %v13038_v37 }
 0x985   : > { %v6571_v35 = vmax.f32 %v6570_v24, %v6422_v55  ;;  %v13052_v24 = vld [vmem:[#allocation48_spill] sm:$0xff] }
 0x986   : > { %v5917_v53 = vpop.f32.mrf.mxu3 }
 0x987   : > { %v6572_v43 = vrot.slane %v6571_v35, 4  ;;  %v6087_v56 = vadd.f32 %v13039_v45, %v5917_v53  ;;  %v13054_v53 = vld [vmem:[#allocation179_spill] sm:$0xff] }
 0x988   : > { %v13056_v45 = vld [vmem:[#allocation187_spill] sm:$0xff] }
 0x989   : > { %v6573_v58 = vmax.f32 %v6571_v35, %v6572_v43  ;;  %v6256_v32 = vadd.f32 %v13040_v0, %v6087_v56 }
 0x98b   : > { %v6574_v57 = vrot.slane %v6573_v58, 2  ;;  %v6425_v21 = vadd.f32 %v13043_v40, %v6256_v32  ;;  %v13059_v32 = vld [vmem:[#allocation57_spill] sm:$0xff] }
 0x98d   : > { %v6575_v49 = vmax.f32 %v6573_v58, %v6574_v57  ;;  %v13055_v58 = vld [vmem:[#allocation53_spill] sm:$0xff] }
 0x98e   : > { %v5919_v36 = vpop.f32.mrf.mxu3 }
 0x98f   : > { %v6576_v50 = vrot.slane %v6575_v49, 1  ;;  %v6089_v31 = vadd.f32 %v13041_v62, %v5919_v36 }
 0x991   : > { %v6577_v42 = vmax.f32 %v6575_v49, %v6576_v50  ;;  %v6258_v27 = vadd.f32 %v13042_v11, %v6089_v31  ;;  %v13057_v49 = vld [vmem:[#allocation143_spill] sm:$0xff]  ;;  %v13058_v50 = vld [vmem:[#allocation181_spill] sm:$0xff] }
 0x993   : > { %v6677_v20 = vadd.f32 %v11728_v46, %v6577_v42  ;;  %v6427_v3 = vadd.f32 %v13044_v29, %v6258_v27  ;;  %5961 = vmatmul.bf16.gmra.mxu3 %v13045_v61  ;;  %v13060_v42 = vld [vmem:[#allocation107_spill] sm:$0xff]  ;;  %v13063_v61 = vld [vmem:[#allocation50_spill] sm:$0xff] }
 0x994   : > { %v13061_v27 = vld [vmem:[#allocation135_spill] sm:$0xff] }
 0x995   : > { %v6712_v47 = vrot.slane %v6677_v20, 3  ;;  %v6578_v30 = vmax.f32 %v6425_v21, %v6427_v3  ;;  %v13062_v21 = vld [vmem:[#allocation77_spill] sm:$0xff] }
 0x996   : > { %v5922_v41 = vpop.f32.mrf.mxu3 }
 0x997   : > { %v6713_v12 = vsel %vm1899_vm5, %v6712_v47, %v6711_v26  ;;  %v6092_v5 = vadd.f32 %v13046_v13, %v5922_v41  ;;  %v13053_v26 = vld [vmem:[#allocation140_spill] sm:$0xff]  ;;  %v13065_v13 = vld [vmem:[#allocation23_spill] sm:$0xff] }
 0x999   : > { %v6261_v25 = vadd.f32 %v13047_v18, %v6092_v5 }
 0x99b   : > { %v6430_v60 = vadd.f32 %v13048_v19, %v6261_v25  ;;  %v13066_v19 = vld [vmem:[#allocation119_spill] sm:$0xff] }
 0x99d   : > { %v6579_v63 = vmax.f32 %v6578_v30, %v6430_v60  ;;  %v13064_v30 = vld [vmem:[#allocation81_spill] sm:$0xff] }
 0x99e   : > { %v5924_v17 = vpop.f32.mrf.mxu3 }
 0x99f   : > { %v6094_v14 = vadd.f32 %v13050_v15, %v5924_v17 }
 0x9a1   : > { %v6263_v2 = vadd.f32 %v13051_v54, %v6094_v14  ;;  %v13068_v14 = vld [vmem:[#allocation93_spill] sm:$0xff] }
 0x9a3   : > { %5966 = vmatmul.bf16.gmra.mxu3 %v13049_v16  ;;  %v6432_v7 = vadd.f32 %v13052_v24, %v6263_v2  ;;  %v13067_v16 = vld [vmem:[#allocation54_spill] sm:$0xff]  ;;  %v13069_v24 = vld [vmem:[#allocation191_spill] sm:$0xff] }
 0x9a5   : > { %v6580_v1 = vmax.f32 %v6579_v63, %v6432_v7 }
 0x9a6   : > { %v5927_v4 = vpop.f32.mrf.mxu3 }
 0x9a7   : > { %v6581_v6 = vrot.slane %v6580_v1, 4  ;;  %v6097_v57 = vadd.f32 %v13055_v58, %v5927_v4  ;;  %v13073_v58 = vld [vmem:[#allocation112_spill] sm:$0xff] }
 0x9a9   : > { %v6582_v59 = vmax.f32 %v6580_v1, %v6581_v6  ;;  %v6266_v11 = vadd.f32 %v13060_v42, %v6097_v57 }
 0x9ab   : > { %v6583_v55 = vrot.slane %v6582_v59, 2  ;;  %v6435_v47 = vadd.f32 %v13063_v61, %v6266_v11 }
 0x9ad   : > { %v6584_v35 = vmax.f32 %v6582_v59, %v6583_v55 }
 0x9ae   : > { %v5929_v38 = vpop.f32.mrf.mxu3 }
 0x9af   : > { %v6099_v43 = vadd.f32 %v13054_v53, %v5929_v38  ;;  %v6585_v36 = vrot.slane %v6584_v35, 1  ;;  %v13070_v38 = vld [vmem:[#allocation192_spill] sm:$0xff]  ;;  %v11832_v53 = vpop.f32.mrf.mxu0 }
 0x9b1   : > { %v6268_v0 = vadd.f32 %v13058_v50, %v6099_v43  ;;  %v6586_v40 = vmax.f32 %v6584_v35, %v6585_v36 }
 0x9b3   : > { %5971 = vmatmul.bf16.gmra.mxu3 %v13053_v26  ;;  %v6437_v29 = vadd.f32 %v13062_v21, %v6268_v0  ;;  %v6678_v18 = vadd.f32 %v11728_v46, %v6586_v40  ;;  %v13071_v26 = vld [vmem:[#allocation148_spill] sm:$0xff] }
 0x9b5   : > { %v6587_v25 = vmax.f32 %v6435_v47, %v6437_v29  ;;  %v6714_v54 = vrot.slane %v6678_v18, 2  ;;  %v13077_v47 = vld [vmem:[#allocation86_spill] sm:$0xff]  ;;  %v13078_v18 = vld [vmem:[#allocation65_spill] sm:$0xff] }
 0x9b6   : > { %v5932_v44 = vpop.f32.mrf.mxu3 }
 0x9b7   : > { %v6102_v56 = vadd.f32 %v13056_v45, %v5932_v44  ;;  %v6715_v59 = vsel %vm1901_vm6, %v6714_v54, %v6713_v12  ;;  %v11835_v45 = vpop.f32.mrf.mxu1  ;;  %v6128_v42 = vpop.f32.mrf.mxu0 }
 0x9b9   : > { %v6271_v20 = vadd.f32 %v13061_v27, %v6102_v56  ;;  %v13076_v27 = vld [vmem:[#allocation51_spill] sm:$0xff] }
 0x9bb   : > { %v6440_v41 = vadd.f32 %v13064_v30, %v6271_v20 }
 0x9bd   : > { %v6588_v17 = vmax.f32 %v6587_v25, %v6440_v41 }
 0x9be   : > { %v5934_v37 = vpop.f32.mrf.mxu3 }
 0x9bf   : > { %v6104_v62 = vadd.f32 %v13059_v32, %v5934_v37  ;;  %v13072_v37 = vld [vmem:[#allocation39_spill] sm:$0xff]  ;;  %v13075_v32 = vld [vmem:[#allocation40_spill] sm:$0xff]  ;;  %v6297_v20 = vpop.f32.mrf.mxu1  ;;  %v11845_v41 = vpop.f32.mrf.mxu0 }
 0x9c1   : > { %v6273_v3 = vadd.f32 %v11625_v33, %v6104_v62 }
 0x9c3   : > { %5976 = vmatmul.bf16.gmra.mxu3 %v13057_v49  ;;  %v6442_v60 = vadd.f32 %v13066_v19, %v6273_v3  ;;  %v11838_v49 = vpop.f32.mrf.mxu2 }
 0x9c5   : > { %v6589_v2 = vmax.f32 %v6588_v17, %v6442_v60 }
 0x9c6   : > { %v5937_v31 = vpop.f32.mrf.mxu3 }
 0x9c7   : > { %v6107_v5 = vadd.f32 %v13065_v13, %v5937_v31  ;;  %v6590_v6 = vrot.slane %v6589_v2, 4  ;;  %v6133_v54 = vpop.f32.mrf.mxu0 }
 0x9c9   : > { %v6276_v15 = vadd.f32 %v13067_v16, %v6107_v5  ;;  %v6591_v43 = vmax.f32 %v6589_v2, %v6590_v6  ;;  %v13080_v2 = vld [vmem:[#allocation67_spill] sm:$0xff] }
 0x9cb   : > { %v6445_v7 = vadd.f32 %v13069_v24, %v6276_v15  ;;  %v6592_v36 = vrot.slane %v6591_v43, 2  ;;  %v6466_v29 = vpop.f32.mrf.mxu2  ;;  %v13079_v15 = vld [vmem:[#allocation156_spill] sm:$0xff] }
 0x9cd   : > { %v6593_v62 = vmax.f32 %v6591_v43, %v6592_v36  ;;  %v13082_v43 = vld [vmem:[#allocation22_spill] sm:$0xff] }
 0x9ce   : > { %v5939_v63 = vpop.f32.mrf.mxu3 }
 0x9cf   : > { %v6109_v4 = vadd.f32 %v13068_v14, %v5939_v63  ;;  %v6594_v40 = vrot.slane %v6593_v62, 1 }
 0x9d1   : > { %v6278_v33 = vadd.f32 %v11642_v34, %v6109_v4  ;;  %v13074_v34 = vld [vmem:[#allocation58_spill] sm:$0xff]  ;;  %v6595_v61 = vmax.f32 %v6593_v62, %v6594_v40 }
 0x9d3   : > { %v6447_v1 = vadd.f32 %v13070_v38, %v6278_v33  ;;  %5981 = vmatmul.bf16.gmra.mxu3 %v13071_v26  ;;  %v6679_v13 = vadd.f32 %v11728_v46, %v6595_v61  ;;  %v11853_v19 = vpop.f32.mrf.mxu2  ;;  %v13081_v26 = vld [vmem:[#allocation99_spill] sm:$0xff] }
 0x9d5   : > { %v6596_v44 = vmax.f32 %v6445_v7, %v6447_v1  ;;  %v6716_v60 = vrot.slane %v6679_v13, 1 }
 0x9d6   : > { %v5942_v55 = vpop.f32.mrf.mxu3 }
 0x9d7   : > { %v6112_v35 = vadd.f32 %v13072_v37, %v5942_v55  ;;  %v6717_v4 = vsel %vm1903_vm7, %v6716_v60, %v6715_v59 }
 0x9d8   : > { %6734 = vst [vmem:[%s11862_s22] sm:$0xff] %v6717_v4 }
 0x9d9   : > { %v6281_v57 = vadd.f32 %v13073_v58, %v6112_v35 }
 0x9db   : > { %v6450_v56 = vadd.f32 %v13074_v34, %v6281_v57  ;;  %v6471_v7 = vpop.f32.mrf.mxu2 }
 0x9dd   : > { %v6597_v50 = vmax.f32 %v6596_v44, %v6450_v56  ;;  %v6136_v44 = vpop.f32.mrf.mxu0 }
 0x9de   : > { %v5944_v0 = vpop.f32.mrf.mxu3 }
 0x9df   : > { %v6114_v12 = vadd.f32 %v13075_v32, %v5944_v0 }
 0x9e1   : > { %v6283_v31 = vadd.f32 %v11658_v10, %v6114_v12  ;;  %v11849_v10 = vpop.f32.mrf.mxu1 }
 0x9e3   : > { %v6452_v11 = vadd.f32 %v11660_v39, %v6283_v31  ;;  %5986 = vmatmul.bf16.gmra.mxu3 %v13076_v27  ;;  %v11872_v58 = vpop.f32.mrf.mxu2 }
 0x9e5   : > { %v6598_v21 = vmax.f32 %v6597_v50, %v6452_v11  ;;  %v6138_v50 = vpop.f32.mrf.mxu0 }
 0x9e6   : > { %v5947_v3 = vpop.f32.mrf.mxu3 }
 0x9e7   : > { %v6117_v30 = vadd.f32 %v13077_v47, %v5947_v3 }
 0x9e9   : > { %v6286_v39 = vadd.f32 %v11668_v52, %v6117_v30  ;;  %v6302_v24 = vpop.f32.mrf.mxu1 }
 0x9eb   : > { %v6455_v17 = vadd.f32 %v11670_v28, %v6286_v39  ;;  %v6476_v31 = vpop.f32.mrf.mxu2 }
 0x9ee   : > { %v5949_v5 = vpop.f32.mrf.mxu3 }
 0x9ef   : > { %v6119_v25 = vadd.f32 %v13078_v18, %v5949_v5  ;;  %v13083_v5 = vld [vmem:[#allocation24_spill] sm:$0xff] }
 0x9f1   : > { %v6288_v63 = vadd.f32 %v11675_v51, %v6119_v25  ;;  %v6305_v37 = vpop.f32.mrf.mxu1 }
 0x9f3   : > { %v6457_v16 = vadd.f32 %v11677_v48, %v6288_v63  ;;  %5991 = vmatmul.bf16.gmra.mxu3 %v13079_v15  ;;  %v6599_v48 = vrot.slane %v6598_v21, 4 }
 0x9f5   : > { %v6605_v14 = vmax.f32 %v6455_v17, %v6457_v16  ;;  %v6600_v59 = vmax.f32 %v6598_v21, %v6599_v48  ;;  %v6479_v17 = vpop.f32.mrf.mxu2 }
 0x9f6   : > { %v5952_v52 = vpop.f32.mrf.mxu3 }
 0x9f7   : > { %v6122_v33 = vadd.f32 %v13080_v2, %v5952_v52 }
 0x9f9   : > { %v6291_v51 = vadd.f32 %v11685_v8, %v6122_v33  ;;  %v6601_v8 = vrot.slane %v6600_v59, 2  ;;  %v6307_v12 = vpop.f32.mrf.mxu1 }
 0x9fb   : > { %v6460_v28 = vadd.f32 %v11687_v9, %v6291_v51  ;;  %v6602_v56 = vmax.f32 %v6600_v59, %v6601_v8  ;;  %v13084_v51 = vld [vmem:[#allocation26_spill] sm:$0xff] }
 0x9fd   : > { %v6606_v38 = vmax.f32 %v6605_v14, %v6460_v28  ;;  %v6603_v62 = vrot.slane %v6602_v56, 1  ;;  %v6481_v2 = vpop.f32.mrf.mxu2 }
 0x9fe   : > { %v5954_v1 = vpop.f32.mrf.mxu3 }
 0x9ff   : > { %v6124_v6 = vadd.f32 %v13081_v26, %v5954_v1  ;;  %v6604_v21 = vmax.f32 %v6602_v56, %v6603_v62  ;;  %v13085_v56 = vld [vmem:[#allocation69_spill] sm:$0xff] }
 0xa01   : > { %v6293_v55 = vadd.f32 %v11690_v23, %v6124_v6  ;;  %v6680_v39 = vadd.f32 %v11728_v46, %v6604_v21  ;;  %v6310_v60 = vpop.f32.mrf.mxu1 }
 0xa03   : > { %v6462_v35 = vadd.f32 %v11692_v22, %v6293_v55  ;;  %5996 = vmatmul.bf16.gmra.mxu3 %v13082_v43 }
 0xa05   : > { %v6607_v57 = vmax.f32 %v6606_v38, %v6462_v35  ;;  %v6484_v59 = vpop.f32.mrf.mxu2 }
 0xa06   : > { %v5957_v34 = vpop.f32.mrf.mxu3 }
 0xa07   : > { %v6608_v9 = vrot.slane %v6607_v57, 4  ;;  %v6127_v32 = vadd.f32 %v11832_v53, %v5957_v34  ;;  %v6141_v53 = vpop.f32.mrf.mxu0 }
 0xa09   : > { %v6609_v36 = vmax.f32 %v6607_v57, %v6608_v9  ;;  %v6296_v27 = vadd.f32 %v11835_v45, %v6127_v32  ;;  %v6312_v4 = vpop.f32.mrf.mxu1 }
 0xa0b   : > { %v6610_v0 = vrot.slane %v6609_v36, 2  ;;  %v6465_v30 = vadd.f32 %v11838_v49, %v6296_v27 }
 0xa0d   : > { %v6611_v23 = vmax.f32 %v6609_v36, %v6610_v0 }
 0xa0e   : > { %v5959_v11 = vpop.f32.mrf.mxu3 }
 0xa0f   : > { %v6612_v22 = vrot.slane %v6611_v23, 1  ;;  %v6129_v40 = vadd.f32 %v6128_v42, %v5959_v11 }
 0xa11   : > { %v6613_v3 = vmax.f32 %v6611_v23, %v6612_v22  ;;  %v6298_v61 = vadd.f32 %v6297_v20, %v6129_v40  ;;  %v6315_v26 = vpop.f32.mrf.mxu1 }
 0xa13   : > { %v6681_v47 = vadd.f32 %v11728_v46, %v6613_v3  ;;  %v6467_v13 = vadd.f32 %v6466_v29, %v6298_v61  ;;  %6001 = vmatmul.bf16.gmra.mxu3 %v13083_v5  ;;  %v6143_v29 = vpop.f32.mrf.mxu0 }
 0xa15   : > { %v6718_v18 = vrot.slane %v6681_v47, 7  ;;  %v6614_v25 = vmax.f32 %v6465_v30, %v6467_v13 }
 0xa16   : > { %v5962_v63 = vpop.f32.mrf.mxu3 }
 0xa17   : > { %v6719_v45 = vsel %vm1891_vm1, %v6718_v18, %v6680_v39  ;;  %v6132_v42 = vadd.f32 %v11845_v41, %v5962_v63 }
 0xa19   : > { %v6301_v20 = vadd.f32 %v11849_v10, %v6132_v42  ;;  %v6317_v36 = vpop.f32.mrf.mxu1 }
 0xa1b   : > { %v6470_v16 = vadd.f32 %v11853_v19, %v6301_v20  ;;  %v6146_v1 = vpop.f32.mrf.mxu0 }
 0xa1d   : > { %v6615_v49 = vmax.f32 %v6614_v25, %v6470_v16 }
 0xa1e   : > { %v5964_v15 = vpop.f32.mrf.mxu3 }
 0xa1f   : > { %v6134_v14 = vadd.f32 %v6133_v54, %v5964_v15 }
 0xa21   : > { %v6303_v52 = vadd.f32 %v6302_v24, %v6134_v14  ;;  %v6320_v27 = vpop.f32.mrf.mxu1 }
 0xa23   : > { %v6472_v33 = vadd.f32 %v6471_v7, %v6303_v52  ;;  %6006 = vmatmul.bf16.gmra.mxu3 %v13084_v51  ;;  %v6148_v57 = vpop.f32.mrf.mxu0 }
 0xa25   : > { %v6616_v28 = vmax.f32 %v6615_v49, %v6472_v33 }
 0xa26   : > { %v5967_v48 = vpop.f32.mrf.mxu3 }
 0xa27   : > { %v6617_v38 = vrot.slane %v6616_v28, 4  ;;  %v6137_v10 = vadd.f32 %v6136_v44, %v5967_v48  ;;  %v6486_v44 = vpop.f32.mrf.mxu2 }
 0xa29   : > { %v6618_v41 = vmax.f32 %v6616_v28, %v6617_v38  ;;  %v6306_v43 = vadd.f32 %v6305_v37, %v6137_v10  ;;  %v6322_v5 = vpop.f32.mrf.mxu1 }
 0xa2b   : > { %v6619_v6 = vrot.slane %v6618_v41, 2  ;;  %v6475_v34 = vadd.f32 %v11872_v58, %v6306_v43  ;;  %v6151_v22 = vpop.f32.mrf.mxu0 }
 0xa2d   : > { %v6620_v19 = vmax.f32 %v6618_v41, %v6619_v6 }
 0xa2e   : > { %v5969_v55 = vpop.f32.mrf.mxu3 }
 0xa2f   : > { %v6621_v35 = vrot.slane %v6620_v19, 1  ;;  %v6139_v54 = vadd.f32 %v6138_v50, %v5969_v55  ;;  %v6489_v3 = vpop.f32.mrf.mxu2 }
 0xa31   : > { %v6622_v8 = vmax.f32 %v6620_v19, %v6621_v35  ;;  %v6308_v24 = vadd.f32 %v6307_v12, %v6139_v54 }
 0xa33   : > { %v6682_v7 = vadd.f32 %v11728_v46, %v6622_v8  ;;  %v6477_v9 = vadd.f32 %v6476_v31, %v6308_v24  ;;  %6011 = vmatmul.bf16.gmra.mxu3 %v13085_v56  ;;  %v6153_v47 = vpop.f32.mrf.mxu0 }
 0xa35   : > { %v6720_v0 = vrot.slane %v6682_v7, 6  ;;  %v6623_v32 = vmax.f32 %v6475_v34, %v6477_v9 }
 0xa36   : > { %v5972_v62 = vpop.f32.mrf.mxu3 }
 0xa37   : > { %v6721_v23 = vsel %vm1893_vm2, %v6720_v0, %v6719_v45  ;;  %v6142_v11 = vadd.f32 %v6141_v53, %v5972_v62  ;;  %v6491_v18 = vpop.f32.mrf.mxu2 }
 0xa39   : > { %v6311_v37 = vadd.f32 %v6310_v60, %v6142_v11 }
 0xa3b   : > { %v6480_v50 = vadd.f32 %v6479_v17, %v6311_v37  ;;  %v6156_v20 = vpop.f32.mrf.mxu0 }
 0xa3d   : > { %v6624_v12 = vmax.f32 %v6623_v32, %v6480_v50 }
 0xa3e   : > { %v5974_v40 = vpop.f32.mrf.mxu3 }
 0xa3f   : > { %v6144_v21 = vadd.f32 %v6143_v29, %v5974_v40  ;;  %v6325_v29 = vpop.f32.mrf.mxu1  ;;  %v6494_v52 = vpop.f32.mrf.mxu2 }
 0xa41   : > { %v6313_v58 = vadd.f32 %v6312_v4, %v6144_v21 }
 0xa43   : > { %v6482_v31 = vadd.f32 %v6481_v2, %v6313_v58 }
 0xa45   : > { %v6625_v61 = vmax.f32 %v6624_v12, %v6482_v31 }
 0xa46   : > { %v5977_v30 = vpop.f32.mrf.mxu3 }
 0xa47   : > { %v6626_v13 = vrot.slane %v6625_v61, 4  ;;  %v6147_v63 = vadd.f32 %v6146_v1, %v5977_v30  ;;  %v6158_v1 = vpop.f32.mrf.mxu0  ;;  %v6496_v10 = vpop.f32.mrf.mxu2 }
 0xa49   : > { %v6627_v39 = vmax.f32 %v6625_v61, %v6626_v13  ;;  %v6316_v42 = vadd.f32 %v6315_v26, %v6147_v63  ;;  %v6327_v26 = vpop.f32.mrf.mxu1 }
 0xa4b   : > { %v6628_v25 = vrot.slane %v6627_v39, 2  ;;  %v6485_v14 = vadd.f32 %v6484_v59, %v6316_v42 }
 0xa4d   : > { %v6629_v53 = vmax.f32 %v6627_v39, %v6628_v25 }
 0xa4e   : > { %v5979_v60 = vpop.f32.mrf.mxu3 }
 0xa4f   : > { %v6630_v45 = vrot.slane %v6629_v53, 1  ;;  %v6149_v17 = vadd.f32 %v6148_v57, %v5979_v60  ;;  %v6161_v54 = vpop.f32.mrf.mxu0  ;;  %v6499_v7 = vpop.f32.mrf.mxu2 }
 0xa51   : > { %v6631_v16 = vmax.f32 %v6629_v53, %v6630_v45  ;;  %v6318_v49 = vadd.f32 %v6317_v36, %v6149_v17  ;;  %v6330_v8 = vpop.f32.mrf.mxu1 }
 0xa53   : > { %v6683_v15 = vadd.f32 %v11728_v46, %v6631_v16  ;;  %v6487_v4 = vadd.f32 %v6486_v44, %v6318_v49 }
 0xa55   : > { %v6722_v2 = vrot.slane %v6683_v15, 5  ;;  %v6632_v33 = vmax.f32 %v6485_v14, %v6487_v4 }
 0xa56   : > { %v5982_v51 = vpop.f32.mrf.mxu3 }
 0xa57   : > { %v6723_v28 = vsel %vm1895_vm3, %v6722_v2, %v6721_v23  ;;  %v6152_v48 = vadd.f32 %v6151_v22, %v5982_v51  ;;  %v6163_v0 = vpop.f32.mrf.mxu0  ;;  %v6501_v22 = vpop.f32.mrf.mxu2 }
 0xa59   : > { %v6321_v38 = vadd.f32 %v6320_v27, %v6152_v48  ;;  %v6332_v11 = vpop.f32.mrf.mxu1 }
 0xa5b   : > { %v6490_v41 = vadd.f32 %v6489_v3, %v6321_v38 }
 0xa5d   : > { %v6633_v6 = vmax.f32 %v6632_v33, %v6490_v41 }
 0xa5e   : > { %v5984_v19 = vpop.f32.mrf.mxu3 }
 0xa5f   : > { %v6154_v55 = vadd.f32 %v6153_v47, %v5984_v19  ;;  %v6166_v47 = vpop.f32.mrf.mxu0  ;;  %v6504_v39 = vpop.f32.mrf.mxu2 }
 0xa61   : > { %v6323_v35 = vadd.f32 %v6322_v5, %v6154_v55  ;;  %v6335_v13 = vpop.f32.mrf.mxu1 }
 0xa63   : > { %v6492_v43 = vadd.f32 %v6491_v18, %v6323_v35 }
 0xa65   : > { %v6634_v59 = vmax.f32 %v6633_v6, %v6492_v43 }
 0xa66   : > { %v5987_v24 = vpop.f32.mrf.mxu3 }
 0xa67   : > { %v6635_v57 = vrot.slane %v6634_v59, 4  ;;  %v6157_v56 = vadd.f32 %v6156_v20, %v5987_v24  ;;  %v6168_v60 = vpop.f32.mrf.mxu0  ;;  %v6506_v20 = vpop.f32.mrf.mxu2 }
 0xa69   : > { %v6636_v34 = vmax.f32 %v6634_v59, %v6635_v57  ;;  %v6326_v62 = vadd.f32 %v6325_v29, %v6157_v56  ;;  %v6337_v42 = vpop.f32.mrf.mxu1 }
 0xa6b   : > { %v6637_v9 = vrot.slane %v6636_v34, 2  ;;  %v6495_v27 = vadd.f32 %v6494_v52, %v6326_v62 }
 0xa6d   : > { %v6638_v36 = vmax.f32 %v6636_v34, %v6637_v9 }
 0xa6e   : > { %v5989_v32 = vpop.f32.mrf.mxu3 }
 0xa6f   : > { %v6639_v44 = vrot.slane %v6638_v36, 1  ;;  %v6159_v23 = vadd.f32 %v6158_v1, %v5989_v32  ;;  %v6171_v14 = vpop.f32.mrf.mxu0  ;;  %v6509_v51 = vpop.f32.mrf.mxu2 }
 0xa71   : > { %v6640_v37 = vmax.f32 %v6638_v36, %v6639_v44  ;;  %v6328_v50 = vadd.f32 %v6327_v26, %v6159_v23  ;;  %v6340_v52 = vpop.f32.mrf.mxu1 }
 0xa73   : > { %v6684_v12 = vadd.f32 %v11728_v46, %v6640_v37  ;;  %v6497_v40 = vadd.f32 %v6496_v10, %v6328_v50 }
 0xa75   : > { %v6724_v21 = vrot.slane %v6684_v12, 4  ;;  %v6641_v3 = vmax.f32 %v6495_v27, %v6497_v40 }
 0xa76   : > { %v5992_v58 = vpop.f32.mrf.mxu3 }
 0xa77   : > { %v6725_v31 = vsel %vm1897_vm4, %v6724_v21, %v6723_v28  ;;  %v6162_v61 = vadd.f32 %v6161_v54, %v5992_v58  ;;  %v6173_v1 = vpop.f32.mrf.mxu0  ;;  %v6511_v10 = vpop.f32.mrf.mxu2 }
 0xa79   : > { %v6331_v30 = vadd.f32 %v6330_v8, %v6162_v61  ;;  %v6342_v6 = vpop.f32.mrf.mxu1 }
 0xa7b   : > { %v6500_v5 = vadd.f32 %v6499_v7, %v6331_v30 }
 0xa7d   : > { %v6642_v18 = vmax.f32 %v6641_v3, %v6500_v5 }
 0xa7e   : > { %v5994_v25 = vpop.f32.mrf.mxu3 }
 0xa7f   : > { %v6164_v63 = vadd.f32 %v6163_v0, %v5994_v25  ;;  %v6176_v55 = vpop.f32.mrf.mxu0  ;;  %v6514_v54 = vpop.f32.mrf.mxu2 }
 0xa81   : > { %v6333_v53 = vadd.f32 %v6332_v11, %v6164_v63  ;;  %v6345_v35 = vpop.f32.mrf.mxu1 }
 0xa83   : > { %v6502_v45 = vadd.f32 %v6501_v22, %v6333_v53 }
 0xa85   : > { %v6643_v17 = vmax.f32 %v6642_v18, %v6502_v45 }
 0xa86   : > { %v5997_v16 = vpop.f32.mrf.mxu3 }
 0xa87   : > { %v6644_v49 = vrot.slane %v6643_v17, 4  ;;  %v6167_v59 = vadd.f32 %v6166_v47, %v5997_v16  ;;  %v6178_v56 = vpop.f32.mrf.mxu0  ;;  %v6516_v23 = vpop.f32.mrf.mxu2 }
 0xa89   : > { %v6645_v29 = vmax.f32 %v6643_v17, %v6644_v49  ;;  %v6336_v34 = vadd.f32 %v6335_v13, %v6167_v59  ;;  %v6347_v32 = vpop.f32.mrf.mxu1 }
 0xa8b   : > { %v6646_v15 = vrot.slane %v6645_v29, 2  ;;  %v6505_v44 = vadd.f32 %v6504_v39, %v6336_v34 }
 0xa8d   : > { %v6647_v4 = vmax.f32 %v6645_v29, %v6646_v15 }
 0xa8e   : > { %v5999_v2 = vpop.f32.mrf.mxu3 }
 0xa8f   : > { %v6648_v33 = vrot.slane %v6647_v4, 1  ;;  %v6169_v43 = vadd.f32 %v6168_v60, %v5999_v2  ;;  %v6181_v27 = vpop.f32.mrf.mxu0  ;;  %v6519_v47 = vpop.f32.mrf.mxu2 }
 0xa91   : > { %v6649_v28 = vmax.f32 %v6647_v4, %v6648_v33  ;;  %v6338_v24 = vadd.f32 %v6337_v42, %v6169_v43  ;;  %v6350_v21 = vpop.f32.mrf.mxu1 }
 0xa93   : > { %v6685_v48 = vadd.f32 %v11728_v46, %v6649_v28  ;;  %v6507_v36 = vadd.f32 %v6506_v20, %v6338_v24 }
 0xa95   : > { %v6726_v38 = vrot.slane %v6685_v48, 3  ;;  %v6650_v11 = vmax.f32 %v6505_v44, %v6507_v36 }
 0xa96   : > { %v6002_v41 = vpop.f32.mrf.mxu3 }
 0xa97   : > { %v11895_v26 = vsel %vm1899_vm5, %v6726_v38, %v6725_v31  ;;  %v6172_v8 = vadd.f32 %v6171_v14, %v6002_v41  ;;  %v6183_v25 = vpop.f32.mrf.mxu0  ;;  %v6521_v49 = vpop.f32.mrf.mxu2 }
 0xa99   : > { %v6341_v9 = vadd.f32 %v6340_v52, %v6172_v8  ;;  %v6352_v17 = vpop.f32.mrf.mxu1 }
 0xa9b   : > { %v6510_v62 = vadd.f32 %v6509_v51, %v6341_v9 }
 0xa9d   : > { %v6651_v22 = vmax.f32 %v6650_v11, %v6510_v62 }
 0xa9e   : > { %v6004_v19 = vpop.f32.mrf.mxu3 }
 0xa9f   : > { %v6174_v57 = vadd.f32 %v6173_v1, %v6004_v19 }
 0xaa1   : > { %v6343_v0 = vadd.f32 %v6342_v6, %v6174_v57 }
 0xaa3   : > { %v6512_v37 = vadd.f32 %v6511_v10, %v6343_v0 }
 0xaa5   : > { %v6652_v12 = vmax.f32 %v6651_v22, %v6512_v37 }
 0xaa6   : > { %v6007_v7 = vpop.f32.mrf.mxu3 }
 0xaa7   : > { %v6653_v3 = vrot.slane %v6652_v12, 4  ;;  %v6177_v31 = vadd.f32 %v6176_v55, %v6007_v7 }
 0xaa9   : > { %v6654_v13 = vmax.f32 %v6652_v12, %v6653_v3  ;;  %v6346_v5 = vadd.f32 %v6345_v35, %v6177_v31 }
 0xaab   : > { %v6655_v63 = vrot.slane %v6654_v13, 2  ;;  %v6515_v60 = vadd.f32 %v6514_v54, %v6346_v5 }
 0xaad   : > { %v6656_v29 = vmax.f32 %v6654_v13, %v6655_v63 }
 0xaae   : > { %v6009_v50 = vpop.f32.mrf.mxu3 }
 0xaaf   : > { %v6179_v40 = vadd.f32 %v6178_v56, %v6009_v50  ;;  %v6657_v52 = vrot.slane %v6656_v29, 1 }
 0xab1   : > { %v6348_v30 = vadd.f32 %v6347_v32, %v6179_v40  ;;  %v6658_v51 = vmax.f32 %v6656_v29, %v6657_v52 }
 0xab3   : > { %v6517_v39 = vadd.f32 %v6516_v23, %v6348_v30  ;;  %v6686_v38 = vadd.f32 %v11728_v46, %v6658_v51 }
 0xab5   : > { %v6659_v20 = vmax.f32 %v6515_v60, %v6517_v39  ;;  %v6728_v6 = vrot.slane %v6686_v38, 2 }
 0xab6   : > { %v6012_v58 = vpop.f32.mrf.mxu3 }
 0xab7   : > { %v6182_v61 = vadd.f32 %v6181_v27, %v6012_v58  ;;  %v6729_v55 = vsel %vm1901_vm6, %v6728_v6, %v11895_v26 }
 0xab9   : > { %v6351_v18 = vadd.f32 %v6350_v21, %v6182_v61 }
 0xabb   : > { %v6520_v45 = vadd.f32 %v6519_v47, %v6351_v18 }
 0xabd   : > { %v6660_v15 = vmax.f32 %v6659_v20, %v6520_v45 }
 0xabe   : > { %v6014_v53 = vpop.f32.mrf.mxu3 }
 0xabf   : > { %v6184_v42 = vadd.f32 %v6183_v25, %v6014_v53 }
 0xac1   : > { %v6353_v16 = vadd.f32 %v6352_v17, %v6184_v42 }
 0xac3   : > { %v6522_v14 = vadd.f32 %v6521_v49, %v6353_v16 }
 0xac5   : > { %v6661_v4 = vmax.f32 %v6660_v15, %v6522_v14 }
 0xac7   : > { %v6662_v2 = vrot.slane %v6661_v4, 4 }
 0xac9   : > { %v6663_v33 = vmax.f32 %v6661_v4, %v6662_v2 }
 0xacb   : > { %v6664_v28 = vrot.slane %v6663_v33, 2 }
 0xacd   : > { %v6665_v48 = vmax.f32 %v6663_v33, %v6664_v28 }
 0xacf   : > { %v6666_v1 = vrot.slane %v6665_v48, 1 }
 0xad1   : > { %v6667_v41 = vmax.f32 %v6665_v48, %v6666_v1 }
 0xad3   : > { %v6687_v10 = vadd.f32 %v11728_v46, %v6667_v41 }
 0xad5   : > { %v6730_v19 = vrot.slane %v6687_v10, 1 }
 0xad7   : > { %v6731_v35 = vsel %vm1903_vm7, %v6730_v19, %v6729_v55 }
 0xad8   : > { %6735 = vst [vmem:[%s11862_s22 + $0x8] sm:$0xff] %v6731_v35 }
 0xad9   : > { %7970 = shalt.err (!%p7967_p8)
}
 0xada   : > { %s8021_s16 = smov 128   ;;  %s8022_s22 = smov 8  }
 0xadb   : > { %7822 = dma.vmem_to_hbm [thread:$0]  (%p8111_p5), %s6750_s21, 256, %s6752_s27, %s6737_s13, %s8021_s16, %s8021_s16, %s8022_s22  }
 0xadc PF: > { %p7839_p9 = scmp.ge.s32.totalorder %s8013_s12, 2  ;;  %s6766_s3 = sand.u32 1, %s8001_s30  }
 0xadd   : > { %s6767_s25 = scalar_lea.sflag [#allocation4], %s6766_s3 }
 0xade   : > { %p7832_p10 = pnand %p7839_p9, %p8115_p6 }
 0xae0   : > { %p7833_p11 = pneg %p7832_p10 }
 0xae2   : > { %7996 = dma.done.wait (%p7833_p11), %s6767_s25, 256  }
 0xae3   : > { %7998 = vsyncadd (%p7833_p11), %s6767_s25, 4294967040  ;;  %p21_p12 = scmp.ge.s32.totalorder %s8098_s15, 4   ;;  %s13086_s30 = smov %s8005_s10 }
 0xae4   : > { %s13087_s10 = smov %s8009_s11  ;;  %s13088_s11 = smov %s8109_s18 }
 0xae5   : > { %s13089_s12 = smov %s8098_s15  ;;  %23 = sbr.rel (!%p21_p12) target bundleno = 7 (0x7), region = 100 }
 0xaea   :  { %6773 = vsyncpa [#allocation3], 1 }
 0xaeb   :  { %6775 = vsyncpa [#allocation3 + $0x1], 1 }
 0xaec   :  { %6776 = vsyncpa [#allocation6], 1 }
 0xaed   :  { %6777 = vsyncpa [#allocation4], 1 }
 0xaee   :  { %6779 = vsyncpa [#allocation4 + $0x1], 1 }

</bundles_post_ra>
